<compile_context>
chip_gen: v6e
topology: v6e:2x2x1
jax: 0.10.0
libtpu: 0.0.40
codegen_flags: <defaults>
</compile_context>

<pallas_src>
import jax
import jax.numpy as jnp
from jax import lax
from jax.experimental import pallas as pl
from jax.experimental.pallas import tpu as pltpu

# ----------------------------- model config ---------------------------------
B = 2            # batch
LT = 8           # text sequence length
NUM_CLS = 3      # number of <cls> tokens appended
LS = LT + NUM_CLS
V = 2            # camera views
C = 3            # image channels (NCHW)
H = W = 16       # image spatial size
PATCH = 8        # patch size for the synthetic Brain patch embedding
LD = 4           # decoder / label length
VOCAB = 64
D_MODEL = 32
N_HEADS = 4
D_KV = 8
INNER = N_HEADS * D_KV
D_FF = 64
N_ENC = 2
N_DEC = 2
CLS_TOKEN_ID = VOCAB - 1
DECODER_START_ID = 0
LN_EPS = 1e-6
NEG_INF = -1e9   # f32 additive mask (attention math kept in f32)

P_TOK = V * (H // PATCH) * (W // PATCH)      # patch tokens per batch element
PATCH_DIM = C * PATCH * PATCH                # im2col feature size


# ----------------------- in-kernel building blocks ---------------------------
def _rmsnorm(x, w):
    """T5 LayerNorm (no mean subtraction, no bias). x:[L,D] f32, w:[1,D] f32."""
    var = jnp.mean(x * x, axis=-1, keepdims=True)
    return x * lax.rsqrt(var + LN_EPS) * w


def _mm(x, w):
    """bf16 MXU matmul with f32 accumulation (weights already stored bf16)."""
    return jnp.dot(x.astype(jnp.bfloat16), w.astype(jnp.bfloat16),
                   preferred_element_type=jnp.float32)


def _mha(q, k, v, causal=False):
    """Multi-head attention on packed [L, N_HEADS*D_KV] f32 tensors.
    T5 style: no 1/sqrt(d) scaling (folded into init)."""
    Lq, Lk = q.shape[0], k.shape[0]
    if causal:
        qi = lax.broadcasted_iota(jnp.int32, (Lq, Lk), 0)
        kj = lax.broadcasted_iota(jnp.int32, (Lq, Lk), 1)
        keep = kj <= qi
    ctx = []
    for h in range(N_HEADS):                       # static unroll, heads stay in lanes
        sl = slice(h * D_KV, (h + 1) * D_KV)
        s = jnp.einsum('qd,kd->qk', q[:, sl], k[:, sl],
                       preferred_element_type=jnp.float32)   # [Lq, Lk]
        if causal:
            s = jnp.where(keep, s, NEG_INF)
        s = s - jnp.max(s, axis=-1, keepdims=True)
        p = jnp.exp(s)
        p = p * pl.reciprocal(jnp.sum(p, axis=-1, keepdims=True), approx=True)
        ctx.append(jnp.dot(p, v[:, sl], preferred_element_type=jnp.float32))
    return jnp.concatenate(ctx, axis=-1)           # [Lq, INNER]


def _encoder_stack(x, ln1_ref, wqkv_ref, wo_ref, ln2_ref, wi_ref, wff_ref,
                   lnf_ref):
    """Whole T5 encoder stack on an in-VMEM activation x:[L, D] f32."""
    for l in range(N_ENC):
        h = _rmsnorm(x, ln1_ref[l])
        qkv = _mm(h, wqkv_ref[l])                            # [L, 3*INNER]
        q = qkv[:, :INNER]
        k = qkv[:, INNER:2 * INNER]
        v = qkv[:, 2 * INNER:]
        x = x + _mm(_mha(q, k, v), wo_ref[l])
        h = _rmsnorm(x, ln2_ref[l])
        x = x + _mm(jnp.maximum(_mm(h, wi_ref[l]), 0.0), wff_ref[l])
    return _rmsnorm(x, lnf_ref[...])


# ----------------------------- fused kernel ----------------------------------
def _drivevlm_kernel(seq_ref, patch_ref, dec_ref, modal_ref,
                     e_ln1, e_wqkv, e_wo, e_ln2, e_wi, e_wff, e_lnf,
                     b_pw, b_pb, b_wq, b_wkv, b_wo,
                     d_ln1, d_wqkv, d_wos, d_ln2, d_wqc, d_wkvc, d_woc,
                     d_ln3, d_wi, d_wff, d_lnf, lmh_ref,
                     logits_ref):
    """Entire DriveVLMT5 forward for one batch element (grid over batch)."""
    # ---- stage 1: T5 encoder over text + <cls> embeddings ----
    x1 = _encoder_stack(seq_ref[0].astype(jnp.float32),
                        e_ln1, e_wqkv, e_wo, e_ln2, e_wi, e_wff, e_lnf)
    text_h = x1[:LT, :]                                      # [LT, D]
    cls_tok = x1[LT:, :]                                     # [NUM_CLS, D]

    # ---- stage 2: Brain (patch embed + cls-token cross-attn memory read) ----
    patches = patch_ref[0].astype(jnp.float32)               # [P_TOK, PATCH_DIM]
    tok = _mm(patches, b_pw[...]) + b_pb[...]                # [P_TOK, D]
    q = _mm(cls_tok, b_wq[...])                              # [NUM_CLS, INNER]
    kv = _mm(tok, b_wkv[...])                                # [P_TOK, 2*INNER]
    img = _mm(_mha(q, kv[:, :INNER], kv[:, INNER:]), b_wo[...])   # [NUM_CLS, D]

    # ---- stage 3: modal embeddings + merge ----
    modal = modal_ref[...].astype(jnp.float32)               # [2, D]
    merged = jnp.concatenate(
        [text_h + modal[0:1, :], img + modal[1:2, :]], axis=0)     # [LS, D]

    # ---- stage 4: T5 encoder over the merged sequence ----
    e = _encoder_stack(merged, e_ln1, e_wqkv, e_wo, e_ln2, e_wi, e_wff, e_lnf)

    # ---- stage 5: T5 causal decoder + tied LM head ----
    y = dec_ref[0].astype(jnp.float32)                       # [LD, D]
    for l in range(N_DEC):
        # causal self-attention
        h = _rmsnorm(y, d_ln1[l])
        qkv = _mm(h, d_wqkv[l])
        qs = qkv[:, :INNER]
        ks = qkv[:, INNER:2 * INNER]
        vs = qkv[:, 2 * INNER:]
        y = y + _mm(_mha(qs, ks, vs, causal=True), d_wos[l])
        # cross-attention over encoder output
        h = _rmsnorm(y, d_ln2[l])
        qc = _mm(h, d_wqc[l])
        kvc = _mm(e, d_wkvc[l])
        y = y + _mm(_mha(qc, kvc[:, :INNER], kvc[:, INNER:]), d_woc[l])
        # FFN
        h = _rmsnorm(y, d_ln3[l])
        y = y + _mm(jnp.maximum(_mm(h, d_wi[l]), 0.0), d_wff[l])
    y = _rmsnorm(y, d_lnf[...]) * (D_MODEL ** -0.5)          # tied-head scale
    logits_ref[0] = _mm(y, lmh_ref[...])                     # [LD, VOCAB]


# ----------------------------- pallas_call wrapper ----------------------------
def _full_spec(arr):
    nd = arr.ndim
    return pl.BlockSpec(arr.shape, lambda b, _nd=nd: (0,) * _nd)


def _batch_spec(arr):
    nd = arr.ndim
    return pl.BlockSpec((1,) + arr.shape[1:],
                        lambda b, _nd=nd: (b,) + (0,) * (_nd - 1))


def drive_vlm_fused(seq, patches, dec_emb, params, lm_head):
    Bb = seq.shape[0]
    ep, dp, bp = params['enc'], params['dec'], params['brain']
    modal = params['modal_embed']

    ins = [seq, patches, dec_emb, modal,
           ep['ln1'], ep['wqkv'], ep['wo'], ep['ln2'], ep['wi'], ep['wo_ff'],
           ep['ln_f'],
           bp['patch_w'], bp['patch_b'], bp['wq'], bp['wkv'], bp['wo'],
           dp['ln1'], dp['wqkv_self'], dp['wo_self'], dp['ln2'], dp['wq_cross'],
           dp['wkv_cross'], dp['wo_cross'], dp['ln3'], dp['wi'], dp['wo_ff'],
           dp['ln_f'],
           lm_head]
    in_specs = ([_batch_spec(seq), _batch_spec(patches), _batch_spec(dec_emb)]
                + [_full_spec(a) for a in ins[3:]])

    return pl.pallas_call(
        _drivevlm_kernel,
        out_shape=jax.ShapeDtypeStruct((Bb, LD, VOCAB), jnp.float32),
        grid=(Bb,),
        in_specs=in_specs,
        out_specs=pl.BlockSpec((1, LD, VOCAB), lambda b: (b, 0, 0)),
        compiler_params=pltpu.CompilerParams(
            dimension_semantics=("parallel",)),
    )(*ins)


# ----------------------------- JAX glue ---------------------------------------
def im2col_patches(imgs):
    """[B, V, C, H, W] NCHW -> [B, V*P, C*p*p] row-major patches (conv im2col)."""
    Bb, Vv, Cc, Hh, Ww = imgs.shape
    hp, wp = Hh // PATCH, Ww // PATCH
    x = imgs.reshape(Bb, Vv, Cc, hp, PATCH, wp, PATCH)
    x = x.transpose(0, 1, 3, 5, 2, 4, 6)
    return x.reshape(Bb, Vv * hp * wp, Cc * PATCH * PATCH)


def cross_entropy(logits, labels):
    logp = jax.nn.log_softmax(logits, axis=-1)
    ll = jnp.take_along_axis(logp, labels[..., None], axis=-1)[..., 0]
    return -jnp.mean(ll)


@jax.jit
def drive_vlm_t5_forward(params, text_enc, imgs, labels):
    shared = params['shared_embed']                          # [VOCAB, D] f32

    # ---- MultiViewProcessor inputs ----
    text_emb = shared[text_enc]                              # [B, LT, D]
    cls_embeds = jnp.broadcast_to(shared[CLS_TOKEN_ID][None, None, :],
                                  (text_enc.shape[0], NUM_CLS, D_MODEL))
    seq = jnp.concatenate([text_emb, cls_embeds], axis=1)    # [B, LT+3, D]
    patches = im2col_patches(imgs)                           # [B, P_TOK, PATCH_DIM]

    # ---- decoder inputs (shift labels right) ----
    dec_in_ids = jnp.concatenate(
        [jnp.full((labels.shape[0], 1), DECODER_START_ID, labels.dtype),
         labels[:, :-1]], axis=1)
    dec_emb = shared[dec_in_ids]                             # [B, LD, D]
    lm_head = shared.T.astype(jnp.bfloat16)                  # tied LM head [D, VOCAB]

    # ---- one fused kernel: enc1 -> Brain -> merge -> enc2 -> decoder -> head ----
    logits = drive_vlm_fused(seq, patches, dec_emb, params, lm_head)
    loss = cross_entropy(logits, labels)
    return loss, logits


# ----------------------------- deterministic init -----------------------------
def init_params(key):
    keys = iter(jax.random.split(key, 64))

    def nrm(shape, std=0.02, dtype=jnp.float32):
        return (jax.random.normal(next(keys), shape, jnp.float32) * std
                ).astype(dtype)

    bf = jnp.bfloat16
    enc = {
        'ln1': jnp.ones((N_ENC, 1, D_MODEL), jnp.float32),
        'wqkv': nrm((N_ENC, D_MODEL, 3 * INNER), dtype=bf),
        'wo': nrm((N_ENC, INNER, D_MODEL), dtype=bf),
        'ln2': jnp.ones((N_ENC, 1, D_MODEL), jnp.float32),
        'wi': nrm((N_ENC, D_MODEL, D_FF), dtype=bf),
        'wo_ff': nrm((N_ENC, D_FF, D_MODEL), dtype=bf),
        'ln_f': jnp.ones((1, D_MODEL), jnp.float32),
    }
    dec = {
        'ln1': jnp.ones((N_DEC, 1, D_MODEL), jnp.float32),
        'wqkv_self': nrm((N_DEC, D_MODEL, 3 * INNER), dtype=bf),
        'wo_self': nrm((N_DEC, INNER, D_MODEL), dtype=bf),
        'ln2': jnp.ones((N_DEC, 1, D_MODEL), jnp.float32),
        'wq_cross': nrm((N_DEC, D_MODEL, INNER), dtype=bf),
        'wkv_cross': nrm((N_DEC, D_MODEL, 2 * INNER), dtype=bf),
        'wo_cross': nrm((N_DEC, INNER, D_MODEL), dtype=bf),
        'ln3': jnp.ones((N_DEC, 1, D_MODEL), jnp.float32),
        'wi': nrm((N_DEC, D_MODEL, D_FF), dtype=bf),
        'wo_ff': nrm((N_DEC, D_FF, D_MODEL), dtype=bf),
        'ln_f': jnp.ones((1, D_MODEL), jnp.float32),
    }
    brain = {
        'patch_w': nrm((PATCH_DIM, D_MODEL), dtype=bf),
        'patch_b': jnp.zeros((1, D_MODEL), jnp.float32),
        'wq': nrm((D_MODEL, INNER), dtype=bf),
        'wkv': nrm((D_MODEL, 2 * INNER), dtype=bf),
        'wo': nrm((INNER, D_MODEL), dtype=bf),
    }
    return {
        'shared_embed': nrm((VOCAB, D_MODEL)),
        'modal_embed': nrm((2, D_MODEL)),        # nn.Embedding(2, hidden), std=0.02
        'enc': enc,
        'dec': dec,
        'brain': brain,
    }


# ----------------------------------- main --------------------------------------
if __name__ == "__main__":
    key = jax.random.PRNGKey(0)
    kp, kt, ki, kl = jax.random.split(key, 4)
    params = init_params(kp)

    text_enc = jax.random.randint(kt, (B, LT), 0, VOCAB, dtype=jnp.int32)
    imgs = jax.random.normal(ki, (B, V, C, H, W), jnp.float32)   # NCHW per view
    labels = jax.random.randint(kl, (B, LD), 1, VOCAB, dtype=jnp.int32)

    loss, logits = drive_vlm_t5_forward(params, text_enc, imgs, labels)
    jax.block_until_ready((loss, logits))

    assert logits.shape == (B, LD, VOCAB)
    assert jnp.isfinite(loss)
    print("KERNEL_OK")
</pallas_src>

<mosaic_0001>
module attributes {stable_mosaic.version = 11 : i64} {
  func.func @_drivevlm_kernel(%arg0: i32, %arg1: memref<1x11x32xf32, #tpu.memory_space<vmem>>, %arg2: memref<1x8x192xf32, #tpu.memory_space<vmem>>, %arg3: memref<1x4x32xf32, #tpu.memory_space<vmem>>, %arg4: memref<2x32xf32, #tpu.memory_space<vmem>>, %arg5: memref<2x1x32xf32, #tpu.memory_space<vmem>>, %arg6: memref<2x32x96xbf16, #tpu.memory_space<vmem>>, %arg7: memref<2x32x32xbf16, #tpu.memory_space<vmem>>, %arg8: memref<2x1x32xf32, #tpu.memory_space<vmem>>, %arg9: memref<2x32x64xbf16, #tpu.memory_space<vmem>>, %arg10: memref<2x64x32xbf16, #tpu.memory_space<vmem>>, %arg11: memref<1x32xf32, #tpu.memory_space<vmem>>, %arg12: memref<192x32xbf16, #tpu.memory_space<vmem>>, %arg13: memref<1x32xf32, #tpu.memory_space<vmem>>, %arg14: memref<32x32xbf16, #tpu.memory_space<vmem>>, %arg15: memref<32x64xbf16, #tpu.memory_space<vmem>>, %arg16: memref<32x32xbf16, #tpu.memory_space<vmem>>, %arg17: memref<2x1x32xf32, #tpu.memory_space<vmem>>, %arg18: memref<2x32x96xbf16, #tpu.memory_space<vmem>>, %arg19: memref<2x32x32xbf16, #tpu.memory_space<vmem>>, %arg20: memref<2x1x32xf32, #tpu.memory_space<vmem>>, %arg21: memref<2x32x32xbf16, #tpu.memory_space<vmem>>, %arg22: memref<2x32x64xbf16, #tpu.memory_space<vmem>>, %arg23: memref<2x32x32xbf16, #tpu.memory_space<vmem>>, %arg24: memref<2x1x32xf32, #tpu.memory_space<vmem>>, %arg25: memref<2x32x64xbf16, #tpu.memory_space<vmem>>, %arg26: memref<2x64x32xbf16, #tpu.memory_space<vmem>>, %arg27: memref<1x32xf32, #tpu.memory_space<vmem>>, %arg28: memref<32x64xbf16, #tpu.memory_space<vmem>>, %arg29: memref<1x4x64xf32, #tpu.memory_space<vmem>>) attributes {dimension_semantics = [#tpu.dimension_semantics<parallel>], iteration_bounds = array<i64: 2>, scalar_prefetch = 0 : i64, scratch_operands = 0 : i64, tpu.core_type = #tpu.core_type<tc>, window_params = [{transform_indices = @transform_0, window_bounds = array<i64: 1, 11, 32>}, {transform_indices = @transform_1, window_bounds = array<i64: 1, 8, 192>}, {transform_indices = @transform_2, window_bounds = array<i64: 1, 4, 32>}, {pipeline_mode = #tpu.pipeline_mode<synchronous>, transform_indices = @transform_3, window_bounds = array<i64: 2, 32>}, {pipeline_mode = #tpu.pipeline_mode<synchronous>, transform_indices = @transform_4, window_bounds = array<i64: 2, 1, 32>}, {pipeline_mode = #tpu.pipeline_mode<synchronous>, transform_indices = @transform_5, window_bounds = array<i64: 2, 32, 96>}, {pipeline_mode = #tpu.pipeline_mode<synchronous>, transform_indices = @transform_6, window_bounds = array<i64: 2, 32, 32>}, {pipeline_mode = #tpu.pipeline_mode<synchronous>, transform_indices = @transform_7, window_bounds = array<i64: 2, 1, 32>}, {pipeline_mode = #tpu.pipeline_mode<synchronous>, transform_indices = @transform_8, window_bounds = array<i64: 2, 32, 64>}, {pipeline_mode = #tpu.pipeline_mode<synchronous>, transform_indices = @transform_9, window_bounds = array<i64: 2, 64, 32>}, {pipeline_mode = #tpu.pipeline_mode<synchronous>, transform_indices = @transform_10, window_bounds = array<i64: 1, 32>}, {pipeline_mode = #tpu.pipeline_mode<synchronous>, transform_indices = @transform_11, window_bounds = array<i64: 192, 32>}, {pipeline_mode = #tpu.pipeline_mode<synchronous>, transform_indices = @transform_12, window_bounds = array<i64: 1, 32>}, {pipeline_mode = #tpu.pipeline_mode<synchronous>, transform_indices = @transform_13, window_bounds = array<i64: 32, 32>}, {pipeline_mode = #tpu.pipeline_mode<synchronous>, transform_indices = @transform_14, window_bounds = array<i64: 32, 64>}, {pipeline_mode = #tpu.pipeline_mode<synchronous>, transform_indices = @transform_15, window_bounds = array<i64: 32, 32>}, {pipeline_mode = #tpu.pipeline_mode<synchronous>, transform_indices = @transform_16, window_bounds = array<i64: 2, 1, 32>}, {pipeline_mode = #tpu.pipeline_mode<synchronous>, transform_indices = @transform_17, window_bounds = array<i64: 2, 32, 96>}, {pipeline_mode = #tpu.pipeline_mode<synchronous>, transform_indices = @transform_18, window_bounds = array<i64: 2, 32, 32>}, {pipeline_mode = #tpu.pipeline_mode<synchronous>, transform_indices = @transform_19, window_bounds = array<i64: 2, 1, 32>}, {pipeline_mode = #tpu.pipeline_mode<synchronous>, transform_indices = @transform_20, window_bounds = array<i64: 2, 32, 32>}, {pipeline_mode = #tpu.pipeline_mode<synchronous>, transform_indices = @transform_21, window_bounds = array<i64: 2, 32, 64>}, {pipeline_mode = #tpu.pipeline_mode<synchronous>, transform_indices = @transform_22, window_bounds = array<i64: 2, 32, 32>}, {pipeline_mode = #tpu.pipeline_mode<synchronous>, transform_indices = @transform_23, window_bounds = array<i64: 2, 1, 32>}, {pipeline_mode = #tpu.pipeline_mode<synchronous>, transform_indices = @transform_24, window_bounds = array<i64: 2, 32, 64>}, {pipeline_mode = #tpu.pipeline_mode<synchronous>, transform_indices = @transform_25, window_bounds = array<i64: 2, 64, 32>}, {pipeline_mode = #tpu.pipeline_mode<synchronous>, transform_indices = @transform_26, window_bounds = array<i64: 1, 32>}, {pipeline_mode = #tpu.pipeline_mode<synchronous>, transform_indices = @transform_27, window_bounds = array<i64: 32, 64>}, {transform_indices = @transform_28, window_bounds = array<i64: 1, 4, 64>}]} {
    %c0 = arith.constant 0 : index
    %c0_0 = arith.constant 0 : index
    %c0_1 = arith.constant 0 : index
    %0 = vector.load %arg1[%c0, %c0_0, %c0_1] : memref<1x11x32xf32, #tpu.memory_space<vmem>>, vector<1x11x32xf32>
    %1 = vector.shape_cast %0 : vector<1x11x32xf32> to vector<11x32xf32>
    %c0_2 = arith.constant 0 : index
    %c0_3 = arith.constant 0 : index
    %c0_4 = arith.constant 0 : index
    %2 = vector.load %arg5[%c0_2, %c0_3, %c0_4] : memref<2x1x32xf32, #tpu.memory_space<vmem>>, vector<1x1x32xf32>
    %3 = vector.shape_cast %2 : vector<1x1x32xf32> to vector<1x32xf32>
    %4 = arith.mulf %1, %1 : vector<11x32xf32>
    %cst = arith.constant dense<0.000000e+00> : vector<11xf32>
    %5 = vector.multi_reduction <add>, %4, %cst [1] : vector<11x32xf32> to vector<11xf32>
    %6 = vector.shape_cast %5 : vector<11xf32> to vector<11x1xf32>
    %cst_5 = arith.constant 3.200000e+01 : f32
    %7 = vector.broadcast %cst_5 : f32 to vector<11x1xf32>
    %8 = arith.divf %6, %7 : vector<11x1xf32>
    %cst_6 = arith.constant 9.99999997E-7 : f32
    %9 = vector.broadcast %cst_6 : f32 to vector<11x1xf32>
    %10 = arith.addf %8, %9 : vector<11x1xf32>
    %11 = math.rsqrt %10 : vector<11x1xf32>
    %12 = vector.broadcast %11 : vector<11x1xf32> to vector<11x32xf32>
    %13 = arith.mulf %1, %12 : vector<11x32xf32>
    %14 = vector.broadcast %3 : vector<1x32xf32> to vector<11x32xf32>
    %15 = arith.mulf %13, %14 : vector<11x32xf32>
    %c0_7 = arith.constant 0 : index
    %c0_8 = arith.constant 0 : index
    %c0_9 = arith.constant 0 : index
    %16 = vector.load %arg6[%c0_7, %c0_8, %c0_9] : memref<2x32x96xbf16, #tpu.memory_space<vmem>>, vector<1x32x96xbf16>
    %17 = vector.shape_cast %16 : vector<1x32x96xbf16> to vector<32x96xbf16>
    %18 = arith.truncf %15 : vector<11x32xf32> to vector<11x32xbf16>
    %cst_10 = arith.constant dense<0.000000e+00> : vector<11x96xf32>
    %19 = tpu.matmul %18, %17, %cst_10 {dimension_numbers = #tpu.dot_dimension_numbers<[1], [0], [0], [1], [0, 0, 1, 1], [], []>} : vector<11x32xbf16>, vector<32x96xbf16>, vector<11x96xf32> -> vector<11x96xf32>
    %20 = vector.extract_strided_slice %19 {offsets = [0, 0], sizes = [11, 32], strides = [1, 1]} : vector<11x96xf32> to vector<11x32xf32>
    %21 = vector.extract_strided_slice %19 {offsets = [0, 32], sizes = [11, 32], strides = [1, 1]} : vector<11x96xf32> to vector<11x32xf32>
    %22 = vector.extract_strided_slice %19 {offsets = [0, 64], sizes = [11, 32], strides = [1, 1]} : vector<11x96xf32> to vector<11x32xf32>
    %23 = vector.extract_strided_slice %20 {offsets = [0, 0], sizes = [11, 8], strides = [1, 1]} : vector<11x32xf32> to vector<11x8xf32>
    %24 = vector.extract_strided_slice %21 {offsets = [0, 0], sizes = [11, 8], strides = [1, 1]} : vector<11x32xf32> to vector<11x8xf32>
    "tpu.trace_start"() <{level = 10 : i32, message = "qd,kd->qk"}> : () -> ()
    %cst_11 = arith.constant dense<0.000000e+00> : vector<11x11xf32>
    %25 = tpu.matmul %23, %24, %cst_11 {dimension_numbers = #tpu.dot_dimension_numbers<[1], [1], [0], [0], [0, 0, 1, 0], [], []>} : vector<11x8xf32>, vector<11x8xf32>, vector<11x11xf32> -> vector<11x11xf32>
    "tpu.trace_stop"() : () -> ()
    %cst_12 = arith.constant dense<0xFF800000> : vector<11xf32>
    %26 = vector.multi_reduction <maximumf>, %25, %cst_12 [1] : vector<11x11xf32> to vector<11xf32>
    %27 = vector.shape_cast %26 : vector<11xf32> to vector<11x1xf32>
    %28 = vector.broadcast %27 : vector<11x1xf32> to vector<11x11xf32>
    %29 = arith.subf %25, %28 : vector<11x11xf32>
    %30 = math.exp %29 : vector<11x11xf32>
    %cst_13 = arith.constant dense<0.000000e+00> : vector<11xf32>
    %31 = vector.multi_reduction <add>, %30, %cst_13 [1] : vector<11x11xf32> to vector<11xf32>
    %32 = vector.shape_cast %31 : vector<11xf32> to vector<11x1xf32>
    %33 = tpu.reciprocal %32 {approx = true} : vector<11x1xf32> -> vector<11x1xf32>
    %34 = vector.broadcast %33 : vector<11x1xf32> to vector<11x11xf32>
    %35 = arith.mulf %30, %34 : vector<11x11xf32>
    %36 = vector.extract_strided_slice %22 {offsets = [0, 0], sizes = [11, 8], strides = [1, 1]} : vector<11x32xf32> to vector<11x8xf32>
    %cst_14 = arith.constant dense<0.000000e+00> : vector<11x8xf32>
    %37 = tpu.matmul %35, %36, %cst_14 {dimension_numbers = #tpu.dot_dimension_numbers<[1], [0], [0], [1], [0, 0, 1, 1], [], []>} : vector<11x11xf32>, vector<11x8xf32>, vector<11x8xf32> -> vector<11x8xf32>
    %38 = vector.extract_strided_slice %20 {offsets = [0, 8], sizes = [11, 8], strides = [1, 1]} : vector<11x32xf32> to vector<11x8xf32>
    %39 = vector.extract_strided_slice %21 {offsets = [0, 8], sizes = [11, 8], strides = [1, 1]} : vector<11x32xf32> to vector<11x8xf32>
    "tpu.trace_start"() <{level = 10 : i32, message = "qd,kd->qk"}> : () -> ()
    %cst_15 = arith.constant dense<0.000000e+00> : vector<11x11xf32>
    %40 = tpu.matmul %38, %39, %cst_15 {dimension_numbers = #tpu.dot_dimension_numbers<[1], [1], [0], [0], [0, 0, 1, 0], [], []>} : vector<11x8xf32>, vector<11x8xf32>, vector<11x11xf32> -> vector<11x11xf32>
    "tpu.trace_stop"() : () -> ()
    %cst_16 = arith.constant dense<0xFF800000> : vector<11xf32>
    %41 = vector.multi_reduction <maximumf>, %40, %cst_16 [1] : vector<11x11xf32> to vector<11xf32>
    %42 = vector.shape_cast %41 : vector<11xf32> to vector<11x1xf32>
    %43 = vector.broadcast %42 : vector<11x1xf32> to vector<11x11xf32>
    %44 = arith.subf %40, %43 : vector<11x11xf32>
    %45 = math.exp %44 : vector<11x11xf32>
    %cst_17 = arith.constant dense<0.000000e+00> : vector<11xf32>
    %46 = vector.multi_reduction <add>, %45, %cst_17 [1] : vector<11x11xf32> to vector<11xf32>
    %47 = vector.shape_cast %46 : vector<11xf32> to vector<11x1xf32>
    %48 = tpu.reciprocal %47 {approx = true} : vector<11x1xf32> -> vector<11x1xf32>
    %49 = vector.broadcast %48 : vector<11x1xf32> to vector<11x11xf32>
    %50 = arith.mulf %45, %49 : vector<11x11xf32>
    %51 = vector.extract_strided_slice %22 {offsets = [0, 8], sizes = [11, 8], strides = [1, 1]} : vector<11x32xf32> to vector<11x8xf32>
    %cst_18 = arith.constant dense<0.000000e+00> : vector<11x8xf32>
    %52 = tpu.matmul %50, %51, %cst_18 {dimension_numbers = #tpu.dot_dimension_numbers<[1], [0], [0], [1], [0, 0, 1, 1], [], []>} : vector<11x11xf32>, vector<11x8xf32>, vector<11x8xf32> -> vector<11x8xf32>
    %53 = vector.extract_strided_slice %20 {offsets = [0, 16], sizes = [11, 8], strides = [1, 1]} : vector<11x32xf32> to vector<11x8xf32>
    %54 = vector.extract_strided_slice %21 {offsets = [0, 16], sizes = [11, 8], strides = [1, 1]} : vector<11x32xf32> to vector<11x8xf32>
    "tpu.trace_start"() <{level = 10 : i32, message = "qd,kd->qk"}> : () -> ()
    %cst_19 = arith.constant dense<0.000000e+00> : vector<11x11xf32>
    %55 = tpu.matmul %53, %54, %cst_19 {dimension_numbers = #tpu.dot_dimension_numbers<[1], [1], [0], [0], [0, 0, 1, 0], [], []>} : vector<11x8xf32>, vector<11x8xf32>, vector<11x11xf32> -> vector<11x11xf32>
    "tpu.trace_stop"() : () -> ()
    %cst_20 = arith.constant dense<0xFF800000> : vector<11xf32>
    %56 = vector.multi_reduction <maximumf>, %55, %cst_20 [1] : vector<11x11xf32> to vector<11xf32>
    %57 = vector.shape_cast %56 : vector<11xf32> to vector<11x1xf32>
    %58 = vector.broadcast %57 : vector<11x1xf32> to vector<11x11xf32>
    %59 = arith.subf %55, %58 : vector<11x11xf32>
    %60 = math.exp %59 : vector<11x11xf32>
    %cst_21 = arith.constant dense<0.000000e+00> : vector<11xf32>
    %61 = vector.multi_reduction <add>, %60, %cst_21 [1] : vector<11x11xf32> to vector<11xf32>
    %62 = vector.shape_cast %61 : vector<11xf32> to vector<11x1xf32>
    %63 = tpu.reciprocal %62 {approx = true} : vector<11x1xf32> -> vector<11x1xf32>
    %64 = vector.broadcast %63 : vector<11x1xf32> to vector<11x11xf32>
    %65 = arith.mulf %60, %64 : vector<11x11xf32>
    %66 = vector.extract_strided_slice %22 {offsets = [0, 16], sizes = [11, 8], strides = [1, 1]} : vector<11x32xf32> to vector<11x8xf32>
    %cst_22 = arith.constant dense<0.000000e+00> : vector<11x8xf32>
    %67 = tpu.matmul %65, %66, %cst_22 {dimension_numbers = #tpu.dot_dimension_numbers<[1], [0], [0], [1], [0, 0, 1, 1], [], []>} : vector<11x11xf32>, vector<11x8xf32>, vector<11x8xf32> -> vector<11x8xf32>
    %68 = vector.extract_strided_slice %20 {offsets = [0, 24], sizes = [11, 8], strides = [1, 1]} : vector<11x32xf32> to vector<11x8xf32>
    %69 = vector.extract_strided_slice %21 {offsets = [0, 24], sizes = [11, 8], strides = [1, 1]} : vector<11x32xf32> to vector<11x8xf32>
    "tpu.trace_start"() <{level = 10 : i32, message = "qd,kd->qk"}> : () -> ()
    %cst_23 = arith.constant dense<0.000000e+00> : vector<11x11xf32>
    %70 = tpu.matmul %68, %69, %cst_23 {dimension_numbers = #tpu.dot_dimension_numbers<[1], [1], [0], [0], [0, 0, 1, 0], [], []>} : vector<11x8xf32>, vector<11x8xf32>, vector<11x11xf32> -> vector<11x11xf32>
    "tpu.trace_stop"() : () -> ()
    %cst_24 = arith.constant dense<0xFF800000> : vector<11xf32>
    %71 = vector.multi_reduction <maximumf>, %70, %cst_24 [1] : vector<11x11xf32> to vector<11xf32>
    %72 = vector.shape_cast %71 : vector<11xf32> to vector<11x1xf32>
    %73 = vector.broadcast %72 : vector<11x1xf32> to vector<11x11xf32>
    %74 = arith.subf %70, %73 : vector<11x11xf32>
    %75 = math.exp %74 : vector<11x11xf32>
    %cst_25 = arith.constant dense<0.000000e+00> : vector<11xf32>
    %76 = vector.multi_reduction <add>, %75, %cst_25 [1] : vector<11x11xf32> to vector<11xf32>
    %77 = vector.shape_cast %76 : vector<11xf32> to vector<11x1xf32>
    %78 = tpu.reciprocal %77 {approx = true} : vector<11x1xf32> -> vector<11x1xf32>
    %79 = vector.broadcast %78 : vector<11x1xf32> to vector<11x11xf32>
    %80 = arith.mulf %75, %79 : vector<11x11xf32>
    %81 = vector.extract_strided_slice %22 {offsets = [0, 24], sizes = [11, 8], strides = [1, 1]} : vector<11x32xf32> to vector<11x8xf32>
    %cst_26 = arith.constant dense<0.000000e+00> : vector<11x8xf32>
    %82 = tpu.matmul %80, %81, %cst_26 {dimension_numbers = #tpu.dot_dimension_numbers<[1], [0], [0], [1], [0, 0, 1, 1], [], []>} : vector<11x11xf32>, vector<11x8xf32>, vector<11x8xf32> -> vector<11x8xf32>
    %83 = tpu.concatenate %37, %52, %67, %82 in 1 : vector<11x8xf32>, vector<11x8xf32>, vector<11x8xf32>, vector<11x8xf32> -> vector<11x32xf32>
    %c0_27 = arith.constant 0 : index
    %c0_28 = arith.constant 0 : index
    %c0_29 = arith.constant 0 : index
    %84 = vector.load %arg7[%c0_27, %c0_28, %c0_29] : memref<2x32x32xbf16, #tpu.memory_space<vmem>>, vector<1x32x32xbf16>
    %85 = vector.shape_cast %84 : vector<1x32x32xbf16> to vector<32x32xbf16>
    %86 = arith.truncf %83 : vector<11x32xf32> to vector<11x32xbf16>
    %cst_30 = arith.constant dense<0.000000e+00> : vector<11x32xf32>
    %87 = tpu.matmul %86, %85, %cst_30 {dimension_numbers = #tpu.dot_dimension_numbers<[1], [0], [0], [1], [0, 0, 1, 1], [], []>} : vector<11x32xbf16>, vector<32x32xbf16>, vector<11x32xf32> -> vector<11x32xf32>
    %88 = arith.addf %1, %87 : vector<11x32xf32>
    %c0_31 = arith.constant 0 : index
    %c0_32 = arith.constant 0 : index
    %c0_33 = arith.constant 0 : index
    %89 = vector.load %arg8[%c0_31, %c0_32, %c0_33] : memref<2x1x32xf32, #tpu.memory_space<vmem>>, vector<1x1x32xf32>
    %90 = vector.shape_cast %89 : vector<1x1x32xf32> to vector<1x32xf32>
    %91 = arith.mulf %88, %88 : vector<11x32xf32>
    %cst_34 = arith.constant dense<0.000000e+00> : vector<11xf32>
    %92 = vector.multi_reduction <add>, %91, %cst_34 [1] : vector<11x32xf32> to vector<11xf32>
    %93 = vector.shape_cast %92 : vector<11xf32> to vector<11x1xf32>
    %cst_35 = arith.constant 3.200000e+01 : f32
    %94 = vector.broadcast %cst_35 : f32 to vector<11x1xf32>
    %95 = arith.divf %93, %94 : vector<11x1xf32>
    %cst_36 = arith.constant 9.99999997E-7 : f32
    %96 = vector.broadcast %cst_36 : f32 to vector<11x1xf32>
    %97 = arith.addf %95, %96 : vector<11x1xf32>
    %98 = math.rsqrt %97 : vector<11x1xf32>
    %99 = vector.broadcast %98 : vector<11x1xf32> to vector<11x32xf32>
    %100 = arith.mulf %88, %99 : vector<11x32xf32>
    %101 = vector.broadcast %90 : vector<1x32xf32> to vector<11x32xf32>
    %102 = arith.mulf %100, %101 : vector<11x32xf32>
    %c0_37 = arith.constant 0 : index
    %c0_38 = arith.constant 0 : index
    %c0_39 = arith.constant 0 : index
    %103 = vector.load %arg9[%c0_37, %c0_38, %c0_39] : memref<2x32x64xbf16, #tpu.memory_space<vmem>>, vector<1x32x64xbf16>
    %104 = vector.shape_cast %103 : vector<1x32x64xbf16> to vector<32x64xbf16>
    %105 = arith.truncf %102 : vector<11x32xf32> to vector<11x32xbf16>
    %cst_40 = arith.constant dense<0.000000e+00> : vector<11x64xf32>
    %106 = tpu.matmul %105, %104, %cst_40 {dimension_numbers = #tpu.dot_dimension_numbers<[1], [0], [0], [1], [0, 0, 1, 1], [], []>} : vector<11x32xbf16>, vector<32x64xbf16>, vector<11x64xf32> -> vector<11x64xf32>
    %cst_41 = arith.constant 0.000000e+00 : f32
    %107 = vector.broadcast %cst_41 : f32 to vector<11x64xf32>
    %108 = arith.maximumf %106, %107 : vector<11x64xf32>
    %c0_42 = arith.constant 0 : index
    %c0_43 = arith.constant 0 : index
    %c0_44 = arith.constant 0 : index
    %109 = vector.load %arg10[%c0_42, %c0_43, %c0_44] : memref<2x64x32xbf16, #tpu.memory_space<vmem>>, vector<1x64x32xbf16>
    %110 = vector.shape_cast %109 : vector<1x64x32xbf16> to vector<64x32xbf16>
    %111 = arith.truncf %108 : vector<11x64xf32> to vector<11x64xbf16>
    %cst_45 = arith.constant dense<0.000000e+00> : vector<11x32xf32>
    %112 = tpu.matmul %111, %110, %cst_45 {dimension_numbers = #tpu.dot_dimension_numbers<[1], [0], [0], [1], [0, 0, 1, 1], [], []>} : vector<11x64xbf16>, vector<64x32xbf16>, vector<11x32xf32> -> vector<11x32xf32>
    %113 = arith.addf %88, %112 : vector<11x32xf32>
    %c1 = arith.constant 1 : index
    %c0_46 = arith.constant 0 : index
    %c0_47 = arith.constant 0 : index
    %114 = vector.load %arg5[%c1, %c0_46, %c0_47] : memref<2x1x32xf32, #tpu.memory_space<vmem>>, vector<1x1x32xf32>
    %115 = vector.shape_cast %114 : vector<1x1x32xf32> to vector<1x32xf32>
    %116 = arith.mulf %113, %113 : vector<11x32xf32>
    %cst_48 = arith.constant dense<0.000000e+00> : vector<11xf32>
    %117 = vector.multi_reduction <add>, %116, %cst_48 [1] : vector<11x32xf32> to vector<11xf32>
    %118 = vector.shape_cast %117 : vector<11xf32> to vector<11x1xf32>
    %cst_49 = arith.constant 3.200000e+01 : f32
    %119 = vector.broadcast %cst_49 : f32 to vector<11x1xf32>
    %120 = arith.divf %118, %119 : vector<11x1xf32>
    %cst_50 = arith.constant 9.99999997E-7 : f32
    %121 = vector.broadcast %cst_50 : f32 to vector<11x1xf32>
    %122 = arith.addf %120, %121 : vector<11x1xf32>
    %123 = math.rsqrt %122 : vector<11x1xf32>
    %124 = vector.broadcast %123 : vector<11x1xf32> to vector<11x32xf32>
    %125 = arith.mulf %113, %124 : vector<11x32xf32>
    %126 = vector.broadcast %115 : vector<1x32xf32> to vector<11x32xf32>
    %127 = arith.mulf %125, %126 : vector<11x32xf32>
    %c1_51 = arith.constant 1 : index
    %c0_52 = arith.constant 0 : index
    %c0_53 = arith.constant 0 : index
    %128 = vector.load %arg6[%c1_51, %c0_52, %c0_53] : memref<2x32x96xbf16, #tpu.memory_space<vmem>>, vector<1x32x96xbf16>
    %129 = vector.shape_cast %128 : vector<1x32x96xbf16> to vector<32x96xbf16>
    %130 = arith.truncf %127 : vector<11x32xf32> to vector<11x32xbf16>
    %cst_54 = arith.constant dense<0.000000e+00> : vector<11x96xf32>
    %131 = tpu.matmul %130, %129, %cst_54 {dimension_numbers = #tpu.dot_dimension_numbers<[1], [0], [0], [1], [0, 0, 1, 1], [], []>} : vector<11x32xbf16>, vector<32x96xbf16>, vector<11x96xf32> -> vector<11x96xf32>
    %132 = vector.extract_strided_slice %131 {offsets = [0, 0], sizes = [11, 32], strides = [1, 1]} : vector<11x96xf32> to vector<11x32xf32>
    %133 = vector.extract_strided_slice %131 {offsets = [0, 32], sizes = [11, 32], strides = [1, 1]} : vector<11x96xf32> to vector<11x32xf32>
    %134 = vector.extract_strided_slice %131 {offsets = [0, 64], sizes = [11, 32], strides = [1, 1]} : vector<11x96xf32> to vector<11x32xf32>
    %135 = vector.extract_strided_slice %132 {offsets = [0, 0], sizes = [11, 8], strides = [1, 1]} : vector<11x32xf32> to vector<11x8xf32>
    %136 = vector.extract_strided_slice %133 {offsets = [0, 0], sizes = [11, 8], strides = [1, 1]} : vector<11x32xf32> to vector<11x8xf32>
    "tpu.trace_start"() <{level = 10 : i32, message = "qd,kd->qk"}> : () -> ()
    %cst_55 = arith.constant dense<0.000000e+00> : vector<11x11xf32>
    %137 = tpu.matmul %135, %136, %cst_55 {dimension_numbers = #tpu.dot_dimension_numbers<[1], [1], [0], [0], [0, 0, 1, 0], [], []>} : vector<11x8xf32>, vector<11x8xf32>, vector<11x11xf32> -> vector<11x11xf32>
    "tpu.trace_stop"() : () -> ()
    %cst_56 = arith.constant dense<0xFF800000> : vector<11xf32>
    %138 = vector.multi_reduction <maximumf>, %137, %cst_56 [1] : vector<11x11xf32> to vector<11xf32>
    %139 = vector.shape_cast %138 : vector<11xf32> to vector<11x1xf32>
    %140 = vector.broadcast %139 : vector<11x1xf32> to vector<11x11xf32>
    %141 = arith.subf %137, %140 : vector<11x11xf32>
    %142 = math.exp %141 : vector<11x11xf32>
    %cst_57 = arith.constant dense<0.000000e+00> : vector<11xf32>
    %143 = vector.multi_reduction <add>, %142, %cst_57 [1] : vector<11x11xf32> to vector<11xf32>
    %144 = vector.shape_cast %143 : vector<11xf32> to vector<11x1xf32>
    %145 = tpu.reciprocal %144 {approx = true} : vector<11x1xf32> -> vector<11x1xf32>
    %146 = vector.broadcast %145 : vector<11x1xf32> to vector<11x11xf32>
    %147 = arith.mulf %142, %146 : vector<11x11xf32>
    %148 = vector.extract_strided_slice %134 {offsets = [0, 0], sizes = [11, 8], strides = [1, 1]} : vector<11x32xf32> to vector<11x8xf32>
    %cst_58 = arith.constant dense<0.000000e+00> : vector<11x8xf32>
    %149 = tpu.matmul %147, %148, %cst_58 {dimension_numbers = #tpu.dot_dimension_numbers<[1], [0], [0], [1], [0, 0, 1, 1], [], []>} : vector<11x11xf32>, vector<11x8xf32>, vector<11x8xf32> -> vector<11x8xf32>
    %150 = vector.extract_strided_slice %132 {offsets = [0, 8], sizes = [11, 8], strides = [1, 1]} : vector<11x32xf32> to vector<11x8xf32>
    %151 = vector.extract_strided_slice %133 {offsets = [0, 8], sizes = [11, 8], strides = [1, 1]} : vector<11x32xf32> to vector<11x8xf32>
    "tpu.trace_start"() <{level = 10 : i32, message = "qd,kd->qk"}> : () -> ()
    %cst_59 = arith.constant dense<0.000000e+00> : vector<11x11xf32>
    %152 = tpu.matmul %150, %151, %cst_59 {dimension_numbers = #tpu.dot_dimension_numbers<[1], [1], [0], [0], [0, 0, 1, 0], [], []>} : vector<11x8xf32>, vector<11x8xf32>, vector<11x11xf32> -> vector<11x11xf32>
    "tpu.trace_stop"() : () -> ()
    %cst_60 = arith.constant dense<0xFF800000> : vector<11xf32>
    %153 = vector.multi_reduction <maximumf>, %152, %cst_60 [1] : vector<11x11xf32> to vector<11xf32>
    %154 = vector.shape_cast %153 : vector<11xf32> to vector<11x1xf32>
    %155 = vector.broadcast %154 : vector<11x1xf32> to vector<11x11xf32>
    %156 = arith.subf %152, %155 : vector<11x11xf32>
    %157 = math.exp %156 : vector<11x11xf32>
    %cst_61 = arith.constant dense<0.000000e+00> : vector<11xf32>
    %158 = vector.multi_reduction <add>, %157, %cst_61 [1] : vector<11x11xf32> to vector<11xf32>
    %159 = vector.shape_cast %158 : vector<11xf32> to vector<11x1xf32>
    %160 = tpu.reciprocal %159 {approx = true} : vector<11x1xf32> -> vector<11x1xf32>
    %161 = vector.broadcast %160 : vector<11x1xf32> to vector<11x11xf32>
    %162 = arith.mulf %157, %161 : vector<11x11xf32>
    %163 = vector.extract_strided_slice %134 {offsets = [0, 8], sizes = [11, 8], strides = [1, 1]} : vector<11x32xf32> to vector<11x8xf32>
    %cst_62 = arith.constant dense<0.000000e+00> : vector<11x8xf32>
    %164 = tpu.matmul %162, %163, %cst_62 {dimension_numbers = #tpu.dot_dimension_numbers<[1], [0], [0], [1], [0, 0, 1, 1], [], []>} : vector<11x11xf32>, vector<11x8xf32>, vector<11x8xf32> -> vector<11x8xf32>
    %165 = vector.extract_strided_slice %132 {offsets = [0, 16], sizes = [11, 8], strides = [1, 1]} : vector<11x32xf32> to vector<11x8xf32>
    %166 = vector.extract_strided_slice %133 {offsets = [0, 16], sizes = [11, 8], strides = [1, 1]} : vector<11x32xf32> to vector<11x8xf32>
    "tpu.trace_start"() <{level = 10 : i32, message = "qd,kd->qk"}> : () -> ()
    %cst_63 = arith.constant dense<0.000000e+00> : vector<11x11xf32>
    %167 = tpu.matmul %165, %166, %cst_63 {dimension_numbers = #tpu.dot_dimension_numbers<[1], [1], [0], [0], [0, 0, 1, 0], [], []>} : vector<11x8xf32>, vector<11x8xf32>, vector<11x11xf32> -> vector<11x11xf32>
    "tpu.trace_stop"() : () -> ()
    %cst_64 = arith.constant dense<0xFF800000> : vector<11xf32>
    %168 = vector.multi_reduction <maximumf>, %167, %cst_64 [1] : vector<11x11xf32> to vector<11xf32>
    %169 = vector.shape_cast %168 : vector<11xf32> to vector<11x1xf32>
    %170 = vector.broadcast %169 : vector<11x1xf32> to vector<11x11xf32>
    %171 = arith.subf %167, %170 : vector<11x11xf32>
    %172 = math.exp %171 : vector<11x11xf32>
    %cst_65 = arith.constant dense<0.000000e+00> : vector<11xf32>
    %173 = vector.multi_reduction <add>, %172, %cst_65 [1] : vector<11x11xf32> to vector<11xf32>
    %174 = vector.shape_cast %173 : vector<11xf32> to vector<11x1xf32>
    %175 = tpu.reciprocal %174 {approx = true} : vector<11x1xf32> -> vector<11x1xf32>
    %176 = vector.broadcast %175 : vector<11x1xf32> to vector<11x11xf32>
    %177 = arith.mulf %172, %176 : vector<11x11xf32>
    %178 = vector.extract_strided_slice %134 {offsets = [0, 16], sizes = [11, 8], strides = [1, 1]} : vector<11x32xf32> to vector<11x8xf32>
    %cst_66 = arith.constant dense<0.000000e+00> : vector<11x8xf32>
    %179 = tpu.matmul %177, %178, %cst_66 {dimension_numbers = #tpu.dot_dimension_numbers<[1], [0], [0], [1], [0, 0, 1, 1], [], []>} : vector<11x11xf32>, vector<11x8xf32>, vector<11x8xf32> -> vector<11x8xf32>
    %180 = vector.extract_strided_slice %132 {offsets = [0, 24], sizes = [11, 8], strides = [1, 1]} : vector<11x32xf32> to vector<11x8xf32>
    %181 = vector.extract_strided_slice %133 {offsets = [0, 24], sizes = [11, 8], strides = [1, 1]} : vector<11x32xf32> to vector<11x8xf32>
    "tpu.trace_start"() <{level = 10 : i32, message = "qd,kd->qk"}> : () -> ()
    %cst_67 = arith.constant dense<0.000000e+00> : vector<11x11xf32>
    %182 = tpu.matmul %180, %181, %cst_67 {dimension_numbers = #tpu.dot_dimension_numbers<[1], [1], [0], [0], [0, 0, 1, 0], [], []>} : vector<11x8xf32>, vector<11x8xf32>, vector<11x11xf32> -> vector<11x11xf32>
    "tpu.trace_stop"() : () -> ()
    %cst_68 = arith.constant dense<0xFF800000> : vector<11xf32>
    %183 = vector.multi_reduction <maximumf>, %182, %cst_68 [1] : vector<11x11xf32> to vector<11xf32>
    %184 = vector.shape_cast %183 : vector<11xf32> to vector<11x1xf32>
    %185 = vector.broadcast %184 : vector<11x1xf32> to vector<11x11xf32>
    %186 = arith.subf %182, %185 : vector<11x11xf32>
    %187 = math.exp %186 : vector<11x11xf32>
    %cst_69 = arith.constant dense<0.000000e+00> : vector<11xf32>
    %188 = vector.multi_reduction <add>, %187, %cst_69 [1] : vector<11x11xf32> to vector<11xf32>
    %189 = vector.shape_cast %188 : vector<11xf32> to vector<11x1xf32>
    %190 = tpu.reciprocal %189 {approx = true} : vector<11x1xf32> -> vector<11x1xf32>
    %191 = vector.broadcast %190 : vector<11x1xf32> to vector<11x11xf32>
    %192 = arith.mulf %187, %191 : vector<11x11xf32>
    %193 = vector.extract_strided_slice %134 {offsets = [0, 24], sizes = [11, 8], strides = [1, 1]} : vector<11x32xf32> to vector<11x8xf32>
    %cst_70 = arith.constant dense<0.000000e+00> : vector<11x8xf32>
    %194 = tpu.matmul %192, %193, %cst_70 {dimension_numbers = #tpu.dot_dimension_numbers<[1], [0], [0], [1], [0, 0, 1, 1], [], []>} : vector<11x11xf32>, vector<11x8xf32>, vector<11x8xf32> -> vector<11x8xf32>
    %195 = tpu.concatenate %149, %164, %179, %194 in 1 : vector<11x8xf32>, vector<11x8xf32>, vector<11x8xf32>, vector<11x8xf32> -> vector<11x32xf32>
    %c1_71 = arith.constant 1 : index
    %c0_72 = arith.constant 0 : index
    %c0_73 = arith.constant 0 : index
    %196 = vector.load %arg7[%c1_71, %c0_72, %c0_73] : memref<2x32x32xbf16, #tpu.memory_space<vmem>>, vector<1x32x32xbf16>
    %197 = vector.shape_cast %196 : vector<1x32x32xbf16> to vector<32x32xbf16>
    %198 = arith.truncf %195 : vector<11x32xf32> to vector<11x32xbf16>
    %cst_74 = arith.constant dense<0.000000e+00> : vector<11x32xf32>
    %199 = tpu.matmul %198, %197, %cst_74 {dimension_numbers = #tpu.dot_dimension_numbers<[1], [0], [0], [1], [0, 0, 1, 1], [], []>} : vector<11x32xbf16>, vector<32x32xbf16>, vector<11x32xf32> -> vector<11x32xf32>
    %200 = arith.addf %113, %199 : vector<11x32xf32>
    %c1_75 = arith.constant 1 : index
    %c0_76 = arith.constant 0 : index
    %c0_77 = arith.constant 0 : index
    %201 = vector.load %arg8[%c1_75, %c0_76, %c0_77] : memref<2x1x32xf32, #tpu.memory_space<vmem>>, vector<1x1x32xf32>
    %202 = vector.shape_cast %201 : vector<1x1x32xf32> to vector<1x32xf32>
    %203 = arith.mulf %200, %200 : vector<11x32xf32>
    %cst_78 = arith.constant dense<0.000000e+00> : vector<11xf32>
    %204 = vector.multi_reduction <add>, %203, %cst_78 [1] : vector<11x32xf32> to vector<11xf32>
    %205 = vector.shape_cast %204 : vector<11xf32> to vector<11x1xf32>
    %cst_79 = arith.constant 3.200000e+01 : f32
    %206 = vector.broadcast %cst_79 : f32 to vector<11x1xf32>
    %207 = arith.divf %205, %206 : vector<11x1xf32>
    %cst_80 = arith.constant 9.99999997E-7 : f32
    %208 = vector.broadcast %cst_80 : f32 to vector<11x1xf32>
    %209 = arith.addf %207, %208 : vector<11x1xf32>
    %210 = math.rsqrt %209 : vector<11x1xf32>
    %211 = vector.broadcast %210 : vector<11x1xf32> to vector<11x32xf32>
    %212 = arith.mulf %200, %211 : vector<11x32xf32>
    %213 = vector.broadcast %202 : vector<1x32xf32> to vector<11x32xf32>
    %214 = arith.mulf %212, %213 : vector<11x32xf32>
    %c1_81 = arith.constant 1 : index
    %c0_82 = arith.constant 0 : index
    %c0_83 = arith.constant 0 : index
    %215 = vector.load %arg9[%c1_81, %c0_82, %c0_83] : memref<2x32x64xbf16, #tpu.memory_space<vmem>>, vector<1x32x64xbf16>
    %216 = vector.shape_cast %215 : vector<1x32x64xbf16> to vector<32x64xbf16>
    %217 = arith.truncf %214 : vector<11x32xf32> to vector<11x32xbf16>
    %cst_84 = arith.constant dense<0.000000e+00> : vector<11x64xf32>
    %218 = tpu.matmul %217, %216, %cst_84 {dimension_numbers = #tpu.dot_dimension_numbers<[1], [0], [0], [1], [0, 0, 1, 1], [], []>} : vector<11x32xbf16>, vector<32x64xbf16>, vector<11x64xf32> -> vector<11x64xf32>
    %cst_85 = arith.constant 0.000000e+00 : f32
    %219 = vector.broadcast %cst_85 : f32 to vector<11x64xf32>
    %220 = arith.maximumf %218, %219 : vector<11x64xf32>
    %c1_86 = arith.constant 1 : index
    %c0_87 = arith.constant 0 : index
    %c0_88 = arith.constant 0 : index
    %221 = vector.load %arg10[%c1_86, %c0_87, %c0_88] : memref<2x64x32xbf16, #tpu.memory_space<vmem>>, vector<1x64x32xbf16>
    %222 = vector.shape_cast %221 : vector<1x64x32xbf16> to vector<64x32xbf16>
    %223 = arith.truncf %220 : vector<11x64xf32> to vector<11x64xbf16>
    %cst_89 = arith.constant dense<0.000000e+00> : vector<11x32xf32>
    %224 = tpu.matmul %223, %222, %cst_89 {dimension_numbers = #tpu.dot_dimension_numbers<[1], [0], [0], [1], [0, 0, 1, 1], [], []>} : vector<11x64xbf16>, vector<64x32xbf16>, vector<11x32xf32> -> vector<11x32xf32>
    %225 = arith.addf %200, %224 : vector<11x32xf32>
    %c0_90 = arith.constant 0 : index
    %c0_91 = arith.constant 0 : index
    %226 = vector.load %arg11[%c0_90, %c0_91] : memref<1x32xf32, #tpu.memory_space<vmem>>, vector<1x32xf32>
    %227 = arith.mulf %225, %225 : vector<11x32xf32>
    %cst_92 = arith.constant dense<0.000000e+00> : vector<11xf32>
    %228 = vector.multi_reduction <add>, %227, %cst_92 [1] : vector<11x32xf32> to vector<11xf32>
    %229 = vector.shape_cast %228 : vector<11xf32> to vector<11x1xf32>
    %cst_93 = arith.constant 3.200000e+01 : f32
    %230 = vector.broadcast %cst_93 : f32 to vector<11x1xf32>
    %231 = arith.divf %229, %230 : vector<11x1xf32>
    %cst_94 = arith.constant 9.99999997E-7 : f32
    %232 = vector.broadcast %cst_94 : f32 to vector<11x1xf32>
    %233 = arith.addf %231, %232 : vector<11x1xf32>
    %234 = math.rsqrt %233 : vector<11x1xf32>
    %235 = vector.broadcast %234 : vector<11x1xf32> to vector<11x32xf32>
    %236 = arith.mulf %225, %235 : vector<11x32xf32>
    %237 = vector.broadcast %226 : vector<1x32xf32> to vector<11x32xf32>
    %238 = arith.mulf %236, %237 : vector<11x32xf32>
    %239 = vector.extract_strided_slice %238 {offsets = [0, 0], sizes = [8, 32], strides = [1, 1]} : vector<11x32xf32> to vector<8x32xf32>
    %240 = vector.extract_strided_slice %238 {offsets = [8, 0], sizes = [3, 32], strides = [1, 1]} : vector<11x32xf32> to vector<3x32xf32>
    %c0_95 = arith.constant 0 : index
    %c0_96 = arith.constant 0 : index
    %c0_97 = arith.constant 0 : index
    %241 = vector.load %arg2[%c0_95, %c0_96, %c0_97] : memref<1x8x192xf32, #tpu.memory_space<vmem>>, vector<1x8x192xf32>
    %242 = vector.shape_cast %241 : vector<1x8x192xf32> to vector<8x192xf32>
    %c0_98 = arith.constant 0 : index
    %c0_99 = arith.constant 0 : index
    %243 = vector.load %arg12[%c0_98, %c0_99] : memref<192x32xbf16, #tpu.memory_space<vmem>>, vector<192x32xbf16>
    %244 = arith.truncf %242 : vector<8x192xf32> to vector<8x192xbf16>
    %cst_100 = arith.constant dense<0.000000e+00> : vector<8x32xf32>
    %245 = tpu.matmul %244, %243, %cst_100 {dimension_numbers = #tpu.dot_dimension_numbers<[1], [0], [0], [1], [0, 0, 1, 1], [], []>} : vector<8x192xbf16>, vector<192x32xbf16>, vector<8x32xf32> -> vector<8x32xf32>
    %c0_101 = arith.constant 0 : index
    %c0_102 = arith.constant 0 : index
    %246 = vector.load %arg13[%c0_101, %c0_102] : memref<1x32xf32, #tpu.memory_space<vmem>>, vector<1x32xf32>
    %247 = vector.broadcast %246 : vector<1x32xf32> to vector<8x32xf32>
    %248 = arith.addf %245, %247 : vector<8x32xf32>
    %c0_103 = arith.constant 0 : index
    %c0_104 = arith.constant 0 : index
    %249 = vector.load %arg14[%c0_103, %c0_104] : memref<32x32xbf16, #tpu.memory_space<vmem>>, vector<32x32xbf16>
    %250 = arith.truncf %240 : vector<3x32xf32> to vector<3x32xbf16>
    %cst_105 = arith.constant dense<0.000000e+00> : vector<3x32xf32>
    %251 = tpu.matmul %250, %249, %cst_105 {dimension_numbers = #tpu.dot_dimension_numbers<[1], [0], [0], [1], [0, 0, 1, 1], [], []>} : vector<3x32xbf16>, vector<32x32xbf16>, vector<3x32xf32> -> vector<3x32xf32>
    %c0_106 = arith.constant 0 : index
    %c0_107 = arith.constant 0 : index
    %252 = vector.load %arg15[%c0_106, %c0_107] : memref<32x64xbf16, #tpu.memory_space<vmem>>, vector<32x64xbf16>
    %253 = arith.truncf %248 : vector<8x32xf32> to vector<8x32xbf16>
    %cst_108 = arith.constant dense<0.000000e+00> : vector<8x64xf32>
    %254 = tpu.matmul %253, %252, %cst_108 {dimension_numbers = #tpu.dot_dimension_numbers<[1], [0], [0], [1], [0, 0, 1, 1], [], []>} : vector<8x32xbf16>, vector<32x64xbf16>, vector<8x64xf32> -> vector<8x64xf32>
    %255 = vector.extract_strided_slice %254 {offsets = [0, 0], sizes = [8, 32], strides = [1, 1]} : vector<8x64xf32> to vector<8x32xf32>
    %256 = vector.extract_strided_slice %254 {offsets = [0, 32], sizes = [8, 32], strides = [1, 1]} : vector<8x64xf32> to vector<8x32xf32>
    %257 = vector.extract_strided_slice %251 {offsets = [0, 0], sizes = [3, 8], strides = [1, 1]} : vector<3x32xf32> to vector<3x8xf32>
    %258 = vector.extract_strided_slice %255 {offsets = [0, 0], sizes = [8, 8], strides = [1, 1]} : vector<8x32xf32> to vector<8x8xf32>
    "tpu.trace_start"() <{level = 10 : i32, message = "qd,kd->qk"}> : () -> ()
    %cst_109 = arith.constant dense<0.000000e+00> : vector<3x8xf32>
    %259 = tpu.matmul %257, %258, %cst_109 {dimension_numbers = #tpu.dot_dimension_numbers<[1], [1], [0], [0], [0, 0, 1, 0], [], []>} : vector<3x8xf32>, vector<8x8xf32>, vector<3x8xf32> -> vector<3x8xf32>
    "tpu.trace_stop"() : () -> ()
    %cst_110 = arith.constant dense<0xFF800000> : vector<3xf32>
    %260 = vector.multi_reduction <maximumf>, %259, %cst_110 [1] : vector<3x8xf32> to vector<3xf32>
    %261 = vector.shape_cast %260 : vector<3xf32> to vector<3x1xf32>
    %262 = vector.broadcast %261 : vector<3x1xf32> to vector<3x8xf32>
    %263 = arith.subf %259, %262 : vector<3x8xf32>
    %264 = math.exp %263 : vector<3x8xf32>
    %cst_111 = arith.constant dense<0.000000e+00> : vector<3xf32>
    %265 = vector.multi_reduction <add>, %264, %cst_111 [1] : vector<3x8xf32> to vector<3xf32>
    %266 = vector.shape_cast %265 : vector<3xf32> to vector<3x1xf32>
    %267 = tpu.reciprocal %266 {approx = true} : vector<3x1xf32> -> vector<3x1xf32>
    %268 = vector.broadcast %267 : vector<3x1xf32> to vector<3x8xf32>
    %269 = arith.mulf %264, %268 : vector<3x8xf32>
    %270 = vector.extract_strided_slice %256 {offsets = [0, 0], sizes = [8, 8], strides = [1, 1]} : vector<8x32xf32> to vector<8x8xf32>
    %cst_112 = arith.constant dense<0.000000e+00> : vector<3x8xf32>
    %271 = tpu.matmul %269, %270, %cst_112 {dimension_numbers = #tpu.dot_dimension_numbers<[1], [0], [0], [1], [0, 0, 1, 1], [], []>} : vector<3x8xf32>, vector<8x8xf32>, vector<3x8xf32> -> vector<3x8xf32>
    %272 = vector.extract_strided_slice %251 {offsets = [0, 8], sizes = [3, 8], strides = [1, 1]} : vector<3x32xf32> to vector<3x8xf32>
    %273 = vector.extract_strided_slice %255 {offsets = [0, 8], sizes = [8, 8], strides = [1, 1]} : vector<8x32xf32> to vector<8x8xf32>
    "tpu.trace_start"() <{level = 10 : i32, message = "qd,kd->qk"}> : () -> ()
    %cst_113 = arith.constant dense<0.000000e+00> : vector<3x8xf32>
    %274 = tpu.matmul %272, %273, %cst_113 {dimension_numbers = #tpu.dot_dimension_numbers<[1], [1], [0], [0], [0, 0, 1, 0], [], []>} : vector<3x8xf32>, vector<8x8xf32>, vector<3x8xf32> -> vector<3x8xf32>
    "tpu.trace_stop"() : () -> ()
    %cst_114 = arith.constant dense<0xFF800000> : vector<3xf32>
    %275 = vector.multi_reduction <maximumf>, %274, %cst_114 [1] : vector<3x8xf32> to vector<3xf32>
    %276 = vector.shape_cast %275 : vector<3xf32> to vector<3x1xf32>
    %277 = vector.broadcast %276 : vector<3x1xf32> to vector<3x8xf32>
    %278 = arith.subf %274, %277 : vector<3x8xf32>
    %279 = math.exp %278 : vector<3x8xf32>
    %cst_115 = arith.constant dense<0.000000e+00> : vector<3xf32>
    %280 = vector.multi_reduction <add>, %279, %cst_115 [1] : vector<3x8xf32> to vector<3xf32>
    %281 = vector.shape_cast %280 : vector<3xf32> to vector<3x1xf32>
    %282 = tpu.reciprocal %281 {approx = true} : vector<3x1xf32> -> vector<3x1xf32>
    %283 = vector.broadcast %282 : vector<3x1xf32> to vector<3x8xf32>
    %284 = arith.mulf %279, %283 : vector<3x8xf32>
    %285 = vector.extract_strided_slice %256 {offsets = [0, 8], sizes = [8, 8], strides = [1, 1]} : vector<8x32xf32> to vector<8x8xf32>
    %cst_116 = arith.constant dense<0.000000e+00> : vector<3x8xf32>
    %286 = tpu.matmul %284, %285, %cst_116 {dimension_numbers = #tpu.dot_dimension_numbers<[1], [0], [0], [1], [0, 0, 1, 1], [], []>} : vector<3x8xf32>, vector<8x8xf32>, vector<3x8xf32> -> vector<3x8xf32>
    %287 = vector.extract_strided_slice %251 {offsets = [0, 16], sizes = [3, 8], strides = [1, 1]} : vector<3x32xf32> to vector<3x8xf32>
    %288 = vector.extract_strided_slice %255 {offsets = [0, 16], sizes = [8, 8], strides = [1, 1]} : vector<8x32xf32> to vector<8x8xf32>
    "tpu.trace_start"() <{level = 10 : i32, message = "qd,kd->qk"}> : () -> ()
    %cst_117 = arith.constant dense<0.000000e+00> : vector<3x8xf32>
    %289 = tpu.matmul %287, %288, %cst_117 {dimension_numbers = #tpu.dot_dimension_numbers<[1], [1], [0], [0], [0, 0, 1, 0], [], []>} : vector<3x8xf32>, vector<8x8xf32>, vector<3x8xf32> -> vector<3x8xf32>
    "tpu.trace_stop"() : () -> ()
    %cst_118 = arith.constant dense<0xFF800000> : vector<3xf32>
    %290 = vector.multi_reduction <maximumf>, %289, %cst_118 [1] : vector<3x8xf32> to vector<3xf32>
    %291 = vector.shape_cast %290 : vector<3xf32> to vector<3x1xf32>
    %292 = vector.broadcast %291 : vector<3x1xf32> to vector<3x8xf32>
    %293 = arith.subf %289, %292 : vector<3x8xf32>
    %294 = math.exp %293 : vector<3x8xf32>
    %cst_119 = arith.constant dense<0.000000e+00> : vector<3xf32>
    %295 = vector.multi_reduction <add>, %294, %cst_119 [1] : vector<3x8xf32> to vector<3xf32>
    %296 = vector.shape_cast %295 : vector<3xf32> to vector<3x1xf32>
    %297 = tpu.reciprocal %296 {approx = true} : vector<3x1xf32> -> vector<3x1xf32>
    %298 = vector.broadcast %297 : vector<3x1xf32> to vector<3x8xf32>
    %299 = arith.mulf %294, %298 : vector<3x8xf32>
    %300 = vector.extract_strided_slice %256 {offsets = [0, 16], sizes = [8, 8], strides = [1, 1]} : vector<8x32xf32> to vector<8x8xf32>
    %cst_120 = arith.constant dense<0.000000e+00> : vector<3x8xf32>
    %301 = tpu.matmul %299, %300, %cst_120 {dimension_numbers = #tpu.dot_dimension_numbers<[1], [0], [0], [1], [0, 0, 1, 1], [], []>} : vector<3x8xf32>, vector<8x8xf32>, vector<3x8xf32> -> vector<3x8xf32>
    %302 = vector.extract_strided_slice %251 {offsets = [0, 24], sizes = [3, 8], strides = [1, 1]} : vector<3x32xf32> to vector<3x8xf32>
    %303 = vector.extract_strided_slice %255 {offsets = [0, 24], sizes = [8, 8], strides = [1, 1]} : vector<8x32xf32> to vector<8x8xf32>
    "tpu.trace_start"() <{level = 10 : i32, message = "qd,kd->qk"}> : () -> ()
    %cst_121 = arith.constant dense<0.000000e+00> : vector<3x8xf32>
    %304 = tpu.matmul %302, %303, %cst_121 {dimension_numbers = #tpu.dot_dimension_numbers<[1], [1], [0], [0], [0, 0, 1, 0], [], []>} : vector<3x8xf32>, vector<8x8xf32>, vector<3x8xf32> -> vector<3x8xf32>
    "tpu.trace_stop"() : () -> ()
    %cst_122 = arith.constant dense<0xFF800000> : vector<3xf32>
    %305 = vector.multi_reduction <maximumf>, %304, %cst_122 [1] : vector<3x8xf32> to vector<3xf32>
    %306 = vector.shape_cast %305 : vector<3xf32> to vector<3x1xf32>
    %307 = vector.broadcast %306 : vector<3x1xf32> to vector<3x8xf32>
    %308 = arith.subf %304, %307 : vector<3x8xf32>
    %309 = math.exp %308 : vector<3x8xf32>
    %cst_123 = arith.constant dense<0.000000e+00> : vector<3xf32>
    %310 = vector.multi_reduction <add>, %309, %cst_123 [1] : vector<3x8xf32> to vector<3xf32>
    %311 = vector.shape_cast %310 : vector<3xf32> to vector<3x1xf32>
    %312 = tpu.reciprocal %311 {approx = true} : vector<3x1xf32> -> vector<3x1xf32>
    %313 = vector.broadcast %312 : vector<3x1xf32> to vector<3x8xf32>
    %314 = arith.mulf %309, %313 : vector<3x8xf32>
    %315 = vector.extract_strided_slice %256 {offsets = [0, 24], sizes = [8, 8], strides = [1, 1]} : vector<8x32xf32> to vector<8x8xf32>
    %cst_124 = arith.constant dense<0.000000e+00> : vector<3x8xf32>
    %316 = tpu.matmul %314, %315, %cst_124 {dimension_numbers = #tpu.dot_dimension_numbers<[1], [0], [0], [1], [0, 0, 1, 1], [], []>} : vector<3x8xf32>, vector<8x8xf32>, vector<3x8xf32> -> vector<3x8xf32>
    %317 = tpu.concatenate %271, %286, %301, %316 in 1 : vector<3x8xf32>, vector<3x8xf32>, vector<3x8xf32>, vector<3x8xf32> -> vector<3x32xf32>
    %c0_125 = arith.constant 0 : index
    %c0_126 = arith.constant 0 : index
    %318 = vector.load %arg16[%c0_125, %c0_126] : memref<32x32xbf16, #tpu.memory_space<vmem>>, vector<32x32xbf16>
    %319 = arith.truncf %317 : vector<3x32xf32> to vector<3x32xbf16>
    %cst_127 = arith.constant dense<0.000000e+00> : vector<3x32xf32>
    %320 = tpu.matmul %319, %318, %cst_127 {dimension_numbers = #tpu.dot_dimension_numbers<[1], [0], [0], [1], [0, 0, 1, 1], [], []>} : vector<3x32xbf16>, vector<32x32xbf16>, vector<3x32xf32> -> vector<3x32xf32>
    %c0_128 = arith.constant 0 : index
    %c0_129 = arith.constant 0 : index
    %321 = vector.load %arg4[%c0_128, %c0_129] : memref<2x32xf32, #tpu.memory_space<vmem>>, vector<2x32xf32>
    %322 = vector.extract_strided_slice %321 {offsets = [0, 0], sizes = [1, 32], strides = [1, 1]} : vector<2x32xf32> to vector<1x32xf32>
    %323 = vector.broadcast %322 : vector<1x32xf32> to vector<8x32xf32>
    %324 = arith.addf %239, %323 : vector<8x32xf32>
    %325 = vector.extract_strided_slice %321 {offsets = [1, 0], sizes = [1, 32], strides = [1, 1]} : vector<2x32xf32> to vector<1x32xf32>
    %326 = vector.broadcast %325 : vector<1x32xf32> to vector<3x32xf32>
    %327 = arith.addf %320, %326 : vector<3x32xf32>
    %328 = tpu.concatenate %324, %327 in 0 : vector<8x32xf32>, vector<3x32xf32> -> vector<11x32xf32>
    %c0_130 = arith.constant 0 : index
    %c0_131 = arith.constant 0 : index
    %c0_132 = arith.constant 0 : index
    %329 = vector.load %arg5[%c0_130, %c0_131, %c0_132] : memref<2x1x32xf32, #tpu.memory_space<vmem>>, vector<1x1x32xf32>
    %330 = vector.shape_cast %329 : vector<1x1x32xf32> to vector<1x32xf32>
    %331 = arith.mulf %328, %328 : vector<11x32xf32>
    %cst_133 = arith.constant dense<0.000000e+00> : vector<11xf32>
    %332 = vector.multi_reduction <add>, %331, %cst_133 [1] : vector<11x32xf32> to vector<11xf32>
    %333 = vector.shape_cast %332 : vector<11xf32> to vector<11x1xf32>
    %cst_134 = arith.constant 3.200000e+01 : f32
    %334 = vector.broadcast %cst_134 : f32 to vector<11x1xf32>
    %335 = arith.divf %333, %334 : vector<11x1xf32>
    %cst_135 = arith.constant 9.99999997E-7 : f32
    %336 = vector.broadcast %cst_135 : f32 to vector<11x1xf32>
    %337 = arith.addf %335, %336 : vector<11x1xf32>
    %338 = math.rsqrt %337 : vector<11x1xf32>
    %339 = vector.broadcast %338 : vector<11x1xf32> to vector<11x32xf32>
    %340 = arith.mulf %328, %339 : vector<11x32xf32>
    %341 = vector.broadcast %330 : vector<1x32xf32> to vector<11x32xf32>
    %342 = arith.mulf %340, %341 : vector<11x32xf32>
    %c0_136 = arith.constant 0 : index
    %c0_137 = arith.constant 0 : index
    %c0_138 = arith.constant 0 : index
    %343 = vector.load %arg6[%c0_136, %c0_137, %c0_138] : memref<2x32x96xbf16, #tpu.memory_space<vmem>>, vector<1x32x96xbf16>
    %344 = vector.shape_cast %343 : vector<1x32x96xbf16> to vector<32x96xbf16>
    %345 = arith.truncf %342 : vector<11x32xf32> to vector<11x32xbf16>
    %cst_139 = arith.constant dense<0.000000e+00> : vector<11x96xf32>
    %346 = tpu.matmul %345, %344, %cst_139 {dimension_numbers = #tpu.dot_dimension_numbers<[1], [0], [0], [1], [0, 0, 1, 1], [], []>} : vector<11x32xbf16>, vector<32x96xbf16>, vector<11x96xf32> -> vector<11x96xf32>
    %347 = vector.extract_strided_slice %346 {offsets = [0, 0], sizes = [11, 32], strides = [1, 1]} : vector<11x96xf32> to vector<11x32xf32>
    %348 = vector.extract_strided_slice %346 {offsets = [0, 32], sizes = [11, 32], strides = [1, 1]} : vector<11x96xf32> to vector<11x32xf32>
    %349 = vector.extract_strided_slice %346 {offsets = [0, 64], sizes = [11, 32], strides = [1, 1]} : vector<11x96xf32> to vector<11x32xf32>
    %350 = vector.extract_strided_slice %347 {offsets = [0, 0], sizes = [11, 8], strides = [1, 1]} : vector<11x32xf32> to vector<11x8xf32>
    %351 = vector.extract_strided_slice %348 {offsets = [0, 0], sizes = [11, 8], strides = [1, 1]} : vector<11x32xf32> to vector<11x8xf32>
    "tpu.trace_start"() <{level = 10 : i32, message = "qd,kd->qk"}> : () -> ()
    %cst_140 = arith.constant dense<0.000000e+00> : vector<11x11xf32>
    %352 = tpu.matmul %350, %351, %cst_140 {dimension_numbers = #tpu.dot_dimension_numbers<[1], [1], [0], [0], [0, 0, 1, 0], [], []>} : vector<11x8xf32>, vector<11x8xf32>, vector<11x11xf32> -> vector<11x11xf32>
    "tpu.trace_stop"() : () -> ()
    %cst_141 = arith.constant dense<0xFF800000> : vector<11xf32>
    %353 = vector.multi_reduction <maximumf>, %352, %cst_141 [1] : vector<11x11xf32> to vector<11xf32>
    %354 = vector.shape_cast %353 : vector<11xf32> to vector<11x1xf32>
    %355 = vector.broadcast %354 : vector<11x1xf32> to vector<11x11xf32>
    %356 = arith.subf %352, %355 : vector<11x11xf32>
    %357 = math.exp %356 : vector<11x11xf32>
    %cst_142 = arith.constant dense<0.000000e+00> : vector<11xf32>
    %358 = vector.multi_reduction <add>, %357, %cst_142 [1] : vector<11x11xf32> to vector<11xf32>
    %359 = vector.shape_cast %358 : vector<11xf32> to vector<11x1xf32>
    %360 = tpu.reciprocal %359 {approx = true} : vector<11x1xf32> -> vector<11x1xf32>
    %361 = vector.broadcast %360 : vector<11x1xf32> to vector<11x11xf32>
    %362 = arith.mulf %357, %361 : vector<11x11xf32>
    %363 = vector.extract_strided_slice %349 {offsets = [0, 0], sizes = [11, 8], strides = [1, 1]} : vector<11x32xf32> to vector<11x8xf32>
    %cst_143 = arith.constant dense<0.000000e+00> : vector<11x8xf32>
    %364 = tpu.matmul %362, %363, %cst_143 {dimension_numbers = #tpu.dot_dimension_numbers<[1], [0], [0], [1], [0, 0, 1, 1], [], []>} : vector<11x11xf32>, vector<11x8xf32>, vector<11x8xf32> -> vector<11x8xf32>
    %365 = vector.extract_strided_slice %347 {offsets = [0, 8], sizes = [11, 8], strides = [1, 1]} : vector<11x32xf32> to vector<11x8xf32>
    %366 = vector.extract_strided_slice %348 {offsets = [0, 8], sizes = [11, 8], strides = [1, 1]} : vector<11x32xf32> to vector<11x8xf32>
    "tpu.trace_start"() <{level = 10 : i32, message = "qd,kd->qk"}> : () -> ()
    %cst_144 = arith.constant dense<0.000000e+00> : vector<11x11xf32>
    %367 = tpu.matmul %365, %366, %cst_144 {dimension_numbers = #tpu.dot_dimension_numbers<[1], [1], [0], [0], [0, 0, 1, 0], [], []>} : vector<11x8xf32>, vector<11x8xf32>, vector<11x11xf32> -> vector<11x11xf32>
    "tpu.trace_stop"() : () -> ()
    %cst_145 = arith.constant dense<0xFF800000> : vector<11xf32>
    %368 = vector.multi_reduction <maximumf>, %367, %cst_145 [1] : vector<11x11xf32> to vector<11xf32>
    %369 = vector.shape_cast %368 : vector<11xf32> to vector<11x1xf32>
    %370 = vector.broadcast %369 : vector<11x1xf32> to vector<11x11xf32>
    %371 = arith.subf %367, %370 : vector<11x11xf32>
    %372 = math.exp %371 : vector<11x11xf32>
    %cst_146 = arith.constant dense<0.000000e+00> : vector<11xf32>
    %373 = vector.multi_reduction <add>, %372, %cst_146 [1] : vector<11x11xf32> to vector<11xf32>
    %374 = vector.shape_cast %373 : vector<11xf32> to vector<11x1xf32>
    %375 = tpu.reciprocal %374 {approx = true} : vector<11x1xf32> -> vector<11x1xf32>
    %376 = vector.broadcast %375 : vector<11x1xf32> to vector<11x11xf32>
    %377 = arith.mulf %372, %376 : vector<11x11xf32>
    %378 = vector.extract_strided_slice %349 {offsets = [0, 8], sizes = [11, 8], strides = [1, 1]} : vector<11x32xf32> to vector<11x8xf32>
    %cst_147 = arith.constant dense<0.000000e+00> : vector<11x8xf32>
    %379 = tpu.matmul %377, %378, %cst_147 {dimension_numbers = #tpu.dot_dimension_numbers<[1], [0], [0], [1], [0, 0, 1, 1], [], []>} : vector<11x11xf32>, vector<11x8xf32>, vector<11x8xf32> -> vector<11x8xf32>
    %380 = vector.extract_strided_slice %347 {offsets = [0, 16], sizes = [11, 8], strides = [1, 1]} : vector<11x32xf32> to vector<11x8xf32>
    %381 = vector.extract_strided_slice %348 {offsets = [0, 16], sizes = [11, 8], strides = [1, 1]} : vector<11x32xf32> to vector<11x8xf32>
    "tpu.trace_start"() <{level = 10 : i32, message = "qd,kd->qk"}> : () -> ()
    %cst_148 = arith.constant dense<0.000000e+00> : vector<11x11xf32>
    %382 = tpu.matmul %380, %381, %cst_148 {dimension_numbers = #tpu.dot_dimension_numbers<[1], [1], [0], [0], [0, 0, 1, 0], [], []>} : vector<11x8xf32>, vector<11x8xf32>, vector<11x11xf32> -> vector<11x11xf32>
    "tpu.trace_stop"() : () -> ()
    %cst_149 = arith.constant dense<0xFF800000> : vector<11xf32>
    %383 = vector.multi_reduction <maximumf>, %382, %cst_149 [1] : vector<11x11xf32> to vector<11xf32>
    %384 = vector.shape_cast %383 : vector<11xf32> to vector<11x1xf32>
    %385 = vector.broadcast %384 : vector<11x1xf32> to vector<11x11xf32>
    %386 = arith.subf %382, %385 : vector<11x11xf32>
    %387 = math.exp %386 : vector<11x11xf32>
    %cst_150 = arith.constant dense<0.000000e+00> : vector<11xf32>
    %388 = vector.multi_reduction <add>, %387, %cst_150 [1] : vector<11x11xf32> to vector<11xf32>
    %389 = vector.shape_cast %388 : vector<11xf32> to vector<11x1xf32>
    %390 = tpu.reciprocal %389 {approx = true} : vector<11x1xf32> -> vector<11x1xf32>
    %391 = vector.broadcast %390 : vector<11x1xf32> to vector<11x11xf32>
    %392 = arith.mulf %387, %391 : vector<11x11xf32>
    %393 = vector.extract_strided_slice %349 {offsets = [0, 16], sizes = [11, 8], strides = [1, 1]} : vector<11x32xf32> to vector<11x8xf32>
    %cst_151 = arith.constant dense<0.000000e+00> : vector<11x8xf32>
    %394 = tpu.matmul %392, %393, %cst_151 {dimension_numbers = #tpu.dot_dimension_numbers<[1], [0], [0], [1], [0, 0, 1, 1], [], []>} : vector<11x11xf32>, vector<11x8xf32>, vector<11x8xf32> -> vector<11x8xf32>
    %395 = vector.extract_strided_slice %347 {offsets = [0, 24], sizes = [11, 8], strides = [1, 1]} : vector<11x32xf32> to vector<11x8xf32>
    %396 = vector.extract_strided_slice %348 {offsets = [0, 24], sizes = [11, 8], strides = [1, 1]} : vector<11x32xf32> to vector<11x8xf32>
    "tpu.trace_start"() <{level = 10 : i32, message = "qd,kd->qk"}> : () -> ()
    %cst_152 = arith.constant dense<0.000000e+00> : vector<11x11xf32>
    %397 = tpu.matmul %395, %396, %cst_152 {dimension_numbers = #tpu.dot_dimension_numbers<[1], [1], [0], [0], [0, 0, 1, 0], [], []>} : vector<11x8xf32>, vector<11x8xf32>, vector<11x11xf32> -> vector<11x11xf32>
    "tpu.trace_stop"() : () -> ()
    %cst_153 = arith.constant dense<0xFF800000> : vector<11xf32>
    %398 = vector.multi_reduction <maximumf>, %397, %cst_153 [1] : vector<11x11xf32> to vector<11xf32>
    %399 = vector.shape_cast %398 : vector<11xf32> to vector<11x1xf32>
    %400 = vector.broadcast %399 : vector<11x1xf32> to vector<11x11xf32>
    %401 = arith.subf %397, %400 : vector<11x11xf32>
    %402 = math.exp %401 : vector<11x11xf32>
    %cst_154 = arith.constant dense<0.000000e+00> : vector<11xf32>
    %403 = vector.multi_reduction <add>, %402, %cst_154 [1] : vector<11x11xf32> to vector<11xf32>
    %404 = vector.shape_cast %403 : vector<11xf32> to vector<11x1xf32>
    %405 = tpu.reciprocal %404 {approx = true} : vector<11x1xf32> -> vector<11x1xf32>
    %406 = vector.broadcast %405 : vector<11x1xf32> to vector<11x11xf32>
    %407 = arith.mulf %402, %406 : vector<11x11xf32>
    %408 = vector.extract_strided_slice %349 {offsets = [0, 24], sizes = [11, 8], strides = [1, 1]} : vector<11x32xf32> to vector<11x8xf32>
    %cst_155 = arith.constant dense<0.000000e+00> : vector<11x8xf32>
    %409 = tpu.matmul %407, %408, %cst_155 {dimension_numbers = #tpu.dot_dimension_numbers<[1], [0], [0], [1], [0, 0, 1, 1], [], []>} : vector<11x11xf32>, vector<11x8xf32>, vector<11x8xf32> -> vector<11x8xf32>
    %410 = tpu.concatenate %364, %379, %394, %409 in 1 : vector<11x8xf32>, vector<11x8xf32>, vector<11x8xf32>, vector<11x8xf32> -> vector<11x32xf32>
    %c0_156 = arith.constant 0 : index
    %c0_157 = arith.constant 0 : index
    %c0_158 = arith.constant 0 : index
    %411 = vector.load %arg7[%c0_156, %c0_157, %c0_158] : memref<2x32x32xbf16, #tpu.memory_space<vmem>>, vector<1x32x32xbf16>
    %412 = vector.shape_cast %411 : vector<1x32x32xbf16> to vector<32x32xbf16>
    %413 = arith.truncf %410 : vector<11x32xf32> to vector<11x32xbf16>
    %cst_159 = arith.constant dense<0.000000e+00> : vector<11x32xf32>
    %414 = tpu.matmul %413, %412, %cst_159 {dimension_numbers = #tpu.dot_dimension_numbers<[1], [0], [0], [1], [0, 0, 1, 1], [], []>} : vector<11x32xbf16>, vector<32x32xbf16>, vector<11x32xf32> -> vector<11x32xf32>
    %415 = arith.addf %328, %414 : vector<11x32xf32>
    %c0_160 = arith.constant 0 : index
    %c0_161 = arith.constant 0 : index
    %c0_162 = arith.constant 0 : index
    %416 = vector.load %arg8[%c0_160, %c0_161, %c0_162] : memref<2x1x32xf32, #tpu.memory_space<vmem>>, vector<1x1x32xf32>
    %417 = vector.shape_cast %416 : vector<1x1x32xf32> to vector<1x32xf32>
    %418 = arith.mulf %415, %415 : vector<11x32xf32>
    %cst_163 = arith.constant dense<0.000000e+00> : vector<11xf32>
    %419 = vector.multi_reduction <add>, %418, %cst_163 [1] : vector<11x32xf32> to vector<11xf32>
    %420 = vector.shape_cast %419 : vector<11xf32> to vector<11x1xf32>
    %cst_164 = arith.constant 3.200000e+01 : f32
    %421 = vector.broadcast %cst_164 : f32 to vector<11x1xf32>
    %422 = arith.divf %420, %421 : vector<11x1xf32>
    %cst_165 = arith.constant 9.99999997E-7 : f32
    %423 = vector.broadcast %cst_165 : f32 to vector<11x1xf32>
    %424 = arith.addf %422, %423 : vector<11x1xf32>
    %425 = math.rsqrt %424 : vector<11x1xf32>
    %426 = vector.broadcast %425 : vector<11x1xf32> to vector<11x32xf32>
    %427 = arith.mulf %415, %426 : vector<11x32xf32>
    %428 = vector.broadcast %417 : vector<1x32xf32> to vector<11x32xf32>
    %429 = arith.mulf %427, %428 : vector<11x32xf32>
    %c0_166 = arith.constant 0 : index
    %c0_167 = arith.constant 0 : index
    %c0_168 = arith.constant 0 : index
    %430 = vector.load %arg9[%c0_166, %c0_167, %c0_168] : memref<2x32x64xbf16, #tpu.memory_space<vmem>>, vector<1x32x64xbf16>
    %431 = vector.shape_cast %430 : vector<1x32x64xbf16> to vector<32x64xbf16>
    %432 = arith.truncf %429 : vector<11x32xf32> to vector<11x32xbf16>
    %cst_169 = arith.constant dense<0.000000e+00> : vector<11x64xf32>
    %433 = tpu.matmul %432, %431, %cst_169 {dimension_numbers = #tpu.dot_dimension_numbers<[1], [0], [0], [1], [0, 0, 1, 1], [], []>} : vector<11x32xbf16>, vector<32x64xbf16>, vector<11x64xf32> -> vector<11x64xf32>
    %cst_170 = arith.constant 0.000000e+00 : f32
    %434 = vector.broadcast %cst_170 : f32 to vector<11x64xf32>
    %435 = arith.maximumf %433, %434 : vector<11x64xf32>
    %c0_171 = arith.constant 0 : index
    %c0_172 = arith.constant 0 : index
    %c0_173 = arith.constant 0 : index
    %436 = vector.load %arg10[%c0_171, %c0_172, %c0_173] : memref<2x64x32xbf16, #tpu.memory_space<vmem>>, vector<1x64x32xbf16>
    %437 = vector.shape_cast %436 : vector<1x64x32xbf16> to vector<64x32xbf16>
    %438 = arith.truncf %435 : vector<11x64xf32> to vector<11x64xbf16>
    %cst_174 = arith.constant dense<0.000000e+00> : vector<11x32xf32>
    %439 = tpu.matmul %438, %437, %cst_174 {dimension_numbers = #tpu.dot_dimension_numbers<[1], [0], [0], [1], [0, 0, 1, 1], [], []>} : vector<11x64xbf16>, vector<64x32xbf16>, vector<11x32xf32> -> vector<11x32xf32>
    %440 = arith.addf %415, %439 : vector<11x32xf32>
    %c1_175 = arith.constant 1 : index
    %c0_176 = arith.constant 0 : index
    %c0_177 = arith.constant 0 : index
    %441 = vector.load %arg5[%c1_175, %c0_176, %c0_177] : memref<2x1x32xf32, #tpu.memory_space<vmem>>, vector<1x1x32xf32>
    %442 = vector.shape_cast %441 : vector<1x1x32xf32> to vector<1x32xf32>
    %443 = arith.mulf %440, %440 : vector<11x32xf32>
    %cst_178 = arith.constant dense<0.000000e+00> : vector<11xf32>
    %444 = vector.multi_reduction <add>, %443, %cst_178 [1] : vector<11x32xf32> to vector<11xf32>
    %445 = vector.shape_cast %444 : vector<11xf32> to vector<11x1xf32>
    %cst_179 = arith.constant 3.200000e+01 : f32
    %446 = vector.broadcast %cst_179 : f32 to vector<11x1xf32>
    %447 = arith.divf %445, %446 : vector<11x1xf32>
    %cst_180 = arith.constant 9.99999997E-7 : f32
    %448 = vector.broadcast %cst_180 : f32 to vector<11x1xf32>
    %449 = arith.addf %447, %448 : vector<11x1xf32>
    %450 = math.rsqrt %449 : vector<11x1xf32>
    %451 = vector.broadcast %450 : vector<11x1xf32> to vector<11x32xf32>
    %452 = arith.mulf %440, %451 : vector<11x32xf32>
    %453 = vector.broadcast %442 : vector<1x32xf32> to vector<11x32xf32>
    %454 = arith.mulf %452, %453 : vector<11x32xf32>
    %c1_181 = arith.constant 1 : index
    %c0_182 = arith.constant 0 : index
    %c0_183 = arith.constant 0 : index
    %455 = vector.load %arg6[%c1_181, %c0_182, %c0_183] : memref<2x32x96xbf16, #tpu.memory_space<vmem>>, vector<1x32x96xbf16>
    %456 = vector.shape_cast %455 : vector<1x32x96xbf16> to vector<32x96xbf16>
    %457 = arith.truncf %454 : vector<11x32xf32> to vector<11x32xbf16>
    %cst_184 = arith.constant dense<0.000000e+00> : vector<11x96xf32>
    %458 = tpu.matmul %457, %456, %cst_184 {dimension_numbers = #tpu.dot_dimension_numbers<[1], [0], [0], [1], [0, 0, 1, 1], [], []>} : vector<11x32xbf16>, vector<32x96xbf16>, vector<11x96xf32> -> vector<11x96xf32>
    %459 = vector.extract_strided_slice %458 {offsets = [0, 0], sizes = [11, 32], strides = [1, 1]} : vector<11x96xf32> to vector<11x32xf32>
    %460 = vector.extract_strided_slice %458 {offsets = [0, 32], sizes = [11, 32], strides = [1, 1]} : vector<11x96xf32> to vector<11x32xf32>
    %461 = vector.extract_strided_slice %458 {offsets = [0, 64], sizes = [11, 32], strides = [1, 1]} : vector<11x96xf32> to vector<11x32xf32>
    %462 = vector.extract_strided_slice %459 {offsets = [0, 0], sizes = [11, 8], strides = [1, 1]} : vector<11x32xf32> to vector<11x8xf32>
    %463 = vector.extract_strided_slice %460 {offsets = [0, 0], sizes = [11, 8], strides = [1, 1]} : vector<11x32xf32> to vector<11x8xf32>
    "tpu.trace_start"() <{level = 10 : i32, message = "qd,kd->qk"}> : () -> ()
    %cst_185 = arith.constant dense<0.000000e+00> : vector<11x11xf32>
    %464 = tpu.matmul %462, %463, %cst_185 {dimension_numbers = #tpu.dot_dimension_numbers<[1], [1], [0], [0], [0, 0, 1, 0], [], []>} : vector<11x8xf32>, vector<11x8xf32>, vector<11x11xf32> -> vector<11x11xf32>
    "tpu.trace_stop"() : () -> ()
    %cst_186 = arith.constant dense<0xFF800000> : vector<11xf32>
    %465 = vector.multi_reduction <maximumf>, %464, %cst_186 [1] : vector<11x11xf32> to vector<11xf32>
    %466 = vector.shape_cast %465 : vector<11xf32> to vector<11x1xf32>
    %467 = vector.broadcast %466 : vector<11x1xf32> to vector<11x11xf32>
    %468 = arith.subf %464, %467 : vector<11x11xf32>
    %469 = math.exp %468 : vector<11x11xf32>
    %cst_187 = arith.constant dense<0.000000e+00> : vector<11xf32>
    %470 = vector.multi_reduction <add>, %469, %cst_187 [1] : vector<11x11xf32> to vector<11xf32>
    %471 = vector.shape_cast %470 : vector<11xf32> to vector<11x1xf32>
    %472 = tpu.reciprocal %471 {approx = true} : vector<11x1xf32> -> vector<11x1xf32>
    %473 = vector.broadcast %472 : vector<11x1xf32> to vector<11x11xf32>
    %474 = arith.mulf %469, %473 : vector<11x11xf32>
    %475 = vector.extract_strided_slice %461 {offsets = [0, 0], sizes = [11, 8], strides = [1, 1]} : vector<11x32xf32> to vector<11x8xf32>
    %cst_188 = arith.constant dense<0.000000e+00> : vector<11x8xf32>
    %476 = tpu.matmul %474, %475, %cst_188 {dimension_numbers = #tpu.dot_dimension_numbers<[1], [0], [0], [1], [0, 0, 1, 1], [], []>} : vector<11x11xf32>, vector<11x8xf32>, vector<11x8xf32> -> vector<11x8xf32>
    %477 = vector.extract_strided_slice %459 {offsets = [0, 8], sizes = [11, 8], strides = [1, 1]} : vector<11x32xf32> to vector<11x8xf32>
    %478 = vector.extract_strided_slice %460 {offsets = [0, 8], sizes = [11, 8], strides = [1, 1]} : vector<11x32xf32> to vector<11x8xf32>
    "tpu.trace_start"() <{level = 10 : i32, message = "qd,kd->qk"}> : () -> ()
    %cst_189 = arith.constant dense<0.000000e+00> : vector<11x11xf32>
    %479 = tpu.matmul %477, %478, %cst_189 {dimension_numbers = #tpu.dot_dimension_numbers<[1], [1], [0], [0], [0, 0, 1, 0], [], []>} : vector<11x8xf32>, vector<11x8xf32>, vector<11x11xf32> -> vector<11x11xf32>
    "tpu.trace_stop"() : () -> ()
    %cst_190 = arith.constant dense<0xFF800000> : vector<11xf32>
    %480 = vector.multi_reduction <maximumf>, %479, %cst_190 [1] : vector<11x11xf32> to vector<11xf32>
    %481 = vector.shape_cast %480 : vector<11xf32> to vector<11x1xf32>
    %482 = vector.broadcast %481 : vector<11x1xf32> to vector<11x11xf32>
    %483 = arith.subf %479, %482 : vector<11x11xf32>
    %484 = math.exp %483 : vector<11x11xf32>
    %cst_191 = arith.constant dense<0.000000e+00> : vector<11xf32>
    %485 = vector.multi_reduction <add>, %484, %cst_191 [1] : vector<11x11xf32> to vector<11xf32>
    %486 = vector.shape_cast %485 : vector<11xf32> to vector<11x1xf32>
    %487 = tpu.reciprocal %486 {approx = true} : vector<11x1xf32> -> vector<11x1xf32>
    %488 = vector.broadcast %487 : vector<11x1xf32> to vector<11x11xf32>
    %489 = arith.mulf %484, %488 : vector<11x11xf32>
    %490 = vector.extract_strided_slice %461 {offsets = [0, 8], sizes = [11, 8], strides = [1, 1]} : vector<11x32xf32> to vector<11x8xf32>
    %cst_192 = arith.constant dense<0.000000e+00> : vector<11x8xf32>
    %491 = tpu.matmul %489, %490, %cst_192 {dimension_numbers = #tpu.dot_dimension_numbers<[1], [0], [0], [1], [0, 0, 1, 1], [], []>} : vector<11x11xf32>, vector<11x8xf32>, vector<11x8xf32> -> vector<11x8xf32>
    %492 = vector.extract_strided_slice %459 {offsets = [0, 16], sizes = [11, 8], strides = [1, 1]} : vector<11x32xf32> to vector<11x8xf32>
    %493 = vector.extract_strided_slice %460 {offsets = [0, 16], sizes = [11, 8], strides = [1, 1]} : vector<11x32xf32> to vector<11x8xf32>
    "tpu.trace_start"() <{level = 10 : i32, message = "qd,kd->qk"}> : () -> ()
    %cst_193 = arith.constant dense<0.000000e+00> : vector<11x11xf32>
    %494 = tpu.matmul %492, %493, %cst_193 {dimension_numbers = #tpu.dot_dimension_numbers<[1], [1], [0], [0], [0, 0, 1, 0], [], []>} : vector<11x8xf32>, vector<11x8xf32>, vector<11x11xf32> -> vector<11x11xf32>
    "tpu.trace_stop"() : () -> ()
    %cst_194 = arith.constant dense<0xFF800000> : vector<11xf32>
    %495 = vector.multi_reduction <maximumf>, %494, %cst_194 [1] : vector<11x11xf32> to vector<11xf32>
    %496 = vector.shape_cast %495 : vector<11xf32> to vector<11x1xf32>
    %497 = vector.broadcast %496 : vector<11x1xf32> to vector<11x11xf32>
    %498 = arith.subf %494, %497 : vector<11x11xf32>
    %499 = math.exp %498 : vector<11x11xf32>
    %cst_195 = arith.constant dense<0.000000e+00> : vector<11xf32>
    %500 = vector.multi_reduction <add>, %499, %cst_195 [1] : vector<11x11xf32> to vector<11xf32>
    %501 = vector.shape_cast %500 : vector<11xf32> to vector<11x1xf32>
    %502 = tpu.reciprocal %501 {approx = true} : vector<11x1xf32> -> vector<11x1xf32>
    %503 = vector.broadcast %502 : vector<11x1xf32> to vector<11x11xf32>
    %504 = arith.mulf %499, %503 : vector<11x11xf32>
    %505 = vector.extract_strided_slice %461 {offsets = [0, 16], sizes = [11, 8], strides = [1, 1]} : vector<11x32xf32> to vector<11x8xf32>
    %cst_196 = arith.constant dense<0.000000e+00> : vector<11x8xf32>
    %506 = tpu.matmul %504, %505, %cst_196 {dimension_numbers = #tpu.dot_dimension_numbers<[1], [0], [0], [1], [0, 0, 1, 1], [], []>} : vector<11x11xf32>, vector<11x8xf32>, vector<11x8xf32> -> vector<11x8xf32>
    %507 = vector.extract_strided_slice %459 {offsets = [0, 24], sizes = [11, 8], strides = [1, 1]} : vector<11x32xf32> to vector<11x8xf32>
    %508 = vector.extract_strided_slice %460 {offsets = [0, 24], sizes = [11, 8], strides = [1, 1]} : vector<11x32xf32> to vector<11x8xf32>
    "tpu.trace_start"() <{level = 10 : i32, message = "qd,kd->qk"}> : () -> ()
    %cst_197 = arith.constant dense<0.000000e+00> : vector<11x11xf32>
    %509 = tpu.matmul %507, %508, %cst_197 {dimension_numbers = #tpu.dot_dimension_numbers<[1], [1], [0], [0], [0, 0, 1, 0], [], []>} : vector<11x8xf32>, vector<11x8xf32>, vector<11x11xf32> -> vector<11x11xf32>
    "tpu.trace_stop"() : () -> ()
    %cst_198 = arith.constant dense<0xFF800000> : vector<11xf32>
    %510 = vector.multi_reduction <maximumf>, %509, %cst_198 [1] : vector<11x11xf32> to vector<11xf32>
    %511 = vector.shape_cast %510 : vector<11xf32> to vector<11x1xf32>
    %512 = vector.broadcast %511 : vector<11x1xf32> to vector<11x11xf32>
    %513 = arith.subf %509, %512 : vector<11x11xf32>
    %514 = math.exp %513 : vector<11x11xf32>
    %cst_199 = arith.constant dense<0.000000e+00> : vector<11xf32>
    %515 = vector.multi_reduction <add>, %514, %cst_199 [1] : vector<11x11xf32> to vector<11xf32>
    %516 = vector.shape_cast %515 : vector<11xf32> to vector<11x1xf32>
    %517 = tpu.reciprocal %516 {approx = true} : vector<11x1xf32> -> vector<11x1xf32>
    %518 = vector.broadcast %517 : vector<11x1xf32> to vector<11x11xf32>
    %519 = arith.mulf %514, %518 : vector<11x11xf32>
    %520 = vector.extract_strided_slice %461 {offsets = [0, 24], sizes = [11, 8], strides = [1, 1]} : vector<11x32xf32> to vector<11x8xf32>
    %cst_200 = arith.constant dense<0.000000e+00> : vector<11x8xf32>
    %521 = tpu.matmul %519, %520, %cst_200 {dimension_numbers = #tpu.dot_dimension_numbers<[1], [0], [0], [1], [0, 0, 1, 1], [], []>} : vector<11x11xf32>, vector<11x8xf32>, vector<11x8xf32> -> vector<11x8xf32>
    %522 = tpu.concatenate %476, %491, %506, %521 in 1 : vector<11x8xf32>, vector<11x8xf32>, vector<11x8xf32>, vector<11x8xf32> -> vector<11x32xf32>
    %c1_201 = arith.constant 1 : index
    %c0_202 = arith.constant 0 : index
    %c0_203 = arith.constant 0 : index
    %523 = vector.load %arg7[%c1_201, %c0_202, %c0_203] : memref<2x32x32xbf16, #tpu.memory_space<vmem>>, vector<1x32x32xbf16>
    %524 = vector.shape_cast %523 : vector<1x32x32xbf16> to vector<32x32xbf16>
    %525 = arith.truncf %522 : vector<11x32xf32> to vector<11x32xbf16>
    %cst_204 = arith.constant dense<0.000000e+00> : vector<11x32xf32>
    %526 = tpu.matmul %525, %524, %cst_204 {dimension_numbers = #tpu.dot_dimension_numbers<[1], [0], [0], [1], [0, 0, 1, 1], [], []>} : vector<11x32xbf16>, vector<32x32xbf16>, vector<11x32xf32> -> vector<11x32xf32>
    %527 = arith.addf %440, %526 : vector<11x32xf32>
    %c1_205 = arith.constant 1 : index
    %c0_206 = arith.constant 0 : index
    %c0_207 = arith.constant 0 : index
    %528 = vector.load %arg8[%c1_205, %c0_206, %c0_207] : memref<2x1x32xf32, #tpu.memory_space<vmem>>, vector<1x1x32xf32>
    %529 = vector.shape_cast %528 : vector<1x1x32xf32> to vector<1x32xf32>
    %530 = arith.mulf %527, %527 : vector<11x32xf32>
    %cst_208 = arith.constant dense<0.000000e+00> : vector<11xf32>
    %531 = vector.multi_reduction <add>, %530, %cst_208 [1] : vector<11x32xf32> to vector<11xf32>
    %532 = vector.shape_cast %531 : vector<11xf32> to vector<11x1xf32>
    %cst_209 = arith.constant 3.200000e+01 : f32
    %533 = vector.broadcast %cst_209 : f32 to vector<11x1xf32>
    %534 = arith.divf %532, %533 : vector<11x1xf32>
    %cst_210 = arith.constant 9.99999997E-7 : f32
    %535 = vector.broadcast %cst_210 : f32 to vector<11x1xf32>
    %536 = arith.addf %534, %535 : vector<11x1xf32>
    %537 = math.rsqrt %536 : vector<11x1xf32>
    %538 = vector.broadcast %537 : vector<11x1xf32> to vector<11x32xf32>
    %539 = arith.mulf %527, %538 : vector<11x32xf32>
    %540 = vector.broadcast %529 : vector<1x32xf32> to vector<11x32xf32>
    %541 = arith.mulf %539, %540 : vector<11x32xf32>
    %c1_211 = arith.constant 1 : index
    %c0_212 = arith.constant 0 : index
    %c0_213 = arith.constant 0 : index
    %542 = vector.load %arg9[%c1_211, %c0_212, %c0_213] : memref<2x32x64xbf16, #tpu.memory_space<vmem>>, vector<1x32x64xbf16>
    %543 = vector.shape_cast %542 : vector<1x32x64xbf16> to vector<32x64xbf16>
    %544 = arith.truncf %541 : vector<11x32xf32> to vector<11x32xbf16>
    %cst_214 = arith.constant dense<0.000000e+00> : vector<11x64xf32>
    %545 = tpu.matmul %544, %543, %cst_214 {dimension_numbers = #tpu.dot_dimension_numbers<[1], [0], [0], [1], [0, 0, 1, 1], [], []>} : vector<11x32xbf16>, vector<32x64xbf16>, vector<11x64xf32> -> vector<11x64xf32>
    %cst_215 = arith.constant 0.000000e+00 : f32
    %546 = vector.broadcast %cst_215 : f32 to vector<11x64xf32>
    %547 = arith.maximumf %545, %546 : vector<11x64xf32>
    %c1_216 = arith.constant 1 : index
    %c0_217 = arith.constant 0 : index
    %c0_218 = arith.constant 0 : index
    %548 = vector.load %arg10[%c1_216, %c0_217, %c0_218] : memref<2x64x32xbf16, #tpu.memory_space<vmem>>, vector<1x64x32xbf16>
    %549 = vector.shape_cast %548 : vector<1x64x32xbf16> to vector<64x32xbf16>
    %550 = arith.truncf %547 : vector<11x64xf32> to vector<11x64xbf16>
    %cst_219 = arith.constant dense<0.000000e+00> : vector<11x32xf32>
    %551 = tpu.matmul %550, %549, %cst_219 {dimension_numbers = #tpu.dot_dimension_numbers<[1], [0], [0], [1], [0, 0, 1, 1], [], []>} : vector<11x64xbf16>, vector<64x32xbf16>, vector<11x32xf32> -> vector<11x32xf32>
    %552 = arith.addf %527, %551 : vector<11x32xf32>
    %c0_220 = arith.constant 0 : index
    %c0_221 = arith.constant 0 : index
    %553 = vector.load %arg11[%c0_220, %c0_221] : memref<1x32xf32, #tpu.memory_space<vmem>>, vector<1x32xf32>
    %554 = arith.mulf %552, %552 : vector<11x32xf32>
    %cst_222 = arith.constant dense<0.000000e+00> : vector<11xf32>
    %555 = vector.multi_reduction <add>, %554, %cst_222 [1] : vector<11x32xf32> to vector<11xf32>
    %556 = vector.shape_cast %555 : vector<11xf32> to vector<11x1xf32>
    %cst_223 = arith.constant 3.200000e+01 : f32
    %557 = vector.broadcast %cst_223 : f32 to vector<11x1xf32>
    %558 = arith.divf %556, %557 : vector<11x1xf32>
    %cst_224 = arith.constant 9.99999997E-7 : f32
    %559 = vector.broadcast %cst_224 : f32 to vector<11x1xf32>
    %560 = arith.addf %558, %559 : vector<11x1xf32>
    %561 = math.rsqrt %560 : vector<11x1xf32>
    %562 = vector.broadcast %561 : vector<11x1xf32> to vector<11x32xf32>
    %563 = arith.mulf %552, %562 : vector<11x32xf32>
    %564 = vector.broadcast %553 : vector<1x32xf32> to vector<11x32xf32>
    %565 = arith.mulf %563, %564 : vector<11x32xf32>
    %c0_225 = arith.constant 0 : index
    %c0_226 = arith.constant 0 : index
    %c0_227 = arith.constant 0 : index
    %566 = vector.load %arg3[%c0_225, %c0_226, %c0_227] : memref<1x4x32xf32, #tpu.memory_space<vmem>>, vector<1x4x32xf32>
    %567 = vector.shape_cast %566 : vector<1x4x32xf32> to vector<4x32xf32>
    %c0_228 = arith.constant 0 : index
    %c0_229 = arith.constant 0 : index
    %c0_230 = arith.constant 0 : index
    %568 = vector.load %arg17[%c0_228, %c0_229, %c0_230] : memref<2x1x32xf32, #tpu.memory_space<vmem>>, vector<1x1x32xf32>
    %569 = vector.shape_cast %568 : vector<1x1x32xf32> to vector<1x32xf32>
    %570 = arith.mulf %567, %567 : vector<4x32xf32>
    %cst_231 = arith.constant dense<0.000000e+00> : vector<4xf32>
    %571 = vector.multi_reduction <add>, %570, %cst_231 [1] : vector<4x32xf32> to vector<4xf32>
    %572 = vector.shape_cast %571 : vector<4xf32> to vector<4x1xf32>
    %cst_232 = arith.constant 3.200000e+01 : f32
    %573 = vector.broadcast %cst_232 : f32 to vector<4x1xf32>
    %574 = arith.divf %572, %573 : vector<4x1xf32>
    %cst_233 = arith.constant 9.99999997E-7 : f32
    %575 = vector.broadcast %cst_233 : f32 to vector<4x1xf32>
    %576 = arith.addf %574, %575 : vector<4x1xf32>
    %577 = math.rsqrt %576 : vector<4x1xf32>
    %578 = vector.broadcast %577 : vector<4x1xf32> to vector<4x32xf32>
    %579 = arith.mulf %567, %578 : vector<4x32xf32>
    %580 = vector.broadcast %569 : vector<1x32xf32> to vector<4x32xf32>
    %581 = arith.mulf %579, %580 : vector<4x32xf32>
    %c0_234 = arith.constant 0 : index
    %c0_235 = arith.constant 0 : index
    %c0_236 = arith.constant 0 : index
    %582 = vector.load %arg18[%c0_234, %c0_235, %c0_236] : memref<2x32x96xbf16, #tpu.memory_space<vmem>>, vector<1x32x96xbf16>
    %583 = vector.shape_cast %582 : vector<1x32x96xbf16> to vector<32x96xbf16>
    %584 = arith.truncf %581 : vector<4x32xf32> to vector<4x32xbf16>
    %cst_237 = arith.constant dense<0.000000e+00> : vector<4x96xf32>
    %585 = tpu.matmul %584, %583, %cst_237 {dimension_numbers = #tpu.dot_dimension_numbers<[1], [0], [0], [1], [0, 0, 1, 1], [], []>} : vector<4x32xbf16>, vector<32x96xbf16>, vector<4x96xf32> -> vector<4x96xf32>
    %586 = vector.extract_strided_slice %585 {offsets = [0, 0], sizes = [4, 32], strides = [1, 1]} : vector<4x96xf32> to vector<4x32xf32>
    %587 = vector.extract_strided_slice %585 {offsets = [0, 32], sizes = [4, 32], strides = [1, 1]} : vector<4x96xf32> to vector<4x32xf32>
    %588 = vector.extract_strided_slice %585 {offsets = [0, 64], sizes = [4, 32], strides = [1, 1]} : vector<4x96xf32> to vector<4x32xf32>
    %589 = tpu.iota {dimensions = array<i32: 0>} : vector<4x4xi32>
    %590 = tpu.iota {dimensions = array<i32: 1>} : vector<4x4xi32>
    %591 = arith.cmpi sle, %590, %589 : vector<4x4xi32>
    %592 = vector.extract_strided_slice %586 {offsets = [0, 0], sizes = [4, 8], strides = [1, 1]} : vector<4x32xf32> to vector<4x8xf32>
    %593 = vector.extract_strided_slice %587 {offsets = [0, 0], sizes = [4, 8], strides = [1, 1]} : vector<4x32xf32> to vector<4x8xf32>
    "tpu.trace_start"() <{level = 10 : i32, message = "qd,kd->qk"}> : () -> ()
    %cst_238 = arith.constant dense<0.000000e+00> : vector<4x4xf32>
    %594 = tpu.matmul %592, %593, %cst_238 {dimension_numbers = #tpu.dot_dimension_numbers<[1], [1], [0], [0], [0, 0, 1, 0], [], []>} : vector<4x8xf32>, vector<4x8xf32>, vector<4x4xf32> -> vector<4x4xf32>
    %cst_239 = arith.constant -1.000000e+09 : f32
    "tpu.trace_stop"() : () -> ()
    %595 = vector.broadcast %cst_239 : f32 to vector<4x4xf32>
    %596 = arith.select %591, %594, %595 : vector<4x4xi1>, vector<4x4xf32>
    %cst_240 = arith.constant dense<0xFF800000> : vector<4xf32>
    %597 = vector.multi_reduction <maximumf>, %596, %cst_240 [1] : vector<4x4xf32> to vector<4xf32>
    %598 = vector.shape_cast %597 : vector<4xf32> to vector<4x1xf32>
    %599 = vector.broadcast %598 : vector<4x1xf32> to vector<4x4xf32>
    %600 = arith.subf %596, %599 : vector<4x4xf32>
    %601 = math.exp %600 : vector<4x4xf32>
    %cst_241 = arith.constant dense<0.000000e+00> : vector<4xf32>
    %602 = vector.multi_reduction <add>, %601, %cst_241 [1] : vector<4x4xf32> to vector<4xf32>
    %603 = vector.shape_cast %602 : vector<4xf32> to vector<4x1xf32>
    %604 = tpu.reciprocal %603 {approx = true} : vector<4x1xf32> -> vector<4x1xf32>
    %605 = vector.broadcast %604 : vector<4x1xf32> to vector<4x4xf32>
    %606 = arith.mulf %601, %605 : vector<4x4xf32>
    %607 = vector.extract_strided_slice %588 {offsets = [0, 0], sizes = [4, 8], strides = [1, 1]} : vector<4x32xf32> to vector<4x8xf32>
    %cst_242 = arith.constant dense<0.000000e+00> : vector<4x8xf32>
    %608 = tpu.matmul %606, %607, %cst_242 {dimension_numbers = #tpu.dot_dimension_numbers<[1], [0], [0], [1], [0, 0, 1, 1], [], []>} : vector<4x4xf32>, vector<4x8xf32>, vector<4x8xf32> -> vector<4x8xf32>
    %609 = vector.extract_strided_slice %586 {offsets = [0, 8], sizes = [4, 8], strides = [1, 1]} : vector<4x32xf32> to vector<4x8xf32>
    %610 = vector.extract_strided_slice %587 {offsets = [0, 8], sizes = [4, 8], strides = [1, 1]} : vector<4x32xf32> to vector<4x8xf32>
    "tpu.trace_start"() <{level = 10 : i32, message = "qd,kd->qk"}> : () -> ()
    %cst_243 = arith.constant dense<0.000000e+00> : vector<4x4xf32>
    %611 = tpu.matmul %609, %610, %cst_243 {dimension_numbers = #tpu.dot_dimension_numbers<[1], [1], [0], [0], [0, 0, 1, 0], [], []>} : vector<4x8xf32>, vector<4x8xf32>, vector<4x4xf32> -> vector<4x4xf32>
    %cst_244 = arith.constant -1.000000e+09 : f32
    "tpu.trace_stop"() : () -> ()
    %612 = vector.broadcast %cst_244 : f32 to vector<4x4xf32>
    %613 = arith.select %591, %611, %612 : vector<4x4xi1>, vector<4x4xf32>
    %cst_245 = arith.constant dense<0xFF800000> : vector<4xf32>
    %614 = vector.multi_reduction <maximumf>, %613, %cst_245 [1] : vector<4x4xf32> to vector<4xf32>
    %615 = vector.shape_cast %614 : vector<4xf32> to vector<4x1xf32>
    %616 = vector.broadcast %615 : vector<4x1xf32> to vector<4x4xf32>
    %617 = arith.subf %613, %616 : vector<4x4xf32>
    %618 = math.exp %617 : vector<4x4xf32>
    %cst_246 = arith.constant dense<0.000000e+00> : vector<4xf32>
    %619 = vector.multi_reduction <add>, %618, %cst_246 [1] : vector<4x4xf32> to vector<4xf32>
    %620 = vector.shape_cast %619 : vector<4xf32> to vector<4x1xf32>
    %621 = tpu.reciprocal %620 {approx = true} : vector<4x1xf32> -> vector<4x1xf32>
    %622 = vector.broadcast %621 : vector<4x1xf32> to vector<4x4xf32>
    %623 = arith.mulf %618, %622 : vector<4x4xf32>
    %624 = vector.extract_strided_slice %588 {offsets = [0, 8], sizes = [4, 8], strides = [1, 1]} : vector<4x32xf32> to vector<4x8xf32>
    %cst_247 = arith.constant dense<0.000000e+00> : vector<4x8xf32>
    %625 = tpu.matmul %623, %624, %cst_247 {dimension_numbers = #tpu.dot_dimension_numbers<[1], [0], [0], [1], [0, 0, 1, 1], [], []>} : vector<4x4xf32>, vector<4x8xf32>, vector<4x8xf32> -> vector<4x8xf32>
    %626 = vector.extract_strided_slice %586 {offsets = [0, 16], sizes = [4, 8], strides = [1, 1]} : vector<4x32xf32> to vector<4x8xf32>
    %627 = vector.extract_strided_slice %587 {offsets = [0, 16], sizes = [4, 8], strides = [1, 1]} : vector<4x32xf32> to vector<4x8xf32>
    "tpu.trace_start"() <{level = 10 : i32, message = "qd,kd->qk"}> : () -> ()
    %cst_248 = arith.constant dense<0.000000e+00> : vector<4x4xf32>
    %628 = tpu.matmul %626, %627, %cst_248 {dimension_numbers = #tpu.dot_dimension_numbers<[1], [1], [0], [0], [0, 0, 1, 0], [], []>} : vector<4x8xf32>, vector<4x8xf32>, vector<4x4xf32> -> vector<4x4xf32>
    %cst_249 = arith.constant -1.000000e+09 : f32
    "tpu.trace_stop"() : () -> ()
    %629 = vector.broadcast %cst_249 : f32 to vector<4x4xf32>
    %630 = arith.select %591, %628, %629 : vector<4x4xi1>, vector<4x4xf32>
    %cst_250 = arith.constant dense<0xFF800000> : vector<4xf32>
    %631 = vector.multi_reduction <maximumf>, %630, %cst_250 [1] : vector<4x4xf32> to vector<4xf32>
    %632 = vector.shape_cast %631 : vector<4xf32> to vector<4x1xf32>
    %633 = vector.broadcast %632 : vector<4x1xf32> to vector<4x4xf32>
    %634 = arith.subf %630, %633 : vector<4x4xf32>
    %635 = math.exp %634 : vector<4x4xf32>
    %cst_251 = arith.constant dense<0.000000e+00> : vector<4xf32>
    %636 = vector.multi_reduction <add>, %635, %cst_251 [1] : vector<4x4xf32> to vector<4xf32>
    %637 = vector.shape_cast %636 : vector<4xf32> to vector<4x1xf32>
    %638 = tpu.reciprocal %637 {approx = true} : vector<4x1xf32> -> vector<4x1xf32>
    %639 = vector.broadcast %638 : vector<4x1xf32> to vector<4x4xf32>
    %640 = arith.mulf %635, %639 : vector<4x4xf32>
    %641 = vector.extract_strided_slice %588 {offsets = [0, 16], sizes = [4, 8], strides = [1, 1]} : vector<4x32xf32> to vector<4x8xf32>
    %cst_252 = arith.constant dense<0.000000e+00> : vector<4x8xf32>
    %642 = tpu.matmul %640, %641, %cst_252 {dimension_numbers = #tpu.dot_dimension_numbers<[1], [0], [0], [1], [0, 0, 1, 1], [], []>} : vector<4x4xf32>, vector<4x8xf32>, vector<4x8xf32> -> vector<4x8xf32>
    %643 = vector.extract_strided_slice %586 {offsets = [0, 24], sizes = [4, 8], strides = [1, 1]} : vector<4x32xf32> to vector<4x8xf32>
    %644 = vector.extract_strided_slice %587 {offsets = [0, 24], sizes = [4, 8], strides = [1, 1]} : vector<4x32xf32> to vector<4x8xf32>
    "tpu.trace_start"() <{level = 10 : i32, message = "qd,kd->qk"}> : () -> ()
    %cst_253 = arith.constant dense<0.000000e+00> : vector<4x4xf32>
    %645 = tpu.matmul %643, %644, %cst_253 {dimension_numbers = #tpu.dot_dimension_numbers<[1], [1], [0], [0], [0, 0, 1, 0], [], []>} : vector<4x8xf32>, vector<4x8xf32>, vector<4x4xf32> -> vector<4x4xf32>
    %cst_254 = arith.constant -1.000000e+09 : f32
    "tpu.trace_stop"() : () -> ()
    %646 = vector.broadcast %cst_254 : f32 to vector<4x4xf32>
    %647 = arith.select %591, %645, %646 : vector<4x4xi1>, vector<4x4xf32>
    %cst_255 = arith.constant dense<0xFF800000> : vector<4xf32>
    %648 = vector.multi_reduction <maximumf>, %647, %cst_255 [1] : vector<4x4xf32> to vector<4xf32>
    %649 = vector.shape_cast %648 : vector<4xf32> to vector<4x1xf32>
    %650 = vector.broadcast %649 : vector<4x1xf32> to vector<4x4xf32>
    %651 = arith.subf %647, %650 : vector<4x4xf32>
    %652 = math.exp %651 : vector<4x4xf32>
    %cst_256 = arith.constant dense<0.000000e+00> : vector<4xf32>
    %653 = vector.multi_reduction <add>, %652, %cst_256 [1] : vector<4x4xf32> to vector<4xf32>
    %654 = vector.shape_cast %653 : vector<4xf32> to vector<4x1xf32>
    %655 = tpu.reciprocal %654 {approx = true} : vector<4x1xf32> -> vector<4x1xf32>
    %656 = vector.broadcast %655 : vector<4x1xf32> to vector<4x4xf32>
    %657 = arith.mulf %652, %656 : vector<4x4xf32>
    %658 = vector.extract_strided_slice %588 {offsets = [0, 24], sizes = [4, 8], strides = [1, 1]} : vector<4x32xf32> to vector<4x8xf32>
    %cst_257 = arith.constant dense<0.000000e+00> : vector<4x8xf32>
    %659 = tpu.matmul %657, %658, %cst_257 {dimension_numbers = #tpu.dot_dimension_numbers<[1], [0], [0], [1], [0, 0, 1, 1], [], []>} : vector<4x4xf32>, vector<4x8xf32>, vector<4x8xf32> -> vector<4x8xf32>
    %660 = tpu.concatenate %608, %625, %642, %659 in 1 : vector<4x8xf32>, vector<4x8xf32>, vector<4x8xf32>, vector<4x8xf32> -> vector<4x32xf32>
    %c0_258 = arith.constant 0 : index
    %c0_259 = arith.constant 0 : index
    %c0_260 = arith.constant 0 : index
    %661 = vector.load %arg19[%c0_258, %c0_259, %c0_260] : memref<2x32x32xbf16, #tpu.memory_space<vmem>>, vector<1x32x32xbf16>
    %662 = vector.shape_cast %661 : vector<1x32x32xbf16> to vector<32x32xbf16>
    %663 = arith.truncf %660 : vector<4x32xf32> to vector<4x32xbf16>
    %cst_261 = arith.constant dense<0.000000e+00> : vector<4x32xf32>
    %664 = tpu.matmul %663, %662, %cst_261 {dimension_numbers = #tpu.dot_dimension_numbers<[1], [0], [0], [1], [0, 0, 1, 1], [], []>} : vector<4x32xbf16>, vector<32x32xbf16>, vector<4x32xf32> -> vector<4x32xf32>
    %665 = arith.addf %567, %664 : vector<4x32xf32>
    %c0_262 = arith.constant 0 : index
    %c0_263 = arith.constant 0 : index
    %c0_264 = arith.constant 0 : index
    %666 = vector.load %arg20[%c0_262, %c0_263, %c0_264] : memref<2x1x32xf32, #tpu.memory_space<vmem>>, vector<1x1x32xf32>
    %667 = vector.shape_cast %666 : vector<1x1x32xf32> to vector<1x32xf32>
    %668 = arith.mulf %665, %665 : vector<4x32xf32>
    %cst_265 = arith.constant dense<0.000000e+00> : vector<4xf32>
    %669 = vector.multi_reduction <add>, %668, %cst_265 [1] : vector<4x32xf32> to vector<4xf32>
    %670 = vector.shape_cast %669 : vector<4xf32> to vector<4x1xf32>
    %cst_266 = arith.constant 3.200000e+01 : f32
    %671 = vector.broadcast %cst_266 : f32 to vector<4x1xf32>
    %672 = arith.divf %670, %671 : vector<4x1xf32>
    %cst_267 = arith.constant 9.99999997E-7 : f32
    %673 = vector.broadcast %cst_267 : f32 to vector<4x1xf32>
    %674 = arith.addf %672, %673 : vector<4x1xf32>
    %675 = math.rsqrt %674 : vector<4x1xf32>
    %676 = vector.broadcast %675 : vector<4x1xf32> to vector<4x32xf32>
    %677 = arith.mulf %665, %676 : vector<4x32xf32>
    %678 = vector.broadcast %667 : vector<1x32xf32> to vector<4x32xf32>
    %679 = arith.mulf %677, %678 : vector<4x32xf32>
    %c0_268 = arith.constant 0 : index
    %c0_269 = arith.constant 0 : index
    %c0_270 = arith.constant 0 : index
    %680 = vector.load %arg21[%c0_268, %c0_269, %c0_270] : memref<2x32x32xbf16, #tpu.memory_space<vmem>>, vector<1x32x32xbf16>
    %681 = vector.shape_cast %680 : vector<1x32x32xbf16> to vector<32x32xbf16>
    %682 = arith.truncf %679 : vector<4x32xf32> to vector<4x32xbf16>
    %cst_271 = arith.constant dense<0.000000e+00> : vector<4x32xf32>
    %683 = tpu.matmul %682, %681, %cst_271 {dimension_numbers = #tpu.dot_dimension_numbers<[1], [0], [0], [1], [0, 0, 1, 1], [], []>} : vector<4x32xbf16>, vector<32x32xbf16>, vector<4x32xf32> -> vector<4x32xf32>
    %c0_272 = arith.constant 0 : index
    %c0_273 = arith.constant 0 : index
    %c0_274 = arith.constant 0 : index
    %684 = vector.load %arg22[%c0_272, %c0_273, %c0_274] : memref<2x32x64xbf16, #tpu.memory_space<vmem>>, vector<1x32x64xbf16>
    %685 = vector.shape_cast %684 : vector<1x32x64xbf16> to vector<32x64xbf16>
    %686 = arith.truncf %565 : vector<11x32xf32> to vector<11x32xbf16>
    %cst_275 = arith.constant dense<0.000000e+00> : vector<11x64xf32>
    %687 = tpu.matmul %686, %685, %cst_275 {dimension_numbers = #tpu.dot_dimension_numbers<[1], [0], [0], [1], [0, 0, 1, 1], [], []>} : vector<11x32xbf16>, vector<32x64xbf16>, vector<11x64xf32> -> vector<11x64xf32>
    %688 = vector.extract_strided_slice %687 {offsets = [0, 0], sizes = [11, 32], strides = [1, 1]} : vector<11x64xf32> to vector<11x32xf32>
    %689 = vector.extract_strided_slice %687 {offsets = [0, 32], sizes = [11, 32], strides = [1, 1]} : vector<11x64xf32> to vector<11x32xf32>
    %690 = vector.extract_strided_slice %683 {offsets = [0, 0], sizes = [4, 8], strides = [1, 1]} : vector<4x32xf32> to vector<4x8xf32>
    %691 = vector.extract_strided_slice %688 {offsets = [0, 0], sizes = [11, 8], strides = [1, 1]} : vector<11x32xf32> to vector<11x8xf32>
    "tpu.trace_start"() <{level = 10 : i32, message = "qd,kd->qk"}> : () -> ()
    %cst_276 = arith.constant dense<0.000000e+00> : vector<4x11xf32>
    %692 = tpu.matmul %690, %691, %cst_276 {dimension_numbers = #tpu.dot_dimension_numbers<[1], [1], [0], [0], [0, 0, 1, 0], [], []>} : vector<4x8xf32>, vector<11x8xf32>, vector<4x11xf32> -> vector<4x11xf32>
    "tpu.trace_stop"() : () -> ()
    %cst_277 = arith.constant dense<0xFF800000> : vector<4xf32>
    %693 = vector.multi_reduction <maximumf>, %692, %cst_277 [1] : vector<4x11xf32> to vector<4xf32>
    %694 = vector.shape_cast %693 : vector<4xf32> to vector<4x1xf32>
    %695 = vector.broadcast %694 : vector<4x1xf32> to vector<4x11xf32>
    %696 = arith.subf %692, %695 : vector<4x11xf32>
    %697 = math.exp %696 : vector<4x11xf32>
    %cst_278 = arith.constant dense<0.000000e+00> : vector<4xf32>
    %698 = vector.multi_reduction <add>, %697, %cst_278 [1] : vector<4x11xf32> to vector<4xf32>
    %699 = vector.shape_cast %698 : vector<4xf32> to vector<4x1xf32>
    %700 = tpu.reciprocal %699 {approx = true} : vector<4x1xf32> -> vector<4x1xf32>
    %701 = vector.broadcast %700 : vector<4x1xf32> to vector<4x11xf32>
    %702 = arith.mulf %697, %701 : vector<4x11xf32>
    %703 = vector.extract_strided_slice %689 {offsets = [0, 0], sizes = [11, 8], strides = [1, 1]} : vector<11x32xf32> to vector<11x8xf32>
    %cst_279 = arith.constant dense<0.000000e+00> : vector<4x8xf32>
    %704 = tpu.matmul %702, %703, %cst_279 {dimension_numbers = #tpu.dot_dimension_numbers<[1], [0], [0], [1], [0, 0, 1, 1], [], []>} : vector<4x11xf32>, vector<11x8xf32>, vector<4x8xf32> -> vector<4x8xf32>
    %705 = vector.extract_strided_slice %683 {offsets = [0, 8], sizes = [4, 8], strides = [1, 1]} : vector<4x32xf32> to vector<4x8xf32>
    %706 = vector.extract_strided_slice %688 {offsets = [0, 8], sizes = [11, 8], strides = [1, 1]} : vector<11x32xf32> to vector<11x8xf32>
    "tpu.trace_start"() <{level = 10 : i32, message = "qd,kd->qk"}> : () -> ()
    %cst_280 = arith.constant dense<0.000000e+00> : vector<4x11xf32>
    %707 = tpu.matmul %705, %706, %cst_280 {dimension_numbers = #tpu.dot_dimension_numbers<[1], [1], [0], [0], [0, 0, 1, 0], [], []>} : vector<4x8xf32>, vector<11x8xf32>, vector<4x11xf32> -> vector<4x11xf32>
    "tpu.trace_stop"() : () -> ()
    %cst_281 = arith.constant dense<0xFF800000> : vector<4xf32>
    %708 = vector.multi_reduction <maximumf>, %707, %cst_281 [1] : vector<4x11xf32> to vector<4xf32>
    %709 = vector.shape_cast %708 : vector<4xf32> to vector<4x1xf32>
    %710 = vector.broadcast %709 : vector<4x1xf32> to vector<4x11xf32>
    %711 = arith.subf %707, %710 : vector<4x11xf32>
    %712 = math.exp %711 : vector<4x11xf32>
    %cst_282 = arith.constant dense<0.000000e+00> : vector<4xf32>
    %713 = vector.multi_reduction <add>, %712, %cst_282 [1] : vector<4x11xf32> to vector<4xf32>
    %714 = vector.shape_cast %713 : vector<4xf32> to vector<4x1xf32>
    %715 = tpu.reciprocal %714 {approx = true} : vector<4x1xf32> -> vector<4x1xf32>
    %716 = vector.broadcast %715 : vector<4x1xf32> to vector<4x11xf32>
    %717 = arith.mulf %712, %716 : vector<4x11xf32>
    %718 = vector.extract_strided_slice %689 {offsets = [0, 8], sizes = [11, 8], strides = [1, 1]} : vector<11x32xf32> to vector<11x8xf32>
    %cst_283 = arith.constant dense<0.000000e+00> : vector<4x8xf32>
    %719 = tpu.matmul %717, %718, %cst_283 {dimension_numbers = #tpu.dot_dimension_numbers<[1], [0], [0], [1], [0, 0, 1, 1], [], []>} : vector<4x11xf32>, vector<11x8xf32>, vector<4x8xf32> -> vector<4x8xf32>
    %720 = vector.extract_strided_slice %683 {offsets = [0, 16], sizes = [4, 8], strides = [1, 1]} : vector<4x32xf32> to vector<4x8xf32>
    %721 = vector.extract_strided_slice %688 {offsets = [0, 16], sizes = [11, 8], strides = [1, 1]} : vector<11x32xf32> to vector<11x8xf32>
    "tpu.trace_start"() <{level = 10 : i32, message = "qd,kd->qk"}> : () -> ()
    %cst_284 = arith.constant dense<0.000000e+00> : vector<4x11xf32>
    %722 = tpu.matmul %720, %721, %cst_284 {dimension_numbers = #tpu.dot_dimension_numbers<[1], [1], [0], [0], [0, 0, 1, 0], [], []>} : vector<4x8xf32>, vector<11x8xf32>, vector<4x11xf32> -> vector<4x11xf32>
    "tpu.trace_stop"() : () -> ()
    %cst_285 = arith.constant dense<0xFF800000> : vector<4xf32>
    %723 = vector.multi_reduction <maximumf>, %722, %cst_285 [1] : vector<4x11xf32> to vector<4xf32>
    %724 = vector.shape_cast %723 : vector<4xf32> to vector<4x1xf32>
    %725 = vector.broadcast %724 : vector<4x1xf32> to vector<4x11xf32>
    %726 = arith.subf %722, %725 : vector<4x11xf32>
    %727 = math.exp %726 : vector<4x11xf32>
    %cst_286 = arith.constant dense<0.000000e+00> : vector<4xf32>
    %728 = vector.multi_reduction <add>, %727, %cst_286 [1] : vector<4x11xf32> to vector<4xf32>
    %729 = vector.shape_cast %728 : vector<4xf32> to vector<4x1xf32>
    %730 = tpu.reciprocal %729 {approx = true} : vector<4x1xf32> -> vector<4x1xf32>
    %731 = vector.broadcast %730 : vector<4x1xf32> to vector<4x11xf32>
    %732 = arith.mulf %727, %731 : vector<4x11xf32>
    %733 = vector.extract_strided_slice %689 {offsets = [0, 16], sizes = [11, 8], strides = [1, 1]} : vector<11x32xf32> to vector<11x8xf32>
    %cst_287 = arith.constant dense<0.000000e+00> : vector<4x8xf32>
    %734 = tpu.matmul %732, %733, %cst_287 {dimension_numbers = #tpu.dot_dimension_numbers<[1], [0], [0], [1], [0, 0, 1, 1], [], []>} : vector<4x11xf32>, vector<11x8xf32>, vector<4x8xf32> -> vector<4x8xf32>
    %735 = vector.extract_strided_slice %683 {offsets = [0, 24], sizes = [4, 8], strides = [1, 1]} : vector<4x32xf32> to vector<4x8xf32>
    %736 = vector.extract_strided_slice %688 {offsets = [0, 24], sizes = [11, 8], strides = [1, 1]} : vector<11x32xf32> to vector<11x8xf32>
    "tpu.trace_start"() <{level = 10 : i32, message = "qd,kd->qk"}> : () -> ()
    %cst_288 = arith.constant dense<0.000000e+00> : vector<4x11xf32>
    %737 = tpu.matmul %735, %736, %cst_288 {dimension_numbers = #tpu.dot_dimension_numbers<[1], [1], [0], [0], [0, 0, 1, 0], [], []>} : vector<4x8xf32>, vector<11x8xf32>, vector<4x11xf32> -> vector<4x11xf32>
    "tpu.trace_stop"() : () -> ()
    %cst_289 = arith.constant dense<0xFF800000> : vector<4xf32>
    %738 = vector.multi_reduction <maximumf>, %737, %cst_289 [1] : vector<4x11xf32> to vector<4xf32>
    %739 = vector.shape_cast %738 : vector<4xf32> to vector<4x1xf32>
    %740 = vector.broadcast %739 : vector<4x1xf32> to vector<4x11xf32>
    %741 = arith.subf %737, %740 : vector<4x11xf32>
    %742 = math.exp %741 : vector<4x11xf32>
    %cst_290 = arith.constant dense<0.000000e+00> : vector<4xf32>
    %743 = vector.multi_reduction <add>, %742, %cst_290 [1] : vector<4x11xf32> to vector<4xf32>
    %744 = vector.shape_cast %743 : vector<4xf32> to vector<4x1xf32>
    %745 = tpu.reciprocal %744 {approx = true} : vector<4x1xf32> -> vector<4x1xf32>
    %746 = vector.broadcast %745 : vector<4x1xf32> to vector<4x11xf32>
    %747 = arith.mulf %742, %746 : vector<4x11xf32>
    %748 = vector.extract_strided_slice %689 {offsets = [0, 24], sizes = [11, 8], strides = [1, 1]} : vector<11x32xf32> to vector<11x8xf32>
    %cst_291 = arith.constant dense<0.000000e+00> : vector<4x8xf32>
    %749 = tpu.matmul %747, %748, %cst_291 {dimension_numbers = #tpu.dot_dimension_numbers<[1], [0], [0], [1], [0, 0, 1, 1], [], []>} : vector<4x11xf32>, vector<11x8xf32>, vector<4x8xf32> -> vector<4x8xf32>
    %750 = tpu.concatenate %704, %719, %734, %749 in 1 : vector<4x8xf32>, vector<4x8xf32>, vector<4x8xf32>, vector<4x8xf32> -> vector<4x32xf32>
    %c0_292 = arith.constant 0 : index
    %c0_293 = arith.constant 0 : index
    %c0_294 = arith.constant 0 : index
    %751 = vector.load %arg23[%c0_292, %c0_293, %c0_294] : memref<2x32x32xbf16, #tpu.memory_space<vmem>>, vector<1x32x32xbf16>
    %752 = vector.shape_cast %751 : vector<1x32x32xbf16> to vector<32x32xbf16>
    %753 = arith.truncf %750 : vector<4x32xf32> to vector<4x32xbf16>
    %cst_295 = arith.constant dense<0.000000e+00> : vector<4x32xf32>
    %754 = tpu.matmul %753, %752, %cst_295 {dimension_numbers = #tpu.dot_dimension_numbers<[1], [0], [0], [1], [0, 0, 1, 1], [], []>} : vector<4x32xbf16>, vector<32x32xbf16>, vector<4x32xf32> -> vector<4x32xf32>
    %755 = arith.addf %665, %754 : vector<4x32xf32>
    %c0_296 = arith.constant 0 : index
    %c0_297 = arith.constant 0 : index
    %c0_298 = arith.constant 0 : index
    %756 = vector.load %arg24[%c0_296, %c0_297, %c0_298] : memref<2x1x32xf32, #tpu.memory_space<vmem>>, vector<1x1x32xf32>
    %757 = vector.shape_cast %756 : vector<1x1x32xf32> to vector<1x32xf32>
    %758 = arith.mulf %755, %755 : vector<4x32xf32>
    %cst_299 = arith.constant dense<0.000000e+00> : vector<4xf32>
    %759 = vector.multi_reduction <add>, %758, %cst_299 [1] : vector<4x32xf32> to vector<4xf32>
    %760 = vector.shape_cast %759 : vector<4xf32> to vector<4x1xf32>
    %cst_300 = arith.constant 3.200000e+01 : f32
    %761 = vector.broadcast %cst_300 : f32 to vector<4x1xf32>
    %762 = arith.divf %760, %761 : vector<4x1xf32>
    %cst_301 = arith.constant 9.99999997E-7 : f32
    %763 = vector.broadcast %cst_301 : f32 to vector<4x1xf32>
    %764 = arith.addf %762, %763 : vector<4x1xf32>
    %765 = math.rsqrt %764 : vector<4x1xf32>
    %766 = vector.broadcast %765 : vector<4x1xf32> to vector<4x32xf32>
    %767 = arith.mulf %755, %766 : vector<4x32xf32>
    %768 = vector.broadcast %757 : vector<1x32xf32> to vector<4x32xf32>
    %769 = arith.mulf %767, %768 : vector<4x32xf32>
    %c0_302 = arith.constant 0 : index
    %c0_303 = arith.constant 0 : index
    %c0_304 = arith.constant 0 : index
    %770 = vector.load %arg25[%c0_302, %c0_303, %c0_304] : memref<2x32x64xbf16, #tpu.memory_space<vmem>>, vector<1x32x64xbf16>
    %771 = vector.shape_cast %770 : vector<1x32x64xbf16> to vector<32x64xbf16>
    %772 = arith.truncf %769 : vector<4x32xf32> to vector<4x32xbf16>
    %cst_305 = arith.constant dense<0.000000e+00> : vector<4x64xf32>
    %773 = tpu.matmul %772, %771, %cst_305 {dimension_numbers = #tpu.dot_dimension_numbers<[1], [0], [0], [1], [0, 0, 1, 1], [], []>} : vector<4x32xbf16>, vector<32x64xbf16>, vector<4x64xf32> -> vector<4x64xf32>
    %cst_306 = arith.constant 0.000000e+00 : f32
    %774 = vector.broadcast %cst_306 : f32 to vector<4x64xf32>
    %775 = arith.maximumf %773, %774 : vector<4x64xf32>
    %c0_307 = arith.constant 0 : index
    %c0_308 = arith.constant 0 : index
    %c0_309 = arith.constant 0 : index
    %776 = vector.load %arg26[%c0_307, %c0_308, %c0_309] : memref<2x64x32xbf16, #tpu.memory_space<vmem>>, vector<1x64x32xbf16>
    %777 = vector.shape_cast %776 : vector<1x64x32xbf16> to vector<64x32xbf16>
    %778 = arith.truncf %775 : vector<4x64xf32> to vector<4x64xbf16>
    %cst_310 = arith.constant dense<0.000000e+00> : vector<4x32xf32>
    %779 = tpu.matmul %778, %777, %cst_310 {dimension_numbers = #tpu.dot_dimension_numbers<[1], [0], [0], [1], [0, 0, 1, 1], [], []>} : vector<4x64xbf16>, vector<64x32xbf16>, vector<4x32xf32> -> vector<4x32xf32>
    %780 = arith.addf %755, %779 : vector<4x32xf32>
    %c1_311 = arith.constant 1 : index
    %c0_312 = arith.constant 0 : index
    %c0_313 = arith.constant 0 : index
    %781 = vector.load %arg17[%c1_311, %c0_312, %c0_313] : memref<2x1x32xf32, #tpu.memory_space<vmem>>, vector<1x1x32xf32>
    %782 = vector.shape_cast %781 : vector<1x1x32xf32> to vector<1x32xf32>
    %783 = arith.mulf %780, %780 : vector<4x32xf32>
    %cst_314 = arith.constant dense<0.000000e+00> : vector<4xf32>
    %784 = vector.multi_reduction <add>, %783, %cst_314 [1] : vector<4x32xf32> to vector<4xf32>
    %785 = vector.shape_cast %784 : vector<4xf32> to vector<4x1xf32>
    %cst_315 = arith.constant 3.200000e+01 : f32
    %786 = vector.broadcast %cst_315 : f32 to vector<4x1xf32>
    %787 = arith.divf %785, %786 : vector<4x1xf32>
    %cst_316 = arith.constant 9.99999997E-7 : f32
    %788 = vector.broadcast %cst_316 : f32 to vector<4x1xf32>
    %789 = arith.addf %787, %788 : vector<4x1xf32>
    %790 = math.rsqrt %789 : vector<4x1xf32>
    %791 = vector.broadcast %790 : vector<4x1xf32> to vector<4x32xf32>
    %792 = arith.mulf %780, %791 : vector<4x32xf32>
    %793 = vector.broadcast %782 : vector<1x32xf32> to vector<4x32xf32>
    %794 = arith.mulf %792, %793 : vector<4x32xf32>
    %c1_317 = arith.constant 1 : index
    %c0_318 = arith.constant 0 : index
    %c0_319 = arith.constant 0 : index
    %795 = vector.load %arg18[%c1_317, %c0_318, %c0_319] : memref<2x32x96xbf16, #tpu.memory_space<vmem>>, vector<1x32x96xbf16>
    %796 = vector.shape_cast %795 : vector<1x32x96xbf16> to vector<32x96xbf16>
    %797 = arith.truncf %794 : vector<4x32xf32> to vector<4x32xbf16>
    %cst_320 = arith.constant dense<0.000000e+00> : vector<4x96xf32>
    %798 = tpu.matmul %797, %796, %cst_320 {dimension_numbers = #tpu.dot_dimension_numbers<[1], [0], [0], [1], [0, 0, 1, 1], [], []>} : vector<4x32xbf16>, vector<32x96xbf16>, vector<4x96xf32> -> vector<4x96xf32>
    %799 = vector.extract_strided_slice %798 {offsets = [0, 0], sizes = [4, 32], strides = [1, 1]} : vector<4x96xf32> to vector<4x32xf32>
    %800 = vector.extract_strided_slice %798 {offsets = [0, 32], sizes = [4, 32], strides = [1, 1]} : vector<4x96xf32> to vector<4x32xf32>
    %801 = vector.extract_strided_slice %798 {offsets = [0, 64], sizes = [4, 32], strides = [1, 1]} : vector<4x96xf32> to vector<4x32xf32>
    %802 = tpu.iota {dimensions = array<i32: 0>} : vector<4x4xi32>
    %803 = tpu.iota {dimensions = array<i32: 1>} : vector<4x4xi32>
    %804 = arith.cmpi sle, %803, %802 : vector<4x4xi32>
    %805 = vector.extract_strided_slice %799 {offsets = [0, 0], sizes = [4, 8], strides = [1, 1]} : vector<4x32xf32> to vector<4x8xf32>
    %806 = vector.extract_strided_slice %800 {offsets = [0, 0], sizes = [4, 8], strides = [1, 1]} : vector<4x32xf32> to vector<4x8xf32>
    "tpu.trace_start"() <{level = 10 : i32, message = "qd,kd->qk"}> : () -> ()
    %cst_321 = arith.constant dense<0.000000e+00> : vector<4x4xf32>
    %807 = tpu.matmul %805, %806, %cst_321 {dimension_numbers = #tpu.dot_dimension_numbers<[1], [1], [0], [0], [0, 0, 1, 0], [], []>} : vector<4x8xf32>, vector<4x8xf32>, vector<4x4xf32> -> vector<4x4xf32>
    %cst_322 = arith.constant -1.000000e+09 : f32
    "tpu.trace_stop"() : () -> ()
    %808 = vector.broadcast %cst_322 : f32 to vector<4x4xf32>
    %809 = arith.select %804, %807, %808 : vector<4x4xi1>, vector<4x4xf32>
    %cst_323 = arith.constant dense<0xFF800000> : vector<4xf32>
    %810 = vector.multi_reduction <maximumf>, %809, %cst_323 [1] : vector<4x4xf32> to vector<4xf32>
    %811 = vector.shape_cast %810 : vector<4xf32> to vector<4x1xf32>
    %812 = vector.broadcast %811 : vector<4x1xf32> to vector<4x4xf32>
    %813 = arith.subf %809, %812 : vector<4x4xf32>
    %814 = math.exp %813 : vector<4x4xf32>
    %cst_324 = arith.constant dense<0.000000e+00> : vector<4xf32>
    %815 = vector.multi_reduction <add>, %814, %cst_324 [1] : vector<4x4xf32> to vector<4xf32>
    %816 = vector.shape_cast %815 : vector<4xf32> to vector<4x1xf32>
    %817 = tpu.reciprocal %816 {approx = true} : vector<4x1xf32> -> vector<4x1xf32>
    %818 = vector.broadcast %817 : vector<4x1xf32> to vector<4x4xf32>
    %819 = arith.mulf %814, %818 : vector<4x4xf32>
    %820 = vector.extract_strided_slice %801 {offsets = [0, 0], sizes = [4, 8], strides = [1, 1]} : vector<4x32xf32> to vector<4x8xf32>
    %cst_325 = arith.constant dense<0.000000e+00> : vector<4x8xf32>
    %821 = tpu.matmul %819, %820, %cst_325 {dimension_numbers = #tpu.dot_dimension_numbers<[1], [0], [0], [1], [0, 0, 1, 1], [], []>} : vector<4x4xf32>, vector<4x8xf32>, vector<4x8xf32> -> vector<4x8xf32>
    %822 = vector.extract_strided_slice %799 {offsets = [0, 8], sizes = [4, 8], strides = [1, 1]} : vector<4x32xf32> to vector<4x8xf32>
    %823 = vector.extract_strided_slice %800 {offsets = [0, 8], sizes = [4, 8], strides = [1, 1]} : vector<4x32xf32> to vector<4x8xf32>
    "tpu.trace_start"() <{level = 10 : i32, message = "qd,kd->qk"}> : () -> ()
    %cst_326 = arith.constant dense<0.000000e+00> : vector<4x4xf32>
    %824 = tpu.matmul %822, %823, %cst_326 {dimension_numbers = #tpu.dot_dimension_numbers<[1], [1], [0], [0], [0, 0, 1, 0], [], []>} : vector<4x8xf32>, vector<4x8xf32>, vector<4x4xf32> -> vector<4x4xf32>
    %cst_327 = arith.constant -1.000000e+09 : f32
    "tpu.trace_stop"() : () -> ()
    %825 = vector.broadcast %cst_327 : f32 to vector<4x4xf32>
    %826 = arith.select %804, %824, %825 : vector<4x4xi1>, vector<4x4xf32>
    %cst_328 = arith.constant dense<0xFF800000> : vector<4xf32>
    %827 = vector.multi_reduction <maximumf>, %826, %cst_328 [1] : vector<4x4xf32> to vector<4xf32>
    %828 = vector.shape_cast %827 : vector<4xf32> to vector<4x1xf32>
    %829 = vector.broadcast %828 : vector<4x1xf32> to vector<4x4xf32>
    %830 = arith.subf %826, %829 : vector<4x4xf32>
    %831 = math.exp %830 : vector<4x4xf32>
    %cst_329 = arith.constant dense<0.000000e+00> : vector<4xf32>
    %832 = vector.multi_reduction <add>, %831, %cst_329 [1] : vector<4x4xf32> to vector<4xf32>
    %833 = vector.shape_cast %832 : vector<4xf32> to vector<4x1xf32>
    %834 = tpu.reciprocal %833 {approx = true} : vector<4x1xf32> -> vector<4x1xf32>
    %835 = vector.broadcast %834 : vector<4x1xf32> to vector<4x4xf32>
    %836 = arith.mulf %831, %835 : vector<4x4xf32>
    %837 = vector.extract_strided_slice %801 {offsets = [0, 8], sizes = [4, 8], strides = [1, 1]} : vector<4x32xf32> to vector<4x8xf32>
    %cst_330 = arith.constant dense<0.000000e+00> : vector<4x8xf32>
    %838 = tpu.matmul %836, %837, %cst_330 {dimension_numbers = #tpu.dot_dimension_numbers<[1], [0], [0], [1], [0, 0, 1, 1], [], []>} : vector<4x4xf32>, vector<4x8xf32>, vector<4x8xf32> -> vector<4x8xf32>
    %839 = vector.extract_strided_slice %799 {offsets = [0, 16], sizes = [4, 8], strides = [1, 1]} : vector<4x32xf32> to vector<4x8xf32>
    %840 = vector.extract_strided_slice %800 {offsets = [0, 16], sizes = [4, 8], strides = [1, 1]} : vector<4x32xf32> to vector<4x8xf32>
    "tpu.trace_start"() <{level = 10 : i32, message = "qd,kd->qk"}> : () -> ()
    %cst_331 = arith.constant dense<0.000000e+00> : vector<4x4xf32>
    %841 = tpu.matmul %839, %840, %cst_331 {dimension_numbers = #tpu.dot_dimension_numbers<[1], [1], [0], [0], [0, 0, 1, 0], [], []>} : vector<4x8xf32>, vector<4x8xf32>, vector<4x4xf32> -> vector<4x4xf32>
    %cst_332 = arith.constant -1.000000e+09 : f32
    "tpu.trace_stop"() : () -> ()
    %842 = vector.broadcast %cst_332 : f32 to vector<4x4xf32>
    %843 = arith.select %804, %841, %842 : vector<4x4xi1>, vector<4x4xf32>
    %cst_333 = arith.constant dense<0xFF800000> : vector<4xf32>
    %844 = vector.multi_reduction <maximumf>, %843, %cst_333 [1] : vector<4x4xf32> to vector<4xf32>
    %845 = vector.shape_cast %844 : vector<4xf32> to vector<4x1xf32>
    %846 = vector.broadcast %845 : vector<4x1xf32> to vector<4x4xf32>
    %847 = arith.subf %843, %846 : vector<4x4xf32>
    %848 = math.exp %847 : vector<4x4xf32>
    %cst_334 = arith.constant dense<0.000000e+00> : vector<4xf32>
    %849 = vector.multi_reduction <add>, %848, %cst_334 [1] : vector<4x4xf32> to vector<4xf32>
    %850 = vector.shape_cast %849 : vector<4xf32> to vector<4x1xf32>
    %851 = tpu.reciprocal %850 {approx = true} : vector<4x1xf32> -> vector<4x1xf32>
    %852 = vector.broadcast %851 : vector<4x1xf32> to vector<4x4xf32>
    %853 = arith.mulf %848, %852 : vector<4x4xf32>
    %854 = vector.extract_strided_slice %801 {offsets = [0, 16], sizes = [4, 8], strides = [1, 1]} : vector<4x32xf32> to vector<4x8xf32>
    %cst_335 = arith.constant dense<0.000000e+00> : vector<4x8xf32>
    %855 = tpu.matmul %853, %854, %cst_335 {dimension_numbers = #tpu.dot_dimension_numbers<[1], [0], [0], [1], [0, 0, 1, 1], [], []>} : vector<4x4xf32>, vector<4x8xf32>, vector<4x8xf32> -> vector<4x8xf32>
    %856 = vector.extract_strided_slice %799 {offsets = [0, 24], sizes = [4, 8], strides = [1, 1]} : vector<4x32xf32> to vector<4x8xf32>
    %857 = vector.extract_strided_slice %800 {offsets = [0, 24], sizes = [4, 8], strides = [1, 1]} : vector<4x32xf32> to vector<4x8xf32>
    "tpu.trace_start"() <{level = 10 : i32, message = "qd,kd->qk"}> : () -> ()
    %cst_336 = arith.constant dense<0.000000e+00> : vector<4x4xf32>
    %858 = tpu.matmul %856, %857, %cst_336 {dimension_numbers = #tpu.dot_dimension_numbers<[1], [1], [0], [0], [0, 0, 1, 0], [], []>} : vector<4x8xf32>, vector<4x8xf32>, vector<4x4xf32> -> vector<4x4xf32>
    %cst_337 = arith.constant -1.000000e+09 : f32
    "tpu.trace_stop"() : () -> ()
    %859 = vector.broadcast %cst_337 : f32 to vector<4x4xf32>
    %860 = arith.select %804, %858, %859 : vector<4x4xi1>, vector<4x4xf32>
    %cst_338 = arith.constant dense<0xFF800000> : vector<4xf32>
    %861 = vector.multi_reduction <maximumf>, %860, %cst_338 [1] : vector<4x4xf32> to vector<4xf32>
    %862 = vector.shape_cast %861 : vector<4xf32> to vector<4x1xf32>
    %863 = vector.broadcast %862 : vector<4x1xf32> to vector<4x4xf32>
    %864 = arith.subf %860, %863 : vector<4x4xf32>
    %865 = math.exp %864 : vector<4x4xf32>
    %cst_339 = arith.constant dense<0.000000e+00> : vector<4xf32>
    %866 = vector.multi_reduction <add>, %865, %cst_339 [1] : vector<4x4xf32> to vector<4xf32>
    %867 = vector.shape_cast %866 : vector<4xf32> to vector<4x1xf32>
    %868 = tpu.reciprocal %867 {approx = true} : vector<4x1xf32> -> vector<4x1xf32>
    %869 = vector.broadcast %868 : vector<4x1xf32> to vector<4x4xf32>
    %870 = arith.mulf %865, %869 : vector<4x4xf32>
    %871 = vector.extract_strided_slice %801 {offsets = [0, 24], sizes = [4, 8], strides = [1, 1]} : vector<4x32xf32> to vector<4x8xf32>
    %cst_340 = arith.constant dense<0.000000e+00> : vector<4x8xf32>
    %872 = tpu.matmul %870, %871, %cst_340 {dimension_numbers = #tpu.dot_dimension_numbers<[1], [0], [0], [1], [0, 0, 1, 1], [], []>} : vector<4x4xf32>, vector<4x8xf32>, vector<4x8xf32> -> vector<4x8xf32>
    %873 = tpu.concatenate %821, %838, %855, %872 in 1 : vector<4x8xf32>, vector<4x8xf32>, vector<4x8xf32>, vector<4x8xf32> -> vector<4x32xf32>
    %c1_341 = arith.constant 1 : index
    %c0_342 = arith.constant 0 : index
    %c0_343 = arith.constant 0 : index
    %874 = vector.load %arg19[%c1_341, %c0_342, %c0_343] : memref<2x32x32xbf16, #tpu.memory_space<vmem>>, vector<1x32x32xbf16>
    %875 = vector.shape_cast %874 : vector<1x32x32xbf16> to vector<32x32xbf16>
    %876 = arith.truncf %873 : vector<4x32xf32> to vector<4x32xbf16>
    %cst_344 = arith.constant dense<0.000000e+00> : vector<4x32xf32>
    %877 = tpu.matmul %876, %875, %cst_344 {dimension_numbers = #tpu.dot_dimension_numbers<[1], [0], [0], [1], [0, 0, 1, 1], [], []>} : vector<4x32xbf16>, vector<32x32xbf16>, vector<4x32xf32> -> vector<4x32xf32>
    %878 = arith.addf %780, %877 : vector<4x32xf32>
    %c1_345 = arith.constant 1 : index
    %c0_346 = arith.constant 0 : index
    %c0_347 = arith.constant 0 : index
    %879 = vector.load %arg20[%c1_345, %c0_346, %c0_347] : memref<2x1x32xf32, #tpu.memory_space<vmem>>, vector<1x1x32xf32>
    %880 = vector.shape_cast %879 : vector<1x1x32xf32> to vector<1x32xf32>
    %881 = arith.mulf %878, %878 : vector<4x32xf32>
    %cst_348 = arith.constant dense<0.000000e+00> : vector<4xf32>
    %882 = vector.multi_reduction <add>, %881, %cst_348 [1] : vector<4x32xf32> to vector<4xf32>
    %883 = vector.shape_cast %882 : vector<4xf32> to vector<4x1xf32>
    %cst_349 = arith.constant 3.200000e+01 : f32
    %884 = vector.broadcast %cst_349 : f32 to vector<4x1xf32>
    %885 = arith.divf %883, %884 : vector<4x1xf32>
    %cst_350 = arith.constant 9.99999997E-7 : f32
    %886 = vector.broadcast %cst_350 : f32 to vector<4x1xf32>
    %887 = arith.addf %885, %886 : vector<4x1xf32>
    %888 = math.rsqrt %887 : vector<4x1xf32>
    %889 = vector.broadcast %888 : vector<4x1xf32> to vector<4x32xf32>
    %890 = arith.mulf %878, %889 : vector<4x32xf32>
    %891 = vector.broadcast %880 : vector<1x32xf32> to vector<4x32xf32>
    %892 = arith.mulf %890, %891 : vector<4x32xf32>
    %c1_351 = arith.constant 1 : index
    %c0_352 = arith.constant 0 : index
    %c0_353 = arith.constant 0 : index
    %893 = vector.load %arg21[%c1_351, %c0_352, %c0_353] : memref<2x32x32xbf16, #tpu.memory_space<vmem>>, vector<1x32x32xbf16>
    %894 = vector.shape_cast %893 : vector<1x32x32xbf16> to vector<32x32xbf16>
    %895 = arith.truncf %892 : vector<4x32xf32> to vector<4x32xbf16>
    %cst_354 = arith.constant dense<0.000000e+00> : vector<4x32xf32>
    %896 = tpu.matmul %895, %894, %cst_354 {dimension_numbers = #tpu.dot_dimension_numbers<[1], [0], [0], [1], [0, 0, 1, 1], [], []>} : vector<4x32xbf16>, vector<32x32xbf16>, vector<4x32xf32> -> vector<4x32xf32>
    %c1_355 = arith.constant 1 : index
    %c0_356 = arith.constant 0 : index
    %c0_357 = arith.constant 0 : index
    %897 = vector.load %arg22[%c1_355, %c0_356, %c0_357] : memref<2x32x64xbf16, #tpu.memory_space<vmem>>, vector<1x32x64xbf16>
    %898 = vector.shape_cast %897 : vector<1x32x64xbf16> to vector<32x64xbf16>
    %899 = arith.truncf %565 : vector<11x32xf32> to vector<11x32xbf16>
    %cst_358 = arith.constant dense<0.000000e+00> : vector<11x64xf32>
    %900 = tpu.matmul %899, %898, %cst_358 {dimension_numbers = #tpu.dot_dimension_numbers<[1], [0], [0], [1], [0, 0, 1, 1], [], []>} : vector<11x32xbf16>, vector<32x64xbf16>, vector<11x64xf32> -> vector<11x64xf32>
    %901 = vector.extract_strided_slice %900 {offsets = [0, 0], sizes = [11, 32], strides = [1, 1]} : vector<11x64xf32> to vector<11x32xf32>
    %902 = vector.extract_strided_slice %900 {offsets = [0, 32], sizes = [11, 32], strides = [1, 1]} : vector<11x64xf32> to vector<11x32xf32>
    %903 = vector.extract_strided_slice %896 {offsets = [0, 0], sizes = [4, 8], strides = [1, 1]} : vector<4x32xf32> to vector<4x8xf32>
    %904 = vector.extract_strided_slice %901 {offsets = [0, 0], sizes = [11, 8], strides = [1, 1]} : vector<11x32xf32> to vector<11x8xf32>
    "tpu.trace_start"() <{level = 10 : i32, message = "qd,kd->qk"}> : () -> ()
    %cst_359 = arith.constant dense<0.000000e+00> : vector<4x11xf32>
    %905 = tpu.matmul %903, %904, %cst_359 {dimension_numbers = #tpu.dot_dimension_numbers<[1], [1], [0], [0], [0, 0, 1, 0], [], []>} : vector<4x8xf32>, vector<11x8xf32>, vector<4x11xf32> -> vector<4x11xf32>
    "tpu.trace_stop"() : () -> ()
    %cst_360 = arith.constant dense<0xFF800000> : vector<4xf32>
    %906 = vector.multi_reduction <maximumf>, %905, %cst_360 [1] : vector<4x11xf32> to vector<4xf32>
    %907 = vector.shape_cast %906 : vector<4xf32> to vector<4x1xf32>
    %908 = vector.broadcast %907 : vector<4x1xf32> to vector<4x11xf32>
    %909 = arith.subf %905, %908 : vector<4x11xf32>
    %910 = math.exp %909 : vector<4x11xf32>
    %cst_361 = arith.constant dense<0.000000e+00> : vector<4xf32>
    %911 = vector.multi_reduction <add>, %910, %cst_361 [1] : vector<4x11xf32> to vector<4xf32>
    %912 = vector.shape_cast %911 : vector<4xf32> to vector<4x1xf32>
    %913 = tpu.reciprocal %912 {approx = true} : vector<4x1xf32> -> vector<4x1xf32>
    %914 = vector.broadcast %913 : vector<4x1xf32> to vector<4x11xf32>
    %915 = arith.mulf %910, %914 : vector<4x11xf32>
    %916 = vector.extract_strided_slice %902 {offsets = [0, 0], sizes = [11, 8], strides = [1, 1]} : vector<11x32xf32> to vector<11x8xf32>
    %cst_362 = arith.constant dense<0.000000e+00> : vector<4x8xf32>
    %917 = tpu.matmul %915, %916, %cst_362 {dimension_numbers = #tpu.dot_dimension_numbers<[1], [0], [0], [1], [0, 0, 1, 1], [], []>} : vector<4x11xf32>, vector<11x8xf32>, vector<4x8xf32> -> vector<4x8xf32>
    %918 = vector.extract_strided_slice %896 {offsets = [0, 8], sizes = [4, 8], strides = [1, 1]} : vector<4x32xf32> to vector<4x8xf32>
    %919 = vector.extract_strided_slice %901 {offsets = [0, 8], sizes = [11, 8], strides = [1, 1]} : vector<11x32xf32> to vector<11x8xf32>
    "tpu.trace_start"() <{level = 10 : i32, message = "qd,kd->qk"}> : () -> ()
    %cst_363 = arith.constant dense<0.000000e+00> : vector<4x11xf32>
    %920 = tpu.matmul %918, %919, %cst_363 {dimension_numbers = #tpu.dot_dimension_numbers<[1], [1], [0], [0], [0, 0, 1, 0], [], []>} : vector<4x8xf32>, vector<11x8xf32>, vector<4x11xf32> -> vector<4x11xf32>
    "tpu.trace_stop"() : () -> ()
    %cst_364 = arith.constant dense<0xFF800000> : vector<4xf32>
    %921 = vector.multi_reduction <maximumf>, %920, %cst_364 [1] : vector<4x11xf32> to vector<4xf32>
    %922 = vector.shape_cast %921 : vector<4xf32> to vector<4x1xf32>
    %923 = vector.broadcast %922 : vector<4x1xf32> to vector<4x11xf32>
    %924 = arith.subf %920, %923 : vector<4x11xf32>
    %925 = math.exp %924 : vector<4x11xf32>
    %cst_365 = arith.constant dense<0.000000e+00> : vector<4xf32>
    %926 = vector.multi_reduction <add>, %925, %cst_365 [1] : vector<4x11xf32> to vector<4xf32>
    %927 = vector.shape_cast %926 : vector<4xf32> to vector<4x1xf32>
    %928 = tpu.reciprocal %927 {approx = true} : vector<4x1xf32> -> vector<4x1xf32>
    %929 = vector.broadcast %928 : vector<4x1xf32> to vector<4x11xf32>
    %930 = arith.mulf %925, %929 : vector<4x11xf32>
    %931 = vector.extract_strided_slice %902 {offsets = [0, 8], sizes = [11, 8], strides = [1, 1]} : vector<11x32xf32> to vector<11x8xf32>
    %cst_366 = arith.constant dense<0.000000e+00> : vector<4x8xf32>
    %932 = tpu.matmul %930, %931, %cst_366 {dimension_numbers = #tpu.dot_dimension_numbers<[1], [0], [0], [1], [0, 0, 1, 1], [], []>} : vector<4x11xf32>, vector<11x8xf32>, vector<4x8xf32> -> vector<4x8xf32>
    %933 = vector.extract_strided_slice %896 {offsets = [0, 16], sizes = [4, 8], strides = [1, 1]} : vector<4x32xf32> to vector<4x8xf32>
    %934 = vector.extract_strided_slice %901 {offsets = [0, 16], sizes = [11, 8], strides = [1, 1]} : vector<11x32xf32> to vector<11x8xf32>
    "tpu.trace_start"() <{level = 10 : i32, message = "qd,kd->qk"}> : () -> ()
    %cst_367 = arith.constant dense<0.000000e+00> : vector<4x11xf32>
    %935 = tpu.matmul %933, %934, %cst_367 {dimension_numbers = #tpu.dot_dimension_numbers<[1], [1], [0], [0], [0, 0, 1, 0], [], []>} : vector<4x8xf32>, vector<11x8xf32>, vector<4x11xf32> -> vector<4x11xf32>
    "tpu.trace_stop"() : () -> ()
    %cst_368 = arith.constant dense<0xFF800000> : vector<4xf32>
    %936 = vector.multi_reduction <maximumf>, %935, %cst_368 [1] : vector<4x11xf32> to vector<4xf32>
    %937 = vector.shape_cast %936 : vector<4xf32> to vector<4x1xf32>
    %938 = vector.broadcast %937 : vector<4x1xf32> to vector<4x11xf32>
    %939 = arith.subf %935, %938 : vector<4x11xf32>
    %940 = math.exp %939 : vector<4x11xf32>
    %cst_369 = arith.constant dense<0.000000e+00> : vector<4xf32>
    %941 = vector.multi_reduction <add>, %940, %cst_369 [1] : vector<4x11xf32> to vector<4xf32>
    %942 = vector.shape_cast %941 : vector<4xf32> to vector<4x1xf32>
    %943 = tpu.reciprocal %942 {approx = true} : vector<4x1xf32> -> vector<4x1xf32>
    %944 = vector.broadcast %943 : vector<4x1xf32> to vector<4x11xf32>
    %945 = arith.mulf %940, %944 : vector<4x11xf32>
    %946 = vector.extract_strided_slice %902 {offsets = [0, 16], sizes = [11, 8], strides = [1, 1]} : vector<11x32xf32> to vector<11x8xf32>
    %cst_370 = arith.constant dense<0.000000e+00> : vector<4x8xf32>
    %947 = tpu.matmul %945, %946, %cst_370 {dimension_numbers = #tpu.dot_dimension_numbers<[1], [0], [0], [1], [0, 0, 1, 1], [], []>} : vector<4x11xf32>, vector<11x8xf32>, vector<4x8xf32> -> vector<4x8xf32>
    %948 = vector.extract_strided_slice %896 {offsets = [0, 24], sizes = [4, 8], strides = [1, 1]} : vector<4x32xf32> to vector<4x8xf32>
    %949 = vector.extract_strided_slice %901 {offsets = [0, 24], sizes = [11, 8], strides = [1, 1]} : vector<11x32xf32> to vector<11x8xf32>
    "tpu.trace_start"() <{level = 10 : i32, message = "qd,kd->qk"}> : () -> ()
    %cst_371 = arith.constant dense<0.000000e+00> : vector<4x11xf32>
    %950 = tpu.matmul %948, %949, %cst_371 {dimension_numbers = #tpu.dot_dimension_numbers<[1], [1], [0], [0], [0, 0, 1, 0], [], []>} : vector<4x8xf32>, vector<11x8xf32>, vector<4x11xf32> -> vector<4x11xf32>
    "tpu.trace_stop"() : () -> ()
    %cst_372 = arith.constant dense<0xFF800000> : vector<4xf32>
    %951 = vector.multi_reduction <maximumf>, %950, %cst_372 [1] : vector<4x11xf32> to vector<4xf32>
    %952 = vector.shape_cast %951 : vector<4xf32> to vector<4x1xf32>
    %953 = vector.broadcast %952 : vector<4x1xf32> to vector<4x11xf32>
    %954 = arith.subf %950, %953 : vector<4x11xf32>
    %955 = math.exp %954 : vector<4x11xf32>
    %cst_373 = arith.constant dense<0.000000e+00> : vector<4xf32>
    %956 = vector.multi_reduction <add>, %955, %cst_373 [1] : vector<4x11xf32> to vector<4xf32>
    %957 = vector.shape_cast %956 : vector<4xf32> to vector<4x1xf32>
    %958 = tpu.reciprocal %957 {approx = true} : vector<4x1xf32> -> vector<4x1xf32>
    %959 = vector.broadcast %958 : vector<4x1xf32> to vector<4x11xf32>
    %960 = arith.mulf %955, %959 : vector<4x11xf32>
    %961 = vector.extract_strided_slice %902 {offsets = [0, 24], sizes = [11, 8], strides = [1, 1]} : vector<11x32xf32> to vector<11x8xf32>
    %cst_374 = arith.constant dense<0.000000e+00> : vector<4x8xf32>
    %962 = tpu.matmul %960, %961, %cst_374 {dimension_numbers = #tpu.dot_dimension_numbers<[1], [0], [0], [1], [0, 0, 1, 1], [], []>} : vector<4x11xf32>, vector<11x8xf32>, vector<4x8xf32> -> vector<4x8xf32>
    %963 = tpu.concatenate %917, %932, %947, %962 in 1 : vector<4x8xf32>, vector<4x8xf32>, vector<4x8xf32>, vector<4x8xf32> -> vector<4x32xf32>
    %c1_375 = arith.constant 1 : index
    %c0_376 = arith.constant 0 : index
    %c0_377 = arith.constant 0 : index
    %964 = vector.load %arg23[%c1_375, %c0_376, %c0_377] : memref<2x32x32xbf16, #tpu.memory_space<vmem>>, vector<1x32x32xbf16>
    %965 = vector.shape_cast %964 : vector<1x32x32xbf16> to vector<32x32xbf16>
    %966 = arith.truncf %963 : vector<4x32xf32> to vector<4x32xbf16>
    %cst_378 = arith.constant dense<0.000000e+00> : vector<4x32xf32>
    %967 = tpu.matmul %966, %965, %cst_378 {dimension_numbers = #tpu.dot_dimension_numbers<[1], [0], [0], [1], [0, 0, 1, 1], [], []>} : vector<4x32xbf16>, vector<32x32xbf16>, vector<4x32xf32> -> vector<4x32xf32>
    %968 = arith.addf %878, %967 : vector<4x32xf32>
    %c1_379 = arith.constant 1 : index
    %c0_380 = arith.constant 0 : index
    %c0_381 = arith.constant 0 : index
    %969 = vector.load %arg24[%c1_379, %c0_380, %c0_381] : memref<2x1x32xf32, #tpu.memory_space<vmem>>, vector<1x1x32xf32>
    %970 = vector.shape_cast %969 : vector<1x1x32xf32> to vector<1x32xf32>
    %971 = arith.mulf %968, %968 : vector<4x32xf32>
    %cst_382 = arith.constant dense<0.000000e+00> : vector<4xf32>
    %972 = vector.multi_reduction <add>, %971, %cst_382 [1] : vector<4x32xf32> to vector<4xf32>
    %973 = vector.shape_cast %972 : vector<4xf32> to vector<4x1xf32>
    %cst_383 = arith.constant 3.200000e+01 : f32
    %974 = vector.broadcast %cst_383 : f32 to vector<4x1xf32>
    %975 = arith.divf %973, %974 : vector<4x1xf32>
    %cst_384 = arith.constant 9.99999997E-7 : f32
    %976 = vector.broadcast %cst_384 : f32 to vector<4x1xf32>
    %977 = arith.addf %975, %976 : vector<4x1xf32>
    %978 = math.rsqrt %977 : vector<4x1xf32>
    %979 = vector.broadcast %978 : vector<4x1xf32> to vector<4x32xf32>
    %980 = arith.mulf %968, %979 : vector<4x32xf32>
    %981 = vector.broadcast %970 : vector<1x32xf32> to vector<4x32xf32>
    %982 = arith.mulf %980, %981 : vector<4x32xf32>
    %c1_385 = arith.constant 1 : index
    %c0_386 = arith.constant 0 : index
    %c0_387 = arith.constant 0 : index
    %983 = vector.load %arg25[%c1_385, %c0_386, %c0_387] : memref<2x32x64xbf16, #tpu.memory_space<vmem>>, vector<1x32x64xbf16>
    %984 = vector.shape_cast %983 : vector<1x32x64xbf16> to vector<32x64xbf16>
    %985 = arith.truncf %982 : vector<4x32xf32> to vector<4x32xbf16>
    %cst_388 = arith.constant dense<0.000000e+00> : vector<4x64xf32>
    %986 = tpu.matmul %985, %984, %cst_388 {dimension_numbers = #tpu.dot_dimension_numbers<[1], [0], [0], [1], [0, 0, 1, 1], [], []>} : vector<4x32xbf16>, vector<32x64xbf16>, vector<4x64xf32> -> vector<4x64xf32>
    %cst_389 = arith.constant 0.000000e+00 : f32
    %987 = vector.broadcast %cst_389 : f32 to vector<4x64xf32>
    %988 = arith.maximumf %986, %987 : vector<4x64xf32>
    %c1_390 = arith.constant 1 : index
    %c0_391 = arith.constant 0 : index
    %c0_392 = arith.constant 0 : index
    %989 = vector.load %arg26[%c1_390, %c0_391, %c0_392] : memref<2x64x32xbf16, #tpu.memory_space<vmem>>, vector<1x64x32xbf16>
    %990 = vector.shape_cast %989 : vector<1x64x32xbf16> to vector<64x32xbf16>
    %991 = arith.truncf %988 : vector<4x64xf32> to vector<4x64xbf16>
    %cst_393 = arith.constant dense<0.000000e+00> : vector<4x32xf32>
    %992 = tpu.matmul %991, %990, %cst_393 {dimension_numbers = #tpu.dot_dimension_numbers<[1], [0], [0], [1], [0, 0, 1, 1], [], []>} : vector<4x64xbf16>, vector<64x32xbf16>, vector<4x32xf32> -> vector<4x32xf32>
    %993 = arith.addf %968, %992 : vector<4x32xf32>
    %c0_394 = arith.constant 0 : index
    %c0_395 = arith.constant 0 : index
    %994 = vector.load %arg27[%c0_394, %c0_395] : memref<1x32xf32, #tpu.memory_space<vmem>>, vector<1x32xf32>
    %995 = arith.mulf %993, %993 : vector<4x32xf32>
    %cst_396 = arith.constant dense<0.000000e+00> : vector<4xf32>
    %996 = vector.multi_reduction <add>, %995, %cst_396 [1] : vector<4x32xf32> to vector<4xf32>
    %997 = vector.shape_cast %996 : vector<4xf32> to vector<4x1xf32>
    %cst_397 = arith.constant 3.200000e+01 : f32
    %998 = vector.broadcast %cst_397 : f32 to vector<4x1xf32>
    %999 = arith.divf %997, %998 : vector<4x1xf32>
    %cst_398 = arith.constant 9.99999997E-7 : f32
    %1000 = vector.broadcast %cst_398 : f32 to vector<4x1xf32>
    %1001 = arith.addf %999, %1000 : vector<4x1xf32>
    %1002 = math.rsqrt %1001 : vector<4x1xf32>
    %1003 = vector.broadcast %1002 : vector<4x1xf32> to vector<4x32xf32>
    %1004 = arith.mulf %993, %1003 : vector<4x32xf32>
    %1005 = vector.broadcast %994 : vector<1x32xf32> to vector<4x32xf32>
    %1006 = arith.mulf %1004, %1005 : vector<4x32xf32>
    %cst_399 = arith.constant 0.176776692 : f32
    %1007 = vector.broadcast %cst_399 : f32 to vector<4x32xf32>
    %1008 = arith.mulf %1006, %1007 : vector<4x32xf32>
    %c0_400 = arith.constant 0 : index
    %c0_401 = arith.constant 0 : index
    %1009 = vector.load %arg28[%c0_400, %c0_401] : memref<32x64xbf16, #tpu.memory_space<vmem>>, vector<32x64xbf16>
    %1010 = arith.truncf %1008 : vector<4x32xf32> to vector<4x32xbf16>
    %cst_402 = arith.constant dense<0.000000e+00> : vector<4x64xf32>
    %1011 = tpu.matmul %1010, %1009, %cst_402 {dimension_numbers = #tpu.dot_dimension_numbers<[1], [0], [0], [1], [0, 0, 1, 1], [], []>} : vector<4x32xbf16>, vector<32x64xbf16>, vector<4x64xf32> -> vector<4x64xf32>
    %c0_403 = arith.constant 0 : index
    %c0_404 = arith.constant 0 : index
    %c0_405 = arith.constant 0 : index
    %1012 = vector.load %arg29[%c0_403, %c0_404, %c0_405] : memref<1x4x64xf32, #tpu.memory_space<vmem>>, vector<1x4x64xf32>
    %1013 = vector.shape_cast %1012 : vector<1x4x64xf32> to vector<4x64xf32>
    %1014 = vector.shape_cast %1011 : vector<4x64xf32> to vector<1x4x64xf32>
    tpu.vector_store %arg29[%c0_403, %c0_404, %c0_405], %1014 {strides = array<i32>} : memref<1x4x64xf32, #tpu.memory_space<vmem>>, vector<1x4x64xf32>,
    return
  }
  func.func @transform_0(%arg0: i32) -> (i32, i32, i32) {
    %c0_i32 = arith.constant 0 : i32
    %c0_i32_0 = arith.constant 0 : i32
    %c0_i32_1 = arith.constant 0 : i32
    return %arg0, %c0_i32, %c0_i32_0 : i32, i32, i32
  }
  func.func @transform_1(%arg0: i32) -> (i32, i32, i32) {
    %c0_i32 = arith.constant 0 : i32
    %c0_i32_0 = arith.constant 0 : i32
    %c0_i32_1 = arith.constant 0 : i32
    return %arg0, %c0_i32, %c0_i32_0 : i32, i32, i32
  }
  func.func @transform_2(%arg0: i32) -> (i32, i32, i32) {
    %c0_i32 = arith.constant 0 : i32
    %c0_i32_0 = arith.constant 0 : i32
    %c0_i32_1 = arith.constant 0 : i32
    return %arg0, %c0_i32, %c0_i32_0 : i32, i32, i32
  }
  func.func @transform_3(%arg0: i32) -> (i32, i32) {
    %c0_i32 = arith.constant 0 : i32
    %c0_i32_0 = arith.constant 0 : i32
    %c0_i32_1 = arith.constant 0 : i32
    return %c0_i32, %c0_i32_0 : i32, i32
  }
  func.func @transform_4(%arg0: i32) -> (i32, i32, i32) {
    %c0_i32 = arith.constant 0 : i32
    %c0_i32_0 = arith.constant 0 : i32
    %c0_i32_1 = arith.constant 0 : i32
    %c0_i32_2 = arith.constant 0 : i32
    return %c0_i32, %c0_i32_0, %c0_i32_1 : i32, i32, i32
  }
  func.func @transform_5(%arg0: i32) -> (i32, i32, i32) {
    %c0_i32 = arith.constant 0 : i32
    %c0_i32_0 = arith.constant 0 : i32
    %c0_i32_1 = arith.constant 0 : i32
    %c0_i32_2 = arith.constant 0 : i32
    return %c0_i32, %c0_i32_0, %c0_i32_1 : i32, i32, i32
  }
  func.func @transform_6(%arg0: i32) -> (i32, i32, i32) {
    %c0_i32 = arith.constant 0 : i32
    %c0_i32_0 = arith.constant 0 : i32
    %c0_i32_1 = arith.constant 0 : i32
    %c0_i32_2 = arith.constant 0 : i32
    return %c0_i32, %c0_i32_0, %c0_i32_1 : i32, i32, i32
  }
  func.func @transform_7(%arg0: i32) -> (i32, i32, i32) {
    %c0_i32 = arith.constant 0 : i32
    %c0_i32_0 = arith.constant 0 : i32
    %c0_i32_1 = arith.constant 0 : i32
    %c0_i32_2 = arith.constant 0 : i32
    return %c0_i32, %c0_i32_0, %c0_i32_1 : i32, i32, i32
  }
  func.func @transform_8(%arg0: i32) -> (i32, i32, i32) {
    %c0_i32 = arith.constant 0 : i32
    %c0_i32_0 = arith.constant 0 : i32
    %c0_i32_1 = arith.constant 0 : i32
    %c0_i32_2 = arith.constant 0 : i32
    return %c0_i32, %c0_i32_0, %c0_i32_1 : i32, i32, i32
  }
  func.func @transform_9(%arg0: i32) -> (i32, i32, i32) {
    %c0_i32 = arith.constant 0 : i32
    %c0_i32_0 = arith.constant 0 : i32
    %c0_i32_1 = arith.constant 0 : i32
    %c0_i32_2 = arith.constant 0 : i32
    return %c0_i32, %c0_i32_0, %c0_i32_1 : i32, i32, i32
  }
  func.func @transform_10(%arg0: i32) -> (i32, i32) {
    %c0_i32 = arith.constant 0 : i32
    %c0_i32_0 = arith.constant 0 : i32
    %c0_i32_1 = arith.constant 0 : i32
    return %c0_i32, %c0_i32_0 : i32, i32
  }
  func.func @transform_11(%arg0: i32) -> (i32, i32) {
    %c0_i32 = arith.constant 0 : i32
    %c0_i32_0 = arith.constant 0 : i32
    %c0_i32_1 = arith.constant 0 : i32
    return %c0_i32, %c0_i32_0 : i32, i32
  }
  func.func @transform_12(%arg0: i32) -> (i32, i32) {
    %c0_i32 = arith.constant 0 : i32
    %c0_i32_0 = arith.constant 0 : i32
    %c0_i32_1 = arith.constant 0 : i32
    return %c0_i32, %c0_i32_0 : i32, i32
  }
  func.func @transform_13(%arg0: i32) -> (i32, i32) {
    %c0_i32 = arith.constant 0 : i32
    %c0_i32_0 = arith.constant 0 : i32
    %c0_i32_1 = arith.constant 0 : i32
    return %c0_i32, %c0_i32_0 : i32, i32
  }
  func.func @transform_14(%arg0: i32) -> (i32, i32) {
    %c0_i32 = arith.constant 0 : i32
    %c0_i32_0 = arith.constant 0 : i32
    %c0_i32_1 = arith.constant 0 : i32
    return %c0_i32, %c0_i32_0 : i32, i32
  }
  func.func @transform_15(%arg0: i32) -> (i32, i32) {
    %c0_i32 = arith.constant 0 : i32
    %c0_i32_0 = arith.constant 0 : i32
    %c0_i32_1 = arith.constant 0 : i32
    return %c0_i32, %c0_i32_0 : i32, i32
  }
  func.func @transform_16(%arg0: i32) -> (i32, i32, i32) {
    %c0_i32 = arith.constant 0 : i32
    %c0_i32_0 = arith.constant 0 : i32
    %c0_i32_1 = arith.constant 0 : i32
    %c0_i32_2 = arith.constant 0 : i32
    return %c0_i32, %c0_i32_0, %c0_i32_1 : i32, i32, i32
  }
  func.func @transform_17(%arg0: i32) -> (i32, i32, i32) {
    %c0_i32 = arith.constant 0 : i32
    %c0_i32_0 = arith.constant 0 : i32
    %c0_i32_1 = arith.constant 0 : i32
    %c0_i32_2 = arith.constant 0 : i32
    return %c0_i32, %c0_i32_0, %c0_i32_1 : i32, i32, i32
  }
  func.func @transform_18(%arg0: i32) -> (i32, i32, i32) {
    %c0_i32 = arith.constant 0 : i32
    %c0_i32_0 = arith.constant 0 : i32
    %c0_i32_1 = arith.constant 0 : i32
    %c0_i32_2 = arith.constant 0 : i32
    return %c0_i32, %c0_i32_0, %c0_i32_1 : i32, i32, i32
  }
  func.func @transform_19(%arg0: i32) -> (i32, i32, i32) {
    %c0_i32 = arith.constant 0 : i32
    %c0_i32_0 = arith.constant 0 : i32
    %c0_i32_1 = arith.constant 0 : i32
    %c0_i32_2 = arith.constant 0 : i32
    return %c0_i32, %c0_i32_0, %c0_i32_1 : i32, i32, i32
  }
  func.func @transform_20(%arg0: i32) -> (i32, i32, i32) {
    %c0_i32 = arith.constant 0 : i32
    %c0_i32_0 = arith.constant 0 : i32
    %c0_i32_1 = arith.constant 0 : i32
    %c0_i32_2 = arith.constant 0 : i32
    return %c0_i32, %c0_i32_0, %c0_i32_1 : i32, i32, i32
  }
  func.func @transform_21(%arg0: i32) -> (i32, i32, i32) {
    %c0_i32 = arith.constant 0 : i32
    %c0_i32_0 = arith.constant 0 : i32
    %c0_i32_1 = arith.constant 0 : i32
    %c0_i32_2 = arith.constant 0 : i32
    return %c0_i32, %c0_i32_0, %c0_i32_1 : i32, i32, i32
  }
  func.func @transform_22(%arg0: i32) -> (i32, i32, i32) {
    %c0_i32 = arith.constant 0 : i32
    %c0_i32_0 = arith.constant 0 : i32
    %c0_i32_1 = arith.constant 0 : i32
    %c0_i32_2 = arith.constant 0 : i32
    return %c0_i32, %c0_i32_0, %c0_i32_1 : i32, i32, i32
  }
  func.func @transform_23(%arg0: i32) -> (i32, i32, i32) {
    %c0_i32 = arith.constant 0 : i32
    %c0_i32_0 = arith.constant 0 : i32
    %c0_i32_1 = arith.constant 0 : i32
    %c0_i32_2 = arith.constant 0 : i32
    return %c0_i32, %c0_i32_0, %c0_i32_1 : i32, i32, i32
  }
  func.func @transform_24(%arg0: i32) -> (i32, i32, i32) {
    %c0_i32 = arith.constant 0 : i32
    %c0_i32_0 = arith.constant 0 : i32
    %c0_i32_1 = arith.constant 0 : i32
    %c0_i32_2 = arith.constant 0 : i32
    return %c0_i32, %c0_i32_0, %c0_i32_1 : i32, i32, i32
  }
  func.func @transform_25(%arg0: i32) -> (i32, i32, i32) {
    %c0_i32 = arith.constant 0 : i32
    %c0_i32_0 = arith.constant 0 : i32
    %c0_i32_1 = arith.constant 0 : i32
    %c0_i32_2 = arith.constant 0 : i32
    return %c0_i32, %c0_i32_0, %c0_i32_1 : i32, i32, i32
  }
  func.func @transform_26(%arg0: i32) -> (i32, i32) {
    %c0_i32 = arith.constant 0 : i32
    %c0_i32_0 = arith.constant 0 : i32
    %c0_i32_1 = arith.constant 0 : i32
    return %c0_i32, %c0_i32_0 : i32, i32
  }
  func.func @transform_27(%arg0: i32) -> (i32, i32) {
    %c0_i32 = arith.constant 0 : i32
    %c0_i32_0 = arith.constant 0 : i32
    %c0_i32_1 = arith.constant 0 : i32
    return %c0_i32, %c0_i32_0 : i32, i32
  }
  func.func @transform_28(%arg0: i32) -> (i32, i32, i32) {
    %c0_i32 = arith.constant 0 : i32
    %c0_i32_0 = arith.constant 0 : i32
    %c0_i32_1 = arith.constant 0 : i32
    return %arg0, %c0_i32, %c0_i32_0 : i32, i32, i32
  }
}

</mosaic_0001>

<bundles_post_ra>
// kernel: drive_vlm_t5_forward.1
= control target key start
LH: loop header
LB: loop body
LE: loop exit
PB: predicated region body
PF: predicated region fallthrough
CT: control target
= control target key end

     0   :  { %s14271_s0 = inlined_call_operand.vmem [shape: f32[2,11,32], index: 0, kind: input, shape index: {}]   ;;  %s14272_s1 = inlined_call_operand.vmem [shape: f32[2,8,192], index: 1, kind: input, shape index: {}]   ;;  %s14273_s2 = inlined_call_operand.vmem [shape: f32[2,4,32], index: 2, kind: input, shape index: {}]   ;;  %s14274_s3 = inlined_call_operand.vmem [shape: f32[2,32], index: 3, kind: input, shape index: {}]   ;;  %s14275_s4 = inlined_call_operand.vmem [shape: f32[2,1,32], index: 4, kind: input, shape index: {}]   ;;  %s14276_s5 = inlined_call_operand.vmem [shape: bf16[2,32,96], index: 5, kind: input, shape index: {}]   ;;  %s14277_s6 = inlined_call_operand.vmem [shape: bf16[2,32,32], index: 6, kind: input, shape index: {}]   ;;  %s14278_s7 = inlined_call_operand.vmem [shape: f32[2,1,32], index: 7, kind: input, shape index: {}]   ;;  %s14279_s8 = inlined_call_operand.vmem [shape: bf16[2,32,64], index: 8, kind: input, shape index: {}]   ;;  %s14280_s9 = inlined_call_operand.vmem [shape: bf16[2,64,32], index: 9, kind: input, shape index: {}]   ;;  %s14281_s10 = inlined_call_operand.vmem [shape: f32[1,32], index: 10, kind: input, shape index: {}]   ;;  %s14282_s11 = inlined_call_operand.vmem [shape: bf16[192,32], index: 11, kind: input, shape index: {}]   ;;  %s14283_s12 = inlined_call_operand.vmem [shape: f32[1,32], index: 12, kind: input, shape index: {}]   ;;  %s14284_s13 = inlined_call_operand.vmem [shape: bf16[32,32], index: 13, kind: input, shape index: {}]   ;;  %s14285_s14 = inlined_call_operand.vmem [shape: bf16[32,64], index: 14, kind: input, shape index: {}]   ;;  %s14286_s15 = inlined_call_operand.vmem [shape: bf16[32,32], index: 15, kind: input, shape index: {}]   ;;  %s14287_s16 = inlined_call_operand.vmem [shape: f32[2,1,32], index: 16, kind: input, shape index: {}]   ;;  %s14288_s17 = inlined_call_operand.vmem [shape: bf16[2,32,96], index: 17, kind: input, shape index: {}]   ;;  %s14289_s18 = inlined_call_operand.vmem [shape: bf16[2,32,32], index: 18, kind: input, shape index: {}]   ;;  %s14290_s19 = inlined_call_operand.vmem [shape: f32[2,1,32], index: 19, kind: input, shape index: {}]   ;;  %s14291_s20 = inlined_call_operand.vmem [shape: bf16[2,32,32], index: 20, kind: input, shape index: {}]   ;;  %s14292_s21 = inlined_call_operand.vmem [shape: bf16[2,32,64], index: 21, kind: input, shape index: {}]   ;;  %s14293_s22 = inlined_call_operand.vmem [shape: bf16[2,32,32], index: 22, kind: input, shape index: {}]   ;;  %s14294_s23 = inlined_call_operand.vmem [shape: f32[2,1,32], index: 23, kind: input, shape index: {}]   ;;  %s14295_s24 = inlined_call_operand.vmem [shape: bf16[2,32,64], index: 24, kind: input, shape index: {}]   ;;  %s14296_s25 = inlined_call_operand.vmem [shape: bf16[2,64,32], index: 25, kind: input, shape index: {}]   ;;  %s14297_s26 = inlined_call_operand.vmem [shape: f32[1,32], index: 26, kind: input, shape index: {}]   ;;  %s14298_s27 = inlined_call_operand.vmem [shape: bf16[32,64], index: 27, kind: input, shape index: {}]   ;;  %s14299_s28 = inlined_call_operand.vmem [shape: f32[2,4,64], index: 28, kind: output, shape index: {}]  }
   0x1   :  { %14363 = sst [smem:[#allocation4_spill]] %s14271_s0 }
   0x2   :  { %14364 = sst [smem:[#allocation5_spill]] %s14272_s1 }
   0x3   :  { %14365 = sst [smem:[#allocation6_spill]] %s14273_s2 }
   0x4   :  { %14366 = sst [smem:[#allocation7_spill]] %s14274_s3 }
   0x5   :  { %14367 = sst [smem:[#allocation8_spill]] %s14275_s4 }
   0x6   :  { %14368 = sst [smem:[#allocation9_spill]] %s14276_s5 }
   0x7   :  { %14369 = sst [smem:[#allocation10_spill]] %s14277_s6 }
   0x8   :  { %14370 = sst [smem:[#allocation11_spill]] %s14278_s7 }
   0x9   :  { %14371 = sst [smem:[#allocation12_spill]] %s14279_s8  ;;  %s12613_s8 = smov 0  }
   0xa   :  { %14372 = sst [smem:[#allocation13_spill]] %s14280_s9 }
   0xb   :  { %14373 = sst [smem:[#allocation14_spill]] %s14281_s10 }
   0xc   :  { %14374 = sst [smem:[#allocation15_spill]] %s14282_s11 }
   0xd   :  { %14375 = sst [smem:[#allocation16_spill]] %s14283_s12 }
   0xe   :  { %14376 = sst [smem:[#allocation17_spill]] %s14284_s13 }
   0xf   :  { %14377 = sst [smem:[#allocation18_spill]] %s14285_s14 }
  0x10   :  { %14378 = sst [smem:[#allocation19_spill]] %s14286_s15 }
  0x11   :  { %14379 = sst [smem:[#allocation20_spill]] %s14287_s16 }
  0x12   :  { %14380 = sst [smem:[#allocation21_spill]] %s14288_s17 }
  0x13   :  { %14381 = sst [smem:[#allocation22_spill]] %s14289_s18 }
  0x14   :  { %14382 = sst [smem:[#allocation23_spill]] %s14290_s19 }
  0x15   :  { %14383 = sst [smem:[#allocation24_spill]] %s14291_s20 }
  0x16   :  { %14384 = sst [smem:[#allocation25_spill]] %s14292_s21 }
  0x17   :  { %14385 = sst [smem:[#allocation26_spill]] %s14293_s22 }
  0x18   :  { %14386 = sst [smem:[#allocation27_spill]] %s14294_s23 }
  0x19   :  { %14387 = sst [smem:[#allocation28_spill]] %s14295_s24 }
  0x1a   :  { %14388 = sst [smem:[#allocation29_spill]] %s14296_s25 }
  0x1b   :  { %14389 = sst [smem:[#allocation30_spill]] %s14297_s26 }
  0x1c   :  { %14390 = sst [smem:[#allocation31_spill]] %s14298_s27 }
  0x1d   :  { %14391 = sst [smem:[#allocation32_spill]] %s14299_s28 }
  0x1e LB: > { %14392 = sst [smem:[#allocation2_spill]] %s12449_s8  ;;  %s10479_s5 = sadd.s32 4294967295, %s12449_s8   ;;  %s12449_s8 = sphi %s12613_s8, %s38_s8  }
  0x1f   : > { %p10483_p0 = scmp.ge.s32.totalorder %s12449_s8, 1  ;;  %p781_p1 = scmp.lt.s32.totalorder %s12449_s8, 3 }
  0x21   : > { %p782_p2 = pnand %p10483_p0, %p781_p1 }
  0x23   : > { %785 = sbr.rel (%p782_p2) target bundleno = 21459 (0x53d3), region = 132 }
  0x28   : > { %p863_p3 = scmp.lt.s32.totalorder %s10479_s5, 1  ;;  %vm887_vm0 = vcmask 261120   ;;  %s14394_s6 = sld [smem:[#allocation4_spill]]  ;;  %vm891_vm1 = vcmask 256000   ;;  %v12451_v8 = vmov 0.0   ;;  %vm12452_vm2 = vmmov 0  }
  0x29   : > { %s14395_s29 = sld [smem:[#allocation9_spill]]  ;;  %11252 = vmatprep.subr.bf16.mxu0 %v12451_v8  ;;  %11256 = vmatprep.mubr.msk.bf16.mxu0 %vm12452_vm2, %v12451_v8  ;;  %vm979_vm3 = vcmask 64512   ;;  %s14335_s30 = smov 88   ;;  %vm1067_vm4 = vcmask 83968   ;;  %vm1063_vm5 = vcmask 89088   ;;  %vm1098_vm6 = vcmask 1042432  }
  0x2a   : > { %s14448_s5 = smov (!%p863_p3, %s10479_s5), 1  ;;  %s14396_s4 = sld [smem:[#allocation8_spill]]  ;;  %vm1805_vm7 = vcmask 130048   ;;  %vm1808_vm8 = vcmask 195584   ;;  %vm1995_vm9 = vcmask 523264   ;;  %vm3567_vm10 = vcmask 59392  }
  0x2b   : > { %14393 = sst [smem:[#allocation3_spill]] %s14448_s5  ;;  %s14308_s9 = sshll.u32 %s14448_s5, 4  ;;  %vm6559_vm11 = vcmask 257024   ;;  %vm6717_vm13 = vcmask 27648   ;;  %vm6735_vm14 = vcmask 1043456   ;;  %vm6731_vm15 = vcmask 31744  }
  0x2c   : > { %s14333_s3 = smov 96   ;;  %s14327_s0 = smov 80  }
  0x2d   : > { %s14323_s11 = smov 64   ;;  %s14321_s2 = smov 56  }
  0x2e   : > { %s867_s10 = scalar_lea.vmem %s14394_s6, %s14308_s9  ;;  %s14331_s6 = smov 120  }
  0x2f   : > { %v12629_v0 = vld [vmem:[%s867_s10] sm:$0xff]  ;;  %v12631_v1 = vld [vmem:[%s867_s10 + $0x8] sm:$0x7]  ;;  %s14329_s10 = smov 112   ;;  %s14319_s7 = smov 48  }
  0x30   : > { %v885_v2 = vmul.f32 %v12629_v0, %v12629_v0  ;;  %v886_v3 = vmul.f32 %v12631_v1, %v12631_v1  ;;  %v12089_v6 = vld [vmem:[%s14395_s29 + $0x8] sm:$0xff]   ;;  %v12090_v7 = vld [vmem:[%s14395_s29] sm:$0xff]   ;;  %s14311_s12 = smov 72   ;;  %s14309_s1 = smov 104  }
  0x31   : > { %11253 = vmatpush3.bf16.msra.mxu0 %v12089_v6  ;;  %v10490_v18 = vld [vmem:[%s14396_s4] ss:$0 sm:$0xff]  ;;  %s14317_s9 = smov 40   ;;  %s14408_s8 = smov 48  }
  0x32   : > { %v888_v4 = vsel %vm887_vm0, %v885_v2, 0.0  ;;  %v892_v5 = vsel %vm891_vm1, %v886_v3, 0.0  ;;  %11254 = vmatprep.subr.bf16.mxu0 %v12451_v8  ;;  %s14409_s28 = smov 72   ;;  %s14410_s26 = smov 104  }
  0x33   : > { %889 = vadd.xlane.f32.xlu0 %v888_v4  ;;  %s14411_s27 = smov 40   ;;  %s14412_s23 = smov 8  }
  0x34   : > { %s14413_s25 = smov 16   ;;  %s14414_s21 = smov 24  }
  0x35   : > { %11255 = vmatpush3.bf16.msra.mxu0 %v12090_v7  ;;  %s14415_s16 = sld [smem:[#allocation15_spill]]  ;;  %s14416_s17 = sshll.u32 %s14448_s5, 4 }
  0x36   : > { %s14418_s13 = sld [smem:[#allocation17_spill]] }
  0x37   : > { %893 = vadd.xlane.f32.xlu0 %v892_v5  ;;  %s14420_s22 = sld [smem:[#allocation16_spill]] }
  0x38   : > { %s14421_s14 = sld [smem:[#allocation18_spill]] }
  0x39   : > { %s14422_s15 = sld [smem:[#allocation19_spill]] }
  0x3a   : > { %s14426_s20 = sld [smem:[#allocation12_spill]] }
  0x3b   : > { %s14437_s19 = sld [smem:[#allocation26_spill]] }
  0xbc   : > { %v890_v9 = vpop.xlane.xlu0 %889 }
  0xbd   : > { %v896_v10 = vmul.f32 0.03125, %v890_v9 }
  0xbf   : > { %v898_v11 = vadd.f32 1e-06, %v896_v10 }
  0xc0   : > { %v894_v12 = vpop.xlane.xlu0 %893 }
  0xc1   : > { %12181 = vrsqrt.f32 %v898_v11  ;;  %v897_v13 = vmul.f32 0.03125, %v894_v12 }
  0xc3   : > { %v899_v14 = vadd.f32 1e-06, %v897_v13 }
  0xc5   : > { %12183 = vrsqrt.f32 %v899_v14 }
  0xce   : > { %v12182_v15 = vpop.eup %12181 }
  0xcf   : > { %v902_v16 = vmul.f32 %v12182_v15, %v12629_v0 }
  0xd1   : > { %v910_v20 = vmul.f32 %v10490_v18, %v902_v16 }
  0xd2   : > { %v12184_v17 = vpop.eup %12183 }
  0xd3   : > { %v903_v19 = vmul.f32 %v12184_v17, %v12631_v1 }
  0xd5   : > { %v911_v21 = vmul.f32 %v10490_v18, %v903_v19 }
  0xd7   : > { %v916_v22 = vpack.c.bf16 %v911_v21, %v910_v20 }
  0xd9   : > { %11257 = vmatmul.mubr.msk.bf16.vlgmr.msra.gmra.mxu0 %vm887_vm0, %v916_v22 }
 0x199   : > { %v12655_v23 = vpop.f32.mrf.mxu0 }
 0x19a   : > { %1180 = vrot.lane.b32.xlu1 %v12655_v23, %s14335_s30  ;;  %975 = vrot.lane.b32.xlu0 %v12655_v23, %s14333_s3 }
 0x19b   : > { %11264 = vmatprep.mubr.msk.f32.mxu1 %vm979_vm3, %v12655_v23  ;;  %v11258_v24 = vpop.f32.mrf.mxu0 }
 0x19d   : > { %v12663_v25 = vpop.f32.mrf.mxu0 }
 0x19e   : > { %1176 = vrot.lane.b32.xlu1 %v12655_v23, %s14331_s6  ;;  %1379 = vrot.lane.b32.xlu0 %v12663_v25, %s14329_s10 }
 0x19f   : > { %v11259_v26 = vpop.f32.mrf.mxu0 }
 0x1a2   : > { %977 = vrot.lane.b32.xlu1 %v12663_v25, %s14333_s3  ;;  %s14405_s3 = smov 80  }
 0x1a6   : > { %1182 = vrot.lane.b32.xlu1 %v12663_v25, %s14335_s30  ;;  %s14400_s30 = sld [smem:[#allocation11_spill]] }
 0x1aa   : > { %1383 = vrot.lane.b32.xlu1 %v12663_v25, %s14327_s0 }
 0x1ae   : > { %1178 = vrot.lane.b32.xlu1 %v12663_v25, %s14331_s6  ;;  %s14399_s6 = sld [smem:[#allocation13_spill]] }
 0x1b2   : > { %1381 = vrot.lane.b32.xlu1 %v12655_v23, %s14327_s0  ;;  %s14404_s0 = smov 112  }
 0x1b6   : > { %1377 = vrot.lane.b32.xlu1 %v12655_v23, %s14329_s10  ;;  %s14403_s10 = smov 120  }
 0x20c   : > { %v1181_v27 = vpop.permute.xlu1 %1180  ;;  %v976_v30 = vpop.permute.xlu0 %975 }
 0x210   : > { %v1177_v28 = vpop.permute.xlu1 %1176  ;;  %v1380_v36 = vpop.permute.xlu0 %1379 }
 0x211   : > { %11278 = vmatprep.mubr.msk.f32.mxu0 %vm979_vm3, %v1177_v28 }
 0x214   : > { %v978_v29 = vpop.permute.xlu1 %977 }
 0x215   : > { %11260 = vmatprep.subr.msk.mxu1 %vm979_vm3, %v978_v29 }
 0x216   : > { %11261 = vmatpush3.xpose.msk.msra.mxu1 %vm979_vm3, %v978_v29 }
 0x217   : > { %11262 = vmatprep.subr.msk.mxu1 %vm979_vm3, %v976_v30 }
 0x218   : > { %v1183_v31 = vpop.permute.xlu1 %1182 }
 0x219   : > { %11274 = vmatprep.subr.msk.mxu0 %vm979_vm3, %v1183_v31 }
 0x21a   : > { %11263 = vmatpush3.xpose.msk.msra.mxu1 %vm979_vm3, %v976_v30  ;;  %11275 = vmatpush3.xpose.msk.msra.mxu0 %vm979_vm3, %v1183_v31 }
 0x21b   : > { %11276 = vmatprep.subr.msk.mxu0 %vm979_vm3, %v1181_v27 }
 0x21c   : > { %v1384_v32 = vpop.permute.xlu1 %1383 }
 0x21d   : > { %11265 = vmatmul.mubr.msk.f32.vlgmr.msra.gmra.mxu1 %vm979_vm3, %v12663_v25 }
 0x21e   : > { %11277 = vmatpush3.xpose.msk.msra.mxu0 %vm979_vm3, %v1181_v27 }
 0x21f   : > { %11288 = vmatprep.subr.msk.mxu0 %vm979_vm3, %v1384_v32 }
 0x220   : > { %v1179_v33 = vpop.permute.xlu1 %1178 }
 0x221   : > { %11279 = vmatmul.mubr.msk.f32.vlgmr.msra.gmra.mxu0 %vm979_vm3, %v1179_v33 }
 0x222   : > { %11289 = vmatpush3.xpose.msk.msra.mxu0 %vm979_vm3, %v1384_v32 }
 0x224   : > { %v1382_v34 = vpop.permute.xlu1 %1381 }
 0x225   : > { %11290 = vmatprep.subr.msk.mxu0 %vm979_vm3, %v1382_v34 }
 0x226   : > { %11291 = vmatpush3.xpose.msk.msra.mxu0 %vm979_vm3, %v1382_v34 }
 0x228   : > { %v1378_v35 = vpop.permute.xlu1 %1377 }
 0x229   : > { %11292 = vmatprep.mubr.msk.f32.mxu0 %vm979_vm3, %v1378_v35 }
 0x22a   : > { %11293 = vmatmul.mubr.msk.f32.vlgmr.msra.gmra.mxu0 %vm979_vm3, %v1380_v36 }
 0x2dd   : > { %v11266_v37 = vpop.f32.mrf.mxu1 }
 0x2de   : > { %v1068_v38 = vsel %vm1067_vm4, %v11266_v37, -inf }
 0x2df   : > { %1069 = vmax.xlane.f32.xlu0 %v1068_v38  ;;  %v1054_v39 = vpop.f32.mrf.mxu1 }
 0x2e0   : > { %v1064_v40 = vsel %vm1063_vm5, %v1054_v39, -inf }
 0x2e1   : > { %1065 = vmax.xlane.f32.xlu1 %v1064_v40  ;;  %v11280_v41 = vpop.f32.mrf.mxu0 }
 0x2e2   : > { %v1270_v43 = vsel %vm1067_vm4, %v11280_v41, -inf }
 0x2e3   : > { %v1258_v42 = vpop.f32.mrf.mxu0 }
 0x2e4   : > { %v1267_v44 = vsel %vm1063_vm5, %v1258_v42, -inf }
 0x2e5   : > { %1271 = vmax.xlane.f32.xlu1 %v1270_v43  ;;  %1268 = vmax.xlane.f32.xlu0 %v1267_v44 }
 0x2ea   : > { %v11294_v45 = vpop.f32.mrf.mxu0 }
 0x2eb   : > { %v1471_v46 = vsel %vm1067_vm4, %v11294_v45, -inf }
 0x2ec   : > { %1472 = vmax.xlane.f32.xlu1 %v1471_v46  ;;  %v1459_v47 = vpop.f32.mrf.mxu0 }
 0x2ed   : > { %v1468_v48 = vsel %vm1063_vm5, %v1459_v47, -inf }
 0x2ee   : > { %1469 = vmax.xlane.f32.xlu0 %v1468_v48 }
 0x2fd   : > { %1087 = vrot.lane.b32.xlu1 %v12655_v23, %s14323_s11 }
 0x301   : > { %1291 = vrot.lane.b32.xlu1 %v12663_v25, %s14321_s2 }
 0x304   : > { %1089 = vrot.lane.b32.xlu0 %v12663_v25, %s14323_s11  ;;  %s14325_s11 = smov 24  }
 0x305   : > { %1492 = vrot.lane.b32.xlu1 %v12663_v25, %s14319_s7 }
 0x308   : > { %1289 = vrot.lane.b32.xlu0 %v12655_v23, %s14321_s2  ;;  %s14407_s2 = smov 56  }
 0x368   : > { %v1070_v49 = vpop.xlane.xlu0 %1069 }
 0x369   : > { %v1072_v50 = vsub.f32 %v11266_v37, %v1070_v49 }
 0x36a   : > { %v1066_v51 = vpop.xlane.xlu1 %1065 }
 0x36b   : > { %v1075_v52 = vmul.f32 1.442695, %v1072_v50  ;;  %v1071_v53 = vsub.f32 %v1054_v39, %v1066_v51 }
 0x36d   : > { %12185 = vpow2.f32 %v1075_v52  ;;  %v1073_v54 = vmul.f32 1.442695, %v1071_v53 }
 0x36e   : > { %v1272_v55 = vpop.xlane.xlu1 %1271  ;;  %v1269_v56 = vpop.xlane.xlu0 %1268 }
 0x36f   : > { %12187 = vpow2.f32 %v1073_v54  ;;  %v1274_v57 = vsub.f32 %v11280_v41, %v1272_v55  ;;  %v1273_v58 = vsub.f32 %v1258_v42, %v1269_v56 }
 0x371   : > { %v1277_v59 = vmul.f32 1.442695, %v1274_v57  ;;  %v1275_v60 = vmul.f32 1.442695, %v1273_v58 }
 0x373   : > { %12189 = vpow2.f32 %v1277_v59 }
 0x374   : > { %12191 = vpow2.f32 %v1275_v60 }
 0x375   : > { %v1473_v61 = vpop.xlane.xlu1 %1472 }
 0x376   : > { %v1475_v62 = vsub.f32 %v11294_v45, %v1473_v61 }
 0x377   : > { %v1470_v63 = vpop.xlane.xlu0 %1469 }
 0x378   : > { %v1478_v2 = vmul.f32 1.442695, %v1475_v62  ;;  %v1474_v3 = vsub.f32 %v1459_v47, %v1470_v63 }
 0x379   : > { %v1088_v4 = vpop.permute.xlu1 %1087 }
 0x37a   : > { %v12186_v5 = vpop.eup %12185  ;;  %12193 = vpow2.f32 %v1478_v2  ;;  %v1476_v6 = vmul.f32 1.442695, %v1474_v3 }
 0x37b   : > { %v1090_v7 = vpop.permute.xlu0 %1089  ;;  %v1080_v9 = vsel %vm1067_vm4, %v12186_v5, 0.0 }
 0x37c   : > { %v12188_v10 = vpop.eup %12187  ;;  %12195 = vpow2.f32 %v1476_v6  ;;  %1081 = vadd.xlane.f32.xlu1 %v1080_v9  ;;  %11267 = vmatprep.subr.msk.mxu1 %vm1098_vm6, %v1090_v7 }
 0x37d   : > { %11268 = vmatpush3.msk.msra.mxu1 %vm1098_vm6, %v1090_v7  ;;  %v1077_v11 = vsel %vm1063_vm5, %v12188_v10, 0.0  ;;  %v1292_v12 = vpop.permute.xlu1 %1291 }
 0x37e   : > { %1078 = vadd.xlane.f32.xlu0 %v1077_v11  ;;  %11269 = vmatprep.subr.mxu1 %v1088_v4 }
 0x37f   : > { %11270 = vmatpush3.msra.mxu1 %v1088_v4  ;;  %v1290_v22 = vpop.permute.xlu0 %1289 }
 0x380   : > { %v12190_v13 = vpop.eup %12189  ;;  %11281 = vmatprep.subr.msk.mxu1 %vm1098_vm6, %v1292_v12 }
 0x381   : > { %v12192_v14 = vpop.eup %12191  ;;  %v1282_v15 = vsel %vm1067_vm4, %v12190_v13, 0.0  ;;  %v1493_v21 = vpop.permute.xlu1 %1492 }
 0x382   : > { %1283 = vadd.xlane.f32.xlu1 %v1282_v15  ;;  %v1279_v16 = vsel %vm1063_vm5, %v12192_v14, 0.0 }
 0x383   : > { %1280 = vadd.xlane.f32.xlu0 %v1279_v16 }
 0x387   : > { %v12194_v17 = vpop.eup %12193 }
 0x388   : > { %v1483_v18 = vsel %vm1067_vm4, %v12194_v17, 0.0 }
 0x389   : > { %v12196_v19 = vpop.eup %12195  ;;  %1484 = vadd.xlane.f32.xlu1 %v1483_v18 }
 0x38a   : > { %v1480_v20 = vsel %vm1063_vm5, %v12196_v19, 0.0 }
 0x38b   : > { %1481 = vadd.xlane.f32.xlu0 %v1480_v20 }
 0x39a   : > { %1584 = vrot.lane.b32.xlu1 %v12663_v25, %s14311_s12 }
 0x39e   : > { %1578 = vrot.lane.b32.xlu1 %v12655_v23, %s14309_s1 }
 0x3a1   : > { %1490 = vrot.lane.b32.xlu0 %v12655_v23, %s14319_s7  ;;  %s14401_s7 = smov 88  }
 0x3a5   : > { %1582 = vrot.lane.b32.xlu0 %v12655_v23, %s14311_s12  ;;  %s14313_s12 = smov 16  }
 0x3a9   : > { %1580 = vrot.lane.b32.xlu0 %v12663_v25, %s14309_s1  ;;  %s14315_s1 = smov 8  }
 0x405   : > { %v1082_v24 = vpop.xlane.xlu1 %1081 }
 0x406   : > { %12197 = vrcp.f32 %v1082_v24 }
 0x407   : > { %v1079_v26 = vpop.xlane.xlu0 %1078 }
 0x408   : > { %12199 = vrcp.f32 %v1079_v26 }
 0x40b   : > { %v1284_v27 = vpop.xlane.xlu1 %1283 }
 0x40c   : > { %12201 = vrcp.f32 %v1284_v27  ;;  %v1281_v28 = vpop.xlane.xlu0 %1280 }
 0x40d   : > { %12203 = vrcp.f32 %v1281_v28 }
 0x412   : > { %v1485_v29 = vpop.xlane.xlu1 %1484 }
 0x413   : > { %v12198_v30 = vpop.eup %12197  ;;  %12205 = vrcp.f32 %v1485_v29 }
 0x414   : > { %v1482_v31 = vpop.xlane.xlu0 %1481  ;;  %v1086_v34 = vmul.f32 %v12198_v30, %v12186_v5 }
 0x415   : > { %v12200_v32 = vpop.eup %12199  ;;  %12207 = vrcp.f32 %v1482_v31 }
 0x416   : > { %v1085_v33 = vmul.f32 %v12200_v32, %v12188_v10  ;;  %v1585_v40 = vpop.permute.xlu1 %1584 }
 0x418   : > { %11271 = vmatprep.mubr.msk.f32.mxu1 %vm1063_vm5, %v1085_v33  ;;  %v1491_v39 = vpop.permute.xlu0 %1490 }
 0x419   : > { %v12202_v35 = vpop.eup %12201  ;;  %11272 = vmatmul.mubr.msk.f32.vlgmr.msra.gmra.mxu1 %vm1063_vm5, %v1086_v34 }
 0x41a   : > { %v12204_v36 = vpop.eup %12203  ;;  %11282 = vmatpush3.msk.msra.mxu1 %vm1098_vm6, %v1292_v12  ;;  %v1288_v37 = vmul.f32 %v12202_v35, %v12190_v13  ;;  %v1579_v45 = vpop.permute.xlu1 %1578 }
 0x41b   : > { %11283 = vmatprep.subr.mxu1 %v1290_v22  ;;  %v1287_v38 = vmul.f32 %v12204_v36, %v12192_v14 }
 0x41c   : > { %11284 = vmatpush3.msra.mxu1 %v1290_v22  ;;  %v1583_v46 = vpop.permute.xlu0 %1582 }
 0x41d   : > { %11285 = vmatprep.mubr.msk.f32.mxu1 %vm1063_vm5, %v1287_v38  ;;  %11295 = vmatprep.subr.msk.mxu1 %vm1098_vm6, %v1493_v21 }
 0x41e   : > { %11286 = vmatmul.mubr.msk.f32.vlgmr.msra.gmra.mxu1 %vm1063_vm5, %v1288_v37 }
 0x41f   : > { %11296 = vmatpush3.msk.msra.mxu1 %vm1098_vm6, %v1493_v21 }
 0x420   : > { %11297 = vmatprep.subr.mxu1 %v1491_v39  ;;  %v12206_v41 = vpop.eup %12205  ;;  %v1581_v47 = vpop.permute.xlu0 %1580 }
 0x421   : > { %11298 = vmatpush3.msra.mxu1 %v1491_v39  ;;  %v1489_v44 = vmul.f32 %v12206_v41, %v12194_v17 }
 0x422   : > { %v12208_v42 = vpop.eup %12207  ;;  %11302 = vmatprep.subr.msk.mxu1 %vm979_vm3, %v1585_v40 }
 0x423   : > { %v1488_v43 = vmul.f32 %v12208_v42, %v12196_v19 }
 0x425   : > { %11299 = vmatprep.mubr.msk.f32.mxu1 %vm1063_vm5, %v1488_v43 }
 0x426   : > { %11300 = vmatmul.mubr.msk.f32.vlgmr.msra.gmra.mxu1 %vm1063_vm5, %v1489_v44 }
 0x427   : > { %11303 = vmatpush3.xpose.msk.msra.mxu1 %vm979_vm3, %v1585_v40  ;;  %11306 = vmatprep.mubr.msk.f32.mxu1 %vm979_vm3, %v1579_v45 }
 0x428   : > { %11304 = vmatprep.subr.msk.mxu1 %vm979_vm3, %v1583_v46 }
 0x42b   : > { %11305 = vmatpush3.xpose.msk.msra.mxu1 %vm979_vm3, %v1583_v46 }
 0x42c   : > { %11324 = vmatprep.subr.bf16.mxu1 %v12451_v8 }
 0x42e   : > { %11307 = vmatmul.mubr.msk.f32.vlgmr.msra.gmra.mxu1 %vm979_vm3, %v1581_v47 }
 0x42f   : > { %11328 = vmatprep.mubr.msk.bf16.mxu1 %vm12452_vm2, %v12451_v8 }
 0x4d9   : > { %v12752_v48 = vpop.f32.mrf.mxu1 }
 0x4db   : > { %v12754_v49 = vpop.f32.mrf.mxu1 }
 0x4de   : > { %v11287_v50 = vpop.f32.mrf.mxu1 }
 0x4e0   : > { %v1368_v51 = vpop.f32.mrf.mxu1 }
 0x4e1   : > { %v12029_v6 = vpack.i.bf16 %v11287_v50, %v1368_v51 }
 0x4e6   : > { %v11301_v52 = vpop.f32.mrf.mxu1 }
 0x4e8   : > { %v1569_v53 = vpop.f32.mrf.mxu1 }
 0x4e9   : > { %v12034_v7 = vpack.i.bf16 %v11301_v52, %v1569_v53 }
 0x4ee   : > { %v11308_v54 = vpop.f32.mrf.mxu1 }
 0x4ef   : > { %v1672_v55 = vsel %vm1067_vm4, %v11308_v54, -inf }
 0x4f0   : > { %1673 = vmax.xlane.f32.xlu0 %v1672_v55  ;;  %v1660_v56 = vpop.f32.mrf.mxu1 }
 0x4f1   : > { %v1669_v57 = vsel %vm1063_vm5, %v1660_v56, -inf }
 0x4f2   : > { %1670 = vmax.xlane.f32.xlu1 %v1669_v57 }
 0x579   : > { %v1674_v58 = vpop.xlane.xlu0 %1673 }
 0x57a   : > { %v1676_v59 = vsub.f32 %v11308_v54, %v1674_v58 }
 0x57b   : > { %v1671_v60 = vpop.xlane.xlu1 %1670 }
 0x57c   : > { %v1679_v61 = vmul.f32 1.442695, %v1676_v59  ;;  %v1675_v62 = vsub.f32 %v1660_v56, %v1671_v60  ;;  %v10525_v59 = vld [vmem:[%s14400_s30] ss:$0 sm:$0xff] }
 0x57e   : > { %12209 = vpow2.f32 %v1679_v61  ;;  %v1677_v63 = vmul.f32 1.442695, %v1675_v62 }
 0x580   : > { %12211 = vpow2.f32 %v1677_v63 }
 0x58b   : > { %v12210_v2 = vpop.eup %12209 }
 0x58c   : > { %v1684_v3 = vsel %vm1067_vm4, %v12210_v2, 0.0 }
 0x58d   : > { %v12212_v4 = vpop.eup %12211  ;;  %1685 = vadd.xlane.f32.xlu1 %v1684_v3  ;;  %v12098_v3 = vld [vmem:[%s14399_s6] sm:$0xff]  }
 0x58e   : > { %v1681_v5 = vsel %vm1063_vm5, %v12212_v4, 0.0 }
 0x58f   : > { %1682 = vadd.xlane.f32.xlu0 %v1681_v5 }
 0x59e   : > { %1691 = vrot.lane.b32.xlu1 %v12655_v23, %s14317_s9 }
 0x5a2   : > { %12030 = vrot.lane.b32.xlu1 %v12029_v6, %s14315_s1  ;;  %s14402_s1 = smov 96  }
 0x5a5   : > { %1693 = vrot.lane.b32.xlu0 %v12663_v25, %s14317_s9  ;;  %s14397_s9 = sld [smem:[#allocation10_spill]] }
 0x5a9   : > { %12035 = vrot.lane.b32.xlu0 %v12034_v7, %s14313_s12  ;;  %s14398_s12 = sld [smem:[#allocation12_spill]] }
 0x5ab   : > { %v12091_v15 = vld [vmem:[%s14397_s9 + $0x8] sm:$0xff]   ;;  %v12092_v16 = vld [vmem:[%s14397_s9] sm:$0xff]  }
 0x616   : > { %v1686_v9 = vpop.xlane.xlu1 %1685 }
 0x617   : > { %12213 = vrcp.f32 %v1686_v9 }
 0x618   : > { %v1683_v10 = vpop.xlane.xlu0 %1682 }
 0x619   : > { %12215 = vrcp.f32 %v1683_v10 }
 0x61a   : > { %v1692_v12 = vpop.permute.xlu1 %1691 }
 0x61c   : > { %v1694_v11 = vpop.permute.xlu0 %1693 }
 0x61d   : > { %11309 = vmatprep.subr.msk.mxu0 %vm1098_vm6, %v1694_v11 }
 0x61e   : > { %11310 = vmatpush3.msk.msra.mxu0 %vm1098_vm6, %v1694_v11  ;;  %v12031_v20 = vpop.permute.xlu1 %12030 }
 0x61f   : > { %11311 = vmatprep.subr.mxu0 %v1692_v12  ;;  %v12033_v21 = vunpack.i.h.bf16 %v12031_v20  ;;  %v12032_v22 = vunpack.i.l.bf16 %v12031_v20  ;;  %v12099_v20 = vld [vmem:[%s14395_s29 + $0x18] sm:$0xff]  }
 0x620   : > { %11312 = vmatpush3.msra.mxu0 %v1692_v12  ;;  %v12036_v24 = vpop.permute.xlu0 %12035 }
 0x621   : > { %11316 = vmatprep.subr.bf16.mxu0 %v12451_v8  ;;  %v12038_v26 = vunpack.i.h.bf16 %v12036_v24  ;;  %v12037_v27 = vunpack.i.l.bf16 %v12036_v24  ;;  %v1804_v28 = vsel %vm979_vm3, %v12752_v48, %v12033_v21  ;;  %v1803_v29 = vsel %vm979_vm3, %v12754_v49, %v12032_v22  ;;  %v12093_v48 = vld [vmem:[%s14398_s12 + $0x8] sm:$0xff]   ;;  %v12096_v49 = vld [vmem:[%s14399_s6 + $0x10] sm:$0xff]  }
 0x622   : > { %11325 = vmatpush3.bf16.msra.mxu1 %v12093_v48  ;;  %v12100_v21 = vld [vmem:[%s14395_s29 + $0x10] sm:$0xff]  }
 0x623   : > { %v1806_v33 = vsel %vm1805_vm7, %v1803_v29, %v12037_v27  ;;  %v1807_v34 = vsel %vm1805_vm7, %v1804_v28, %v12038_v26  ;;  %11326 = vmatprep.subr.bf16.mxu1 %v12451_v8 }
 0x624   : > { %v12214_v23 = vpop.eup %12213 }
 0x625   : > { %v1690_v14 = vmul.f32 %v12214_v23, %v12210_v2  ;;  %v12097_v2 = vld [vmem:[%s14399_s6 + $0x8] sm:$0xff]  }
 0x626   : > { %v12216_v25 = vpop.eup %12215 }
 0x627   : > { %v1689_v13 = vmul.f32 %v12216_v25, %v12212_v4 }
 0x629   : > { %11313 = vmatprep.mubr.msk.f32.mxu0 %vm1063_vm5, %v1689_v13 }
 0x62a   : > { %11314 = vmatmul.mubr.msk.f32.vlgmr.msra.gmra.mxu0 %vm1063_vm5, %v1690_v14 }
 0x62b   : > { %11320 = vmatprep.mubr.msk.bf16.mxu0 %vm12452_vm2, %v12451_v8  ;;  %11317 = vmatpush3.bf16.msra.mxu0 %v12091_v15 }
 0x62c   : > { %11318 = vmatprep.subr.bf16.mxu0 %v12451_v8 }
 0x62f   : > { %11319 = vmatpush3.bf16.msra.mxu0 %v12092_v16 }
 0x630   : > { %11332 = vmatprep.subr.bf16.mxu0 %v12451_v8 }
 0x6ea   : > { %v11315_v17 = vpop.f32.mrf.mxu0 }
 0x6ec   : > { %v1770_v18 = vpop.f32.mrf.mxu0 }
 0x6ed   : > { %v12039_v19 = vpack.i.bf16 %v11315_v17, %v1770_v18 }
 0x6ef   : > { %12040 = vrot.lane.b32.xlu1 %v12039_v19, %s14325_s11  ;;  %s14406_s11 = smov 64  }
 0x761   : > { %v12041_v30 = vpop.permute.xlu1 %12040 }
 0x762   : > { %v12043_v31 = vunpack.i.h.bf16 %v12041_v30  ;;  %v12042_v32 = vunpack.i.l.bf16 %v12041_v30 }
 0x764   : > { %v1809_v35 = vsel %vm1808_vm8, %v1806_v33, %v12042_v32  ;;  %v1810_v36 = vsel %vm1808_vm8, %v1807_v34, %v12043_v31  ;;  %v10535_v33 = vld [vmem:[%s14396_s4 + $0x1] ss:$0 sm:$0xff] }
 0x765   : > { %v1815_v37 = vpack.c.bf16 %v1810_v36, %v1809_v35 }
 0x767   : > { %11321 = vmatmul.mubr.msk.bf16.vlgmr.msra.gmra.mxu0 %vm887_vm0, %v1815_v37 }
 0x768   : > { %11340 = vmatprep.mubr.msk.bf16.mxu0 %vm12452_vm2, %v12451_v8 }
 0x827   : > { %v1865_v38 = vpop.f32.mrf.mxu0 }
 0x828   : > { %v1872_v39 = vadd.f32 %v1865_v38, %v12629_v0  ;;  %v12094_v0 = vld [vmem:[%s14398_s12] sm:$0xff]  }
 0x829   : > { %v11322_v40 = vpop.f32.mrf.mxu0  ;;  %11327 = vmatpush3.bf16.msra.mxu1 %v12094_v0 }
 0x82a   : > { %v1875_v41 = vmul.f32 %v1872_v39, %v1872_v39  ;;  %11344 = vmatprep.subr.bf16.mxu1 %v12451_v8 }
 0x82b   : > { %v1868_v42 = vpop.f32.mrf.mxu0 }
 0x82c   : > { %v1873_v43 = vadd.f32 %v1868_v42, %v12631_v1  ;;  %v1877_v44 = vsel %vm887_vm0, %v1875_v41, 0.0  ;;  %v12095_v1 = vld [vmem:[%s14399_s6 + $0x18] sm:$0xff]  }
 0x82d   : > { %1878 = vadd.xlane.f32.xlu0 %v1877_v44  ;;  %v11323_v45 = vpop.f32.mrf.mxu0  ;;  %11333 = vmatpush3.bf16.msra.mxu0 %v12095_v1 }
 0x82e   : > { %v1876_v46 = vmul.f32 %v1873_v43, %v1873_v43  ;;  %11334 = vmatprep.subr.bf16.mxu0 %v12451_v8 }
 0x830   : > { %v1880_v47 = vsel %vm891_vm1, %v1876_v46, 0.0 }
 0x831   : > { %1881 = vadd.xlane.f32.xlu1 %v1880_v47  ;;  %11335 = vmatpush3.bf16.msra.mxu0 %v12096_v49 }
 0x832   : > { %11336 = vmatprep.subr.bf16.mxu0 %v12451_v8 }
 0x835   : > { %11337 = vmatpush3.bf16.msra.mxu0 %v12097_v2 }
 0x836   : > { %11338 = vmatprep.subr.bf16.mxu0 %v12451_v8 }
 0x839   : > { %11339 = vmatpush3.bf16.msra.mxu0 %v12098_v3 }
 0x8b6   : > { %v1879_v50 = vpop.xlane.xlu0 %1878 }
 0x8b7   : > { %v1883_v51 = vmul.f32 0.03125, %v1879_v50 }
 0x8b9   : > { %v1885_v52 = vadd.f32 1e-06, %v1883_v51 }
 0x8ba   : > { %v1882_v53 = vpop.xlane.xlu1 %1881 }
 0x8bb   : > { %12217 = vrsqrt.f32 %v1885_v52  ;;  %v1884_v54 = vmul.f32 0.03125, %v1882_v53 }
 0x8bd   : > { %v1886_v55 = vadd.f32 1e-06, %v1884_v54 }
 0x8bf   : > { %12219 = vrsqrt.f32 %v1886_v55 }
 0x8c8   : > { %v12218_v56 = vpop.eup %12217 }
 0x8c9   : > { %v1889_v57 = vmul.f32 %v12218_v56, %v1872_v39 }
 0x8cb   : > { %v1897_v61 = vmul.f32 %v10525_v59, %v1889_v57 }
 0x8cc   : > { %v12220_v58 = vpop.eup %12219 }
 0x8cd   : > { %v1890_v60 = vmul.f32 %v12220_v58, %v1873_v43 }
 0x8cf   : > { %v1898_v62 = vmul.f32 %v10525_v59, %v1890_v60 }
 0x8d1   : > { %v1903_v63 = vpack.c.bf16 %v1898_v62, %v1897_v61 }
 0x8d3   : > { %11329 = vmatmul.mubr.msk.bf16.vlgmr.msra.gmra.mxu1 %vm887_vm0, %v1903_v63 }
 0x8d4   : > { %11348 = vmatprep.mubr.msk.bf16.mxu1 %vm12452_vm2, %v12451_v8  ;;  %11345 = vmatpush3.bf16.msra.mxu1 %v12099_v20 }
 0x8d5   : > { %11346 = vmatprep.subr.bf16.mxu1 %v12451_v8 }
 0x8d8   : > { %11347 = vmatpush3.bf16.msra.mxu1 %v12100_v21 }
 0x993   : > { %v1953_v4 = vpop.f32.mrf.mxu1 }
 0x994   : > { %v1960_v7 = vmax.f32 %v1953_v4, 0.0 }
 0x995   : > { %v11330_v5 = vpop.f32.mrf.mxu1 }
 0x997   : > { %v1956_v6 = vpop.f32.mrf.mxu1 }
 0x998   : > { %v1961_v9 = vmax.f32 %v1956_v6, 0.0 }
 0x999   : > { %v11331_v10 = vpop.f32.mrf.mxu1 }
 0x99a   : > { %v1970_v11 = vpack.c.bf16 %v1961_v9, %v1960_v7 }
 0x99c   : > { %11341 = vmatmul.mubr.msk.bf16.vlgmr.msra.gmra.mxu0 %vm1995_vm9, %v1970_v11 }
 0xa5c   : > { %v2033_v12 = vpop.f32.mrf.mxu0 }
 0xa5d   : > { %v12827_v23 = vadd.f32 %v2033_v12, %v1872_v39 }
 0xa5e   : > { %v11342_v25 = vpop.f32.mrf.mxu0 }
 0xa5f   : > { %v2044_v13 = vmul.f32 %v12827_v23, %v12827_v23 }
 0xa60   : > { %v2036_v14 = vpop.f32.mrf.mxu0 }
 0xa61   : > { %v12831_v15 = vadd.f32 %v2036_v14, %v1873_v43  ;;  %v2046_v16 = vsel %vm887_vm0, %v2044_v13, 0.0 }
 0xa62   : > { %2047 = vadd.xlane.f32.xlu0 %v2046_v16  ;;  %v11343_v17 = vpop.f32.mrf.mxu0 }
 0xa63   : > { %v2045_v18 = vmul.f32 %v12831_v15, %v12831_v15 }
 0xa65   : > { %v2049_v19 = vsel %vm891_vm1, %v2045_v18, 0.0 }
 0xa66   : > { %2050 = vadd.xlane.f32.xlu0 %v2049_v19 }
 0xaeb   : > { %v2048_v22 = vpop.xlane.xlu0 %2047 }
 0xaec   : > { %v2052_v24 = vmul.f32 0.03125, %v2048_v22 }
 0xaee   : > { %v2054_v26 = vadd.f32 1e-06, %v2052_v24 }
 0xaef   : > { %v2051_v27 = vpop.xlane.xlu0 %2050 }
 0xaf0   : > { %12221 = vrsqrt.f32 %v2054_v26  ;;  %v2053_v28 = vmul.f32 0.03125, %v2051_v27 }
 0xaf2   : > { %v2055_v29 = vadd.f32 1e-06, %v2053_v28 }
 0xaf4   : > { %12223 = vrsqrt.f32 %v2055_v29 }
 0xafd   : > { %v12222_v30 = vpop.eup %12221 }
 0xafe   : > { %v2058_v31 = vmul.f32 %v12222_v30, %v12827_v23 }
 0xb00   : > { %v2066_v35 = vmul.f32 %v10535_v33, %v2058_v31 }
 0xb01   : > { %v12224_v32 = vpop.eup %12223 }
 0xb02   : > { %v2059_v34 = vmul.f32 %v12224_v32, %v12831_v15 }
 0xb04   : > { %v2067_v36 = vmul.f32 %v10535_v33, %v2059_v34 }
 0xb06   : > { %v2073_v37 = vpack.c.bf16 %v2067_v36, %v2066_v35 }
 0xb08   : > { %11349 = vmatmul.mubr.msk.bf16.vlgmr.msra.gmra.mxu1 %vm887_vm0, %v2073_v37 }
 0xbc8   : > { %v12850_v38 = vpop.f32.mrf.mxu1 }
 0xbc9   : > { %11356 = vmatprep.mubr.msk.f32.mxu1 %vm979_vm3, %v12850_v38 }
 0xbca   : > { %v11350_v39 = vpop.f32.mrf.mxu1 }
 0xbcc   : > { %v12854_v40 = vpop.f32.mrf.mxu1 }
 0xbcd   : > { %2335 = vrot.lane.b32.xlu0 %v12854_v40, %s14401_s7  ;;  %2134 = vrot.lane.b32.xlu1 %v12854_v40, %s14402_s1 }
 0xbce   : > { %v11351_v41 = vpop.f32.mrf.mxu1 }
 0xbd1   : > { %2329 = vrot.lane.b32.xlu0 %v12850_v38, %s14403_s10  ;;  %2132 = vrot.lane.b32.xlu1 %v12850_v38, %s14402_s1 }
 0xbd5   : > { %2331 = vrot.lane.b32.xlu0 %v12854_v40, %s14403_s10  ;;  %2333 = vrot.lane.b32.xlu1 %v12850_v38, %s14401_s7 }
 0xbd9   : > { %2530 = vrot.lane.b32.xlu0 %v12850_v38, %s14404_s0  ;;  %2536 = vrot.lane.b32.xlu1 %v12854_v40, %s14405_s3 }
 0xbdd   : > { %2534 = vrot.lane.b32.xlu1 %v12850_v38, %s14405_s3 }
 0xbe1   : > { %2532 = vrot.lane.b32.xlu1 %v12854_v40, %s14404_s0 }
 0xc3f   : > { %v2336_v42 = vpop.permute.xlu0 %2335  ;;  %v2135_v43 = vpop.permute.xlu1 %2134 }
 0xc40   : > { %11352 = vmatprep.subr.msk.mxu1 %vm979_vm3, %v2135_v43  ;;  %11366 = vmatprep.subr.msk.mxu0 %vm979_vm3, %v2336_v42 }
 0xc41   : > { %11353 = vmatpush3.xpose.msk.msra.mxu1 %vm979_vm3, %v2135_v43  ;;  %11367 = vmatpush3.xpose.msk.msra.mxu0 %vm979_vm3, %v2336_v42 }
 0xc43   : > { %v2330_v44 = vpop.permute.xlu0 %2329  ;;  %v2133_v45 = vpop.permute.xlu1 %2132 }
 0xc44   : > { %11354 = vmatprep.subr.msk.mxu1 %vm979_vm3, %v2133_v45  ;;  %11370 = vmatprep.mubr.msk.f32.mxu0 %vm979_vm3, %v2330_v44 }
 0xc45   : > { %11355 = vmatpush3.xpose.msk.msra.mxu1 %vm979_vm3, %v2133_v45 }
 0xc47   : > { %v2332_v46 = vpop.permute.xlu0 %2331  ;;  %v2334_v47 = vpop.permute.xlu1 %2333 }
 0xc48   : > { %11357 = vmatmul.mubr.msk.f32.vlgmr.msra.gmra.mxu1 %vm979_vm3, %v12854_v40  ;;  %11368 = vmatprep.subr.msk.mxu0 %vm979_vm3, %v2334_v47 }
 0xc49   : > { %11369 = vmatpush3.xpose.msk.msra.mxu0 %vm979_vm3, %v2334_v47 }
 0xc4b   : > { %v2531_v48 = vpop.permute.xlu0 %2530  ;;  %v2537_v0 = vpop.permute.xlu1 %2536 }
 0xc4c   : > { %11371 = vmatmul.mubr.msk.f32.vlgmr.msra.gmra.mxu0 %vm979_vm3, %v2332_v46  ;;  %11380 = vmatprep.subr.msk.mxu0 %vm979_vm3, %v2537_v0 }
 0xc4d   : > { %11381 = vmatpush3.xpose.msk.msra.mxu0 %vm979_vm3, %v2537_v0  ;;  %11384 = vmatprep.mubr.msk.f32.mxu0 %vm979_vm3, %v2531_v48 }
 0xc4f   : > { %v2535_v1 = vpop.permute.xlu1 %2534 }
 0xc50   : > { %11382 = vmatprep.subr.msk.mxu0 %vm979_vm3, %v2535_v1 }
 0xc51   : > { %11383 = vmatpush3.xpose.msk.msra.mxu0 %vm979_vm3, %v2535_v1 }
 0xc53   : > { %v2533_v49 = vpop.permute.xlu1 %2532 }
 0xc54   : > { %11385 = vmatmul.mubr.msk.f32.vlgmr.msra.gmra.mxu0 %vm979_vm3, %v2533_v49 }
 0xd08   : > { %v11358_v50 = vpop.f32.mrf.mxu1 }
 0xd09   : > { %v2222_v51 = vsel %vm1067_vm4, %v11358_v50, -inf }
 0xd0a   : > { %2223 = vmax.xlane.f32.xlu1 %v2222_v51  ;;  %v2210_v52 = vpop.f32.mrf.mxu1 }
 0xd0b   : > { %v2219_v53 = vsel %vm1063_vm5, %v2210_v52, -inf }
 0xd0c   : > { %2220 = vmax.xlane.f32.xlu0 %v2219_v53  ;;  %v11372_v54 = vpop.f32.mrf.mxu0 }
 0xd0d   : > { %v2423_v57 = vsel %vm1067_vm4, %v11372_v54, -inf }
 0xd0e   : > { %v2411_v55 = vpop.f32.mrf.mxu0 }
 0xd0f   : > { %v2420_v56 = vsel %vm1063_vm5, %v2411_v55, -inf }
 0xd10   : > { %2421 = vmax.xlane.f32.xlu0 %v2420_v56 }
 0xd14   : > { %v11386_v58 = vpop.f32.mrf.mxu0  ;;  %2424 = vmax.xlane.f32.xlu0 %v2423_v57 }
 0xd15   : > { %v2624_v59 = vsel %vm1067_vm4, %v11386_v58, -inf }
 0xd16   : > { %v2612_v60 = vpop.f32.mrf.mxu0 }
 0xd17   : > { %v2621_v61 = vsel %vm1063_vm5, %v2612_v60, -inf }
 0xd18   : > { %2625 = vmax.xlane.f32.xlu0 %v2624_v59 }
 0xd1b   : > { %2243 = vrot.lane.b32.xlu1 %v12854_v40, %s14406_s11 }
 0xd1f   : > { %2444 = vrot.lane.b32.xlu1 %v12854_v40, %s14407_s2 }
 0xd23   : > { %2442 = vrot.lane.b32.xlu1 %v12850_v38, %s14407_s2 }
 0xd2e   : > { %2241 = vrot.lane.b32.xlu0 %v12850_v38, %s14406_s11 }
 0xd32   : > { %2645 = vrot.lane.b32.xlu0 %v12854_v40, %s14408_s8 }
 0xd47   : > { %2622 = vmax.xlane.f32.xlu1 %v2621_v61 }
 0xd58   : > { %2643 = vrot.lane.b32.xlu1 %v12850_v38, %s14408_s8 }
 0xd93   : > { %v2224_v62 = vpop.xlane.xlu1 %2223 }
 0xd94   : > { %v2226_v63 = vsub.f32 %v11358_v50, %v2224_v62 }
 0xd95   : > { %v2221_v2 = vpop.xlane.xlu0 %2220 }
 0xd96   : > { %v2229_v3 = vmul.f32 1.442695, %v2226_v63  ;;  %v2225_v4 = vsub.f32 %v2210_v52, %v2221_v2 }
 0xd97   : > { %v2244_v5 = vpop.permute.xlu1 %2243 }
 0xd98   : > { %12225 = vpow2.f32 %v2229_v3  ;;  %v2227_v6 = vmul.f32 1.442695, %v2225_v4  ;;  %11359 = vmatprep.subr.msk.mxu1 %vm1098_vm6, %v2244_v5 }
 0xd99   : > { %11360 = vmatpush3.msk.msra.mxu1 %vm1098_vm6, %v2244_v5  ;;  %v2422_v7 = vpop.xlane.xlu0 %2421 }
 0xd9a   : > { %12227 = vpow2.f32 %v2227_v6  ;;  %v2426_v9 = vsub.f32 %v2411_v55, %v2422_v7 }
 0xd9b   : > { %v2445_v21 = vpop.permute.xlu1 %2444 }
 0xd9c   : > { %v2428_v10 = vmul.f32 1.442695, %v2426_v9 }
 0xd9d   : > { %v2425_v11 = vpop.xlane.xlu0 %2424 }
 0xd9e   : > { %12229 = vpow2.f32 %v2428_v10  ;;  %v2427_v12 = vsub.f32 %v11372_v54, %v2425_v11 }
 0xd9f   : > { %v2443_v31 = vpop.permute.xlu1 %2442 }
 0xda0   : > { %v2430_v25 = vmul.f32 1.442695, %v2427_v12 }
 0xda1   : > { %v2626_v13 = vpop.xlane.xlu0 %2625 }
 0xda2   : > { %12231 = vpow2.f32 %v2430_v25  ;;  %v2628_v14 = vsub.f32 %v11386_v58, %v2626_v13 }
 0xda4   : > { %v2631_v16 = vmul.f32 1.442695, %v2628_v14 }
 0xda5   : > { %v12226_v17 = vpop.eup %12225  ;;  %v2242_v18 = vpop.permute.xlu0 %2241 }
 0xda6   : > { %12233 = vpow2.f32 %v2631_v16  ;;  %11361 = vmatprep.subr.mxu1 %v2242_v18  ;;  %v2234_v19 = vsel %vm1067_vm4, %v12226_v17, 0.0 }
 0xda7   : > { %v12228_v20 = vpop.eup %12227  ;;  %2235 = vadd.xlane.f32.xlu0 %v2234_v19  ;;  %11362 = vmatpush3.msra.mxu1 %v2242_v18 }
 0xda8   : > { %11373 = vmatprep.subr.msk.mxu1 %vm1098_vm6, %v2445_v21  ;;  %v2231_v22 = vsel %vm1063_vm5, %v12228_v20, 0.0 }
 0xda9   : > { %2232 = vadd.xlane.f32.xlu1 %v2231_v22  ;;  %v2646_v37 = vpop.permute.xlu0 %2645 }
 0xdab   : > { %v12230_v24 = vpop.eup %12229 }
 0xdac   : > { %v2432_v26 = vsel %vm1063_vm5, %v12230_v24, 0.0 }
 0xdad   : > { %2433 = vadd.xlane.f32.xlu1 %v2432_v26 }
 0xdaf   : > { %v12232_v27 = vpop.eup %12231 }
 0xdb0   : > { %v2435_v28 = vsel %vm1067_vm4, %v12232_v27, 0.0 }
 0xdb1   : > { %2436 = vadd.xlane.f32.xlu0 %v2435_v28 }
 0xdb3   : > { %v12234_v29 = vpop.eup %12233 }
 0xdb4   : > { %v2636_v30 = vsel %vm1067_vm4, %v12234_v29, 0.0 }
 0xdb5   : > { %2637 = vadd.xlane.f32.xlu0 %v2636_v30 }
 0xdbe   : > { %2735 = vrot.lane.b32.xlu1 %v12850_v38, %s14409_s28 }
 0xdcb   : > { %2737 = vrot.lane.b32.xlu0 %v12854_v40, %s14409_s28 }
 0xdcf   : > { %2731 = vrot.lane.b32.xlu0 %v12850_v38, %s14410_s26 }
 0xdd0   : > { %v2623_v32 = vpop.xlane.xlu1 %2622 }
 0xdd1   : > { %v2627_v33 = vsub.f32 %v2612_v60, %v2623_v32 }
 0xdd3   : > { %v2629_v34 = vmul.f32 1.442695, %v2627_v33 }
 0xdd4   : > { %v2644_v39 = vpop.permute.xlu1 %2643 }
 0xdd5   : > { %12235 = vpow2.f32 %v2629_v34 }
 0xde2   : > { %v12236_v35 = vpop.eup %12235 }
 0xde3   : > { %v2633_v36 = vsel %vm1063_vm5, %v12236_v35, 0.0 }
 0xde4   : > { %2634 = vadd.xlane.f32.xlu1 %v2633_v36 }
 0xdf5   : > { %2733 = vrot.lane.b32.xlu1 %v12854_v40, %s14410_s26 }
 0xe30   : > { %v2236_v41 = vpop.xlane.xlu0 %2235 }
 0xe31   : > { %12237 = vrcp.f32 %v2236_v41 }
 0xe32   : > { %v2233_v42 = vpop.xlane.xlu1 %2232 }
 0xe33   : > { %12239 = vrcp.f32 %v2233_v42 }
 0xe36   : > { %v2434_v43 = vpop.xlane.xlu1 %2433 }
 0xe37   : > { %12241 = vrcp.f32 %v2434_v43 }
 0xe3a   : > { %v2437_v44 = vpop.xlane.xlu0 %2436  ;;  %v2736_v53 = vpop.permute.xlu1 %2735 }
 0xe3b   : > { %12243 = vrcp.f32 %v2437_v44 }
 0xe3e   : > { %v12238_v45 = vpop.eup %12237  ;;  %v2638_v50 = vpop.xlane.xlu0 %2637 }
 0xe3f   : > { %v2240_v48 = vmul.f32 %v12238_v45, %v12226_v17  ;;  %12245 = vrcp.f32 %v2638_v50 }
 0xe40   : > { %v12240_v46 = vpop.eup %12239 }
 0xe41   : > { %v2239_v47 = vmul.f32 %v12240_v46, %v12228_v20 }
 0xe42   : > { %v2738_v52 = vpop.permute.xlu0 %2737 }
 0xe43   : > { %11363 = vmatprep.mubr.msk.f32.mxu1 %vm1063_vm5, %v2239_v47 }
 0xe44   : > { %v12242_v0 = vpop.eup %12241  ;;  %11364 = vmatmul.mubr.msk.f32.vlgmr.msra.gmra.mxu1 %vm1063_vm5, %v2240_v48 }
 0xe45   : > { %11374 = vmatpush3.msk.msra.mxu1 %vm1098_vm6, %v2445_v21  ;;  %v2440_v1 = vmul.f32 %v12242_v0, %v12230_v24 }
 0xe46   : > { %11375 = vmatprep.subr.mxu1 %v2443_v31  ;;  %v2732_v59 = vpop.permute.xlu0 %2731 }
 0xe47   : > { %11376 = vmatpush3.msra.mxu1 %v2443_v31  ;;  %11377 = vmatprep.mubr.msk.f32.mxu1 %vm1063_vm5, %v2440_v1  ;;  %v12102_v31 = vld [vmem:[%s14397_s9 + $0x10] sm:$0xff]  }
 0xe48   : > { %v12244_v49 = vpop.eup %12243  ;;  %11387 = vmatprep.subr.msk.mxu1 %vm1098_vm6, %v2646_v37 }
 0xe49   : > { %v2441_v51 = vmul.f32 %v12244_v49, %v12232_v27 }
 0xe4b   : > { %11378 = vmatmul.mubr.msk.f32.vlgmr.msra.gmra.mxu1 %vm1063_vm5, %v2441_v51 }
 0xe4c   : > { %11388 = vmatpush3.msk.msra.mxu1 %vm1098_vm6, %v2646_v37  ;;  %v12246_v55 = vpop.eup %12245 }
 0xe4d   : > { %11389 = vmatprep.subr.mxu1 %v2644_v39  ;;  %v2642_v58 = vmul.f32 %v12246_v55, %v12234_v29 }
 0xe4e   : > { %11390 = vmatpush3.msra.mxu1 %v2644_v39 }
 0xe4f   : > { %11394 = vmatprep.subr.msk.mxu1 %vm979_vm3, %v2738_v52 }
 0xe6d   : > { %v2635_v54 = vpop.xlane.xlu1 %2634 }
 0xe6e   : > { %12247 = vrcp.f32 %v2635_v54 }
 0xe71   : > { %v2734_v60 = vpop.permute.xlu1 %2733 }
 0xe7b   : > { %v12248_v56 = vpop.eup %12247 }
 0xe7c   : > { %v2641_v57 = vmul.f32 %v12248_v56, %v12236_v35 }
 0xe7e   : > { %11391 = vmatprep.mubr.msk.f32.mxu1 %vm1063_vm5, %v2641_v57 }
 0xe7f   : > { %11392 = vmatmul.mubr.msk.f32.vlgmr.msra.gmra.mxu1 %vm1063_vm5, %v2642_v58 }
 0xe80   : > { %11395 = vmatpush3.xpose.msk.msra.mxu1 %vm979_vm3, %v2738_v52  ;;  %11398 = vmatprep.mubr.msk.f32.mxu1 %vm979_vm3, %v2732_v59 }
 0xe81   : > { %11396 = vmatprep.subr.msk.mxu1 %vm979_vm3, %v2736_v53 }
 0xe84   : > { %11397 = vmatpush3.xpose.msk.msra.mxu1 %vm979_vm3, %v2736_v53 }
 0xe85   : > { %11416 = vmatprep.subr.bf16.mxu1 %v12451_v8 }
 0xe87   : > { %11399 = vmatmul.mubr.msk.f32.vlgmr.msra.gmra.mxu1 %vm979_vm3, %v2734_v60 }
 0xe88   : > { %11420 = vmatprep.mubr.msk.bf16.mxu1 %vm12452_vm2, %v12451_v8 }
 0xf04   : > { %v12947_v61 = vpop.f32.mrf.mxu1 }
 0xf06   : > { %v12949_v62 = vpop.f32.mrf.mxu1 }
 0xf0b   : > { %v11379_v63 = vpop.f32.mrf.mxu1 }
 0xf0d   : > { %v2521_v2 = vpop.f32.mrf.mxu1 }
 0xf0e   : > { %v12044_v10 = vpack.i.bf16 %v11379_v63, %v2521_v2 }
 0xf3f   : > { %v11393_v3 = vpop.f32.mrf.mxu1 }
 0xf41   : > { %v2722_v4 = vpop.f32.mrf.mxu1 }
 0xf42   : > { %v12049_v11 = vpack.i.bf16 %v11393_v3, %v2722_v4 }
 0xf47   : > { %v11400_v5 = vpop.f32.mrf.mxu1 }
 0xf48   : > { %v2825_v6 = vsel %vm1067_vm4, %v11400_v5, -inf }
 0xf49   : > { %2826 = vmax.xlane.f32.xlu1 %v2825_v6  ;;  %v2813_v7 = vpop.f32.mrf.mxu1 }
 0xf4a   : > { %v2822_v9 = vsel %vm1063_vm5, %v2813_v7, -inf }
 0xf4b   : > { %2823 = vmax.xlane.f32.xlu0 %v2822_v9 }
 0xf5a   : > { %2846 = vrot.lane.b32.xlu1 %v12854_v40, %s14411_s27 }
 0xf5e   : > { %12045 = vrot.lane.b32.xlu1 %v12044_v10, %s14412_s23 }
 0xf62   : > { %12050 = vrot.lane.b32.xlu1 %v12049_v11, %s14413_s25  ;;  %v10579_v11 = vld [vmem:[%s14400_s30 + $0x1] ss:$0 sm:$0xff]  ;;  %s14428_s30 = sld [smem:[#allocation6_spill]] }
 0xfd2   : > { %v2827_v12 = vpop.xlane.xlu1 %2826 }
 0xfd3   : > { %v2829_v25 = vsub.f32 %v11400_v5, %v2827_v12 }
 0xfd4   : > { %v2824_v13 = vpop.xlane.xlu0 %2823 }
 0xfd5   : > { %v2832_v14 = vmul.f32 1.442695, %v2829_v25  ;;  %v2828_v16 = vsub.f32 %v2813_v7, %v2824_v13 }
 0xfd6   : > { %v2847_v17 = vpop.permute.xlu1 %2846 }
 0xfd7   : > { %12249 = vpow2.f32 %v2832_v14  ;;  %v2830_v18 = vmul.f32 1.442695, %v2828_v16  ;;  %11401 = vmatprep.subr.msk.mxu0 %vm1098_vm6, %v2847_v17  ;;  %v12107_v16 = vld [vmem:[%s14399_s6 + $0x28] sm:$0xff]  }
 0xfd8   : > { %11402 = vmatpush3.msk.msra.mxu0 %vm1098_vm6, %v2847_v17  ;;  %v12108_v17 = vld [vmem:[%s14399_s6 + $0x20] sm:$0xff]  }
 0xfd9   : > { %12251 = vpow2.f32 %v2830_v18  ;;  %v12109_v18 = vld [vmem:[%s14415_s16 + $0x38] sm:$0xff]  }
 0xfda   : > { %v12046_v35 = vpop.permute.xlu1 %12045 }
 0xfdb   : > { %v12048_v37 = vunpack.i.h.bf16 %v12046_v35  ;;  %v12047_v39 = vunpack.i.l.bf16 %v12046_v35 }
 0xfdd   : > { %v2957_v44 = vsel %vm979_vm3, %v12947_v61, %v12048_v37  ;;  %v2956_v45 = vsel %vm979_vm3, %v12949_v62, %v12047_v39  ;;  %v12105_v61 = vld [vmem:[%s14399_s6 + $0x38] sm:$0xff]   ;;  %v12106_v62 = vld [vmem:[%s14399_s6 + $0x30] sm:$0xff]  }
 0xfde   : > { %v12051_v36 = vpop.permute.xlu1 %12050 }
 0xfdf   : > { %v12053_v41 = vunpack.i.h.bf16 %v12051_v36  ;;  %v12052_v42 = vunpack.i.l.bf16 %v12051_v36 }
 0xfe1   : > { %v2958_v48 = vsel %vm1805_vm7, %v2956_v45, %v12052_v42  ;;  %v2959_v0 = vsel %vm1805_vm7, %v2957_v44, %v12053_v41 }
 0xfe4   : > { %v12250_v40 = vpop.eup %12249 }
 0xfe5   : > { %v2837_v19 = vsel %vm1067_vm4, %v12250_v40, 0.0 }
 0xfe6   : > { %v12252_v20 = vpop.eup %12251  ;;  %2838 = vadd.xlane.f32.xlu0 %v2837_v19  ;;  %v12110_v19 = vld [vmem:[%s14415_s16 + $0x30] sm:$0xff]  }
 0xfe7   : > { %v2834_v21 = vsel %vm1063_vm5, %v12252_v20, 0.0 }
 0xfea   : > { %2835 = vadd.xlane.f32.xlu0 %v2834_v21 }
0x1000   : > { %2844 = vrot.lane.b32.xlu0 %v12850_v38, %s14411_s27  ;;  %v12101_v38 = vld [vmem:[%s14397_s9 + $0x18] sm:$0xff]   ;;  %s14417_s27 = sld [smem:[#allocation5_spill]] }
0x1001   : > { %s14419_s9 = sld [smem:[#allocation14_spill]] }
0x1006   : > { %s13037_s18 = scalar_lea.vmem %s14417_s27, %s14416_s17  ;;  %s14423_s27 = sld [smem:[#allocation7_spill]] }
0x1007   : > { %s14433_s17 = sld [smem:[#allocation22_spill]] }
0x106f   : > { %v2839_v22 = vpop.xlane.xlu0 %2838 }
0x1070   : > { %12253 = vrcp.f32 %v2839_v22  ;;  %v12111_v22 = vld [vmem:[%s14415_s16 + $0x28] sm:$0xff]  }
0x1073   : > { %v2836_v24 = vpop.xlane.xlu0 %2835 }
0x1074   : > { %12255 = vrcp.f32 %v2836_v24  ;;  %v12112_v24 = vld [vmem:[%s14415_s16 + $0x20] sm:$0xff]  }
0x1077   : > { %v2845_v26 = vpop.permute.xlu0 %2844 }
0x1078   : > { %11403 = vmatprep.subr.mxu0 %v2845_v26 }
0x1079   : > { %11404 = vmatpush3.msra.mxu0 %v2845_v26  ;;  %v12113_v26 = vld [vmem:[%s14415_s16 + $0x18] sm:$0xff]  }
0x107a   : > { %11408 = vmatprep.subr.bf16.mxu0 %v12451_v8 }
0x107d   : > { %v12254_v27 = vpop.eup %12253 }
0x107e   : > { %v2843_v30 = vmul.f32 %v12254_v27, %v12250_v40  ;;  %v12467_v40 = vmov 0   ;;  %v12114_v27 = vld [vmem:[%s14415_s16 + $0x10] sm:$0xff]  }
0x1081   : > { %v12256_v28 = vpop.eup %12255 }
0x1082   : > { %v2842_v29 = vmul.f32 %v12256_v28, %v12252_v20  ;;  %v3222_v20 = vld [vmem:[%s13037_s18 + $0x8] sm:$0xff] }
0x1083   : > { %v3248_v21 = vpack.c.bf16 %v3222_v20, %v3222_v20  ;;  %v12115_v28 = vld [vmem:[%s14415_s16 + $0x8] sm:$0xff]  }
0x1084   : > { %11405 = vmatprep.mubr.msk.f32.mxu0 %vm1063_vm5, %v2842_v29  ;;  %v12116_v29 = vld [vmem:[%s14415_s16] sm:$0xff]  }
0x1085   : > { %11406 = vmatmul.mubr.msk.f32.vlgmr.msra.gmra.mxu0 %vm1063_vm5, %v2843_v30  ;;  %v12117_v30 = vld [vmem:[%s14415_s16 + $0x58] sm:$0xff]  }
0x1086   : > { %11412 = vmatprep.mubr.msk.bf16.mxu0 %vm12452_vm2, %v12451_v8  ;;  %11409 = vmatpush3.bf16.msra.mxu0 %v12101_v38  ;;  %v12118_v38 = vld [vmem:[%s14415_s16 + $0x50] sm:$0xff]  }
0x1087   : > { %11410 = vmatprep.subr.bf16.mxu0 %v12451_v8 }
0x108a   : > { %11411 = vmatpush3.bf16.msra.mxu0 %v12102_v31  ;;  %v12119_v31 = vld [vmem:[%s14415_s16 + $0x48] sm:$0xff]  }
0x108b   : > { %11424 = vmatprep.subr.bf16.mxu0 %v12451_v8 }
0x1145   : > { %v11407_v32 = vpop.f32.mrf.mxu0 }
0x1147   : > { %v2923_v33 = vpop.f32.mrf.mxu0 }
0x1148   : > { %v12054_v34 = vpack.i.bf16 %v11407_v32, %v2923_v33  ;;  %v12120_v32 = vld [vmem:[%s14415_s16 + $0x40] sm:$0xff]  }
0x1149   : > { %v3221_v33 = vld [vmem:[%s13037_s18] sm:$0xff]  ;;  %s14429_s18 = sld [smem:[#allocation21_spill]] }
0x114a   : > { %12055 = vrot.lane.b32.xlu0 %v12054_v34, %s14414_s21  ;;  %v3247_v34 = vpack.c.bf16 %v3221_v33, %v3221_v33 }
0x11bc   : > { %v12056_v43 = vpop.permute.xlu0 %12055 }
0x11bd   : > { %v12058_v46 = vunpack.i.h.bf16 %v12056_v43  ;;  %v12057_v47 = vunpack.i.l.bf16 %v12056_v43 }
0x11bf   : > { %v2961_v1 = vsel %vm1808_vm8, %v2959_v0, %v12058_v46  ;;  %v2960_v49 = vsel %vm1808_vm8, %v2958_v48, %v12057_v47 }
0x11c0   : > { %v2967_v50 = vpack.c.bf16 %v2961_v1, %v2960_v49  ;;  %v12121_v49 = vld [vmem:[%s14418_s13 + $0x8] sm:$0xff]  }
0x11c2   : > { %11413 = vmatmul.mubr.msk.bf16.vlgmr.msra.gmra.mxu0 %vm887_vm0, %v2967_v50 }
0x11c3   : > { %11432 = vmatprep.mubr.msk.bf16.mxu0 %vm12452_vm2, %v12451_v8  ;;  %11425 = vmatpush3.bf16.msra.mxu0 %v12105_v61  ;;  %v10601_v61 = vld [vmem:[%s14420_s22] ss:$0 sm:$0xff]  ;;  %s14424_s22 = smov 40  }
0x11c4   : > { %11426 = vmatprep.subr.bf16.mxu0 %v12451_v8 }
0x11c7   : > { %11427 = vmatpush3.bf16.msra.mxu0 %v12106_v62  ;;  %v12123_v62 = vld [vmem:[%s14421_s14 + $0x8] sm:$0xff]  }
0x11c8   : > { %11428 = vmatprep.subr.bf16.mxu0 %v12451_v8 }
0x11cb   : > { %11429 = vmatpush3.bf16.msra.mxu0 %v12107_v16 }
0x11cc   : > { %11430 = vmatprep.subr.bf16.mxu0 %v12451_v8 }
0x11cf   : > { %11431 = vmatpush3.bf16.msra.mxu0 %v12108_v17 }
0x11d0   : > { %11436 = vmatprep.subr.bf16.mxu0 %v12451_v8 }
0x1282   : > { %v3017_v51 = vpop.f32.mrf.mxu0 }
0x1283   : > { %v12989_v52 = vadd.f32 %v3017_v51, %v12827_v23  ;;  %v12103_v23 = vld [vmem:[%s14398_s12 + $0x18] sm:$0xff]   ;;  %v12122_v51 = vld [vmem:[%s14418_s13] sm:$0xff]   ;;  %s14427_s13 = sld [smem:[#allocation11_spill]] }
0x1284   : > { %v11414_v53 = vpop.f32.mrf.mxu0  ;;  %11417 = vmatpush3.bf16.msra.mxu1 %v12103_v23 }
0x1285   : > { %v3028_v54 = vmul.f32 %v12989_v52, %v12989_v52  ;;  %11418 = vmatprep.subr.bf16.mxu1 %v12451_v8 }
0x1286   : > { %v3020_v55 = vpop.f32.mrf.mxu0 }
0x1287   : > { %v12994_v56 = vadd.f32 %v3020_v55, %v12831_v15  ;;  %v3030_v57 = vsel %vm887_vm0, %v3028_v54, 0.0  ;;  %v12104_v15 = vld [vmem:[%s14398_s12 + $0x10] sm:$0xff]   ;;  %s14425_s12 = sld [smem:[#allocation10_spill]] }
0x1288   : > { %3031 = vadd.xlane.f32.xlu1 %v3030_v57  ;;  %v11415_v58 = vpop.f32.mrf.mxu0  ;;  %11419 = vmatpush3.bf16.msra.mxu1 %v12104_v15 }
0x1289   : > { %v3029_v59 = vmul.f32 %v12994_v56, %v12994_v56  ;;  %3331 = vmatprep.subr.bf16.mxu1 %v12467_v40 }
0x128b   : > { %v3033_v60 = vsel %vm891_vm1, %v3029_v59, 0.0 }
0x128c   : > { %3034 = vadd.xlane.f32.xlu0 %v3033_v60  ;;  %v13096_v60 = vld [vmem:[%s14419_s9] ss:$0 sm:$0xff] }
0x1311   : > { %v3032_v63 = vpop.xlane.xlu1 %3031 }
0x1312   : > { %v3036_v2 = vmul.f32 0.03125, %v3032_v63 }
0x1314   : > { %v3038_v3 = vadd.f32 1e-06, %v3036_v2 }
0x1315   : > { %v3035_v4 = vpop.xlane.xlu0 %3034 }
0x1316   : > { %12257 = vrsqrt.f32 %v3038_v3  ;;  %v3037_v5 = vmul.f32 0.03125, %v3035_v4  ;;  %v12124_v3 = vld [vmem:[%s14421_s14] sm:$0xff]   ;;  %s14353_s14 = sshll.u32 %s14448_s5, 2 }
0x1317   : > { %s876_s24 = scalar_lea.vmem %s14428_s30, %s14353_s14  ;;  %s14434_s14 = sld [smem:[#allocation25_spill]] }
0x1318   : > { %v3039_v6 = vadd.f32 1e-06, %v3037_v5  ;;  %s14435_s30 = sld [smem:[#allocation24_spill]] }
0x131a   : > { %12259 = vrsqrt.f32 %v3039_v6 }
0x1323   : > { %v12258_v7 = vpop.eup %12257 }
0x1324   : > { %v3042_v9 = vmul.f32 %v12258_v7, %v12989_v52 }
0x1326   : > { %v3050_v25 = vmul.f32 %v10579_v11, %v3042_v9 }
0x1327   : > { %v12260_v10 = vpop.eup %12259 }
0x1328   : > { %v3043_v12 = vmul.f32 %v12260_v10, %v12994_v56 }
0x132a   : > { %v3051_v13 = vmul.f32 %v10579_v11, %v3043_v12 }
0x132c   : > { %v3057_v14 = vpack.c.bf16 %v3051_v13, %v3050_v25 }
0x132e   : > { %11421 = vmatmul.mubr.msk.bf16.vlgmr.msra.gmra.mxu1 %vm887_vm0, %v3057_v14 }
0x132f   : > { %3332 = vmatpush1.bf16.msra.mxu1 %v12109_v18  ;;  %10614 = vmatprep.mubr.msk.bf16.mxu1 %vm1995_vm9, %v3248_v21 }
0x1330   : > { %3333 = vmatprep.subr.bf16.mxu1 %v12467_v40 }
0x1333   : > { %3334 = vmatpush1.bf16.msra.mxu1 %v12110_v19 }
0x1334   : > { %3335 = vmatprep.subr.bf16.mxu1 %v12467_v40 }
0x1337   : > { %3336 = vmatpush1.bf16.msra.mxu1 %v12111_v22 }
0x1338   : > { %3337 = vmatprep.subr.bf16.mxu1 %v12467_v40 }
0x133b   : > { %3338 = vmatpush1.bf16.msra.mxu1 %v12112_v24 }
0x133c   : > { %3339 = vmatprep.subr.bf16.mxu1 %v12467_v40 }
0x133f   : > { %3340 = vmatpush1.bf16.msra.mxu1 %v12113_v26 }
0x1340   : > { %3341 = vmatprep.subr.bf16.mxu1 %v12467_v40 }
0x1343   : > { %3342 = vmatpush1.bf16.msra.mxu1 %v12114_v27 }
0x1344   : > { %3343 = vmatprep.subr.bf16.mxu1 %v12467_v40 }
0x1347   : > { %3344 = vmatpush1.bf16.msra.mxu1 %v12115_v28 }
0x1348   : > { %3345 = vmatprep.subr.bf16.mxu1 %v12467_v40 }
0x134b   : > { %3346 = vmatpush1.bf16.msra.mxu1 %v12116_v29 }
0x134c   : > { %3355 = vmatprep.subr.bf16.mxu1 %v12467_v40 }
0x134f   : > { %3356 = vmatpush2.bf16.msra.mxu1 %v12117_v30 }
0x1350   : > { %3357 = vmatprep.subr.bf16.mxu1 %v12467_v40 }
0x1353   : > { %3358 = vmatpush2.bf16.msra.mxu1 %v12118_v38 }
0x1354   : > { %3359 = vmatprep.subr.bf16.mxu1 %v12467_v40 }
0x1357   : > { %3360 = vmatpush2.bf16.msra.mxu1 %v12119_v31 }
0x1358   : > { %3361 = vmatprep.subr.bf16.mxu1 %v12467_v40 }
0x135b   : > { %3362 = vmatpush2.bf16.msra.mxu1 %v12120_v32 }
0x135c   : > { %11477 = vmatprep.subr.mxu1 %v12451_v8 }
0x135e   : > { %3364 = vmatmul.mubr.bf16.vlgmr.msra.gmra.mxu1 %v3247_v34 }
0x135f   : > { %11479 = vmatprep.mubr.msk.f32.mxu1 %vm12452_vm2, %v12451_v8 }
0x13ee   : > { %v3107_v35 = vpop.f32.mrf.mxu1 }
0x13ef   : > { %v3114_v39 = vmax.f32 %v3107_v35, 0.0 }
0x13f0   : > { %v11422_v36 = vpop.f32.mrf.mxu1 }
0x13f2   : > { %v3110_v37 = vpop.f32.mrf.mxu1 }
0x13f3   : > { %v3115_v41 = vmax.f32 %v3110_v37, 0.0 }
0x13f4   : > { %v11423_v42 = vpop.f32.mrf.mxu1 }
0x13f5   : > { %v3125_v43 = vpack.c.bf16 %v3115_v41, %v3114_v39 }
0x13f7   : > { %11433 = vmatmul.mubr.msk.bf16.vlgmr.msra.gmra.mxu0 %vm1995_vm9, %v3125_v43 }
0x13f8   : > { %11440 = vmatprep.mubr.msk.bf16.mxu0 %vm12452_vm2, %v12451_v8  ;;  %11437 = vmatpush3.bf16.msra.mxu0 %v12121_v49 }
0x13f9   : > { %11438 = vmatprep.subr.bf16.mxu0 %v12451_v8 }
0x13fc   : > { %11439 = vmatpush3.bf16.msra.mxu0 %v12122_v51 }
0x13fd   : > { %11444 = vmatprep.subr.bf16.mxu0 %v12451_v8 }
0x141e   : > { %v3365_v50 = vpop.f32.mrf.mxu1 }
0x141f   : > { %v3366_v2 = vadd.f32 %v10601_v61, %v3365_v50 }
0x1420   : > { %v3367_v53 = vpop.f32.mrf.mxu1 }
0x1421   : > { %v3435_v4 = vpack.c.bf16 %v3366_v2, %v3366_v2 }
0x1422   : > { %v3368_v54 = vpop.f32.mrf.mxu1 }
0x1424   : > { %v3369_v55 = vpop.f32.mrf.mxu1 }
0x14b7   : > { %v13081_v44 = vpop.f32.mrf.mxu0 }
0x14b9   : > { %v11434_v45 = vpop.f32.mrf.mxu0 }
0x14bb   : > { %v3190_v46 = vpop.f32.mrf.mxu0 }
0x14bc   : > { %v3195_v47 = vadd.f32 %v3190_v46, %v12994_v56 }
0x14bd   : > { %v11435_v48 = vpop.f32.mrf.mxu0 }
0x14be   : > { %v3198_v0 = vmul.f32 %v3195_v47, %v3195_v47 }
0x14c0   : > { %v3202_v1 = vsel %vm891_vm1, %v3198_v0, 0.0 }
0x14c1   : > { %3203 = vadd.xlane.f32.xlu0 %v3202_v1 }
0x154a   : > { %v3204_v56 = vpop.xlane.xlu0 %3203 }
0x154b   : > { %v3206_v57 = vmul.f32 0.03125, %v3204_v56 }
0x154d   : > { %v3208_v58 = vadd.f32 1e-06, %v3206_v57 }
0x154f   : > { %12261 = vrsqrt.f32 %v3208_v58 }
0x155c   : > { %v12262_v59 = vpop.eup %12261 }
0x155d   : > { %v3212_v23 = vmul.f32 %v12262_v59, %v3195_v47 }
0x155f   : > { %v3220_v15 = vmul.f32 %v13096_v60, %v3212_v23 }
0x1561   : > { %v3375_v63 = vpack.c.bf16 %v3220_v15, %v3220_v15 }
0x1563   : > { %11441 = vmatmul.mubr.msk.bf16.vlgmr.msra.gmra.mxu0 %vm887_vm0, %v3375_v63 }
0x1564   : > { %11445 = vmatpush3.bf16.msra.mxu0 %v12123_v62  ;;  %11448 = vmatprep.mubr.msk.bf16.mxu0 %vm12452_vm2, %v12451_v8 }
0x1565   : > { %11446 = vmatprep.subr.bf16.mxu0 %v12451_v8 }
0x1568   : > { %11447 = vmatpush3.bf16.msra.mxu0 %v12124_v3 }
0x1569   : > { %11452 = vmatprep.subr.mxu0 %v12451_v8 }
0x156b   : > { %11449 = vmatmul.mubr.msk.bf16.vlgmr.msra.gmra.mxu0 %vm887_vm0, %v3435_v4 }
0x156c   : > { %11454 = vmatprep.mubr.msk.f32.mxu0 %vm12452_vm2, %v12451_v8 }
0x1623   : > { %v3425_v5 = vpop.f32.mrf.mxu0 }
0x1625   : > { %v11442_v6 = vpop.f32.mrf.mxu0 }
0x1627   : > { %v3428_v7 = vpop.f32.mrf.mxu0 }
0x1629   : > { %v11443_v9 = vpop.f32.mrf.mxu0 }
0x162b   : > { %v13116_v10 = vpop.f32.mrf.mxu0 }
0x162c   : > { %11453 = vmatpush3.xpose.msk.msra.mxu0 %vm979_vm3, %v13116_v10 }
0x162d   : > { %v11450_v11 = vpop.f32.mrf.mxu0  ;;  %11457 = vmatprep.subr.mxu0 %v12451_v8 }
0x162f   : > { %v3488_v12 = vpop.f32.mrf.mxu0  ;;  %11455 = vmatmul.mubr.msk.f32.vlgmr.msra.gmra.mxu0 %vm979_vm3, %v3425_v5 }
0x1630   : > { %11459 = vmatprep.mubr.msk.f32.mxu0 %vm12452_vm2, %v12451_v8 }
0x1631   : > { %v11451_v25 = vpop.f32.mrf.mxu0 }
0x1632   : > { %v12126_v25 = vld [vmem:[%s14422_s15] sm:$0xff]  }
0x16ef   : > { %v3563_v13 = vpop.f32.mrf.mxu0 }
0x16f0   : > { %v3568_v14 = vsel %vm3567_vm10, %v3563_v13, -inf }
0x16f1   : > { %3569 = vmax.xlane.f32.xlu1 %v3568_v14  ;;  %v11456_v16 = vpop.f32.mrf.mxu0 }
0x1702   : > { %3579 = vrot.lane.b32.xlu1 %v13116_v10, %s14402_s1 }
0x1706   : > { %3655 = vrot.lane.b32.xlu1 %v3425_v5, %s14403_s10 }
0x177a   : > { %v3570_v17 = vpop.xlane.xlu1 %3569 }
0x177b   : > { %v3571_v18 = vsub.f32 %v3563_v13, %v3570_v17 }
0x177d   : > { %v3572_v40 = vmul.f32 1.442695, %v3571_v18  ;;  %v3194_v18 = vadd.f32 %v13081_v44, %v12989_v52  ;;  %v4171_v44 = vlaneseq }
0x177e   : > { %v3580_v19 = vpop.permute.xlu1 %3579 }
0x177f   : > { %12263 = vpow2.f32 %v3572_v40  ;;  %11458 = vmatpush3.msra.mxu0 %v3580_v19  ;;  %v3197_v40 = vmul.f32 %v3194_v18, %v3194_v18 }
0x1780   : > { %11462 = vmatprep.subr.mxu0 %v12451_v8 }
0x1781   : > { %v3199_v19 = vsel %vm887_vm0, %v3197_v40, 0.0 }
0x1782   : > { %v3656_v28 = vpop.permute.xlu1 %3655 }
0x178c   : > { %v12264_v20 = vpop.eup %12263 }
0x178d   : > { %v3574_v21 = vsel %vm3567_vm10, %v12264_v20, 0.0 }
0x178e   : > { %3575 = vadd.xlane.f32.xlu0 %v3574_v21 }
0x17a4   : > { %3657 = vrot.lane.b32.xlu0 %v13116_v10, %s14403_s10 }
0x1817   : > { %v3576_v22 = vpop.xlane.xlu0 %3575 }
0x1818   : > { %12265 = vrcp.f32 %v3576_v22 }
0x181b   : > { %v3658_v27 = vpop.permute.xlu0 %3657 }
0x1825   : > { %v12266_v24 = vpop.eup %12265 }
0x1826   : > { %v3578_v26 = vmul.f32 %v12266_v24, %v12264_v20 }
0x1828   : > { %11460 = vmatmul.mubr.msk.f32.vlgmr.msra.gmra.mxu0 %vm979_vm3, %v3578_v26 }
0x1829   : > { %11463 = vmatpush3.xpose.msk.msra.mxu0 %vm979_vm3, %v3658_v27  ;;  %11464 = vmatprep.mubr.msk.f32.mxu0 %vm12452_vm2, %v12451_v8 }
0x182a   : > { %11467 = vmatprep.subr.mxu0 %v12451_v8 }
0x182c   : > { %11465 = vmatmul.mubr.msk.f32.vlgmr.msra.gmra.mxu0 %vm979_vm3, %v3656_v28 }
0x182d   : > { %11469 = vmatprep.mubr.msk.f32.mxu0 %vm12452_vm2, %v12451_v8 }
0x18e8   : > { %v13140_v29 = vpop.f32.mrf.mxu0 }
0x18ea   : > { %v11461_v30 = vpop.f32.mrf.mxu0 }
0x18ec   : > { %v3729_v38 = vpop.f32.mrf.mxu0 }
0x18ed   : > { %v3733_v31 = vsel %vm3567_vm10, %v3729_v38, -inf }
0x18ee   : > { %3734 = vmax.xlane.f32.xlu1 %v3733_v31  ;;  %v11466_v32 = vpop.f32.mrf.mxu0  ;;  %v13201_v31 = vshrl.u32 %v4171_v44, 7 }
0x18f0   : > { %v4173_v32 = vsub.s32 0, %v13201_v31 }
0x18ff   : > { %3822 = vrot.lane.b32.xlu1 %v13116_v10, %s14404_s0 }
0x1903   : > { %3820 = vrot.lane.b32.xlu1 %v3425_v5, %s14404_s0 }
0x1907   : > { %3985 = vrot.lane.b32.xlu1 %v3425_v5, %s14410_s26 }
0x1977   : > { %v3735_v33 = vpop.xlane.xlu1 %3734 }
0x1978   : > { %v3736_v34 = vsub.f32 %v3729_v38, %v3735_v33 }
0x197a   : > { %v3737_v35 = vmul.f32 1.442695, %v3736_v34 }
0x197b   : > { %v3823_v42 = vpop.permute.xlu1 %3822 }
0x197c   : > { %12267 = vpow2.f32 %v3737_v35 }
0x197f   : > { %v3821_v46 = vpop.permute.xlu1 %3820 }
0x1983   : > { %v3986_v48 = vpop.permute.xlu1 %3985 }
0x1989   : > { %v12268_v36 = vpop.eup %12267 }
0x198a   : > { %v3739_v37 = vsel %vm3567_vm10, %v12268_v36, 0.0 }
0x198b   : > { %3740 = vadd.xlane.f32.xlu0 %v3739_v37 }
0x19a1   : > { %3744 = vrot.lane.b32.xlu0 %v13116_v10, %s14401_s7 }
0x19a5   : > { %3987 = vrot.lane.b32.xlu0 %v13116_v10, %s14410_s26 }
0x1a14   : > { %v3741_v39 = vpop.xlane.xlu0 %3740 }
0x1a15   : > { %12269 = vrcp.f32 %v3741_v39 }
0x1a18   : > { %v3745_v41 = vpop.permute.xlu0 %3744 }
0x1a19   : > { %11468 = vmatpush3.msra.mxu0 %v3745_v41 }
0x1a1a   : > { %11472 = vmatprep.subr.mxu0 %v12451_v8 }
0x1a1c   : > { %v3988_v47 = vpop.permute.xlu0 %3987 }
0x1a22   : > { %v12270_v43 = vpop.eup %12269 }
0x1a23   : > { %v3743_v45 = vmul.f32 %v12270_v43, %v12268_v36 }
0x1a25   : > { %11470 = vmatmul.mubr.msk.f32.vlgmr.msra.gmra.mxu0 %vm979_vm3, %v3743_v45 }
0x1a26   : > { %11473 = vmatpush3.xpose.msk.msra.mxu0 %vm979_vm3, %v3823_v42  ;;  %11474 = vmatprep.mubr.msk.f32.mxu0 %vm12452_vm2, %v12451_v8  ;;  %v4178_v42 = vsub.s32 1, %v13201_v31 }
0x1a27   : > { %11482 = vmatprep.subr.mxu0 %v12451_v8 }
0x1a29   : > { %11475 = vmatmul.mubr.msk.f32.vlgmr.msra.gmra.mxu0 %vm979_vm3, %v3821_v46 }
0x1a2a   : > { %11483 = vmatpush3.xpose.msk.msra.mxu0 %vm979_vm3, %v3988_v47  ;;  %11484 = vmatprep.mubr.msk.f32.mxu0 %vm12452_vm2, %v12451_v8 }
0x1a2b   : > { %11492 = vmatprep.subr.bf16.mxu0 %v12451_v8 }
0x1a2d   : > { %11485 = vmatmul.mubr.msk.f32.vlgmr.msra.gmra.mxu0 %vm979_vm3, %v3986_v48 }
0x1a2e   : > { %11496 = vmatprep.mubr.msk.bf16.mxu0 %vm12452_vm2, %v12451_v8 }
0x1ae5   : > { %v3816_v0 = vpop.f32.mrf.mxu0 }
0x1ae7   : > { %v11471_v1 = vpop.f32.mrf.mxu0 }
0x1ae9   : > { %v3894_v49 = vpop.f32.mrf.mxu0 }
0x1aea   : > { %v3898_v50 = vsel %vm3567_vm10, %v3894_v49, -inf }
0x1aeb   : > { %3899 = vmax.xlane.f32.xlu0 %v3898_v50  ;;  %v11476_v51 = vpop.f32.mrf.mxu0  ;;  %v12128_v50 = vld [vmem:[%s14395_s29] sm:$0xff]  }
0x1aed   : > { %v4059_v53 = vpop.f32.mrf.mxu0 }
0x1aee   : > { %v4063_v54 = vsel %vm3567_vm10, %v4059_v53, -inf }
0x1aef   : > { %4064 = vmax.xlane.f32.xlu1 %v4063_v54  ;;  %v11486_v55 = vpop.f32.mrf.mxu0 }
0x1b00   : > { %3909 = vrot.lane.b32.xlu1 %v13116_v10, %s14405_s3 }
0x1b04   : > { %4151 = vrot.lane.b32.xlu1 %v3816_v0, %s14412_s23 }
0x1b74   : > { %v3900_v56 = vpop.xlane.xlu0 %3899 }
0x1b75   : > { %v3901_v57 = vsub.f32 %v3894_v49, %v3900_v56  ;;  %v12127_v49 = vld [vmem:[%s14395_s29 + $0x8] sm:$0xff]  }
0x1b77   : > { %v3902_v58 = vmul.f32 1.442695, %v3901_v57 }
0x1b78   : > { %v4065_v59 = vpop.xlane.xlu1 %4064 }
0x1b79   : > { %12271 = vpow2.f32 %v3902_v58  ;;  %v4066_v23 = vsub.f32 %v4059_v53, %v4065_v59 }
0x1b7b   : > { %v4067_v15 = vmul.f32 1.442695, %v4066_v23 }
0x1b7c   : > { %v3910_v61 = vpop.permute.xlu1 %3909 }
0x1b7d   : > { %12273 = vpow2.f32 %v4067_v15  ;;  %11478 = vmatpush3.msra.mxu1 %v3910_v61  ;;  %v10636_v15 = vld [vmem:[%s14396_s4] ss:$0 sm:$0xff] }
0x1b7e   : > { %11487 = vmatprep.subr.mxu1 %v12451_v8 }
0x1b80   : > { %v4152_v20 = vpop.permute.xlu1 %4151 }
0x1b81   : > { %v4162_v22 = vsel %vm979_vm3, %v13140_v29, %v4152_v20  ;;  %v4170_v29 = vld [vmem:[%s14423_s27] sm:$0x3]  ;;  %s14436_s27 = sld [smem:[#allocation23_spill]] }
0x1b82   : > { %v4174_v35 = vrot.slane %v4170_v29, %v4173_v32  ;;  %v4179_v43 = vrot.slane %v4170_v29, %v4178_v42 }
0x1b86   : > { %v12272_v62 = vpop.eup %12271 }
0x1b87   : > { %v3904_v63 = vsel %vm3567_vm10, %v12272_v62, 0.0 }
0x1b88   : > { %3905 = vadd.xlane.f32.xlu0 %v3904_v63 }
0x1b8a   : > { %v12274_v2 = vpop.eup %12273 }
0x1b8b   : > { %v4069_v3 = vsel %vm3567_vm10, %v12274_v2, 0.0 }
0x1b8c   : > { %4070 = vadd.xlane.f32.xlu0 %v4069_v3 }
0x1ba2   : > { %4074 = vrot.lane.b32.xlu0 %v13116_v10, %s14409_s28  ;;  %v12125_v10 = vld [vmem:[%s14422_s15 + $0x8] sm:$0xff]  }
0x1ba3   : > { %11493 = vmatpush3.bf16.msra.mxu0 %v12125_v10 }
0x1ba4   : > { %11494 = vmatprep.subr.bf16.mxu0 %v12451_v8 }
0x1ba7   : > { %11495 = vmatpush3.bf16.msra.mxu0 %v12126_v25 }
0x1c11   : > { %v3906_v4 = vpop.xlane.xlu0 %3905 }
0x1c12   : > { %12275 = vrcp.f32 %v3906_v4 }
0x1c15   : > { %v4071_v5 = vpop.xlane.xlu0 %4070 }
0x1c16   : > { %12277 = vrcp.f32 %v4071_v5 }
0x1c19   : > { %v4075_v9 = vpop.permute.xlu0 %4074 }
0x1c1f   : > { %v12276_v6 = vpop.eup %12275 }
0x1c20   : > { %v3908_v7 = vmul.f32 %v12276_v6, %v12272_v62 }
0x1c22   : > { %11480 = vmatmul.mubr.msk.f32.vlgmr.msra.gmra.mxu1 %vm979_vm3, %v3908_v7 }
0x1c23   : > { %v12278_v11 = vpop.eup %12277  ;;  %11488 = vmatpush3.msra.mxu1 %v4075_v9  ;;  %11489 = vmatprep.mubr.msk.f32.mxu1 %vm12452_vm2, %v12451_v8 }
0x1c24   : > { %v4073_v12 = vmul.f32 %v12278_v11, %v12274_v2  ;;  %11500 = vmatprep.subr.bf16.mxu1 %v12451_v8 }
0x1c26   : > { %11490 = vmatmul.mubr.msk.f32.vlgmr.msra.gmra.mxu1 %vm979_vm3, %v4073_v12 }
0x1c27   : > { %11504 = vmatprep.mubr.msk.bf16.mxu1 %vm12452_vm2, %v12451_v8  ;;  %11501 = vmatpush3.bf16.msra.mxu1 %v12127_v49 }
0x1c28   : > { %11502 = vmatprep.subr.bf16.mxu1 %v12451_v8 }
0x1c2b   : > { %11503 = vmatpush3.bf16.msra.mxu1 %v12128_v50 }
0x1ce2   : > { %v3981_v13 = vpop.f32.mrf.mxu1 }
0x1ce3   : > { %4155 = vrot.lane.b32.xlu1 %v3981_v13, %s14413_s25 }
0x1ce4   : > { %v11481_v14 = vpop.f32.mrf.mxu1 }
0x1ce6   : > { %v4146_v16 = vpop.f32.mrf.mxu1 }
0x1ce7   : > { %4159 = vrot.lane.b32.xlu0 %v4146_v16, %s14414_s21 }
0x1ce8   : > { %v11491_v17 = vpop.f32.mrf.mxu1 }
0x1d07   : > { %3200 = vadd.xlane.f32.xlu1 %v3199_v19 }
0x1d55   : > { %v4156_v21 = vpop.permute.xlu1 %4155 }
0x1d56   : > { %v4163_v24 = vsel %vm1805_vm7, %v4162_v22, %v4156_v21 }
0x1d59   : > { %v4160_v26 = vpop.permute.xlu0 %4159 }
0x1d5a   : > { %v4164_v27 = vsel %vm1808_vm8, %v4163_v24, %v4160_v26 }
0x1d5b   : > { %v4169_v28 = vpack.c.bf16 %v4164_v27, %v4164_v27 }
0x1d5d   : > { %11497 = vmatmul.mubr.msk.bf16.vlgmr.msra.gmra.mxu0 %vm887_vm0, %v4169_v28 }
0x1d90   : > { %v3201_v30 = vpop.xlane.xlu1 %3200 }
0x1d91   : > { %v3205_v38 = vmul.f32 0.03125, %v3201_v30 }
0x1d93   : > { %v3207_v52 = vadd.f32 1e-06, %v3205_v38 }
0x1d95   : > { %12279 = vrsqrt.f32 %v3207_v52 }
0x1da2   : > { %v12280_v33 = vpop.eup %12279 }
0x1da3   : > { %v3211_v34 = vmul.f32 %v12280_v33, %v3194_v18 }
0x1da5   : > { %v3219_v36 = vmul.f32 %v13096_v60, %v3211_v34 }
0x1da7   : > { %v13208_v37 = vadd.f32 %v4174_v35, %v3219_v36 }
0x1da9   : > { %v4236_v39 = vmul.f32 %v13208_v37, %v13208_v37 }
0x1dab   : > { %v4238_v41 = vsel %vm887_vm0, %v4236_v39, 0.0 }
0x1dac   : > { %4239 = vadd.xlane.f32.xlu0 %v4238_v41 }
0x1e1d   : > { %v4229_v45 = vpop.f32.mrf.mxu0 }
0x1e1e   : > { %v13214_v46 = vadd.f32 %v4229_v45, %v4179_v43 }
0x1e1f   : > { %v11498_v47 = vpop.f32.mrf.mxu0 }
0x1e20   : > { %v4237_v48 = vmul.f32 %v13214_v46, %v13214_v46 }
0x1e21   : > { %v4232_v0 = vpop.f32.mrf.mxu0 }
0x1e22   : > { %v4241_v60 = vsel %vm891_vm1, %v4237_v48, 0.0 }
0x1e23   : > { %4242 = vadd.xlane.f32.xlu0 %v4241_v60  ;;  %v11499_v1 = vpop.f32.mrf.mxu0 }
0x1e35   : > { %v4240_v51 = vpop.xlane.xlu0 %4239 }
0x1e36   : > { %v4244_v53 = vmul.f32 0.03125, %v4240_v51 }
0x1e38   : > { %v4246_v54 = vadd.f32 1e-06, %v4244_v53 }
0x1e3a   : > { %12281 = vrsqrt.f32 %v4246_v54 }
0x1e47   : > { %v12282_v58 = vpop.eup %12281 }
0x1e48   : > { %v4250_v59 = vmul.f32 %v12282_v58, %v13208_v37 }
0x1e4a   : > { %v4258_v62 = vmul.f32 %v10636_v15, %v4250_v59 }
0x1eac   : > { %v4243_v55 = vpop.xlane.xlu0 %4242 }
0x1ead   : > { %v4245_v56 = vmul.f32 0.03125, %v4243_v55 }
0x1eaf   : > { %v4247_v57 = vadd.f32 1e-06, %v4245_v56 }
0x1eb1   : > { %12283 = vrsqrt.f32 %v4247_v57 }
0x1ebe   : > { %v12284_v23 = vpop.eup %12283 }
0x1ebf   : > { %v4251_v61 = vmul.f32 %v12284_v23, %v13214_v46 }
0x1ec1   : > { %v4259_v63 = vmul.f32 %v10636_v15, %v4251_v61 }
0x1ec3   : > { %v4264_v2 = vpack.c.bf16 %v4259_v63, %v4258_v62 }
0x1ec5   : > { %11505 = vmatmul.mubr.msk.bf16.vlgmr.msra.gmra.mxu1 %vm887_vm0, %v4264_v2 }
0x1f85   : > { %v13232_v3 = vpop.f32.mrf.mxu1 }
0x1f86   : > { %4323 = vrot.lane.b32.xlu0 %v13232_v3, %s14402_s1  ;;  %11512 = vmatprep.mubr.msk.f32.mxu0 %vm979_vm3, %v13232_v3 }
0x1f87   : > { %v11506_v4 = vpop.f32.mrf.mxu1 }
0x1f89   : > { %v13238_v5 = vpop.f32.mrf.mxu1 }
0x1f8a   : > { %4520 = vrot.lane.b32.xlu0 %v13232_v3, %s14403_s10  ;;  %4325 = vrot.lane.b32.xlu1 %v13238_v5, %s14402_s1 }
0x1f8b   : > { %v11507_v6 = vpop.f32.mrf.mxu1 }
0x1f8e   : > { %4526 = vrot.lane.b32.xlu1 %v13238_v5, %s14401_s7 }
0x1f92   : > { %4524 = vrot.lane.b32.xlu1 %v13232_v3, %s14401_s7 }
0x1f96   : > { %4522 = vrot.lane.b32.xlu1 %v13238_v5, %s14403_s10 }
0x1ff8   : > { %v4324_v9 = vpop.permute.xlu0 %4323 }
0x1ffc   : > { %v4326_v7 = vpop.permute.xlu1 %4325  ;;  %v4521_v12 = vpop.permute.xlu0 %4520 }
0x1ffd   : > { %11508 = vmatprep.subr.msk.mxu0 %vm979_vm3, %v4326_v7 }
0x1ffe   : > { %11509 = vmatpush3.xpose.msk.msra.mxu0 %vm979_vm3, %v4326_v7 }
0x1fff   : > { %11510 = vmatprep.subr.msk.mxu0 %vm979_vm3, %v4324_v9 }
0x2000   : > { %v4527_v11 = vpop.permute.xlu1 %4526 }
0x2002   : > { %11511 = vmatpush3.xpose.msk.msra.mxu0 %vm979_vm3, %v4324_v9 }
0x2003   : > { %11522 = vmatprep.subr.msk.mxu0 %vm979_vm3, %v4527_v11 }
0x2004   : > { %v4525_v10 = vpop.permute.xlu1 %4524 }
0x2005   : > { %11513 = vmatmul.mubr.msk.f32.vlgmr.msra.gmra.mxu0 %vm979_vm3, %v13238_v5 }
0x2006   : > { %11523 = vmatpush3.xpose.msk.msra.mxu0 %vm979_vm3, %v4527_v11  ;;  %11526 = vmatprep.mubr.msk.f32.mxu0 %vm979_vm3, %v4521_v12 }
0x2007   : > { %11524 = vmatprep.subr.msk.mxu0 %vm979_vm3, %v4525_v10 }
0x2008   : > { %v4523_v25 = vpop.permute.xlu1 %4522 }
0x200a   : > { %11525 = vmatpush3.xpose.msk.msra.mxu0 %vm979_vm3, %v4525_v10 }
0x200d   : > { %11527 = vmatmul.mubr.msk.f32.vlgmr.msra.gmra.mxu0 %vm979_vm3, %v4523_v25 }
0x20c5   : > { %v11514_v13 = vpop.f32.mrf.mxu0 }
0x20c6   : > { %v4413_v14 = vsel %vm1067_vm4, %v11514_v13, -inf }
0x20c7   : > { %4414 = vmax.xlane.f32.xlu1 %v4413_v14  ;;  %v4401_v16 = vpop.f32.mrf.mxu0 }
0x20c8   : > { %v4410_v17 = vsel %vm1063_vm5, %v4401_v16, -inf }
0x20c9   : > { %4411 = vmax.xlane.f32.xlu0 %v4410_v17 }
0x20cd   : > { %v11528_v18 = vpop.f32.mrf.mxu0 }
0x20ce   : > { %v4614_v20 = vsel %vm1067_vm4, %v11528_v18, -inf }
0x20cf   : > { %v4602_v40 = vpop.f32.mrf.mxu0 }
0x20d0   : > { %v4611_v19 = vsel %vm1063_vm5, %v4602_v40, -inf }
0x20d1   : > { %4612 = vmax.xlane.f32.xlu0 %v4611_v19 }
0x20d5   : > { %4615 = vmax.xlane.f32.xlu0 %v4614_v20 }
0x20d8   : > { %4434 = vrot.lane.b32.xlu1 %v13238_v5, %s14406_s11 }
0x20dc   : > { %4635 = vrot.lane.b32.xlu1 %v13238_v5, %s14407_s2 }
0x20e0   : > { %4633 = vrot.lane.b32.xlu1 %v13232_v3, %s14407_s2 }
0x20eb   : > { %4432 = vrot.lane.b32.xlu0 %v13232_v3, %s14406_s11 }
0x2150   : > { %v4415_v21 = vpop.xlane.xlu1 %4414 }
0x2151   : > { %v4417_v22 = vsub.f32 %v11514_v13, %v4415_v21 }
0x2152   : > { %v4412_v24 = vpop.xlane.xlu0 %4411 }
0x2153   : > { %v4420_v26 = vmul.f32 1.442695, %v4417_v22  ;;  %v4416_v27 = vsub.f32 %v4401_v16, %v4412_v24 }
0x2154   : > { %v4435_v28 = vpop.permute.xlu1 %4434 }
0x2155   : > { %12285 = vpow2.f32 %v4420_v26  ;;  %v4418_v30 = vmul.f32 1.442695, %v4416_v27  ;;  %11515 = vmatprep.subr.msk.mxu1 %vm1098_vm6, %v4435_v28 }
0x2156   : > { %11516 = vmatpush3.msk.msra.mxu1 %vm1098_vm6, %v4435_v28 }
0x2157   : > { %12287 = vpow2.f32 %v4418_v30 }
0x2158   : > { %v4636_v39 = vpop.permute.xlu1 %4635 }
0x215a   : > { %v4613_v38 = vpop.xlane.xlu0 %4612 }
0x215b   : > { %v4617_v45 = vsub.f32 %v4602_v40, %v4613_v38 }
0x215c   : > { %v4634_v60 = vpop.permute.xlu1 %4633 }
0x215d   : > { %v4619_v47 = vmul.f32 1.442695, %v4617_v45 }
0x215e   : > { %v4616_v52 = vpop.xlane.xlu0 %4615 }
0x215f   : > { %v4618_v32 = vsub.f32 %v11528_v18, %v4616_v52 }
0x2161   : > { %v4621_v29 = vmul.f32 1.442695, %v4618_v32 }
0x2162   : > { %v12286_v33 = vpop.eup %12285  ;;  %v4433_v34 = vpop.permute.xlu0 %4432 }
0x2163   : > { %12289 = vpow2.f32 %v4621_v29  ;;  %11517 = vmatprep.subr.mxu1 %v4433_v34  ;;  %v4425_v35 = vsel %vm1067_vm4, %v12286_v33, 0.0 }
0x2164   : > { %v12288_v36 = vpop.eup %12287  ;;  %4426 = vadd.xlane.f32.xlu0 %v4425_v35  ;;  %11518 = vmatpush3.msra.mxu1 %v4433_v34  ;;  %12291 = vpow2.f32 %v4619_v47 }
0x2165   : > { %11529 = vmatprep.subr.msk.mxu1 %vm1098_vm6, %v4636_v39  ;;  %v4422_v41 = vsel %vm1063_vm5, %v12288_v36, 0.0 }
0x2166   : > { %4423 = vadd.xlane.f32.xlu1 %v4422_v41 }
0x2170   : > { %v12290_v42 = vpop.eup %12289 }
0x2171   : > { %v4626_v43 = vsel %vm1067_vm4, %v12290_v42, 0.0  ;;  %v12292_v48 = vpop.eup %12291 }
0x2172   : > { %4627 = vadd.xlane.f32.xlu0 %v4626_v43  ;;  %v4623_v0 = vsel %vm1063_vm5, %v12292_v48, 0.0 }
0x2177   : > { %4725 = vrot.lane.b32.xlu1 %v13232_v3, %s14405_s3 }
0x2188   : > { %4727 = vrot.lane.b32.xlu0 %v13238_v5, %s14405_s3 }
0x218c   : > { %4721 = vrot.lane.b32.xlu0 %v13232_v3, %s14404_s0 }
0x219b   : > { %4624 = vadd.xlane.f32.xlu1 %v4623_v0 }
0x21ac   : > { %4723 = vrot.lane.b32.xlu1 %v13238_v5, %s14404_s0 }
0x21ed   : > { %v4427_v1 = vpop.xlane.xlu0 %4426 }
0x21ee   : > { %12293 = vrcp.f32 %v4427_v1 }
0x21ef   : > { %v4424_v49 = vpop.xlane.xlu1 %4423 }
0x21f0   : > { %12295 = vrcp.f32 %v4424_v49 }
0x21f3   : > { %v4726_v57 = vpop.permute.xlu1 %4725 }
0x21fb   : > { %v12294_v50 = vpop.eup %12293  ;;  %v4628_v53 = vpop.xlane.xlu0 %4627 }
0x21fc   : > { %v4431_v55 = vmul.f32 %v12294_v50, %v12286_v33  ;;  %12297 = vrcp.f32 %v4628_v53 }
0x21fd   : > { %v12296_v51 = vpop.eup %12295 }
0x21fe   : > { %v4430_v54 = vmul.f32 %v12296_v51, %v12288_v36 }
0x21ff   : > { %v4728_v56 = vpop.permute.xlu0 %4727 }
0x2200   : > { %11519 = vmatprep.mubr.msk.f32.mxu1 %vm1063_vm5, %v4430_v54 }
0x2201   : > { %11520 = vmatmul.mubr.msk.f32.vlgmr.msra.gmra.mxu1 %vm1063_vm5, %v4431_v55 }
0x2202   : > { %11530 = vmatpush3.msk.msra.mxu1 %vm1098_vm6, %v4636_v39 }
0x2203   : > { %11531 = vmatprep.subr.mxu1 %v4634_v60  ;;  %v4722_v62 = vpop.permute.xlu0 %4721 }
0x2204   : > { %11532 = vmatpush3.msra.mxu1 %v4634_v60 }
0x2205   : > { %11536 = vmatprep.subr.msk.mxu1 %vm979_vm3, %v4728_v56 }
0x2209   : > { %v12298_v59 = vpop.eup %12297 }
0x220a   : > { %v4632_v61 = vmul.f32 %v12298_v59, %v12290_v42 }
0x2224   : > { %v4625_v58 = vpop.xlane.xlu1 %4624 }
0x2225   : > { %12299 = vrcp.f32 %v4625_v58 }
0x2228   : > { %v4724_v63 = vpop.permute.xlu1 %4723 }
0x2232   : > { %v12300_v23 = vpop.eup %12299 }
0x2233   : > { %v4631_v15 = vmul.f32 %v12300_v23, %v12292_v48 }
0x2235   : > { %11533 = vmatprep.mubr.msk.f32.mxu1 %vm1063_vm5, %v4631_v15 }
0x2236   : > { %11534 = vmatmul.mubr.msk.f32.vlgmr.msra.gmra.mxu1 %vm1063_vm5, %v4632_v61 }
0x2237   : > { %11537 = vmatpush3.xpose.msk.msra.mxu1 %vm979_vm3, %v4728_v56  ;;  %11540 = vmatprep.mubr.msk.f32.mxu1 %vm979_vm3, %v4722_v62  ;;  %v12130_v62 = vld [vmem:[%s14425_s12] sm:$0xff]  }
0x2238   : > { %11538 = vmatprep.subr.msk.mxu1 %vm979_vm3, %v4726_v57 }
0x223b   : > { %11539 = vmatpush3.xpose.msk.msra.mxu1 %vm979_vm3, %v4726_v57 }
0x223e   : > { %11541 = vmatmul.mubr.msk.f32.vlgmr.msra.gmra.mxu1 %vm979_vm3, %v4724_v63 }
0x22c1   : > { %v13300_v2 = vpop.f32.mrf.mxu1 }
0x22c3   : > { %v13302_v4 = vpop.f32.mrf.mxu1 }
0x22f6   : > { %v13304_v6 = vpop.f32.mrf.mxu1 }
0x22f8   : > { %v13306_v7 = vpop.f32.mrf.mxu1 }
0x22f9   : > { %v12059_v9 = vpack.i.bf16 %v13304_v6, %v13306_v7 }
0x22fe   : > { %v11542_v11 = vpop.f32.mrf.mxu1 }
0x22ff   : > { %v4815_v12 = vsel %vm1067_vm4, %v11542_v11, -inf }
0x2300   : > { %4816 = vmax.xlane.f32.xlu1 %v4815_v12  ;;  %v4803_v10 = vpop.f32.mrf.mxu1 }
0x2301   : > { %v4812_v25 = vsel %vm1063_vm5, %v4803_v10, -inf }
0x2302   : > { %4813 = vmax.xlane.f32.xlu0 %v4812_v25 }
0x2311   : > { %4836 = vrot.lane.b32.xlu1 %v13238_v5, %s14408_s8 }
0x2315   : > { %4928 = vrot.lane.b32.xlu1 %v13238_v5, %s14409_s28 }
0x2319   : > { %4926 = vrot.lane.b32.xlu1 %v13232_v3, %s14409_s28 }
0x231d   : > { %4924 = vrot.lane.b32.xlu1 %v13238_v5, %s14410_s26 }
0x2389   : > { %v4817_v13 = vpop.xlane.xlu1 %4816 }
0x238a   : > { %v4819_v14 = vsub.f32 %v11542_v11, %v4817_v13 }
0x238b   : > { %v4814_v16 = vpop.xlane.xlu0 %4813 }
0x238c   : > { %v4822_v17 = vmul.f32 1.442695, %v4819_v14  ;;  %v4818_v18 = vsub.f32 %v4803_v10, %v4814_v16 }
0x238d   : > { %v4837_v40 = vpop.permute.xlu1 %4836 }
0x238e   : > { %12301 = vpow2.f32 %v4822_v17  ;;  %v4820_v19 = vmul.f32 1.442695, %v4818_v18  ;;  %11543 = vmatprep.subr.msk.mxu0 %vm1098_vm6, %v4837_v40 }
0x238f   : > { %11544 = vmatpush3.msk.msra.mxu0 %vm1098_vm6, %v4837_v40 }
0x2390   : > { %12303 = vpow2.f32 %v4820_v19 }
0x2391   : > { %v4929_v30 = vpop.permute.xlu1 %4928 }
0x2395   : > { %v4927_v34 = vpop.permute.xlu1 %4926 }
0x2399   : > { %v4925_v35 = vpop.permute.xlu1 %4924 }
0x239b   : > { %v12302_v20 = vpop.eup %12301 }
0x239c   : > { %v4827_v21 = vsel %vm1067_vm4, %v12302_v20, 0.0 }
0x239d   : > { %v12304_v22 = vpop.eup %12303  ;;  %4828 = vadd.xlane.f32.xlu0 %v4827_v21 }
0x239e   : > { %v4824_v24 = vsel %vm1063_vm5, %v12304_v22, 0.0 }
0x23a1   : > { %4825 = vadd.xlane.f32.xlu0 %v4824_v24 }
0x23b7   : > { %4834 = vrot.lane.b32.xlu0 %v13232_v3, %s14408_s8 }
0x23bb   : > { %4922 = vrot.lane.b32.xlu0 %v13232_v3, %s14410_s26 }
0x2426   : > { %v4829_v26 = vpop.xlane.xlu0 %4828 }
0x2427   : > { %12305 = vrcp.f32 %v4829_v26 }
0x242a   : > { %v4826_v27 = vpop.xlane.xlu0 %4825 }
0x242b   : > { %12307 = vrcp.f32 %v4826_v27 }
0x242e   : > { %v4835_v28 = vpop.permute.xlu0 %4834 }
0x242f   : > { %11545 = vmatprep.subr.mxu0 %v4835_v28 }
0x2430   : > { %11546 = vmatpush3.msra.mxu0 %v4835_v28 }
0x2431   : > { %11550 = vmatprep.subr.msk.mxu0 %vm979_vm3, %v4929_v30 }
0x2432   : > { %v4923_v33 = vpop.permute.xlu0 %4922 }
0x2434   : > { %v12306_v38 = vpop.eup %12305 }
0x2435   : > { %v4833_v29 = vmul.f32 %v12306_v38, %v12302_v20 }
0x2438   : > { %v12308_v52 = vpop.eup %12307 }
0x2439   : > { %v4832_v32 = vmul.f32 %v12308_v52, %v12304_v22 }
0x243b   : > { %11547 = vmatprep.mubr.msk.f32.mxu0 %vm1063_vm5, %v4832_v32 }
0x243c   : > { %11548 = vmatmul.mubr.msk.f32.vlgmr.msra.gmra.mxu0 %vm1063_vm5, %v4833_v29 }
0x243d   : > { %11551 = vmatpush3.xpose.msk.msra.mxu0 %vm979_vm3, %v4929_v30  ;;  %11554 = vmatprep.mubr.msk.f32.mxu0 %vm979_vm3, %v4923_v33  ;;  %v12131_v33 = vld [vmem:[%s14426_s20 + $0x8] sm:$0xff]  }
0x243e   : > { %11552 = vmatprep.subr.msk.mxu0 %vm979_vm3, %v4927_v34 }
0x2441   : > { %11553 = vmatpush3.xpose.msk.msra.mxu0 %vm979_vm3, %v4927_v34  ;;  %v12134_v34 = vld [vmem:[%s14399_s6 + $0x10] sm:$0xff]  }
0x2442   : > { %11572 = vmatprep.subr.bf16.mxu0 %v12451_v8 }
0x2444   : > { %11555 = vmatmul.mubr.msk.f32.vlgmr.msra.gmra.mxu0 %vm979_vm3, %v4925_v35 }
0x2445   : > { %11576 = vmatprep.mubr.msk.bf16.mxu0 %vm12452_vm2, %v12451_v8  ;;  %11573 = vmatpush3.bf16.msra.mxu0 %v12131_v33 }
0x2446   : > { %11574 = vmatprep.subr.bf16.mxu0 %v12451_v8 }
0x24fc   : > { %v11549_v36 = vpop.f32.mrf.mxu0 }
0x24fe   : > { %v4913_v39 = vpop.f32.mrf.mxu0 }
0x24ff   : > { %v12064_v47 = vpack.i.bf16 %v11549_v36, %v4913_v39 }
0x2504   : > { %v11556_v41 = vpop.f32.mrf.mxu0 }
0x2505   : > { %v5016_v42 = vsel %vm1067_vm4, %v11556_v41, -inf }
0x2506   : > { %5017 = vmax.xlane.f32.xlu1 %v5016_v42  ;;  %v5004_v43 = vpop.f32.mrf.mxu0 }
0x2507   : > { %v5013_v45 = vsel %vm1063_vm5, %v5004_v43, -inf }
0x2508   : > { %5014 = vmax.xlane.f32.xlu0 %v5013_v45 }
0x2517   : > { %5037 = vrot.lane.b32.xlu1 %v13238_v5, %s14424_s22 }
0x251b   : > { %12060 = vrot.lane.b32.xlu1 %v12059_v9, %s14412_s23 }
0x251f   : > { %12065 = vrot.lane.b32.xlu1 %v12064_v47, %s14413_s25 }
0x258f   : > { %v5018_v48 = vpop.xlane.xlu1 %5017 }
0x2590   : > { %v5020_v0 = vsub.f32 %v11556_v41, %v5018_v48 }
0x2591   : > { %v5015_v60 = vpop.xlane.xlu0 %5014 }
0x2592   : > { %v5023_v1 = vmul.f32 1.442695, %v5020_v0  ;;  %v5019_v49 = vsub.f32 %v5004_v43, %v5015_v60  ;;  %v10671_v0 = vld [vmem:[%s14427_s13] ss:$0 sm:$0xff] }
0x2593   : > { %v5038_v50 = vpop.permute.xlu1 %5037 }
0x2594   : > { %12309 = vpow2.f32 %v5023_v1  ;;  %v5021_v51 = vmul.f32 1.442695, %v5019_v49  ;;  %11557 = vmatprep.subr.msk.mxu1 %vm1098_vm6, %v5038_v50 }
0x2595   : > { %11558 = vmatpush3.msk.msra.mxu1 %vm1098_vm6, %v5038_v50 }
0x2596   : > { %12311 = vpow2.f32 %v5021_v51  ;;  %v12135_v51 = vld [vmem:[%s14399_s6 + $0x8] sm:$0xff]  }
0x2597   : > { %v12061_v9 = vpop.permute.xlu1 %12060 }
0x2598   : > { %v12063_v12 = vunpack.i.h.bf16 %v12061_v9  ;;  %v12062_v10 = vunpack.i.l.bf16 %v12061_v9 }
0x259a   : > { %v5148_v16 = vsel %vm979_vm3, %v13300_v2, %v12063_v12  ;;  %v5147_v17 = vsel %vm979_vm3, %v13302_v4, %v12062_v10  ;;  %v12137_v12 = vld [vmem:[%s14395_s29 + $0x18] sm:$0xff]   ;;  %v12138_v10 = vld [vmem:[%s14395_s29 + $0x10] sm:$0xff]   ;;  %s14440_s29 = sld [smem:[#allocation27_spill]] }
0x259b   : > { %v12066_v11 = vpop.permute.xlu1 %12065 }
0x259c   : > { %v12068_v25 = vunpack.i.h.bf16 %v12066_v11  ;;  %v12067_v13 = vunpack.i.l.bf16 %v12066_v11 }
0x259e   : > { %v5149_v19 = vsel %vm1805_vm7, %v5147_v17, %v12067_v13  ;;  %v5150_v20 = vsel %vm1805_vm7, %v5148_v16, %v12068_v25 }
0x25a1   : > { %v12310_v5 = vpop.eup %12309 }
0x25a2   : > { %v5028_v53 = vsel %vm1067_vm4, %v12310_v5, 0.0 }
0x25a3   : > { %v12312_v54 = vpop.eup %12311  ;;  %5029 = vadd.xlane.f32.xlu0 %v5028_v53 }
0x25a4   : > { %v5025_v55 = vsel %vm1063_vm5, %v12312_v54, 0.0 }
0x25a7   : > { %5026 = vadd.xlane.f32.xlu0 %v5025_v55 }
0x25bd   : > { %5035 = vrot.lane.b32.xlu0 %v13232_v3, %s14424_s22  ;;  %v12129_v3 = vld [vmem:[%s14425_s12 + $0x8] sm:$0xff]  }
0x262c   : > { %v5030_v56 = vpop.xlane.xlu0 %5029 }
0x262d   : > { %12313 = vrcp.f32 %v5030_v56 }
0x2630   : > { %v5027_v57 = vpop.xlane.xlu0 %5026 }
0x2631   : > { %12315 = vrcp.f32 %v5027_v57 }
0x2634   : > { %v5036_v58 = vpop.permute.xlu0 %5035 }
0x2635   : > { %11559 = vmatprep.subr.mxu1 %v5036_v58 }
0x2636   : > { %11560 = vmatpush3.msra.mxu1 %v5036_v58 }
0x2637   : > { %11564 = vmatprep.subr.bf16.mxu1 %v12451_v8 }
0x263a   : > { %v12314_v59 = vpop.eup %12313 }
0x263b   : > { %v5034_v61 = vmul.f32 %v12314_v59, %v12310_v5  ;;  %v12136_v5 = vld [vmem:[%s14399_s6] sm:$0xff]  }
0x263e   : > { %v12316_v23 = vpop.eup %12315 }
0x263f   : > { %v5033_v15 = vmul.f32 %v12316_v23, %v12312_v54 }
0x2641   : > { %11561 = vmatprep.mubr.msk.f32.mxu1 %vm1063_vm5, %v5033_v15 }
0x2642   : > { %11562 = vmatmul.mubr.msk.f32.vlgmr.msra.gmra.mxu1 %vm1063_vm5, %v5034_v61 }
0x2643   : > { %11568 = vmatprep.mubr.msk.bf16.mxu1 %vm12452_vm2, %v12451_v8  ;;  %11565 = vmatpush3.bf16.msra.mxu1 %v12129_v3 }
0x2644   : > { %11566 = vmatprep.subr.bf16.mxu1 %v12451_v8 }
0x2647   : > { %11567 = vmatpush3.bf16.msra.mxu1 %v12130_v62 }
0x2648   : > { %11580 = vmatprep.subr.bf16.mxu1 %v12451_v8 }
0x2702   : > { %v11563_v63 = vpop.f32.mrf.mxu1 }
0x2704   : > { %v5114_v6 = vpop.f32.mrf.mxu1 }
0x2705   : > { %v12069_v7 = vpack.i.bf16 %v11563_v63, %v5114_v6 }
0x2707   : > { %12070 = vrot.lane.b32.xlu0 %v12069_v7, %s14414_s21 }
0x2779   : > { %v12071_v14 = vpop.permute.xlu0 %12070 }
0x277a   : > { %v12073_v18 = vunpack.i.h.bf16 %v12071_v14  ;;  %v12072_v40 = vunpack.i.l.bf16 %v12071_v14 }
0x277c   : > { %v5152_v21 = vsel %vm1808_vm8, %v5150_v20, %v12073_v18  ;;  %v5151_v22 = vsel %vm1808_vm8, %v5149_v19, %v12072_v40 }
0x277d   : > { %v5157_v24 = vpack.c.bf16 %v5152_v21, %v5151_v22  ;;  %v10681_v21 = vld [vmem:[%s14396_s4 + $0x1] ss:$0 sm:$0xff]  ;;  %s14438_s4 = sld [smem:[#allocation28_spill]] }
0x277f   : > { %11569 = vmatmul.mubr.msk.bf16.vlgmr.msra.gmra.mxu1 %vm887_vm0, %v5157_v24 }
0x2780   : > { %11588 = vmatprep.mubr.msk.bf16.mxu1 %vm12452_vm2, %v12451_v8 }
0x283f   : > { %v5207_v2 = vpop.f32.mrf.mxu1 }
0x2840   : > { %v5214_v26 = vadd.f32 %v5207_v2, %v13208_v37  ;;  %v12132_v37 = vld [vmem:[%s14426_s20] sm:$0xff]  }
0x2841   : > { %v11570_v4 = vpop.f32.mrf.mxu1  ;;  %11575 = vmatpush3.bf16.msra.mxu0 %v12132_v37 }
0x2842   : > { %v5217_v27 = vmul.f32 %v5214_v26, %v5214_v26  ;;  %11592 = vmatprep.subr.bf16.mxu0 %v12451_v8 }
0x2843   : > { %v5210_v28 = vpop.f32.mrf.mxu1 }
0x2844   : > { %v5215_v30 = vadd.f32 %v5210_v28, %v13214_v46  ;;  %v5219_v38 = vsel %vm887_vm0, %v5217_v27, 0.0  ;;  %v12133_v46 = vld [vmem:[%s14399_s6 + $0x18] sm:$0xff]  }
0x2845   : > { %5220 = vadd.xlane.f32.xlu1 %v5219_v38  ;;  %v11571_v52 = vpop.f32.mrf.mxu1  ;;  %11581 = vmatpush3.bf16.msra.mxu1 %v12133_v46 }
0x2846   : > { %v5218_v32 = vmul.f32 %v5215_v30, %v5215_v30  ;;  %11582 = vmatprep.subr.bf16.mxu1 %v12451_v8 }
0x2848   : > { %v5222_v29 = vsel %vm891_vm1, %v5218_v32, 0.0 }
0x2849   : > { %5223 = vadd.xlane.f32.xlu0 %v5222_v29  ;;  %11583 = vmatpush3.bf16.msra.mxu1 %v12134_v34 }
0x284a   : > { %11584 = vmatprep.subr.bf16.mxu1 %v12451_v8 }
0x284d   : > { %11585 = vmatpush3.bf16.msra.mxu1 %v12135_v51 }
0x284e   : > { %11586 = vmatprep.subr.bf16.mxu1 %v12451_v8 }
0x2851   : > { %11587 = vmatpush3.bf16.msra.mxu1 %v12136_v5 }
0x28ce   : > { %v5221_v35 = vpop.xlane.xlu1 %5220 }
0x28cf   : > { %v5225_v36 = vmul.f32 0.03125, %v5221_v35 }
0x28d1   : > { %v5227_v39 = vadd.f32 1e-06, %v5225_v36 }
0x28d2   : > { %v5224_v41 = vpop.xlane.xlu0 %5223 }
0x28d3   : > { %12317 = vrsqrt.f32 %v5227_v39  ;;  %v5226_v42 = vmul.f32 0.03125, %v5224_v41 }
0x28d5   : > { %v5228_v43 = vadd.f32 1e-06, %v5226_v42 }
0x28d7   : > { %12319 = vrsqrt.f32 %v5228_v43 }
0x28e0   : > { %v12318_v45 = vpop.eup %12317 }
0x28e1   : > { %v5231_v47 = vmul.f32 %v12318_v45, %v5214_v26 }
0x28e3   : > { %v5239_v1 = vmul.f32 %v10671_v0, %v5231_v47 }
0x28e4   : > { %v12320_v48 = vpop.eup %12319 }
0x28e5   : > { %v5232_v60 = vmul.f32 %v12320_v48, %v5215_v30 }
0x28e7   : > { %v5240_v49 = vmul.f32 %v10671_v0, %v5232_v60 }
0x28e9   : > { %v5245_v50 = vpack.c.bf16 %v5240_v49, %v5239_v1 }
0x28eb   : > { %11577 = vmatmul.mubr.msk.bf16.vlgmr.msra.gmra.mxu0 %vm887_vm0, %v5245_v50 }
0x28ec   : > { %11596 = vmatprep.mubr.msk.bf16.mxu0 %vm12452_vm2, %v12451_v8  ;;  %11593 = vmatpush3.bf16.msra.mxu0 %v12137_v12 }
0x28ed   : > { %11594 = vmatprep.subr.bf16.mxu0 %v12451_v8 }
0x28f0   : > { %11595 = vmatpush3.bf16.msra.mxu0 %v12138_v10 }
0x29ab   : > { %v5295_v53 = vpop.f32.mrf.mxu0 }
0x29ac   : > { %v5302_v56 = vmax.f32 %v5295_v53, 0.0 }
0x29ad   : > { %v11578_v54 = vpop.f32.mrf.mxu0 }
0x29af   : > { %v5298_v55 = vpop.f32.mrf.mxu0 }
0x29b0   : > { %v5303_v57 = vmax.f32 %v5298_v55, 0.0 }
0x29b1   : > { %v11579_v58 = vpop.f32.mrf.mxu0 }
0x29b2   : > { %v5312_v59 = vpack.c.bf16 %v5303_v57, %v5302_v56 }
0x29b4   : > { %11589 = vmatmul.mubr.msk.bf16.vlgmr.msra.gmra.mxu1 %vm1995_vm9, %v5312_v59 }
0x2a74   : > { %v5374_v23 = vpop.f32.mrf.mxu1 }
0x2a75   : > { %v13413_v15 = vadd.f32 %v5374_v23, %v5214_v26 }
0x2a76   : > { %v11590_v61 = vpop.f32.mrf.mxu1 }
0x2a77   : > { %v5384_v3 = vmul.f32 %v13413_v15, %v13413_v15 }
0x2a78   : > { %v5377_v62 = vpop.f32.mrf.mxu1 }
0x2a79   : > { %v13417_v63 = vadd.f32 %v5377_v62, %v5215_v30  ;;  %v5386_v6 = vsel %vm887_vm0, %v5384_v3, 0.0 }
0x2a7a   : > { %5387 = vadd.xlane.f32.xlu0 %v5386_v6  ;;  %v11591_v7 = vpop.f32.mrf.mxu1 }
0x2a7b   : > { %v5385_v9 = vmul.f32 %v13417_v63, %v13417_v63 }
0x2a7d   : > { %v5389_v11 = vsel %vm891_vm1, %v5385_v9, 0.0 }
0x2a7e   : > { %5390 = vadd.xlane.f32.xlu1 %v5389_v11 }
0x2b03   : > { %v5388_v25 = vpop.xlane.xlu0 %5387 }
0x2b04   : > { %v5392_v13 = vmul.f32 0.03125, %v5388_v25 }
0x2b06   : > { %v5394_v14 = vadd.f32 1e-06, %v5392_v13 }
0x2b07   : > { %v5391_v16 = vpop.xlane.xlu1 %5390 }
0x2b08   : > { %12321 = vrsqrt.f32 %v5394_v14  ;;  %v5393_v17 = vmul.f32 0.03125, %v5391_v16 }
0x2b0a   : > { %v5395_v18 = vadd.f32 1e-06, %v5393_v17 }
0x2b0c   : > { %12323 = vrsqrt.f32 %v5395_v18 }
0x2b15   : > { %v12322_v40 = vpop.eup %12321 }
0x2b16   : > { %v5398_v19 = vmul.f32 %v12322_v40, %v13413_v15 }
0x2b18   : > { %v5406_v24 = vmul.f32 %v10681_v21, %v5398_v19 }
0x2b19   : > { %v12324_v20 = vpop.eup %12323 }
0x2b1a   : > { %v5399_v22 = vmul.f32 %v12324_v20, %v13417_v63 }
0x2b1c   : > { %v5407_v2 = vmul.f32 %v10681_v21, %v5399_v22 }
0x2b1e   : > { %v5412_v26 = vpack.c.bf16 %v5407_v2, %v5406_v24 }
0x2b20   : > { %11597 = vmatmul.mubr.msk.bf16.vlgmr.msra.gmra.mxu0 %vm887_vm0, %v5412_v26 }
0x2be0   : > { %v13436_v4 = vpop.f32.mrf.mxu0 }
0x2be1   : > { %11604 = vmatprep.mubr.msk.f32.mxu0 %vm979_vm3, %v13436_v4 }
0x2be2   : > { %v11598_v27 = vpop.f32.mrf.mxu0 }
0x2be4   : > { %v13440_v28 = vpop.f32.mrf.mxu0 }
0x2be5   : > { %5674 = vrot.lane.b32.xlu1 %v13440_v28, %s14401_s7  ;;  %5473 = vrot.lane.b32.xlu0 %v13440_v28, %s14402_s1 }
0x2be6   : > { %v11599_v30 = vpop.f32.mrf.mxu0 }
0x2be9   : > { %5471 = vrot.lane.b32.xlu1 %v13436_v4, %s14402_s1  ;;  %5672 = vrot.lane.b32.xlu0 %v13436_v4, %s14401_s7 }
0x2bed   : > { %5668 = vrot.lane.b32.xlu1 %v13436_v4, %s14403_s10  ;;  %5875 = vrot.lane.b32.xlu0 %v13440_v28, %s14405_s3 }
0x2bf1   : > { %5670 = vrot.lane.b32.xlu1 %v13440_v28, %s14403_s10  ;;  %5873 = vrot.lane.b32.xlu0 %v13436_v4, %s14405_s3 }
0x2bf5   : > { %5869 = vrot.lane.b32.xlu1 %v13436_v4, %s14404_s0  ;;  %5871 = vrot.lane.b32.xlu0 %v13440_v28, %s14404_s0 }
0x2c57   : > { %v5675_v38 = vpop.permute.xlu1 %5674  ;;  %v5474_v52 = vpop.permute.xlu0 %5473 }
0x2c58   : > { %11600 = vmatprep.subr.msk.mxu0 %vm979_vm3, %v5474_v52  ;;  %11614 = vmatprep.subr.msk.mxu1 %vm979_vm3, %v5675_v38 }
0x2c59   : > { %11601 = vmatpush3.xpose.msk.msra.mxu0 %vm979_vm3, %v5474_v52  ;;  %11615 = vmatpush3.xpose.msk.msra.mxu1 %vm979_vm3, %v5675_v38 }
0x2c5b   : > { %v5472_v32 = vpop.permute.xlu1 %5471  ;;  %v5673_v29 = vpop.permute.xlu0 %5672 }
0x2c5c   : > { %11602 = vmatprep.subr.msk.mxu0 %vm979_vm3, %v5472_v32  ;;  %11616 = vmatprep.subr.msk.mxu1 %vm979_vm3, %v5673_v29 }
0x2c5d   : > { %11603 = vmatpush3.xpose.msk.msra.mxu0 %vm979_vm3, %v5472_v32  ;;  %11617 = vmatpush3.xpose.msk.msra.mxu1 %vm979_vm3, %v5673_v29 }
0x2c5f   : > { %v5669_v33 = vpop.permute.xlu1 %5668  ;;  %v5876_v37 = vpop.permute.xlu0 %5875 }
0x2c60   : > { %11605 = vmatmul.mubr.msk.f32.vlgmr.msra.gmra.mxu0 %vm979_vm3, %v13440_v28  ;;  %11618 = vmatprep.mubr.msk.f32.mxu1 %vm979_vm3, %v5669_v33 }
0x2c61   : > { %11628 = vmatprep.subr.msk.mxu1 %vm979_vm3, %v5876_v37 }
0x2c63   : > { %v5671_v46 = vpop.permute.xlu1 %5670  ;;  %v5874_v34 = vpop.permute.xlu0 %5873 }
0x2c64   : > { %11619 = vmatmul.mubr.msk.f32.vlgmr.msra.gmra.mxu1 %vm979_vm3, %v5671_v46 }
0x2c65   : > { %11629 = vmatpush3.xpose.msk.msra.mxu1 %vm979_vm3, %v5876_v37 }
0x2c66   : > { %11630 = vmatprep.subr.msk.mxu1 %vm979_vm3, %v5874_v34 }
0x2c67   : > { %v5870_v35 = vpop.permute.xlu1 %5869  ;;  %v5872_v36 = vpop.permute.xlu0 %5871 }
0x2c68   : > { %11632 = vmatprep.mubr.msk.f32.mxu1 %vm979_vm3, %v5870_v35 }
0x2c69   : > { %11631 = vmatpush3.xpose.msk.msra.mxu1 %vm979_vm3, %v5874_v34 }
0x2c6c   : > { %11633 = vmatmul.mubr.msk.f32.vlgmr.msra.gmra.mxu1 %vm979_vm3, %v5872_v36 }
0x2d20   : > { %v11606_v39 = vpop.f32.mrf.mxu0 }
0x2d21   : > { %v5561_v41 = vsel %vm1067_vm4, %v11606_v39, -inf }
0x2d22   : > { %5562 = vmax.xlane.f32.xlu0 %v5561_v41  ;;  %v5549_v42 = vpop.f32.mrf.mxu0 }
0x2d23   : > { %v5558_v43 = vsel %vm1063_vm5, %v5549_v42, -inf }
0x2d24   : > { %5559 = vmax.xlane.f32.xlu1 %v5558_v43  ;;  %v11620_v45 = vpop.f32.mrf.mxu1 }
0x2d25   : > { %v5762_v48 = vsel %vm1067_vm4, %v11620_v45, -inf }
0x2d26   : > { %v5750_v47 = vpop.f32.mrf.mxu1 }
0x2d27   : > { %v5759_v0 = vsel %vm1063_vm5, %v5750_v47, -inf }
0x2d28   : > { %5763 = vmax.xlane.f32.xlu1 %v5762_v48  ;;  %5760 = vmax.xlane.f32.xlu0 %v5759_v0 }
0x2d2c   : > { %v11634_v60 = vpop.f32.mrf.mxu1 }
0x2d2d   : > { %v5963_v1 = vsel %vm1067_vm4, %v11634_v60, -inf }
0x2d2e   : > { %5964 = vmax.xlane.f32.xlu1 %v5963_v1  ;;  %v5951_v49 = vpop.f32.mrf.mxu1 }
0x2d2f   : > { %v5960_v50 = vsel %vm1063_vm5, %v5951_v49, -inf }
0x2d30   : > { %5961 = vmax.xlane.f32.xlu0 %v5960_v50 }
0x2d3f   : > { %5580 = vrot.lane.b32.xlu1 %v13436_v4, %s14406_s11 }
0x2d43   : > { %5783 = vrot.lane.b32.xlu1 %v13440_v28, %s14407_s2 }
0x2d46   : > { %5582 = vrot.lane.b32.xlu0 %v13440_v28, %s14406_s11 }
0x2d47   : > { %5984 = vrot.lane.b32.xlu1 %v13440_v28, %s14408_s8 }
0x2d4a   : > { %5781 = vrot.lane.b32.xlu0 %v13436_v4, %s14407_s2 }
0x2dab   : > { %v5563_v51 = vpop.xlane.xlu0 %5562 }
0x2dac   : > { %v5565_v5 = vsub.f32 %v11606_v39, %v5563_v51 }
0x2dad   : > { %v5560_v53 = vpop.xlane.xlu1 %5559 }
0x2dae   : > { %v5568_v54 = vmul.f32 1.442695, %v5565_v5  ;;  %v5564_v55 = vsub.f32 %v5549_v42, %v5560_v53 }
0x2db0   : > { %12325 = vpow2.f32 %v5568_v54  ;;  %v5566_v56 = vmul.f32 1.442695, %v5564_v55 }
0x2db1   : > { %v5764_v57 = vpop.xlane.xlu1 %5763  ;;  %v5761_v58 = vpop.xlane.xlu0 %5760 }
0x2db2   : > { %12327 = vpow2.f32 %v5566_v56  ;;  %v5766_v59 = vsub.f32 %v11620_v45, %v5764_v57  ;;  %v5765_v23 = vsub.f32 %v5750_v47, %v5761_v58 }
0x2db4   : > { %v5769_v61 = vmul.f32 1.442695, %v5766_v59  ;;  %v5767_v3 = vmul.f32 1.442695, %v5765_v23 }
0x2db6   : > { %12329 = vpow2.f32 %v5769_v61 }
0x2db7   : > { %12331 = vpow2.f32 %v5767_v3  ;;  %v5965_v62 = vpop.xlane.xlu1 %5964 }
0x2db8   : > { %v5967_v6 = vsub.f32 %v11634_v60, %v5965_v62 }
0x2db9   : > { %v5962_v7 = vpop.xlane.xlu0 %5961 }
0x2dba   : > { %v5970_v9 = vmul.f32 1.442695, %v5967_v6  ;;  %v5966_v11 = vsub.f32 %v5951_v49, %v5962_v7 }
0x2dbb   : > { %v5581_v12 = vpop.permute.xlu1 %5580 }
0x2dbc   : > { %12333 = vpow2.f32 %v5970_v9  ;;  %v5968_v10 = vmul.f32 1.442695, %v5966_v11 }
0x2dbd   : > { %v12326_v25 = vpop.eup %12325  ;;  %v5583_v13 = vpop.permute.xlu0 %5582 }
0x2dbe   : > { %12335 = vpow2.f32 %v5968_v10  ;;  %11607 = vmatprep.subr.msk.mxu0 %vm1098_vm6, %v5583_v13  ;;  %v5573_v14 = vsel %vm1067_vm4, %v12326_v25, 0.0 }
0x2dbf   : > { %v12328_v16 = vpop.eup %12327  ;;  %11608 = vmatpush3.msk.msra.mxu0 %vm1098_vm6, %v5583_v13  ;;  %5574 = vadd.xlane.f32.xlu1 %v5573_v14  ;;  %v5784_v18 = vpop.permute.xlu1 %5783 }
0x2dc0   : > { %11609 = vmatprep.subr.mxu0 %v5581_v12  ;;  %v5570_v17 = vsel %vm1063_vm5, %v12328_v16, 0.0 }
0x2dc1   : > { %11610 = vmatpush3.msra.mxu0 %v5581_v12  ;;  %5571 = vadd.xlane.f32.xlu0 %v5570_v17  ;;  %v5782_v30 = vpop.permute.xlu0 %5781 }
0x2dc2   : > { %11621 = vmatprep.subr.msk.mxu0 %vm1098_vm6, %v5784_v18 }
0x2dc3   : > { %v12330_v40 = vpop.eup %12329  ;;  %v5985_v27 = vpop.permute.xlu1 %5984 }
0x2dc4   : > { %v12332_v19 = vpop.eup %12331  ;;  %v5774_v20 = vsel %vm1067_vm4, %v12330_v40, 0.0 }
0x2dc5   : > { %5775 = vadd.xlane.f32.xlu1 %v5774_v20  ;;  %v5771_v21 = vsel %vm1063_vm5, %v12332_v19, 0.0 }
0x2dc6   : > { %5772 = vadd.xlane.f32.xlu0 %v5771_v21 }
0x2dc9   : > { %v12334_v22 = vpop.eup %12333 }
0x2dca   : > { %v5975_v24 = vsel %vm1067_vm4, %v12334_v22, 0.0 }
0x2dcb   : > { %v12336_v2 = vpop.eup %12335  ;;  %5976 = vadd.xlane.f32.xlu1 %v5975_v24  ;;  %v12140_v24 = vld [vmem:[%s14425_s12 + $0x10] sm:$0xff]  }
0x2dcc   : > { %v5972_v26 = vsel %vm1063_vm5, %v12336_v2, 0.0 }
0x2dcd   : > { %5973 = vadd.xlane.f32.xlu0 %v5972_v26 }
0x2ddc   : > { %6076 = vrot.lane.b32.xlu1 %v13440_v28, %s14409_s28 }
0x2de0   : > { %6070 = vrot.lane.b32.xlu1 %v13436_v4, %s14410_s26 }
0x2de3   : > { %5982 = vrot.lane.b32.xlu0 %v13436_v4, %s14408_s8 }
0x2de7   : > { %6074 = vrot.lane.b32.xlu0 %v13436_v4, %s14409_s28 }
0x2deb   : > { %6072 = vrot.lane.b32.xlu0 %v13440_v28, %s14410_s26 }
0x2e48   : > { %v5575_v38 = vpop.xlane.xlu1 %5574 }
0x2e49   : > { %12337 = vrcp.f32 %v5575_v38 }
0x2e4a   : > { %v5572_v52 = vpop.xlane.xlu0 %5571 }
0x2e4b   : > { %12339 = vrcp.f32 %v5572_v52 }
0x2e4e   : > { %v5776_v32 = vpop.xlane.xlu1 %5775 }
0x2e4f   : > { %12341 = vrcp.f32 %v5776_v32  ;;  %v5773_v29 = vpop.xlane.xlu0 %5772 }
0x2e50   : > { %12343 = vrcp.f32 %v5773_v29 }
0x2e54   : > { %v5977_v33 = vpop.xlane.xlu1 %5976 }
0x2e55   : > { %12345 = vrcp.f32 %v5977_v33 }
0x2e56   : > { %v5974_v37 = vpop.xlane.xlu0 %5973  ;;  %v12338_v46 = vpop.eup %12337 }
0x2e57   : > { %12347 = vrcp.f32 %v5974_v37  ;;  %v5579_v36 = vmul.f32 %v12338_v46, %v12326_v25 }
0x2e58   : > { %v12340_v34 = vpop.eup %12339  ;;  %v6077_v45 = vpop.permute.xlu1 %6076 }
0x2e59   : > { %v5578_v35 = vmul.f32 %v12340_v34, %v12328_v16 }
0x2e5a   : > { %v5983_v47 = vpop.permute.xlu0 %5982 }
0x2e5b   : > { %11611 = vmatprep.mubr.msk.f32.mxu0 %vm1063_vm5, %v5578_v35 }
0x2e5c   : > { %v12342_v39 = vpop.eup %12341  ;;  %11612 = vmatmul.mubr.msk.f32.vlgmr.msra.gmra.mxu0 %vm1063_vm5, %v5579_v36  ;;  %v6071_v49 = vpop.permute.xlu1 %6070 }
0x2e5d   : > { %v12344_v41 = vpop.eup %12343  ;;  %11622 = vmatpush3.msk.msra.mxu0 %vm1098_vm6, %v5784_v18  ;;  %v5780_v42 = vmul.f32 %v12342_v39, %v12330_v40 }
0x2e5e   : > { %11623 = vmatprep.subr.mxu0 %v5782_v30  ;;  %v5779_v43 = vmul.f32 %v12344_v41, %v12332_v19  ;;  %v6075_v50 = vpop.permute.xlu0 %6074 }
0x2e5f   : > { %11624 = vmatpush3.msra.mxu0 %v5782_v30 }
0x2e60   : > { %11625 = vmatprep.mubr.msk.f32.mxu0 %vm1063_vm5, %v5779_v43  ;;  %11635 = vmatprep.subr.msk.mxu0 %vm1098_vm6, %v5985_v27 }
0x2e61   : > { %11626 = vmatmul.mubr.msk.f32.vlgmr.msra.gmra.mxu0 %vm1063_vm5, %v5780_v42 }
0x2e62   : > { %11636 = vmatpush3.msk.msra.mxu0 %vm1098_vm6, %v5985_v27  ;;  %v12346_v48 = vpop.eup %12345  ;;  %v6073_v51 = vpop.permute.xlu0 %6072 }
0x2e63   : > { %11637 = vmatprep.subr.mxu0 %v5983_v47  ;;  %v5981_v1 = vmul.f32 %v12346_v48, %v12334_v22  ;;  %v12139_v22 = vld [vmem:[%s14425_s12 + $0x18] sm:$0xff]   ;;  %v13580_v48 = vld [vmem:[%s876_s24] sm:$0xf]  ;;  %s14430_s24 = sld [smem:[#allocation20_spill]] }
0x2e64   : > { %v12348_v0 = vpop.eup %12347  ;;  %11638 = vmatpush3.msra.mxu0 %v5983_v47 }
0x2e65   : > { %11642 = vmatprep.subr.msk.mxu0 %vm979_vm3, %v6077_v45  ;;  %v5980_v60 = vmul.f32 %v12348_v0, %v12336_v2 }
0x2e67   : > { %11639 = vmatprep.mubr.msk.f32.mxu0 %vm1063_vm5, %v5980_v60 }
0x2e68   : > { %11640 = vmatmul.mubr.msk.f32.vlgmr.msra.gmra.mxu0 %vm1063_vm5, %v5981_v1 }
0x2e69   : > { %11643 = vmatpush3.xpose.msk.msra.mxu0 %vm979_vm3, %v6077_v45  ;;  %11646 = vmatprep.mubr.msk.f32.mxu0 %vm979_vm3, %v6071_v49  ;;  %v6558_v49 = vmul.f32 %v13580_v48, %v13580_v48 }
0x2e6a   : > { %11644 = vmatprep.subr.msk.mxu0 %vm979_vm3, %v6075_v50 }
0x2e6d   : > { %11645 = vmatpush3.xpose.msk.msra.mxu0 %vm979_vm3, %v6075_v50 }
0x2e6e   : > { %11664 = vmatprep.subr.bf16.mxu0 %v12451_v8 }
0x2e70   : > { %11647 = vmatmul.mubr.msk.f32.vlgmr.msra.gmra.mxu0 %vm979_vm3, %v6073_v51 }
0x2e71   : > { %11668 = vmatprep.mubr.msk.bf16.mxu0 %vm12452_vm2, %v12451_v8 }
0x2f1c   : > { %v13533_v5 = vpop.f32.mrf.mxu0 }
0x2f1e   : > { %v13535_v53 = vpop.f32.mrf.mxu0 }
0x2f21   : > { %v11627_v54 = vpop.f32.mrf.mxu0 }
0x2f23   : > { %v5860_v55 = vpop.f32.mrf.mxu0 }
0x2f24   : > { %v12074_v56 = vpack.i.bf16 %v11627_v54, %v5860_v55  ;;  %v6560_v54 = vsel %vm6559_vm11, %v6558_v49, 0.0 }
0x2f28   : > { %v11641_v57 = vpop.f32.mrf.mxu0 }
0x2f2a   : > { %v6061_v58 = vpop.f32.mrf.mxu0 }
0x2f2b   : > { %v12079_v59 = vpack.i.bf16 %v11641_v57, %v6061_v58  ;;  %v12145_v57 = vld [vmem:[%s14399_s6 + $0x38] sm:$0xff]   ;;  %v12146_v58 = vld [vmem:[%s14399_s6 + $0x30] sm:$0xff]  }
0x2f30   : > { %v11648_v23 = vpop.f32.mrf.mxu0 }
0x2f31   : > { %v6164_v61 = vsel %vm1067_vm4, %v11648_v23, -inf }
0x2f32   : > { %6165 = vmax.xlane.f32.xlu0 %v6164_v61  ;;  %v6152_v3 = vpop.f32.mrf.mxu0 }
0x2f33   : > { %v6161_v62 = vsel %vm1063_vm5, %v6152_v3, -inf }
0x2f34   : > { %6162 = vmax.xlane.f32.xlu1 %v6161_v62 }
0x2fbb   : > { %v6166_v6 = vpop.xlane.xlu0 %6165 }
0x2fbc   : > { %v6168_v7 = vsub.f32 %v11648_v23, %v6166_v6 }
0x2fbd   : > { %v6163_v9 = vpop.xlane.xlu1 %6162 }
0x2fbe   : > { %v6171_v11 = vmul.f32 1.442695, %v6168_v7  ;;  %v6167_v12 = vsub.f32 %v6152_v3, %v6163_v9 }
0x2fc0   : > { %12349 = vpow2.f32 %v6171_v11  ;;  %v6169_v10 = vmul.f32 1.442695, %v6167_v12 }
0x2fc2   : > { %12351 = vpow2.f32 %v6169_v10 }
0x2fcd   : > { %v12350_v25 = vpop.eup %12349 }
0x2fce   : > { %v6176_v13 = vsel %vm1067_vm4, %v12350_v25, 0.0 }
0x2fcf   : > { %v12352_v14 = vpop.eup %12351  ;;  %6177 = vadd.xlane.f32.xlu1 %v6176_v13  ;;  %v10725_v13 = vld [vmem:[%s14427_s13 + $0x1] ss:$0 sm:$0xff] }
0x2fd0   : > { %v6173_v16 = vsel %vm1063_vm5, %v12352_v14, 0.0 }
0x2fd1   : > { %6174 = vadd.xlane.f32.xlu0 %v6173_v16 }
0x2fe0   : > { %6183 = vrot.lane.b32.xlu1 %v13436_v4, %s14424_s22 }
0x2fe4   : > { %12075 = vrot.lane.b32.xlu1 %v12074_v56, %s14412_s23  ;;  %v12141_v56 = vld [vmem:[%s14426_s20 + $0x18] sm:$0xff]  }
0x2fe5   : > { %11665 = vmatpush3.bf16.msra.mxu0 %v12141_v56 }
0x2fe6   : > { %11666 = vmatprep.subr.bf16.mxu0 %v12451_v8 }
0x2fe7   : > { %6185 = vrot.lane.b32.xlu0 %v13440_v28, %s14424_s22 }
0x2feb   : > { %12080 = vrot.lane.b32.xlu0 %v12079_v59, %s14413_s25 }
0x3058   : > { %v6178_v17 = vpop.xlane.xlu1 %6177 }
0x3059   : > { %12353 = vrcp.f32 %v6178_v17 }
0x305a   : > { %v6175_v18 = vpop.xlane.xlu0 %6174 }
0x305b   : > { %12355 = vrcp.f32 %v6175_v18 }
0x305c   : > { %v6184_v19 = vpop.permute.xlu1 %6183 }
0x305e   : > { %v6186_v40 = vpop.permute.xlu0 %6185 }
0x305f   : > { %11649 = vmatprep.subr.msk.mxu1 %vm1098_vm6, %v6186_v40 }
0x3060   : > { %11650 = vmatpush3.msk.msra.mxu1 %vm1098_vm6, %v6186_v40  ;;  %v12076_v30 = vpop.permute.xlu1 %12075 }
0x3061   : > { %11651 = vmatprep.subr.mxu1 %v6184_v19  ;;  %v12078_v38 = vunpack.i.h.bf16 %v12076_v30  ;;  %v12077_v52 = vunpack.i.l.bf16 %v12076_v30 }
0x3062   : > { %11652 = vmatpush3.msra.mxu1 %v6184_v19  ;;  %v12081_v32 = vpop.permute.xlu0 %12080  ;;  %v12143_v19 = vld [vmem:[%s14429_s18 + $0x8] sm:$0xff]  }
0x3063   : > { %11656 = vmatprep.subr.bf16.mxu1 %v12451_v8  ;;  %v12083_v29 = vunpack.i.h.bf16 %v12081_v32  ;;  %v12082_v33 = vunpack.i.l.bf16 %v12081_v32  ;;  %v6296_v37 = vsel %vm979_vm3, %v13533_v5, %v12078_v38  ;;  %v6295_v46 = vsel %vm979_vm3, %v13535_v53, %v12077_v52 }
0x3065   : > { %v6297_v39 = vsel %vm1805_vm7, %v6295_v46, %v12082_v33  ;;  %v6298_v41 = vsel %vm1805_vm7, %v6296_v37, %v12083_v29 }
0x3066   : > { %v12354_v4 = vpop.eup %12353 }
0x3067   : > { %v6182_v28 = vmul.f32 %v12354_v4, %v12350_v25  ;;  %v10747_v4 = vld [vmem:[%s14430_s24] ss:$0 sm:$0xff] }
0x3068   : > { %v12356_v20 = vpop.eup %12355 }
0x3069   : > { %v6181_v21 = vmul.f32 %v12356_v20, %v12352_v14 }
0x306b   : > { %11653 = vmatprep.mubr.msk.f32.mxu1 %vm1063_vm5, %v6181_v21 }
0x306c   : > { %11654 = vmatmul.mubr.msk.f32.vlgmr.msra.gmra.mxu1 %vm1063_vm5, %v6182_v28  ;;  %v12144_v28 = vld [vmem:[%s14429_s18] sm:$0xff]  }
0x306d   : > { %11660 = vmatprep.mubr.msk.bf16.mxu1 %vm12452_vm2, %v12451_v8  ;;  %11657 = vmatpush3.bf16.msra.mxu1 %v12139_v22 }
0x306e   : > { %11658 = vmatprep.subr.bf16.mxu1 %v12451_v8 }
0x3071   : > { %11659 = vmatpush3.bf16.msra.mxu1 %v12140_v24  ;;  %v12147_v24 = vld [vmem:[%s14399_s6 + $0x28] sm:$0xff]  }
0x3072   : > { %11672 = vmatprep.subr.bf16.mxu1 %v12451_v8 }
0x312c   : > { %v11655_v2 = vpop.f32.mrf.mxu1 }
0x312e   : > { %v6262_v26 = vpop.f32.mrf.mxu1 }
0x312f   : > { %v12084_v27 = vpack.i.bf16 %v11655_v2, %v6262_v26  ;;  %v12148_v2 = vld [vmem:[%s14399_s6 + $0x20] sm:$0xff]  }
0x3131   : > { %12085 = vrot.lane.b32.xlu1 %v12084_v27, %s14414_s21 }
0x31a3   : > { %v12086_v34 = vpop.permute.xlu1 %12085 }
0x31a4   : > { %v12088_v35 = vunpack.i.h.bf16 %v12086_v34  ;;  %v12087_v36 = vunpack.i.l.bf16 %v12086_v34 }
0x31a6   : > { %v6299_v42 = vsel %vm1808_vm8, %v6297_v39, %v12087_v36  ;;  %v6300_v43 = vsel %vm1808_vm8, %v6298_v41, %v12088_v35 }
0x31a7   : > { %v6305_v45 = vpack.c.bf16 %v6300_v43, %v6299_v42 }
0x31a9   : > { %11661 = vmatmul.mubr.msk.bf16.vlgmr.msra.gmra.mxu1 %vm887_vm0, %v6305_v45 }
0x31aa   : > { %11680 = vmatprep.mubr.msk.bf16.mxu1 %vm12452_vm2, %v12451_v8  ;;  %11673 = vmatpush3.bf16.msra.mxu1 %v12145_v57 }
0x31ab   : > { %11674 = vmatprep.subr.bf16.mxu1 %v12451_v8 }
0x31ae   : > { %11675 = vmatpush3.bf16.msra.mxu1 %v12146_v58 }
0x31af   : > { %11676 = vmatprep.subr.bf16.mxu1 %v12451_v8 }
0x31b2   : > { %11677 = vmatpush3.bf16.msra.mxu1 %v12147_v24 }
0x31b3   : > { %11678 = vmatprep.subr.bf16.mxu1 %v12451_v8 }
0x31b6   : > { %11679 = vmatpush3.bf16.msra.mxu1 %v12148_v2 }
0x31b7   : > { %11702 = vmatprep.subr.mxu1 %v12451_v8 }
0x3269   : > { %v6355_v47 = vpop.f32.mrf.mxu1 }
0x326a   : > { %v13583_v0 = vadd.f32 %v6355_v47, %v13413_v15 }
0x326b   : > { %v11662_v60 = vpop.f32.mrf.mxu1 }
0x326c   : > { %v6365_v1 = vmul.f32 %v13583_v0, %v13583_v0 }
0x326d   : > { %v6358_v50 = vpop.f32.mrf.mxu1 }
0x326e   : > { %v13590_v51 = vadd.f32 %v6358_v50, %v13417_v63  ;;  %v6367_v5 = vsel %vm887_vm0, %v6365_v1, 0.0  ;;  %v12142_v63 = vld [vmem:[%s14426_s20 + $0x10] sm:$0xff]   ;;  %v6637_v50 = vand.u32 127, %v4171_v44  ;;  %s14439_s20 = sld [smem:[#allocation29_spill]] }
0x326f   : > { %6368 = vadd.xlane.f32.xlu0 %v6367_v5  ;;  %v11663_v53 = vpop.f32.mrf.mxu1  ;;  %11667 = vmatpush3.bf16.msra.mxu0 %v12142_v63 }
0x3270   : > { %v6366_v15 = vmul.f32 %v13590_v51, %v13590_v51  ;;  %11684 = vmatprep.subr.bf16.mxu0 %v12451_v8  ;;  %vm13690_vm12 = vcmp.le.s32.totalorder %v6637_v50, %v13201_v31 }
0x3272   : > { %v6370_v55 = vsel %vm891_vm1, %v6366_v15, 0.0 }
0x3273   : > { %6371 = vadd.xlane.f32.xlu1 %v6370_v55  ;;  %6561 = vadd.xlane.f32.xlu0 %v6560_v54 }
0x32f8   : > { %v6369_v59 = vpop.xlane.xlu0 %6368 }
0x32f9   : > { %v6373_v23 = vmul.f32 0.03125, %v6369_v59 }
0x32fb   : > { %v6375_v61 = vadd.f32 1e-06, %v6373_v23 }
0x32fc   : > { %v6372_v3 = vpop.xlane.xlu1 %6371  ;;  %v6562_v62 = vpop.xlane.xlu0 %6561 }
0x32fd   : > { %12357 = vrsqrt.f32 %v6375_v61  ;;  %v6374_v6 = vmul.f32 0.03125, %v6372_v3  ;;  %v6563_v7 = vmul.f32 0.03125, %v6562_v62 }
0x32ff   : > { %v6376_v9 = vadd.f32 1e-06, %v6374_v6  ;;  %v6564_v11 = vadd.f32 1e-06, %v6563_v7 }
0x3301   : > { %12359 = vrsqrt.f32 %v6376_v9 }
0x3302   : > { %12361 = vrsqrt.f32 %v6564_v11 }
0x330a   : > { %v12358_v12 = vpop.eup %12357 }
0x330b   : > { %v6379_v10 = vmul.f32 %v12358_v12, %v13583_v0 }
0x330d   : > { %v6387_v17 = vmul.f32 %v10725_v13, %v6379_v10 }
0x330e   : > { %v12360_v25 = vpop.eup %12359 }
0x330f   : > { %v12362_v14 = vpop.eup %12361  ;;  %v6380_v16 = vmul.f32 %v12360_v25, %v13590_v51 }
0x3310   : > { %v6566_v40 = vmul.f32 %v12362_v14, %v13580_v48 }
0x3311   : > { %v6388_v18 = vmul.f32 %v10725_v13, %v6380_v16 }
0x3312   : > { %v6573_v21 = vmul.f32 %v10747_v4, %v6566_v40 }
0x3313   : > { %v6393_v20 = vpack.c.bf16 %v6388_v18, %v6387_v17 }
0x3314   : > { %v6578_v22 = vpack.c.bf16 %v6573_v21, %v6573_v21 }
0x3315   : > { %11669 = vmatmul.mubr.msk.bf16.vlgmr.msra.gmra.mxu0 %vm887_vm0, %v6393_v20 }
0x3316   : > { %11685 = vmatpush3.bf16.msra.mxu0 %v12143_v19  ;;  %11688 = vmatprep.mubr.msk.bf16.mxu0 %vm12452_vm2, %v12451_v8 }
0x3317   : > { %11686 = vmatprep.subr.bf16.mxu0 %v12451_v8 }
0x331a   : > { %11687 = vmatpush3.bf16.msra.mxu0 %v12144_v28 }
0x331b   : > { %11692 = vmatprep.subr.mxu0 %v12451_v8 }
0x331d   : > { %11689 = vmatmul.mubr.msk.bf16.vlgmr.msra.gmra.mxu0 %vm887_vm0, %v6578_v22 }
0x331e   : > { %11694 = vmatprep.mubr.msk.f32.mxu0 %vm12452_vm2, %v12451_v8 }
0x33d5   : > { %v6443_v26 = vpop.f32.mrf.mxu0 }
0x33d6   : > { %v6450_v38 = vmax.f32 %v6443_v26, 0.0 }
0x33d7   : > { %v11670_v27 = vpop.f32.mrf.mxu0 }
0x33d9   : > { %v6446_v30 = vpop.f32.mrf.mxu0 }
0x33da   : > { %v6451_v52 = vmax.f32 %v6446_v30, 0.0 }
0x33db   : > { %v11671_v32 = vpop.f32.mrf.mxu0 }
0x33dc   : > { %v6460_v29 = vpack.c.bf16 %v6451_v52, %v6450_v38 }
0x33dd   : > { %v13644_v33 = vpop.f32.mrf.mxu0 }
0x33de   : > { %11681 = vmatmul.mubr.msk.bf16.vlgmr.msra.gmra.mxu1 %vm1995_vm9, %v6460_v29  ;;  %6810 = vrot.lane.b32.xlu1 %v13644_v33, %s14401_s7 }
0x33df   : > { %6640 = vrot.lane.b32.xlu0 %v13644_v33, %s14402_s1  ;;  %v11690_v37 = vpop.f32.mrf.mxu0  ;;  %11704 = vmatprep.mubr.msk.f32.mxu1 %vm12452_vm2, %v12451_v8 }
0x33e1   : > { %v6631_v46 = vpop.f32.mrf.mxu0 }
0x33e2   : > { %6808 = vrot.lane.b32.xlu1 %v13644_v33, %s14403_s10 }
0x33e3   : > { %6977 = vrot.lane.b32.xlu0 %v13644_v33, %s14405_s3  ;;  %v11691_v34 = vpop.f32.mrf.mxu0 }
0x33e6   : > { %6975 = vrot.lane.b32.xlu1 %v13644_v33, %s14404_s0 }
0x33e7   : > { %7144 = vrot.lane.b32.xlu0 %v13644_v33, %s14409_s28 }
0x33ea   : > { %7142 = vrot.lane.b32.xlu1 %v13644_v33, %s14410_s26 }
0x3450   : > { %v6811_v35 = vpop.permute.xlu1 %6810 }
0x3451   : > { %v6641_v36 = vpop.permute.xlu0 %6640  ;;  %11703 = vmatpush3.xpose.msk.msra.mxu1 %vm979_vm3, %v6811_v35 }
0x3452   : > { %11693 = vmatpush3.xpose.msk.msra.mxu0 %vm979_vm3, %v6641_v36  ;;  %11712 = vmatprep.subr.mxu1 %v12451_v8 }
0x3453   : > { %11697 = vmatprep.subr.mxu0 %v12451_v8 }
0x3454   : > { %v6809_v39 = vpop.permute.xlu1 %6808 }
0x3455   : > { %11695 = vmatmul.mubr.msk.f32.vlgmr.msra.gmra.mxu0 %vm979_vm3, %v13644_v33  ;;  %v6978_v41 = vpop.permute.xlu0 %6977  ;;  %11705 = vmatmul.mubr.msk.f32.vlgmr.msra.gmra.mxu1 %vm979_vm3, %v6809_v39 }
0x3456   : > { %11713 = vmatpush3.xpose.msk.msra.mxu1 %vm979_vm3, %v6978_v41  ;;  %11714 = vmatprep.mubr.msk.f32.mxu1 %vm12452_vm2, %v12451_v8 }
0x3457   : > { %11722 = vmatprep.subr.mxu1 %v12451_v8  ;;  %11699 = vmatprep.mubr.msk.f32.mxu0 %vm12452_vm2, %v12451_v8 }
0x3458   : > { %v6976_v42 = vpop.permute.xlu1 %6975 }
0x3459   : > { %v7145_v43 = vpop.permute.xlu0 %7144  ;;  %11715 = vmatmul.mubr.msk.f32.vlgmr.msra.gmra.mxu1 %vm979_vm3, %v6976_v42 }
0x345a   : > { %11723 = vmatpush3.xpose.msk.msra.mxu1 %vm979_vm3, %v7145_v43  ;;  %11724 = vmatprep.mubr.msk.f32.mxu1 %vm12452_vm2, %v12451_v8  ;;  %v12149_v43 = vld [vmem:[%s14433_s17 + $0x8] sm:$0xff]  }
0x345b   : > { %11732 = vmatprep.subr.bf16.mxu1 %v12451_v8 }
0x345c   : > { %v7143_v45 = vpop.permute.xlu1 %7142 }
0x345d   : > { %11725 = vmatmul.mubr.msk.f32.vlgmr.msra.gmra.mxu1 %vm979_vm3, %v7143_v45  ;;  %v12150_v45 = vld [vmem:[%s14433_s17] sm:$0xff]  }
0x345e   : > { %11736 = vmatprep.mubr.msk.bf16.mxu1 %vm12452_vm2, %v12451_v8  ;;  %11733 = vmatpush3.bf16.msra.mxu1 %v12149_v43 }
0x345f   : > { %11734 = vmatprep.subr.bf16.mxu1 %v12451_v8 }
0x3462   : > { %11735 = vmatpush3.bf16.msra.mxu1 %v12150_v45 }
0x3463   : > { %11748 = vmatprep.subr.bf16.mxu1 %v12451_v8 }
0x349e   : > { %v13684_v47 = vpop.f32.mrf.mxu1 }
0x34a0   : > { %v11682_v60 = vpop.f32.mrf.mxu1 }
0x34a2   : > { %v13686_v1 = vpop.f32.mrf.mxu1 }
0x34a4   : > { %v11683_v49 = vpop.f32.mrf.mxu1 }
0x3515   : > { %v6712_v53 = vpop.f32.mrf.mxu0  ;;  %v6882_v15 = vpop.f32.mrf.mxu1 }
0x3516   : > { %v6716_v54 = vsel %vm13690_vm12, %v6712_v53, -1e+09  ;;  %v6886_v55 = vsel %vm13690_vm12, %v6882_v15, -1e+09 }
0x3517   : > { %v6718_v56 = vsel %vm6717_vm13, %v6716_v54, -inf  ;;  %v6887_v63 = vsel %vm6717_vm13, %v6886_v55, -inf  ;;  %v11696_v57 = vpop.f32.mrf.mxu0  ;;  %v11706_v44 = vpop.f32.mrf.mxu1 }
0x3518   : > { %6719 = vmax.xlane.f32.xlu0 %v6718_v56  ;;  %6888 = vmax.xlane.f32.xlu1 %v6887_v63  ;;  %v6530_v63 = vadd.f32 %v13686_v1, %v13590_v51  ;;  %v6529_v57 = vadd.f32 %v13684_v47, %v13583_v0  ;;  %v12151_v0 = vld [vmem:[%s14434_s14 + $0x8] sm:$0xff]   ;;  %v12152_v1 = vld [vmem:[%s14434_s14] sm:$0xff]  }
0x3519   : > { %v7049_v31 = vpop.f32.mrf.mxu1 }
0x351a   : > { %v7053_v58 = vsel %vm13690_vm12, %v7049_v31, -1e+09  ;;  %v6533_v44 = vmul.f32 %v6530_v63, %v6530_v63  ;;  %v6532_v31 = vmul.f32 %v6529_v57, %v6529_v57 }
0x351b   : > { %v7054_v59 = vsel %vm6717_vm13, %v7053_v58, -inf  ;;  %v11716_v23 = vpop.f32.mrf.mxu1 }
0x351c   : > { %7055 = vmax.xlane.f32.xlu0 %v7054_v59  ;;  %v6534_v59 = vsel %vm887_vm0, %v6532_v31, 0.0 }
0x351d   : > { %v7216_v61 = vpop.f32.mrf.mxu1 }
0x351e   : > { %v7220_v3 = vsel %vm13690_vm12, %v7216_v61, -1e+09 }
0x351f   : > { %v7221_v62 = vsel %vm6717_vm13, %v7220_v3, -inf  ;;  %v11726_v6 = vpop.f32.mrf.mxu1 }
0x3520   : > { %7222 = vmax.xlane.f32.xlu0 %v7221_v62 }
0x3529   : > { %6729 = vrot.lane.b32.xlu1 %v13644_v33, %s14406_s11 }
0x35a1   : > { %v6720_v7 = vpop.xlane.xlu0 %6719  ;;  %v6889_v9 = vpop.xlane.xlu1 %6888 }
0x35a2   : > { %v6721_v11 = vsub.f32 %v6716_v54, %v6720_v7  ;;  %v6890_v12 = vsub.f32 %v6886_v55, %v6889_v9 }
0x35a4   : > { %v6722_v10 = vmul.f32 1.442695, %v6721_v11  ;;  %v6891_v25 = vmul.f32 1.442695, %v6890_v12 }
0x35a5   : > { %v6730_v13 = vpop.permute.xlu1 %6729  ;;  %v7056_v14 = vpop.xlane.xlu0 %7055 }
0x35a6   : > { %12363 = vpow2.f32 %v6722_v10  ;;  %v7057_v16 = vsub.f32 %v7053_v58, %v7056_v14  ;;  %11698 = vmatpush3.msk.msra.mxu0 %vm6735_vm14, %v6730_v13  ;;  %v6537_v58 = vsel %vm891_vm1, %v6533_v44, 0.0  ;;  %v10746_v14 = vld [vmem:[%s14419_s9] ss:$0 sm:$0xff]  ;;  %vm7601_vm1 = vcmask 84992  }
0x35a7   : > { %12365 = vpow2.f32 %v6891_v25  ;;  %11707 = vmatprep.subr.mxu0 %v12451_v8 }
0x35a8   : > { %v7058_v17 = vmul.f32 1.442695, %v7057_v16 }
0x35a9   : > { %v7223_v18 = vpop.xlane.xlu0 %7222 }
0x35aa   : > { %12367 = vpow2.f32 %v7058_v17  ;;  %v7224_v40 = vsub.f32 %v7220_v3, %v7223_v18 }
0x35ac   : > { %v7225_v19 = vmul.f32 1.442695, %v7224_v40 }
0x35ae   : > { %12369 = vpow2.f32 %v7225_v19 }
0x35b3   : > { %v12364_v4 = vpop.eup %12363 }
0x35b4   : > { %v12366_v20 = vpop.eup %12365  ;;  %v6724_v21 = vsel %vm6717_vm13, %v12364_v4, 0.0 }
0x35b5   : > { %6725 = vadd.xlane.f32.xlu1 %v6724_v21  ;;  %v6893_v28 = vsel %vm6717_vm13, %v12366_v20, 0.0 }
0x35b6   : > { %6894 = vadd.xlane.f32.xlu0 %v6893_v28 }
0x35b7   : > { %v12368_v22 = vpop.eup %12367 }
0x35b8   : > { %v7060_v24 = vsel %vm6717_vm13, %v12368_v22, 0.0 }
0x35b9   : > { %7061 = vadd.xlane.f32.xlu1 %v7060_v24 }
0x35bb   : > { %v12370_v2 = vpop.eup %12369 }
0x35bc   : > { %v7227_v26 = vsel %vm6717_vm13, %v12370_v2, 0.0 }
0x35bd   : > { %7228 = vadd.xlane.f32.xlu0 %v7227_v26 }
0x35ca   : > { %7065 = vrot.lane.b32.xlu1 %v13644_v33, %s14408_s8 }
0x35ce   : > { %7232 = vrot.lane.b32.xlu1 %v13644_v33, %s14424_s22 }
0x35d3   : > { %6898 = vrot.lane.b32.xlu0 %v13644_v33, %s14407_s2 }
0x363e   : > { %v6726_v27 = vpop.xlane.xlu1 %6725 }
0x363f   : > { %12371 = vrcp.f32 %v6726_v27  ;;  %v6895_v30 = vpop.xlane.xlu0 %6894  ;;  %v12153_v27 = vld [vmem:[%s14435_s30 + $0x8] sm:$0xff]  }
0x3640   : > { %12373 = vrcp.f32 %v6895_v30  ;;  %v12154_v30 = vld [vmem:[%s14435_s30] sm:$0xff]  }
0x3642   : > { %v7062_v38 = vpop.xlane.xlu1 %7061 }
0x3643   : > { %12375 = vrcp.f32 %v7062_v38 }
0x3646   : > { %v7229_v52 = vpop.xlane.xlu0 %7228  ;;  %v7066_v33 = vpop.permute.xlu1 %7065 }
0x3647   : > { %12377 = vrcp.f32 %v7229_v52 }
0x364a   : > { %v6899_v46 = vpop.permute.xlu0 %6898  ;;  %v7233_v41 = vpop.permute.xlu1 %7232 }
0x364c   : > { %v12372_v32 = vpop.eup %12371 }
0x364d   : > { %v6728_v29 = vmul.f32 %v12372_v32, %v12364_v4  ;;  %v12374_v37 = vpop.eup %12373 }
0x364e   : > { %v6897_v34 = vmul.f32 %v12374_v37, %v12366_v20 }
0x364f   : > { %11700 = vmatmul.mubr.msk.f32.vlgmr.msra.gmra.mxu0 %vm6731_vm15, %v6728_v29 }
0x3650   : > { %11708 = vmatpush3.msk.msra.mxu0 %vm6735_vm14, %v6899_v46  ;;  %11709 = vmatprep.mubr.msk.f32.mxu0 %vm12452_vm2, %v12451_v8  ;;  %v12376_v35 = vpop.eup %12375 }
0x3651   : > { %11717 = vmatprep.subr.mxu0 %v12451_v8  ;;  %v7064_v36 = vmul.f32 %v12376_v35, %v12368_v22 }
0x3653   : > { %11710 = vmatmul.mubr.msk.f32.vlgmr.msra.gmra.mxu0 %vm6731_vm15, %v6897_v34  ;;  %v10770_v34 = vld [vmem:[%s14436_s27] ss:$0 sm:$0xff] }
0x3654   : > { %11718 = vmatpush3.msk.msra.mxu0 %vm6735_vm14, %v7066_v33  ;;  %11719 = vmatprep.mubr.msk.f32.mxu0 %vm12452_vm2, %v12451_v8  ;;  %v12378_v39 = vpop.eup %12377 }
0x3655   : > { %11727 = vmatprep.subr.mxu0 %v12451_v8  ;;  %v7231_v42 = vmul.f32 %v12378_v39, %v12370_v2 }
0x3657   : > { %11720 = vmatmul.mubr.msk.f32.vlgmr.msra.gmra.mxu0 %vm6731_vm15, %v7064_v36 }
0x3658   : > { %11728 = vmatpush3.msk.msra.mxu0 %vm6735_vm14, %v7233_v41  ;;  %11729 = vmatprep.mubr.msk.f32.mxu0 %vm12452_vm2, %v12451_v8 }
0x3659   : > { %11740 = vmatprep.subr.bf16.mxu0 %v12451_v8 }
0x365b   : > { %11730 = vmatmul.mubr.msk.f32.vlgmr.msra.gmra.mxu0 %vm6731_vm15, %v7231_v42 }
0x365c   : > { %11744 = vmatprep.mubr.msk.bf16.mxu0 %vm12452_vm2, %v12451_v8  ;;  %11741 = vmatpush3.bf16.msra.mxu0 %v12153_v27 }
0x365d   : > { %11742 = vmatprep.subr.bf16.mxu0 %v12451_v8 }
0x3660   : > { %11743 = vmatpush3.bf16.msra.mxu0 %v12154_v30 }
0x3661   : > { %11756 = vmatprep.subr.mxu0 %v12451_v8 }
0x370f   : > { %v6804_v60 = vpop.f32.mrf.mxu0 }
0x3711   : > { %v11701_v49 = vpop.f32.mrf.mxu0 }
0x3713   : > { %v6971_v50 = vpop.f32.mrf.mxu0 }
0x3714   : > { %7310 = vrot.lane.b32.xlu0 %v6971_v50, %s14412_s23 }
0x3715   : > { %v11711_v53 = vpop.f32.mrf.mxu0 }
0x3717   : > { %v7138_v15 = vpop.f32.mrf.mxu0 }
0x3718   : > { %7314 = vrot.lane.b32.xlu1 %v7138_v15, %s14413_s25 }
0x3719   : > { %v11721_v54 = vpop.f32.mrf.mxu0 }
0x371b   : > { %v7305_v55 = vpop.f32.mrf.mxu0 }
0x371c   : > { %7318 = vrot.lane.b32.xlu0 %v7305_v55, %s14414_s21 }
0x371d   : > { %v11731_v56 = vpop.f32.mrf.mxu0 }
0x373b   : > { %6538 = vadd.xlane.f32.xlu0 %v6537_v58 }
0x373c   : > { %6535 = vadd.xlane.f32.xlu1 %v6534_v59 }
0x3786   : > { %v7311_v23 = vpop.permute.xlu0 %7310 }
0x3787   : > { %v7321_v3 = vsel %vm979_vm3, %v6804_v60, %v7311_v23 }
0x378a   : > { %v7315_v61 = vpop.permute.xlu1 %7314 }
0x378b   : > { %v7322_v62 = vsel %vm1805_vm7, %v7321_v3, %v7315_v61 }
0x378e   : > { %v7319_v6 = vpop.permute.xlu0 %7318 }
0x378f   : > { %v7323_v51 = vsel %vm1808_vm8, %v7322_v62, %v7319_v6 }
0x3790   : > { %v7328_v47 = vpack.c.bf16 %v7323_v51, %v7323_v51 }
0x3792   : > { %11737 = vmatmul.mubr.msk.bf16.vlgmr.msra.gmra.mxu1 %vm887_vm0, %v7328_v47 }
0x3793   : > { %11749 = vmatpush3.bf16.msra.mxu1 %v12151_v0  ;;  %11752 = vmatprep.mubr.msk.bf16.mxu1 %vm12452_vm2, %v12451_v8 }
0x3794   : > { %11750 = vmatprep.subr.bf16.mxu1 %v12451_v8 }
0x3797   : > { %11751 = vmatpush3.bf16.msra.mxu1 %v12152_v1 }
0x3798   : > { %11770 = vmatprep.subr.mxu1 %v12451_v8 }
0x37c4   : > { %v6539_v7 = vpop.xlane.xlu0 %6538 }
0x37c5   : > { %v6541_v9 = vmul.f32 0.03125, %v6539_v7  ;;  %v6536_v11 = vpop.xlane.xlu1 %6535 }
0x37c6   : > { %v6540_v12 = vmul.f32 0.03125, %v6536_v11 }
0x37c7   : > { %v6543_v10 = vadd.f32 1e-06, %v6541_v9 }
0x37c8   : > { %v6542_v25 = vadd.f32 1e-06, %v6540_v12 }
0x37c9   : > { %12379 = vrsqrt.f32 %v6543_v10 }
0x37ca   : > { %12381 = vrsqrt.f32 %v6542_v25 }
0x37d6   : > { %v12380_v13 = vpop.eup %12379 }
0x37d7   : > { %v12382_v16 = vpop.eup %12381  ;;  %v6547_v17 = vmul.f32 %v12380_v13, %v6530_v63 }
0x37d8   : > { %v6546_v18 = vmul.f32 %v12382_v16, %v6529_v57 }
0x37d9   : > { %v6555_v40 = vmul.f32 %v10746_v14, %v6547_v17 }
0x37da   : > { %v6554_v19 = vmul.f32 %v10746_v14, %v6546_v18 }
0x37dc   : > { %v13772_v4 = vpack.c.bf16 %v6555_v40, %v6554_v19 }
0x37de   : > { %11753 = vmatmul.mubr.msk.bf16.vlgmr.msra.gmra.mxu1 %vm887_vm0, %v13772_v4 }
0x37df   : > { %11774 = vmatprep.mubr.msk.f32.mxu1 %vm12452_vm2, %v12451_v8 }
0x3852   : > { %v7378_v20 = vpop.f32.mrf.mxu1 }
0x3853   : > { %v13779_v21 = vadd.f32 %v7378_v20, %v13580_v48 }
0x3854   : > { %v11738_v28 = vpop.f32.mrf.mxu1 }
0x3855   : > { %v7386_v22 = vmul.f32 %v13779_v21, %v13779_v21 }
0x3856   : > { %v7381_v24 = vpop.f32.mrf.mxu1 }
0x3857   : > { %v7387_v2 = vsel %vm6559_vm11, %v7386_v22, 0.0 }
0x3858   : > { %7388 = vadd.xlane.f32.xlu0 %v7387_v2  ;;  %v11739_v26 = vpop.f32.mrf.mxu1 }
0x389e   : > { %v13792_v48 = vpop.f32.mrf.mxu1 }
0x389f   : > { %7695 = vrot.lane.b32.xlu0 %v13792_v48, %s14403_s10 }
0x38a0   : > { %v11754_v38 = vpop.f32.mrf.mxu1 }
0x38a2   : > { %v13796_v52 = vpop.f32.mrf.mxu1 }
0x38a3   : > { %7868 = vrot.lane.b32.xlu0 %v13792_v48, %s14404_s0  ;;  %7697 = vrot.lane.b32.xlu1 %v13796_v52, %s14403_s10 }
0x38a4   : > { %v11755_v32 = vpop.f32.mrf.mxu1 }
0x38e1   : > { %v7389_v29 = vpop.xlane.xlu0 %7388 }
0x38e2   : > { %v7390_v37 = vmul.f32 0.03125, %v7389_v29 }
0x38e4   : > { %v7391_v46 = vadd.f32 1e-06, %v7390_v37 }
0x38e6   : > { %12383 = vrsqrt.f32 %v7391_v46 }
0x38f3   : > { %v12384_v33 = vpop.eup %12383 }
0x38f4   : > { %v7393_v35 = vmul.f32 %v12384_v33, %v13779_v21 }
0x38f6   : > { %v7400_v36 = vmul.f32 %v10770_v34, %v7393_v35 }
0x38f8   : > { %v7405_v39 = vpack.c.bf16 %v7400_v36, %v7400_v36 }
0x38fa   : > { %11745 = vmatmul.mubr.msk.bf16.vlgmr.msra.gmra.mxu0 %vm887_vm0, %v7405_v39 }
0x38fb   : > { %11757 = vmatpush3.xpose.msk.msra.mxu0 %vm979_vm3, %v13796_v52  ;;  %11760 = vmatprep.mubr.msk.f32.mxu0 %vm12452_vm2, %v12451_v8 }
0x38fc   : > { %11758 = vmatprep.subr.mxu0 %v12451_v8 }
0x38ff   : > { %11759 = vmatpush3.xpose.msk.msra.mxu0 %vm979_vm3, %v13792_v48 }
0x3900   : > { %11763 = vmatprep.subr.mxu0 %v12451_v8 }
0x3911   : > { %v7696_v42 = vpop.permute.xlu0 %7695 }
0x3915   : > { %v7698_v41 = vpop.permute.xlu1 %7697  ;;  %v7869_v15 = vpop.permute.xlu0 %7868 }
0x3916   : > { %11771 = vmatpush3.xpose.msk.msra.mxu1 %vm979_vm3, %v7698_v41 }
0x3917   : > { %11772 = vmatprep.subr.mxu1 %v12451_v8 }
0x391a   : > { %11773 = vmatpush3.xpose.msk.msra.mxu1 %vm979_vm3, %v7696_v42 }
0x391b   : > { %11784 = vmatprep.subr.mxu1 %v12451_v8 }
0x39ba   : > { %v13819_v43 = vpop.f32.mrf.mxu0 }
0x39bb   : > { %7693 = vrot.lane.b32.xlu1 %v13819_v43, %s14403_s10  ;;  %11761 = vmatmul.mubr.msk.f32.vlgmr.msra.gmra.mxu0 %vm979_vm3, %v13819_v43 }
0x39bc   : > { %v11746_v45 = vpop.f32.mrf.mxu0  ;;  %11767 = vmatprep.mubr.msk.f32.mxu0 %vm12452_vm2, %v12451_v8 }
0x39be   : > { %v7458_v60 = vpop.f32.mrf.mxu0 }
0x39bf   : > { %7870 = vrot.lane.b32.xlu1 %v13796_v52, %s14404_s0 }
0x39c0   : > { %v11747_v49 = vpop.f32.mrf.mxu0 }
0x39c3   : > { %7866 = vrot.lane.b32.xlu1 %v13819_v43, %s14404_s0 }
0x3a2d   : > { %v7694_v50 = vpop.permute.xlu1 %7693 }
0x3a2e   : > { %11775 = vmatmul.mubr.msk.f32.vlgmr.msra.gmra.mxu1 %vm979_vm3, %v7694_v50 }
0x3a2f   : > { %11788 = vmatprep.mubr.msk.f32.mxu1 %vm12452_vm2, %v12451_v8 }
0x3a31   : > { %v7871_v53 = vpop.permute.xlu1 %7870 }
0x3a32   : > { %11785 = vmatpush3.xpose.msk.msra.mxu1 %vm979_vm3, %v7871_v53 }
0x3a33   : > { %11786 = vmatprep.subr.mxu1 %v12451_v8 }
0x3a35   : > { %v7867_v54 = vpop.permute.xlu1 %7866 }
0x3a36   : > { %11787 = vmatpush3.xpose.msk.msra.mxu1 %vm979_vm3, %v7869_v15 }
0x3a37   : > { %11805 = vmatprep.subr.mxu1 %v12451_v8 }
0x3a39   : > { %11789 = vmatmul.mubr.msk.f32.vlgmr.msra.gmra.mxu1 %vm979_vm3, %v7867_v54 }
0x3a3a   : > { %11809 = vmatprep.mubr.msk.f32.mxu1 %vm12452_vm2, %v12451_v8 }
0x3a7b   : > { %v7597_v55 = vpop.f32.mrf.mxu0 }
0x3a7c   : > { %v7602_v56 = vsel %vm7601_vm1, %v7597_v55, -inf }
0x3a7d   : > { %7603 = vmax.xlane.f32.xlu0 %v7602_v56  ;;  %v11762_v63 = vpop.f32.mrf.mxu0 }
0x3a7e   : > { %v12156_v63 = vld [vmem:[%s14437_s19] sm:$0xff]  }
0x3aee   : > { %v7771_v57 = vpop.f32.mrf.mxu1 }
0x3aef   : > { %v7775_v44 = vsel %vm7601_vm1, %v7771_v57, -inf }
0x3af0   : > { %7776 = vmax.xlane.f32.xlu1 %v7775_v44  ;;  %v11776_v31 = vpop.f32.mrf.mxu1 }
0x3af9   : > { %v7944_v58 = vpop.f32.mrf.mxu1 }
0x3afa   : > { %v7948_v59 = vsel %vm7601_vm1, %v7944_v58, -inf }
0x3afb   : > { %7949 = vmax.xlane.f32.xlu0 %v7948_v59  ;;  %v11790_v23 = vpop.f32.mrf.mxu1 }
0x3b01   : > { %7615 = vrot.lane.b32.xlu1 %v13796_v52, %s14402_s1 }
0x3b05   : > { %7788 = vrot.lane.b32.xlu1 %v13796_v52, %s14401_s7 }
0x3b06   : > { %v7604_v61 = vpop.xlane.xlu0 %7603 }
0x3b07   : > { %v7605_v3 = vsub.f32 %v7597_v55, %v7604_v61 }
0x3b09   : > { %7786 = vrot.lane.b32.xlu1 %v13792_v48, %s14401_s7  ;;  %v7606_v62 = vmul.f32 1.442695, %v7605_v3 }
0x3b0b   : > { %12385 = vpow2.f32 %v7606_v62 }
0x3b0d   : > { %7959 = vrot.lane.b32.xlu1 %v13792_v48, %s14405_s3 }
0x3b11   : > { %7613 = vrot.lane.b32.xlu0 %v13792_v48, %s14402_s1 }
0x3b18   : > { %v12386_v6 = vpop.eup %12385 }
0x3b19   : > { %v7608_v51 = vsel %vm7601_vm1, %v12386_v6, 0.0 }
0x3b30   : > { %7609 = vadd.xlane.f32.xlu0 %v7608_v51 }
0x3b46   : > { %7961 = vrot.lane.b32.xlu0 %v13796_v52, %s14405_s3 }
0x3b79   : > { %v7777_v0 = vpop.xlane.xlu1 %7776 }
0x3b7a   : > { %v7778_v47 = vsub.f32 %v7771_v57, %v7777_v0 }
0x3b7c   : > { %v7779_v1 = vmul.f32 1.442695, %v7778_v47 }
0x3b7d   : > { %v7616_v7 = vpop.permute.xlu1 %7615 }
0x3b7e   : > { %12387 = vpow2.f32 %v7779_v1  ;;  %11764 = vmatpush3.msk.msra.mxu0 %vm1098_vm6, %v7616_v7 }
0x3b7f   : > { %11765 = vmatprep.subr.mxu0 %v12451_v8 }
0x3b81   : > { %v7789_v18 = vpop.permute.xlu1 %7788 }
0x3b84   : > { %v7950_v9 = vpop.xlane.xlu0 %7949 }
0x3b85   : > { %v7951_v11 = vsub.f32 %v7944_v58, %v7950_v9  ;;  %v7787_v20 = vpop.permute.xlu1 %7786 }
0x3b87   : > { %v7952_v12 = vmul.f32 1.442695, %v7951_v11  ;;  %v12157_v11 = vld [vmem:[%s14438_s4 + $0x8] sm:$0xff]  }
0x3b88   : > { %v7614_v10 = vpop.permute.xlu0 %7613 }
0x3b89   : > { %12389 = vpow2.f32 %v7952_v12  ;;  %11766 = vmatpush3.msra.mxu0 %v7614_v10  ;;  %v7960_v28 = vpop.permute.xlu1 %7959  ;;  %v12158_v12 = vld [vmem:[%s14438_s4] sm:$0xff]   ;;  %v12160_v10 = vld [vmem:[%s14439_s20 + $0x10] sm:$0xff]  }
0x3b8a   : > { %11777 = vmatprep.subr.mxu0 %v12451_v8 }
0x3b8b   : > { %v12388_v25 = vpop.eup %12387 }
0x3b8c   : > { %v7781_v13 = vsel %vm7601_vm1, %v12388_v25, 0.0 }
0x3b8d   : > { %7782 = vadd.xlane.f32.xlu1 %v7781_v13 }
0x3b96   : > { %v12390_v14 = vpop.eup %12389 }
0x3b97   : > { %v7954_v16 = vsel %vm7601_vm1, %v12390_v14, 0.0 }
0x3b98   : > { %7955 = vadd.xlane.f32.xlu0 %v7954_v16 }
0x3b9e   : > { %8041 = vrot.lane.b32.xlu1 %v13792_v48, %s14410_s26 }
0x3bae   : > { %8043 = vrot.lane.b32.xlu0 %v13796_v52, %s14410_s26 }
0x3bb2   : > { %8039 = vrot.lane.b32.xlu0 %v13819_v43, %s14410_s26 }
0x3bb9   : > { %v7610_v17 = vpop.xlane.xlu0 %7609 }
0x3bba   : > { %12391 = vrcp.f32 %v7610_v17 }
0x3bbd   : > { %v7962_v24 = vpop.permute.xlu0 %7961 }
0x3bc7   : > { %v12392_v40 = vpop.eup %12391 }
0x3bc8   : > { %v7612_v19 = vmul.f32 %v12392_v40, %v12386_v6 }
0x3bca   : > { %11768 = vmatmul.mubr.msk.f32.vlgmr.msra.gmra.mxu0 %vm1063_vm5, %v7612_v19 }
0x3bcb   : > { %11778 = vmatpush3.msk.msra.mxu0 %vm1098_vm6, %v7789_v18  ;;  %11781 = vmatprep.mubr.msk.f32.mxu0 %vm12452_vm2, %v12451_v8  ;;  %v10800_v18 = vld [vmem:[%s14440_s29] ss:$0 sm:$0xff] }
0x3bcc   : > { %11779 = vmatprep.subr.mxu0 %v12451_v8 }
0x3bcd   : > { %11780 = vmatpush3.msra.mxu0 %v7787_v20 }
0x3bce   : > { %11791 = vmatprep.subr.mxu0 %v12451_v8 }
0x3c16   : > { %v7783_v22 = vpop.xlane.xlu1 %7782 }
0x3c17   : > { %12393 = vrcp.f32 %v7783_v22 }
0x3c1a   : > { %v8042_v29 = vpop.permute.xlu1 %8041 }
0x3c21   : > { %v7956_v2 = vpop.xlane.xlu0 %7955 }
0x3c22   : > { %12395 = vrcp.f32 %v7956_v2 }
0x3c24   : > { %v12394_v26 = vpop.eup %12393 }
0x3c25   : > { %v7785_v27 = vmul.f32 %v12394_v26, %v12388_v25  ;;  %v8044_v32 = vpop.permute.xlu0 %8043  ;;  %v12161_v25 = vld [vmem:[%s14439_s20 + $0x8] sm:$0xff]  }
0x3c27   : > { %11782 = vmatmul.mubr.msk.f32.vlgmr.msra.gmra.mxu0 %vm1063_vm5, %v7785_v27 }
0x3c28   : > { %11792 = vmatpush3.msk.msra.mxu0 %vm1098_vm6, %v7962_v24  ;;  %11795 = vmatprep.mubr.msk.f32.mxu0 %vm12452_vm2, %v12451_v8 }
0x3c29   : > { %11793 = vmatprep.subr.mxu0 %v12451_v8  ;;  %v8040_v37 = vpop.permute.xlu0 %8039 }
0x3c2a   : > { %11794 = vmatpush3.msra.mxu0 %v7960_v28  ;;  %v12162_v28 = vld [vmem:[%s14439_s20] sm:$0xff]  }
0x3c2b   : > { %11798 = vmatprep.subr.mxu0 %v12451_v8 }
0x3c2f   : > { %v12396_v30 = vpop.eup %12395 }
0x3c30   : > { %v7958_v38 = vmul.f32 %v12396_v30, %v12390_v14 }
0x3c32   : > { %11796 = vmatmul.mubr.msk.f32.vlgmr.msra.gmra.mxu0 %vm1063_vm5, %v7958_v38 }
0x3c33   : > { %11799 = vmatpush3.xpose.msk.msra.mxu0 %vm979_vm3, %v8044_v32  ;;  %11802 = vmatprep.mubr.msk.f32.mxu0 %vm12452_vm2, %v12451_v8 }
0x3c34   : > { %11800 = vmatprep.subr.mxu0 %v12451_v8 }
0x3c37   : > { %11801 = vmatpush3.xpose.msk.msra.mxu0 %vm979_vm3, %v8042_v29 }
0x3c38   : > { %11820 = vmatprep.subr.bf16.mxu0 %v12451_v8 }
0x3c3a   : > { %11803 = vmatmul.mubr.msk.f32.vlgmr.msra.gmra.mxu0 %vm979_vm3, %v8040_v37 }
0x3c3b   : > { %11824 = vmatprep.mubr.msk.bf16.mxu0 %vm12452_vm2, %v12451_v8  ;;  %11821 = vmatpush3.bf16.msra.mxu0 %v12157_v11 }
0x3c3c   : > { %11822 = vmatprep.subr.bf16.mxu0 %v12451_v8 }
0x3c3f   : > { %11823 = vmatpush3.bf16.msra.mxu0 %v12158_v12 }
0x3c40   : > { %11840 = vmatprep.subr.bf16.mxu0 %v12451_v8 }
0x3c8a   : > { %v7689_v46 = vpop.f32.mrf.mxu0 }
0x3c8c   : > { %v11769_v33 = vpop.f32.mrf.mxu0 }
0x3ce7   : > { %v7862_v34 = vpop.f32.mrf.mxu0 }
0x3ce9   : > { %v11783_v35 = vpop.f32.mrf.mxu0 }
0x3cea   : > { %v12163_v35 = vld [vmem:[%s14429_s18 + $0x18] sm:$0xff]  }
0x3cf2   : > { %v8035_v36 = vpop.f32.mrf.mxu0 }
0x3cf4   : > { %v11797_v39 = vpop.f32.mrf.mxu0 }
0x3cfa   : > { %v8117_v41 = vpop.f32.mrf.mxu0 }
0x3cfb   : > { %v8121_v42 = vsel %vm7601_vm1, %v8117_v41, -inf }
0x3cfc   : > { %8122 = vmax.xlane.f32.xlu1 %v8121_v42  ;;  %v11804_v43 = vpop.f32.mrf.mxu0 }
0x3d0d   : > { %8132 = vrot.lane.b32.xlu1 %v13792_v48, %s14409_s28 }
0x3d11   : > { %8213 = vrot.lane.b32.xlu1 %v7862_v34, %s14412_s23 }
0x3d85   : > { %v8123_v45 = vpop.xlane.xlu1 %8122 }
0x3d86   : > { %v8124_v60 = vsub.f32 %v8117_v41, %v8123_v45  ;;  %v10810_v45 = vld [vmem:[%s14430_s24 + $0x1] ss:$0 sm:$0xff] }
0x3d88   : > { %v8125_v49 = vmul.f32 1.442695, %v8124_v60 }
0x3d89   : > { %v8133_v48 = vpop.permute.xlu1 %8132 }
0x3d8a   : > { %12397 = vpow2.f32 %v8125_v49 }
0x3d8d   : > { %v8214_v31 = vpop.permute.xlu1 %8213 }
0x3d8e   : > { %v8224_v59 = vsel %vm979_vm3, %v7689_v46, %v8214_v31 }
0x3d97   : > { %v12398_v50 = vpop.eup %12397 }
0x3d98   : > { %v8127_v53 = vsel %vm7601_vm1, %v12398_v50, 0.0 }
0x3d99   : > { %8128 = vadd.xlane.f32.xlu0 %v8127_v53 }
0x3daf   : > { %8134 = vrot.lane.b32.xlu0 %v13796_v52, %s14409_s28  ;;  %v12155_v52 = vld [vmem:[%s14437_s19 + $0x8] sm:$0xff]  }
0x3db3   : > { %8217 = vrot.lane.b32.xlu0 %v8035_v36, %s14413_s25  ;;  %v12164_v36 = vld [vmem:[%s14429_s18 + $0x10] sm:$0xff]  }
0x3e22   : > { %v8129_v15 = vpop.xlane.xlu0 %8128 }
0x3e23   : > { %12399 = vrcp.f32 %v8129_v15 }
0x3e26   : > { %v8135_v54 = vpop.permute.xlu0 %8134 }
0x3e27   : > { %11806 = vmatpush3.msk.msra.mxu1 %vm1098_vm6, %v8135_v54 }
0x3e28   : > { %11807 = vmatprep.subr.mxu1 %v12451_v8 }
0x3e29   : > { %11808 = vmatpush3.msra.mxu1 %v8133_v48 }
0x3e2a   : > { %11812 = vmatprep.subr.bf16.mxu1 %v12451_v8  ;;  %v8218_v58 = vpop.permute.xlu0 %8217 }
0x3e2b   : > { %v8225_v23 = vsel %vm1805_vm7, %v8224_v59, %v8218_v58 }
0x3e30   : > { %v12400_v55 = vpop.eup %12399 }
0x3e31   : > { %v8131_v56 = vmul.f32 %v12400_v55, %v12398_v50 }
0x3e33   : > { %11810 = vmatmul.mubr.msk.f32.vlgmr.msra.gmra.mxu1 %vm1063_vm5, %v8131_v56 }
0x3e34   : > { %11816 = vmatprep.mubr.msk.bf16.mxu1 %vm12452_vm2, %v12451_v8  ;;  %11813 = vmatpush3.bf16.msra.mxu1 %v12155_v52 }
0x3e35   : > { %11814 = vmatprep.subr.bf16.mxu1 %v12451_v8 }
0x3e38   : > { %11815 = vmatpush3.bf16.msra.mxu1 %v12156_v63 }
0x3e39   : > { %11828 = vmatprep.subr.bf16.mxu1 %v12451_v8 }
0x3ef3   : > { %v8208_v57 = vpop.f32.mrf.mxu1 }
0x3ef4   : > { %8221 = vrot.lane.b32.xlu1 %v8208_v57, %s14414_s21 }
0x3ef5   : > { %v11811_v44 = vpop.f32.mrf.mxu1 }
0x3f66   : > { %v8222_v61 = vpop.permute.xlu1 %8221 }
0x3f67   : > { %v8226_v3 = vsel %vm1808_vm8, %v8225_v23, %v8222_v61 }
0x3f68   : > { %v8231_v62 = vpack.c.bf16 %v8226_v3, %v8226_v3 }
0x3f6a   : > { %11817 = vmatmul.mubr.msk.bf16.vlgmr.msra.gmra.mxu1 %vm887_vm0, %v8231_v62 }
0x3f6b   : > { %11836 = vmatprep.mubr.msk.bf16.mxu1 %vm12452_vm2, %v12451_v8 }
0x402a   : > { %v8281_v6 = vpop.f32.mrf.mxu1 }
0x402b   : > { %v8287_v51 = vadd.f32 %v8281_v6, %v13779_v21  ;;  %v12159_v21 = vld [vmem:[%s14439_s20 + $0x18] sm:$0xff]  }
0x402c   : > { %v11818_v0 = vpop.f32.mrf.mxu1  ;;  %11829 = vmatpush3.bf16.msra.mxu1 %v12159_v21 }
0x402d   : > { %v8289_v47 = vmul.f32 %v8287_v51, %v8287_v51  ;;  %11830 = vmatprep.subr.bf16.mxu1 %v12451_v8 }
0x402e   : > { %v8284_v1 = vpop.f32.mrf.mxu1 }
0x402f   : > { %v8290_v7 = vsel %vm6559_vm11, %v8289_v47, 0.0 }
0x4030   : > { %8291 = vadd.xlane.f32.xlu0 %v8290_v7  ;;  %v11819_v9 = vpop.f32.mrf.mxu1  ;;  %11831 = vmatpush3.bf16.msra.mxu1 %v12160_v10 }
0x4031   : > { %11832 = vmatprep.subr.bf16.mxu1 %v12451_v8 }
0x4034   : > { %11833 = vmatpush3.bf16.msra.mxu1 %v12161_v25 }
0x4035   : > { %11834 = vmatprep.subr.bf16.mxu1 %v12451_v8 }
0x4038   : > { %11835 = vmatpush3.bf16.msra.mxu1 %v12162_v28 }
0x4039   : > { %11858 = vmatprep.subr.mxu1 %v12451_v8 }
0x40b9   : > { %v8292_v13 = vpop.xlane.xlu0 %8291 }
0x40ba   : > { %v8293_v14 = vmul.f32 0.03125, %v8292_v13 }
0x40bc   : > { %v8294_v16 = vadd.f32 1e-06, %v8293_v14 }
0x40be   : > { %12401 = vrsqrt.f32 %v8294_v16 }
0x40cb   : > { %v12402_v17 = vpop.eup %12401 }
0x40cc   : > { %v8296_v40 = vmul.f32 %v12402_v17, %v8287_v51 }
0x40ce   : > { %v8303_v19 = vmul.f32 %v10800_v18, %v8296_v40 }
0x40d0   : > { %v8308_v20 = vpack.c.bf16 %v8303_v19, %v8303_v19 }
0x40d2   : > { %11825 = vmatmul.mubr.msk.bf16.vlgmr.msra.gmra.mxu0 %vm887_vm0, %v8308_v20 }
0x40d3   : > { %11844 = vmatprep.mubr.msk.bf16.mxu0 %vm12452_vm2, %v12451_v8  ;;  %11841 = vmatpush3.bf16.msra.mxu0 %v12163_v35 }
0x40d4   : > { %11842 = vmatprep.subr.bf16.mxu0 %v12451_v8 }
0x40d7   : > { %11843 = vmatpush3.bf16.msra.mxu0 %v12164_v36 }
0x40d8   : > { %11848 = vmatprep.subr.mxu0 %v12451_v8 }
0x4192   : > { %v8358_v22 = vpop.f32.mrf.mxu0 }
0x4193   : > { %v8364_v24 = vmax.f32 %v8358_v22, 0.0 }
0x4194   : > { %v11826_v2 = vpop.f32.mrf.mxu0 }
0x4195   : > { %v8373_v26 = vpack.c.bf16 %v8364_v24, %v8364_v24 }
0x4196   : > { %v8361_v27 = vpop.f32.mrf.mxu0 }
0x4197   : > { %11837 = vmatmul.mubr.msk.bf16.vlgmr.msra.gmra.mxu1 %vm1995_vm9, %v8373_v26 }
0x4198   : > { %v11827_v30 = vpop.f32.mrf.mxu0  ;;  %11860 = vmatprep.mubr.msk.f32.mxu1 %vm12452_vm2, %v12451_v8 }
0x4257   : > { %v8435_v38 = vpop.f32.mrf.mxu1 }
0x4258   : > { %v13954_v32 = vadd.f32 %v8435_v38, %v8287_v51 }
0x4259   : > { %v11838_v29 = vpop.f32.mrf.mxu1 }
0x425a   : > { %v8444_v37 = vmul.f32 %v13954_v32, %v13954_v32 }
0x425b   : > { %v8438_v46 = vpop.f32.mrf.mxu1 }
0x425c   : > { %v8445_v33 = vsel %vm6559_vm11, %v8444_v37, 0.0 }
0x425d   : > { %8446 = vadd.xlane.f32.xlu1 %v8445_v33  ;;  %v11839_v34 = vpop.f32.mrf.mxu1 }
0x42e6   : > { %v8447_v39 = vpop.xlane.xlu1 %8446 }
0x42e7   : > { %v8448_v41 = vmul.f32 0.03125, %v8447_v39 }
0x42e9   : > { %v8449_v42 = vadd.f32 1e-06, %v8448_v41 }
0x42eb   : > { %12403 = vrsqrt.f32 %v8449_v42 }
0x42f8   : > { %v12404_v43 = vpop.eup %12403 }
0x42f9   : > { %v8451_v60 = vmul.f32 %v12404_v43, %v13954_v32 }
0x42fb   : > { %v8458_v49 = vmul.f32 %v10810_v45, %v8451_v60 }
0x42fd   : > { %v8464_v50 = vpack.c.bf16 %v8458_v49, %v8458_v49 }
0x42ff   : > { %11845 = vmatmul.mubr.msk.bf16.vlgmr.msra.gmra.mxu0 %vm887_vm0, %v8464_v50 }
0x4300   : > { %11850 = vmatprep.mubr.msk.f32.mxu0 %vm12452_vm2, %v12451_v8 }
0x43bf   : > { %v13974_v53 = vpop.f32.mrf.mxu0 }
0x43c0   : > { %8688 = vrot.lane.b32.xlu1 %v13974_v53, %s14401_s7  ;;  %8521 = vrot.lane.b32.xlu0 %v13974_v53, %s14402_s1 }
0x43c1   : > { %v11846_v15 = vpop.f32.mrf.mxu0 }
0x43c3   : > { %v8517_v54 = vpop.f32.mrf.mxu0 }
0x43c4   : > { %8855 = vrot.lane.b32.xlu1 %v13974_v53, %s14405_s3  ;;  %8686 = vrot.lane.b32.xlu0 %v13974_v53, %s14403_s10 }
0x43c5   : > { %v11847_v48 = vpop.f32.mrf.mxu0 }
0x43c8   : > { %9022 = vrot.lane.b32.xlu1 %v13974_v53, %s14409_s28  ;;  %8853 = vrot.lane.b32.xlu0 %v13974_v53, %s14404_s0 }
0x43cc   : > { %9020 = vrot.lane.b32.xlu0 %v13974_v53, %s14410_s26 }
0x4432   : > { %v8689_v55 = vpop.permute.xlu1 %8688  ;;  %v8522_v56 = vpop.permute.xlu0 %8521 }
0x4433   : > { %11849 = vmatpush3.xpose.msk.msra.mxu0 %vm979_vm3, %v8522_v56  ;;  %11859 = vmatpush3.xpose.msk.msra.mxu1 %vm979_vm3, %v8689_v55 }
0x4434   : > { %11868 = vmatprep.subr.mxu1 %v12451_v8  ;;  %11853 = vmatprep.subr.mxu0 %v12451_v8 }
0x4436   : > { %v8856_v52 = vpop.permute.xlu1 %8855  ;;  %11851 = vmatmul.mubr.msk.f32.vlgmr.msra.gmra.mxu0 %vm979_vm3, %v13974_v53  ;;  %v8687_v63 = vpop.permute.xlu0 %8686 }
0x4437   : > { %11861 = vmatmul.mubr.msk.f32.vlgmr.msra.gmra.mxu1 %vm979_vm3, %v8687_v63  ;;  %11855 = vmatprep.mubr.msk.f32.mxu0 %vm12452_vm2, %v12451_v8  ;;  %v12166_v63 = vld [vmem:[%s14433_s17 + $0x10] sm:$0xff]  }
0x4438   : > { %11869 = vmatpush3.xpose.msk.msra.mxu1 %vm979_vm3, %v8856_v52  ;;  %11870 = vmatprep.mubr.msk.f32.mxu1 %vm12452_vm2, %v12451_v8  ;;  %v12165_v52 = vld [vmem:[%s14433_s17 + $0x18] sm:$0xff]  }
0x4439   : > { %11878 = vmatprep.subr.mxu1 %v12451_v8 }
0x443a   : > { %v9023_v57 = vpop.permute.xlu1 %9022  ;;  %v8854_v44 = vpop.permute.xlu0 %8853 }
0x443b   : > { %11871 = vmatmul.mubr.msk.f32.vlgmr.msra.gmra.mxu1 %vm979_vm3, %v8854_v44 }
0x443c   : > { %11879 = vmatpush3.xpose.msk.msra.mxu1 %vm979_vm3, %v9023_v57  ;;  %11880 = vmatprep.mubr.msk.f32.mxu1 %vm12452_vm2, %v12451_v8 }
0x443d   : > { %11888 = vmatprep.subr.bf16.mxu1 %v12451_v8 }
0x443e   : > { %v9021_v31 = vpop.permute.xlu0 %9020 }
0x443f   : > { %11881 = vmatmul.mubr.msk.f32.vlgmr.msra.gmra.mxu1 %vm979_vm3, %v9021_v31 }
0x4440   : > { %11892 = vmatprep.mubr.msk.bf16.mxu1 %vm12452_vm2, %v12451_v8  ;;  %11889 = vmatpush3.bf16.msra.mxu1 %v12165_v52 }
0x4441   : > { %11890 = vmatprep.subr.bf16.mxu1 %v12451_v8 }
0x4444   : > { %11891 = vmatpush3.bf16.msra.mxu1 %v12166_v63 }
0x4445   : > { %11904 = vmatprep.subr.bf16.mxu1 %v12451_v8 }
0x44f6   : > { %v8593_v58 = vpop.f32.mrf.mxu0 }
0x44f7   : > { %v8597_v59 = vsel %vm13690_vm12, %v8593_v58, -1e+09  ;;  %v8760_v23 = vpop.f32.mrf.mxu1 }
0x44f8   : > { %v8598_v61 = vsel %vm6717_vm13, %v8597_v59, -inf  ;;  %v8764_v3 = vsel %vm13690_vm12, %v8760_v23, -1e+09  ;;  %v11852_v62 = vpop.f32.mrf.mxu0 }
0x44f9   : > { %v8765_v6 = vsel %vm6717_vm13, %v8764_v3, -inf  ;;  %8599 = vmax.xlane.f32.xlu1 %v8598_v61  ;;  %v11862_v51 = vpop.f32.mrf.mxu1 }
0x44fa   : > { %8766 = vmax.xlane.f32.xlu0 %v8765_v6  ;;  %v12167_v51 = vld [vmem:[%s14434_s14 + $0x18] sm:$0xff]  }
0x44fb   : > { %v8927_v0 = vpop.f32.mrf.mxu1 }
0x44fc   : > { %v8931_v47 = vsel %vm13690_vm12, %v8927_v0, -1e+09 }
0x44fd   : > { %v8932_v1 = vsel %vm6717_vm13, %v8931_v47, -inf  ;;  %v11872_v7 = vpop.f32.mrf.mxu1 }
0x44fe   : > { %8933 = vmax.xlane.f32.xlu0 %v8932_v1 }
0x44ff   : > { %v9094_v9 = vpop.f32.mrf.mxu1 }
0x4500   : > { %v9098_v11 = vsel %vm13690_vm12, %v9094_v9, -1e+09 }
0x4501   : > { %v9099_v12 = vsel %vm6717_vm13, %v9098_v11, -inf  ;;  %v11882_v21 = vpop.f32.mrf.mxu1 }
0x4502   : > { %9100 = vmax.xlane.f32.xlu1 %v9099_v12 }
0x4513   : > { %8776 = vrot.lane.b32.xlu1 %v13974_v53, %s14407_s2  ;;  %s14441_s2 = sld [smem:[#allocation31_spill]] }
0x4582   : > { %v8600_v10 = vpop.xlane.xlu1 %8599 }
0x4583   : > { %v8601_v25 = vsub.f32 %v8597_v59, %v8600_v10  ;;  %v8767_v13 = vpop.xlane.xlu0 %8766 }
0x4584   : > { %v8768_v14 = vsub.f32 %v8764_v3, %v8767_v13 }
0x4585   : > { %v8602_v16 = vmul.f32 1.442695, %v8601_v25 }
0x4586   : > { %v8769_v17 = vmul.f32 1.442695, %v8768_v14  ;;  %v12169_v14 = vld [vmem:[%s14435_s30 + $0x18] sm:$0xff]  }
0x4587   : > { %12405 = vpow2.f32 %v8602_v16  ;;  %v8934_v26 = vpop.xlane.xlu0 %8933  ;;  %v12170_v16 = vld [vmem:[%s14435_s30 + $0x10] sm:$0xff]  }
0x4588   : > { %12407 = vpow2.f32 %v8769_v17  ;;  %v8935_v27 = vsub.f32 %v8931_v47, %v8934_v26  ;;  %v12168_v47 = vld [vmem:[%s14434_s14 + $0x10] sm:$0xff]  }
0x458a   : > { %v8936_v30 = vmul.f32 1.442695, %v8935_v27 }
0x458b   : > { %v9101_v18 = vpop.xlane.xlu1 %9100 }
0x458c   : > { %v9102_v40 = vsub.f32 %v9098_v11, %v9101_v18 }
0x458e   : > { %v9103_v19 = vmul.f32 1.442695, %v9102_v40 }
0x458f   : > { %v8777_v37 = vpop.permute.xlu1 %8776 }
0x4590   : > { %12409 = vpow2.f32 %v9103_v19 }
0x4591   : > { %12411 = vpow2.f32 %v8936_v30 }
0x4594   : > { %v12406_v5 = vpop.eup %12405 }
0x4595   : > { %v12408_v20 = vpop.eup %12407  ;;  %v8604_v28 = vsel %vm6717_vm13, %v12406_v5, 0.0 }
0x4596   : > { %8605 = vadd.xlane.f32.xlu0 %v8604_v28  ;;  %v8771_v22 = vsel %vm6717_vm13, %v12408_v20, 0.0  ;;  %v10842_v28 = vld [vmem:[%s14436_s27 + $0x1] ss:$0 sm:$0xff] }
0x4597   : > { %8772 = vadd.xlane.f32.xlu1 %v8771_v22 }
0x459d   : > { %v12410_v24 = vpop.eup %12409 }
0x459e   : > { %v9105_v2 = vsel %vm6717_vm13, %v12410_v24, 0.0  ;;  %v12412_v38 = vpop.eup %12411 }
0x459f   : > { %9106 = vadd.xlane.f32.xlu1 %v9105_v2  ;;  %v8938_v29 = vsel %vm6717_vm13, %v12412_v38, 0.0 }
0x45ac   : > { %8609 = vrot.lane.b32.xlu0 %v13974_v53, %s14406_s11 }
0x45b0   : > { %8943 = vrot.lane.b32.xlu1 %v13974_v53, %s14408_s8 }
0x45cb   : > { %8939 = vadd.xlane.f32.xlu0 %v8938_v29 }
0x45e1   : > { %9110 = vrot.lane.b32.xlu0 %v13974_v53, %s14424_s22 }
0x461f   : > { %v8606_v46 = vpop.xlane.xlu0 %8605 }
0x4620   : > { %12413 = vrcp.f32 %v8606_v46  ;;  %v8773_v33 = vpop.xlane.xlu1 %8772 }
0x4621   : > { %12415 = vrcp.f32 %v8773_v33 }
0x4623   : > { %v8610_v34 = vpop.permute.xlu0 %8609 }
0x4624   : > { %11854 = vmatpush3.msk.msra.mxu0 %vm6735_vm14, %v8610_v34 }
0x4625   : > { %11863 = vmatprep.subr.mxu0 %v12451_v8 }
0x4628   : > { %v9107_v39 = vpop.xlane.xlu1 %9106 }
0x462c   : > { %v8944_v43 = vpop.permute.xlu1 %8943 }
0x462d   : > { %v12414_v35 = vpop.eup %12413 }
0x462e   : > { %v8608_v36 = vmul.f32 %v12414_v35, %v12406_v5  ;;  %v12416_v41 = vpop.eup %12415 }
0x462f   : > { %v8775_v42 = vmul.f32 %v12416_v41, %v12408_v20 }
0x4630   : > { %11856 = vmatmul.mubr.msk.f32.vlgmr.msra.gmra.mxu0 %vm6731_vm15, %v8608_v36 }
0x4631   : > { %11864 = vmatpush3.msk.msra.mxu0 %vm6735_vm14, %v8777_v37  ;;  %11865 = vmatprep.mubr.msk.f32.mxu0 %vm12452_vm2, %v12451_v8 }
0x4632   : > { %11873 = vmatprep.subr.mxu0 %v12451_v8 }
0x4634   : > { %11866 = vmatmul.mubr.msk.f32.vlgmr.msra.gmra.mxu0 %vm6731_vm15, %v8775_v42 }
0x4635   : > { %11874 = vmatpush3.msk.msra.mxu0 %vm6735_vm14, %v8944_v43  ;;  %11875 = vmatprep.mubr.msk.f32.mxu0 %vm12452_vm2, %v12451_v8 }
0x4636   : > { %11883 = vmatprep.subr.mxu0 %v12451_v8 }
0x4654   : > { %v8940_v45 = vpop.xlane.xlu0 %8939 }
0x4655   : > { %12417 = vrcp.f32 %v8940_v45 }
0x4656   : > { %12419 = vrcp.f32 %v9107_v39 }
0x4658   : > { %v9111_v53 = vpop.permute.xlu0 %9110 }
0x4662   : > { %v12418_v60 = vpop.eup %12417 }
0x4663   : > { %v8942_v49 = vmul.f32 %v12418_v60, %v12412_v38  ;;  %v12420_v50 = vpop.eup %12419 }
0x4664   : > { %v9109_v15 = vmul.f32 %v12420_v50, %v12410_v24 }
0x4665   : > { %11876 = vmatmul.mubr.msk.f32.vlgmr.msra.gmra.mxu0 %vm6731_vm15, %v8942_v49 }
0x4666   : > { %11884 = vmatpush3.msk.msra.mxu0 %vm6735_vm14, %v9111_v53  ;;  %11885 = vmatprep.mubr.msk.f32.mxu0 %vm12452_vm2, %v12451_v8 }
0x4667   : > { %11896 = vmatprep.subr.bf16.mxu0 %v12451_v8 }
0x4669   : > { %11886 = vmatmul.mubr.msk.f32.vlgmr.msra.gmra.mxu0 %vm6731_vm15, %v9109_v15 }
0x466a   : > { %11900 = vmatprep.mubr.msk.bf16.mxu0 %vm12452_vm2, %v12451_v8  ;;  %11897 = vmatpush3.bf16.msra.mxu0 %v12169_v14 }
0x466b   : > { %11898 = vmatprep.subr.bf16.mxu0 %v12451_v8 }
0x466e   : > { %11899 = vmatpush3.bf16.msra.mxu0 %v12170_v16 }
0x466f   : > { %11912 = vmatprep.subr.mxu0 %v12451_v8 }
0x46f0   : > { %v8682_v54 = vpop.f32.mrf.mxu0 }
0x46f2   : > { %v11857_v48 = vpop.f32.mrf.mxu0 }
0x46f4   : > { %v8849_v55 = vpop.f32.mrf.mxu0 }
0x46f5   : > { %9188 = vrot.lane.b32.xlu1 %v8849_v55, %s14412_s23 }
0x46f6   : > { %v11867_v56 = vpop.f32.mrf.mxu0 }
0x4725   : > { %v9016_v57 = vpop.f32.mrf.mxu0 }
0x4726   : > { %9192 = vrot.lane.b32.xlu0 %v9016_v57, %s14413_s25 }
0x4727   : > { %v11877_v44 = vpop.f32.mrf.mxu0 }
0x4729   : > { %v9183_v31 = vpop.f32.mrf.mxu0 }
0x472a   : > { %9196 = vrot.lane.b32.xlu1 %v9183_v31, %s14414_s21 }
0x472b   : > { %v11887_v58 = vpop.f32.mrf.mxu0 }
0x4767   : > { %v9189_v59 = vpop.permute.xlu1 %9188 }
0x4768   : > { %v9199_v61 = vsel %vm979_vm3, %v8682_v54, %v9189_v59 }
0x4798   : > { %v9193_v23 = vpop.permute.xlu0 %9192 }
0x4799   : > { %v9200_v3 = vsel %vm1805_vm7, %v9199_v61, %v9193_v23 }
0x479c   : > { %v9197_v62 = vpop.permute.xlu1 %9196 }
0x479d   : > { %v9201_v6 = vsel %vm1808_vm8, %v9200_v3, %v9197_v62 }
0x479e   : > { %v9207_v0 = vpack.c.bf16 %v9201_v6, %v9201_v6 }
0x47a0   : > { %11893 = vmatmul.mubr.msk.bf16.vlgmr.msra.gmra.mxu1 %vm887_vm0, %v9207_v0 }
0x47a1   : > { %11905 = vmatpush3.bf16.msra.mxu1 %v12167_v51  ;;  %11908 = vmatprep.mubr.msk.bf16.mxu1 %vm12452_vm2, %v12451_v8 }
0x47a2   : > { %11906 = vmatprep.subr.bf16.mxu1 %v12451_v8 }
0x47a5   : > { %11907 = vmatpush3.bf16.msra.mxu1 %v12168_v47 }
0x47a6   : > { %11926 = vmatprep.subr.mxu1 %v12451_v8 }
0x47a8   : > { %11909 = vmatmul.mubr.msk.bf16.vlgmr.msra.gmra.mxu1 %vm887_vm0, %v13772_v4 }
0x47a9   : > { %11930 = vmatprep.mubr.msk.f32.mxu1 %vm12452_vm2, %v12451_v8 }
0x4860   : > { %v9257_v1 = vpop.f32.mrf.mxu1 }
0x4861   : > { %v14085_v7 = vadd.f32 %v9257_v1, %v13954_v32 }
0x4862   : > { %v11894_v9 = vpop.f32.mrf.mxu1 }
0x4863   : > { %v9266_v11 = vmul.f32 %v14085_v7, %v14085_v7 }
0x4864   : > { %v9260_v12 = vpop.f32.mrf.mxu1 }
0x4865   : > { %v9267_v21 = vsel %vm6559_vm11, %v9266_v11, 0.0 }
0x4866   : > { %9268 = vadd.xlane.f32.xlu0 %v9267_v21  ;;  %v11895_v10 = vpop.f32.mrf.mxu1 }
0x4868   : > { %v14090_v25 = vpop.f32.mrf.mxu1 }
0x4869   : > { %9572 = vrot.lane.b32.xlu1 %v14090_v25, %s14403_s10 }
0x486a   : > { %v11910_v4 = vpop.f32.mrf.mxu1 }
0x486c   : > { %v14094_v13 = vpop.f32.mrf.mxu1 }
0x486d   : > { %9574 = vrot.lane.b32.xlu1 %v14094_v13, %s14403_s10 }
0x486e   : > { %v11911_v32 = vpop.f32.mrf.mxu1 }
0x4871   : > { %9747 = vrot.lane.b32.xlu1 %v14094_v13, %s14404_s0 }
0x48db   : > { %v9573_v17 = vpop.permute.xlu1 %9572 }
0x48df   : > { %v9575_v18 = vpop.permute.xlu1 %9574 }
0x48e0   : > { %11927 = vmatpush3.xpose.msk.msra.mxu1 %vm979_vm3, %v9575_v18 }
0x48e1   : > { %11928 = vmatprep.subr.mxu1 %v12451_v8 }
0x48e3   : > { %v9748_v29 = vpop.permute.xlu1 %9747 }
0x48e4   : > { %11929 = vmatpush3.xpose.msk.msra.mxu1 %vm979_vm3, %v9573_v17 }
0x48e5   : > { %11940 = vmatprep.subr.mxu1 %v12451_v8 }
0x48ef   : > { %v9269_v40 = vpop.xlane.xlu0 %9268 }
0x48f0   : > { %v9270_v19 = vmul.f32 0.03125, %v9269_v40 }
0x48f2   : > { %v9271_v5 = vadd.f32 1e-06, %v9270_v19 }
0x48f4   : > { %12421 = vrsqrt.f32 %v9271_v5 }
0x4901   : > { %v12422_v20 = vpop.eup %12421 }
0x4902   : > { %v9273_v22 = vmul.f32 %v12422_v20, %v14085_v7 }
0x4904   : > { %v9280_v24 = vmul.f32 %v10842_v28, %v9273_v22 }
0x4906   : > { %v9286_v2 = vpack.c.bf16 %v9280_v24, %v9280_v24 }
0x4908   : > { %11901 = vmatmul.mubr.msk.bf16.vlgmr.msra.gmra.mxu0 %vm887_vm0, %v9286_v2 }
0x4909   : > { %11913 = vmatpush3.xpose.msk.msra.mxu0 %vm979_vm3, %v14094_v13  ;;  %11916 = vmatprep.mubr.msk.f32.mxu0 %vm12452_vm2, %v12451_v8 }
0x490a   : > { %11914 = vmatprep.subr.mxu0 %v12451_v8 }
0x490d   : > { %11915 = vmatpush3.xpose.msk.msra.mxu0 %vm979_vm3, %v14090_v25 }
0x490e   : > { %11919 = vmatprep.subr.mxu0 %v12451_v8 }
0x49c8   : > { %v9336_v26 = vpop.f32.mrf.mxu0 }
0x49c9   : > { %9570 = vrot.lane.b32.xlu1 %v9336_v26, %s14403_s10  ;;  %11917 = vmatmul.mubr.msk.f32.vlgmr.msra.gmra.mxu0 %vm979_vm3, %v9336_v26 }
0x49ca   : > { %v11902_v27 = vpop.f32.mrf.mxu0  ;;  %11923 = vmatprep.mubr.msk.f32.mxu0 %vm12452_vm2, %v12451_v8 }
0x49cc   : > { %v9339_v30 = vpop.f32.mrf.mxu0 }
0x49cd   : > { %9745 = vrot.lane.b32.xlu1 %v14090_v25, %s14404_s0 }
0x49ce   : > { %v11903_v38 = vpop.f32.mrf.mxu0 }
0x49d1   : > { %9743 = vrot.lane.b32.xlu1 %v9336_v26, %s14404_s0 }
0x4a3b   : > { %v9571_v37 = vpop.permute.xlu1 %9570 }
0x4a3c   : > { %11931 = vmatmul.mubr.msk.f32.vlgmr.msra.gmra.mxu1 %vm979_vm3, %v9571_v37 }
0x4a3d   : > { %11941 = vmatpush3.xpose.msk.msra.mxu1 %vm979_vm3, %v9748_v29  ;;  %11944 = vmatprep.mubr.msk.f32.mxu1 %vm12452_vm2, %v12451_v8 }
0x4a3e   : > { %11942 = vmatprep.subr.mxu1 %v12451_v8 }
0x4a3f   : > { %v9746_v46 = vpop.permute.xlu1 %9745 }
0x4a41   : > { %11943 = vmatpush3.xpose.msk.msra.mxu1 %vm979_vm3, %v9746_v46 }
0x4a42   : > { %11961 = vmatprep.subr.mxu1 %v12451_v8 }
0x4a43   : > { %v9744_v33 = vpop.permute.xlu1 %9743 }
0x4a44   : > { %11945 = vmatmul.mubr.msk.f32.vlgmr.msra.gmra.mxu1 %vm979_vm3, %v9744_v33 }
0x4a45   : > { %11965 = vmatprep.mubr.msk.f32.mxu1 %vm12452_vm2, %v12451_v8 }
0x4a89   : > { %v9475_v34 = vpop.f32.mrf.mxu0 }
0x4a8a   : > { %v9479_v35 = vsel %vm7601_vm1, %v9475_v34, -inf }
0x4a8b   : > { %9480 = vmax.xlane.f32.xlu1 %v9479_v35  ;;  %v11918_v36 = vpop.f32.mrf.mxu0 }
0x4a9c   : > { %9490 = vrot.lane.b32.xlu1 %v14090_v25, %s14402_s1 }
0x4aa0   : > { %9838 = vrot.lane.b32.xlu1 %v14094_v13, %s14405_s3 }
0x4aa4   : > { %9920 = vrot.lane.b32.xlu1 %v14094_v13, %s14410_s26 }
0x4aa8   : > { %9916 = vrot.lane.b32.xlu1 %v9336_v26, %s14410_s26 }
0x4afc   : > { %v9648_v39 = vpop.f32.mrf.mxu1 }
0x4afd   : > { %v9652_v41 = vsel %vm7601_vm1, %v9648_v39, -inf }
0x4afe   : > { %9653 = vmax.xlane.f32.xlu0 %v9652_v41  ;;  %v11932_v42 = vpop.f32.mrf.mxu1 }
0x4b04   : > { %v9821_v43 = vpop.f32.mrf.mxu1 }
0x4b05   : > { %v9825_v45 = vsel %vm7601_vm1, %v9821_v43, -inf }
0x4b06   : > { %9826 = vmax.xlane.f32.xlu0 %v9825_v45  ;;  %v11946_v60 = vpop.f32.mrf.mxu1 }
0x4b14   : > { %v9481_v49 = vpop.xlane.xlu1 %9480 }
0x4b15   : > { %v9482_v50 = vsub.f32 %v9475_v34, %v9481_v49  ;;  %v12171_v34 = vld [vmem:[%s14437_s19 + $0x18] sm:$0xff]  }
0x4b17   : > { %v9483_v53 = vmul.f32 1.442695, %v9482_v50 }
0x4b18   : > { %v9491_v31 = vpop.permute.xlu1 %9490 }
0x4b19   : > { %12423 = vpow2.f32 %v9483_v53 }
0x4b1c   : > { %9492 = vrot.lane.b32.xlu0 %v14094_v13, %s14402_s1  ;;  %v9839_v12 = vpop.permute.xlu1 %9838 }
0x4b20   : > { %9665 = vrot.lane.b32.xlu0 %v14094_v13, %s14401_s7  ;;  %v9921_v32 = vpop.permute.xlu1 %9920 }
0x4b24   : > { %9663 = vrot.lane.b32.xlu0 %v14090_v25, %s14401_s7  ;;  %v9917_v16 = vpop.permute.xlu1 %9916  ;;  %s14443_s7 = sld [smem:[#allocation30_spill]] }
0x4b26   : > { %v12424_v15 = vpop.eup %12423 }
0x4b27   : > { %v9485_v54 = vsel %vm7601_vm1, %v12424_v15, 0.0 }
0x4b43   : > { %9486 = vadd.xlane.f32.xlu0 %v9485_v54 }
0x4b87   : > { %v9654_v48 = vpop.xlane.xlu0 %9653 }
0x4b88   : > { %v9655_v55 = vsub.f32 %v9648_v39, %v9654_v48 }
0x4b8a   : > { %v9656_v56 = vmul.f32 1.442695, %v9655_v55 }
0x4b8c   : > { %12425 = vpow2.f32 %v9656_v56 }
0x4b8f   : > { %v9827_v52 = vpop.xlane.xlu0 %9826 }
0x4b90   : > { %v9828_v63 = vsub.f32 %v9821_v43, %v9827_v52  ;;  %v12173_v52 = vld [vmem:[%s14438_s4 + $0x18] sm:$0xff]  }
0x4b92   : > { %v9829_v57 = vmul.f32 1.442695, %v9828_v63  ;;  %v12174_v63 = vld [vmem:[%s14438_s4 + $0x10] sm:$0xff]  }
0x4b93   : > { %v9493_v44 = vpop.permute.xlu0 %9492 }
0x4b94   : > { %12427 = vpow2.f32 %v9829_v57  ;;  %11920 = vmatpush3.msk.msra.mxu0 %vm1098_vm6, %v9493_v44  ;;  %v12176_v57 = vld [vmem:[%s14439_s20 + $0x30] sm:$0xff]   ;;  %v12177_v44 = vld [vmem:[%s14439_s20 + $0x28] sm:$0xff]  }
0x4b95   : > { %11921 = vmatprep.subr.mxu0 %v12451_v8 }
0x4b96   : > { %11922 = vmatpush3.msra.mxu0 %v9491_v31 }
0x4b97   : > { %11933 = vmatprep.subr.mxu0 %v12451_v8  ;;  %v9666_v3 = vpop.permute.xlu0 %9665 }
0x4b99   : > { %v12426_v58 = vpop.eup %12425 }
0x4b9a   : > { %v9658_v59 = vsel %vm7601_vm1, %v12426_v58, 0.0 }
0x4b9b   : > { %9659 = vadd.xlane.f32.xlu0 %v9658_v59  ;;  %v9664_v62 = vpop.permute.xlu0 %9663 }
0x4ba1   : > { %v12428_v23 = vpop.eup %12427 }
0x4ba2   : > { %v9831_v61 = vsel %vm7601_vm1, %v12428_v23, 0.0 }
0x4ba3   : > { %9832 = vadd.xlane.f32.xlu0 %v9831_v61  ;;  %v10885_v61 = vld [vmem:[%s14440_s29 + $0x1] ss:$0 sm:$0xff] }
0x4bb9   : > { %9836 = vrot.lane.b32.xlu0 %v14090_v25, %s14405_s3  ;;  %s14445_s3 = sld [smem:[#allocation32_spill]] }
0x4bbd   : > { %9918 = vrot.lane.b32.xlu0 %v14090_v25, %s14410_s26 }
0x4bcc   : > { %v9487_v6 = vpop.xlane.xlu0 %9486 }
0x4bcd   : > { %12429 = vrcp.f32 %v9487_v6 }
0x4bda   : > { %v12430_v51 = vpop.eup %12429 }
0x4bdb   : > { %v9489_v0 = vmul.f32 %v12430_v51, %v12424_v15  ;;  %v12178_v51 = vld [vmem:[%s14439_s20 + $0x20] sm:$0xff]  }
0x4bdd   : > { %11924 = vmatmul.mubr.msk.f32.vlgmr.msra.gmra.mxu0 %vm1063_vm5, %v9489_v0 }
0x4bde   : > { %11934 = vmatpush3.msk.msra.mxu0 %vm1098_vm6, %v9666_v3  ;;  %11937 = vmatprep.mubr.msk.f32.mxu0 %vm12452_vm2, %v12451_v8 }
0x4bdf   : > { %11935 = vmatprep.subr.mxu0 %v12451_v8 }
0x4be0   : > { %11936 = vmatpush3.msra.mxu0 %v9664_v62 }
0x4be1   : > { %11947 = vmatprep.subr.mxu0 %v12451_v8 }
0x4c24   : > { %v9660_v47 = vpop.xlane.xlu0 %9659 }
0x4c25   : > { %12431 = vrcp.f32 %v9660_v47 }
0x4c2c   : > { %v9833_v1 = vpop.xlane.xlu0 %9832 }
0x4c2d   : > { %12433 = vrcp.f32 %v9833_v1 }
0x4c30   : > { %v9837_v21 = vpop.permute.xlu0 %9836 }
0x4c32   : > { %v12432_v9 = vpop.eup %12431 }
0x4c33   : > { %v9662_v11 = vmul.f32 %v12432_v9, %v12426_v58 }
0x4c34   : > { %v9919_v14 = vpop.permute.xlu0 %9918 }
0x4c35   : > { %11938 = vmatmul.mubr.msk.f32.vlgmr.msra.gmra.mxu0 %vm1063_vm5, %v9662_v11 }
0x4c36   : > { %11948 = vmatpush3.msk.msra.mxu0 %vm1098_vm6, %v9839_v12  ;;  %11951 = vmatprep.mubr.msk.f32.mxu0 %vm12452_vm2, %v12451_v8 }
0x4c37   : > { %11949 = vmatprep.subr.mxu0 %v12451_v8 }
0x4c38   : > { %11950 = vmatpush3.msra.mxu0 %v9837_v21 }
0x4c39   : > { %11954 = vmatprep.subr.mxu0 %v12451_v8 }
0x4c3a   : > { %v12434_v10 = vpop.eup %12433 }
0x4c3b   : > { %v9835_v4 = vmul.f32 %v12434_v10, %v12428_v23 }
0x4c3d   : > { %11952 = vmatmul.mubr.msk.f32.vlgmr.msra.gmra.mxu0 %vm1063_vm5, %v9835_v4 }
0x4c3e   : > { %11955 = vmatpush3.xpose.msk.msra.mxu0 %vm979_vm3, %v9921_v32  ;;  %11958 = vmatprep.mubr.msk.f32.mxu0 %vm12452_vm2, %v12451_v8 }
0x4c3f   : > { %11956 = vmatprep.subr.mxu0 %v12451_v8 }
0x4c42   : > { %11957 = vmatpush3.xpose.msk.msra.mxu0 %vm979_vm3, %v9919_v14 }
0x4c43   : > { %11976 = vmatprep.subr.bf16.mxu0 %v12451_v8 }
0x4c45   : > { %11959 = vmatmul.mubr.msk.f32.vlgmr.msra.gmra.mxu0 %vm979_vm3, %v9917_v16 }
0x4c46   : > { %11980 = vmatprep.mubr.msk.bf16.mxu0 %vm12452_vm2, %v12451_v8  ;;  %11977 = vmatpush3.bf16.msra.mxu0 %v12173_v52 }
0x4c47   : > { %11978 = vmatprep.subr.bf16.mxu0 %v12451_v8 }
0x4c4a   : > { %11979 = vmatpush3.bf16.msra.mxu0 %v12174_v63 }
0x4c4b   : > { %11996 = vmatprep.subr.bf16.mxu0 %v12451_v8 }
0x4c9d   : > { %v9566_v17 = vpop.f32.mrf.mxu0 }
0x4c9f   : > { %v11925_v18 = vpop.f32.mrf.mxu0 }
0x4ca0   : > { %v12179_v18 = vld [vmem:[%s14441_s2 + $0x8] sm:$0xff]  }
0x4cf5   : > { %v9739_v40 = vpop.f32.mrf.mxu0 }
0x4cf7   : > { %v11939_v19 = vpop.f32.mrf.mxu0 }
0x4cfd   : > { %v9912_v5 = vpop.f32.mrf.mxu0 }
0x4cff   : > { %v11953_v20 = vpop.f32.mrf.mxu0 }
0x4d05   : > { %v9994_v28 = vpop.f32.mrf.mxu0 }
0x4d06   : > { %v9998_v22 = vsel %vm7601_vm1, %v9994_v28, -inf }
0x4d07   : > { %9999 = vmax.xlane.f32.xlu0 %v9998_v22  ;;  %v11960_v24 = vpop.f32.mrf.mxu0  ;;  %v10906_v22 = vld [vmem:[%s14443_s7] ss:$0 sm:$0xff] }
0x4d1d   : > { %10011 = vrot.lane.b32.xlu0 %v14094_v13, %s14409_s28 }
0x4d21   : > { %10090 = vrot.lane.b32.xlu0 %v9739_v40, %s14412_s23  ;;  %s14442_s23 = sld [smem:[#allocation3_spill]]  ;;  %v12180_v40 = vld [vmem:[%s14441_s2] sm:$0xff]  }
0x4d27   : > { %s14444_s1 = sshll.u32 %s14442_s23, 2 }
0x4d28   : > { %s880_s22 = scalar_lea.vmem %s14445_s3, %s14444_s1 }
0x4d90   : > { %v10000_v2 = vpop.xlane.xlu0 %9999 }
0x4d91   : > { %v10001_v26 = vsub.f32 %v9994_v28, %v10000_v2 }
0x4d93   : > { %v10002_v27 = vmul.f32 1.442695, %v10001_v26 }
0x4d94   : > { %v10012_v30 = vpop.permute.xlu0 %10011 }
0x4d95   : > { %12435 = vpow2.f32 %v10002_v27  ;;  %11962 = vmatpush3.msk.msra.mxu1 %vm1098_vm6, %v10012_v30 }
0x4d96   : > { %11963 = vmatprep.subr.mxu1 %v12451_v8 }
0x4d98   : > { %v10091_v39 = vpop.permute.xlu0 %10090 }
0x4d99   : > { %v10101_v42 = vsel %vm979_vm3, %v9566_v17, %v10091_v39 }
0x4da2   : > { %v12436_v38 = vpop.eup %12435 }
0x4da3   : > { %v10004_v29 = vsel %vm7601_vm1, %v12436_v38, 0.0 }
0x4da4   : > { %10005 = vadd.xlane.f32.xlu1 %v10004_v29 }
0x4db5   : > { %10009 = vrot.lane.b32.xlu1 %v14090_v25, %s14409_s28  ;;  %v12172_v25 = vld [vmem:[%s14437_s19 + $0x10] sm:$0xff]  }
0x4db9   : > { %10094 = vrot.lane.b32.xlu1 %v9912_v5, %s14413_s25 }
0x4e2d   : > { %v10006_v13 = vpop.xlane.xlu1 %10005 }
0x4e2e   : > { %12437 = vrcp.f32 %v10006_v13 }
0x4e31   : > { %v10010_v37 = vpop.permute.xlu1 %10009 }
0x4e32   : > { %11964 = vmatpush3.msra.mxu1 %v10010_v37 }
0x4e33   : > { %11968 = vmatprep.subr.bf16.mxu1 %v12451_v8 }
0x4e35   : > { %v10095_v41 = vpop.permute.xlu1 %10094 }
0x4e36   : > { %v10102_v43 = vsel %vm1805_vm7, %v10101_v42, %v10095_v41 }
0x4e3b   : > { %v12438_v46 = vpop.eup %12437 }
0x4e3c   : > { %v10008_v33 = vmul.f32 %v12438_v46, %v12436_v38 }
0x4e3e   : > { %11966 = vmatmul.mubr.msk.f32.vlgmr.msra.gmra.mxu1 %vm1063_vm5, %v10008_v33 }
0x4e3f   : > { %11972 = vmatprep.mubr.msk.bf16.mxu1 %vm12452_vm2, %v12451_v8  ;;  %11969 = vmatpush3.bf16.msra.mxu1 %v12171_v34 }
0x4e40   : > { %11970 = vmatprep.subr.bf16.mxu1 %v12451_v8 }
0x4e43   : > { %11971 = vmatpush3.bf16.msra.mxu1 %v12172_v25 }
0x4e44   : > { %11984 = vmatprep.subr.bf16.mxu1 %v12451_v8 }
0x4efe   : > { %v10085_v35 = vpop.f32.mrf.mxu1 }
0x4eff   : > { %10098 = vrot.lane.b32.xlu0 %v10085_v35, %s14414_s21 }
0x4f00   : > { %v11967_v36 = vpop.f32.mrf.mxu1 }
0x4f71   : > { %v10099_v45 = vpop.permute.xlu0 %10098 }
0x4f72   : > { %v10103_v60 = vsel %vm1808_vm8, %v10102_v43, %v10099_v45 }
0x4f73   : > { %v10109_v49 = vpack.c.bf16 %v10103_v60, %v10103_v60 }
0x4f75   : > { %11973 = vmatmul.mubr.msk.bf16.vlgmr.msra.gmra.mxu1 %vm887_vm0, %v10109_v49 }
0x4f76   : > { %11992 = vmatprep.mubr.msk.bf16.mxu1 %vm12452_vm2, %v12451_v8 }
0x5035   : > { %v10159_v50 = vpop.f32.mrf.mxu1 }
0x5036   : > { %v10165_v53 = vadd.f32 %v10159_v50, %v14085_v7  ;;  %v12175_v7 = vld [vmem:[%s14439_s20 + $0x38] sm:$0xff]  }
0x5037   : > { %v11974_v15 = vpop.f32.mrf.mxu1  ;;  %11985 = vmatpush3.bf16.msra.mxu1 %v12175_v7 }
0x5038   : > { %v10168_v54 = vmul.f32 %v10165_v53, %v10165_v53  ;;  %11986 = vmatprep.subr.bf16.mxu1 %v12451_v8 }
0x5039   : > { %v10162_v48 = vpop.f32.mrf.mxu1 }
0x503a   : > { %v10169_v55 = vsel %vm6559_vm11, %v10168_v54, 0.0 }
0x503b   : > { %10170 = vadd.xlane.f32.xlu1 %v10169_v55  ;;  %v11975_v56 = vpop.f32.mrf.mxu1  ;;  %11987 = vmatpush3.bf16.msra.mxu1 %v12176_v57 }
0x503c   : > { %11988 = vmatprep.subr.bf16.mxu1 %v12451_v8 }
0x503f   : > { %11989 = vmatpush3.bf16.msra.mxu1 %v12177_v44 }
0x5040   : > { %11990 = vmatprep.subr.bf16.mxu1 %v12451_v8 }
0x5043   : > { %11991 = vmatpush3.bf16.msra.mxu1 %v12178_v51 }
0x50c4   : > { %v10171_v31 = vpop.xlane.xlu1 %10170 }
0x50c5   : > { %v10172_v58 = vmul.f32 0.03125, %v10171_v31 }
0x50c7   : > { %v10173_v59 = vadd.f32 1e-06, %v10172_v58 }
0x50c9   : > { %12439 = vrsqrt.f32 %v10173_v59 }
0x50d6   : > { %v12440_v23 = vpop.eup %12439 }
0x50d7   : > { %v10175_v3 = vmul.f32 %v12440_v23, %v10165_v53 }
0x50d9   : > { %v10182_v62 = vmul.f32 %v10885_v61, %v10175_v3 }
0x50db   : > { %v10188_v6 = vpack.c.bf16 %v10182_v62, %v10182_v62 }
0x50dd   : > { %11981 = vmatmul.mubr.msk.bf16.vlgmr.msra.gmra.mxu0 %vm887_vm0, %v10188_v6 }
0x50de   : > { %12000 = vmatprep.mubr.msk.bf16.mxu0 %vm12452_vm2, %v12451_v8  ;;  %11997 = vmatpush3.bf16.msra.mxu0 %v12179_v18  ;;  %vm10400_vm2 = vcmask 519168  }
0x50df   : > { %11998 = vmatprep.subr.bf16.mxu0 %v12451_v8 }
0x50e2   : > { %11999 = vmatpush3.bf16.msra.mxu0 %v12180_v40 }
0x519d   : > { %v10238_v0 = vpop.f32.mrf.mxu0 }
0x519e   : > { %v10244_v47 = vmax.f32 %v10238_v0, 0.0 }
0x519f   : > { %v11982_v1 = vpop.f32.mrf.mxu0 }
0x51a0   : > { %v10254_v9 = vpack.c.bf16 %v10244_v47, %v10244_v47 }
0x51a1   : > { %v10241_v11 = vpop.f32.mrf.mxu0 }
0x51a2   : > { %11993 = vmatmul.mubr.msk.bf16.vlgmr.msra.gmra.mxu1 %vm1995_vm9, %v10254_v9 }
0x51a3   : > { %v11983_v12 = vpop.f32.mrf.mxu0 }
0x5262   : > { %v10316_v21 = vpop.f32.mrf.mxu1 }
0x5263   : > { %v10322_v10 = vadd.f32 %v10316_v21, %v10165_v53 }
0x5264   : > { %v11994_v4 = vpop.f32.mrf.mxu1 }
0x5265   : > { %v10324_v32 = vmul.f32 %v10322_v10, %v10322_v10 }
0x5266   : > { %v10319_v14 = vpop.f32.mrf.mxu1 }
0x5267   : > { %v10325_v16 = vsel %vm6559_vm11, %v10324_v32, 0.0 }
0x5268   : > { %10326 = vadd.xlane.f32.xlu0 %v10325_v16  ;;  %v11995_v17 = vpop.f32.mrf.mxu1 }
0x52f1   : > { %v10327_v19 = vpop.xlane.xlu0 %10326 }
0x52f2   : > { %v10328_v5 = vmul.f32 0.03125, %v10327_v19 }
0x52f4   : > { %v10329_v20 = vadd.f32 1e-06, %v10328_v5 }
0x52f6   : > { %12441 = vrsqrt.f32 %v10329_v20 }
0x5303   : > { %v12442_v28 = vpop.eup %12441 }
0x5304   : > { %v10331_v24 = vmul.f32 %v12442_v28, %v10322_v10 }
0x5306   : > { %v10338_v2 = vmul.f32 %v10906_v22, %v10331_v24 }
0x5308   : > { %v10339_v26 = vmul.f32 0.17677669, %v10338_v2 }
0x530a   : > { %v10344_v27 = vpack.c.bf16 %v10339_v26, %v10339_v26 }
0x530c   : > { %12001 = vmatmul.mubr.msk.bf16.vlgmr.msra.gmra.mxu0 %vm887_vm0, %v10344_v27 }
0x53cc   : > { %v10394_v8 = vpop.f32.mrf.mxu0 }
0x53cd   : > { %10401 = vst.msk [vmem:[%s880_s22] sm:$0xf] %vm10400_vm2, %v10394_v8 }
0x53ce   : > { %v12002_v30 = vpop.f32.mrf.mxu0 }
0x53d0   : > { %v10397_v38 = vpop.f32.mrf.mxu0 }
0x53d2   : > { %v12003_v29 = vpop.f32.mrf.mxu0 }
0x53d3 PF: > { %s14446_s13 = sld [smem:[#allocation2_spill]] }
0x53d9   : > { %s38_s8 = sadd.s32 1, %s14446_s13  }
0x53da   : > { %p35_p4 = scmp.ge.s32.totalorder %s38_s8, 4  }
0x53dc   :  { %37 = sbr.rel (!%p35_p4) target bundleno = 30 (0x1e), region = 184 }

</bundles_post_ra>
